<compile_context>
chip_gen: v6e
topology: v6e:2x2x1
jax: 0.10.0
libtpu: 0.0.40
codegen_flags: <defaults>
</compile_context>

<pallas_src>
import functools

import jax
import jax.numpy as jnp
from jax.experimental import pallas as pl
from jax.experimental.pallas import tpu as pltpu

CP = 128          # lane-padded channel count; all activations are (N, H*W, CP)
EPS = 1e-5
F32 = jnp.float32
BF16 = jnp.bfloat16

_GRID1 = pltpu.CompilerParams(
    dimension_semantics=("parallel",),          # images split across TCs (v7x)
    vmem_limit_bytes=32 * 1024 * 1024,          # safe on v5e/v6e/v7x
)


def _round_up(v, m):
    return (v + m - 1) // m * m


def _bn_scale_shift(st, g, b, count):
    """Batch-stat BN affine from summed (sum, sumsq) stats."""
    inv_n = 1.0 / count
    mean = st[0:1, :] * inv_n
    var = jnp.maximum(st[1:2, :] * inv_n - mean * mean, 0.0)
    scale = g * jax.lax.rsqrt(var + EPS)
    shift = b - mean * scale
    return scale, shift


# ----------------------------------------------------------------------------
# Kernel: stride-1 3x3 conv (+ optional fused 1x1 projection, + optional fused
# input BN+ReLU) as 9 whole-image slab matmuls.  Emits bf16 raw output plus
# per-image f32 [sum, sumsq] so the consumer can finalize BN stats.
# ----------------------------------------------------------------------------
def _conv_s1_kernel(*refs, H, W, base, has_proj, fuse_bn, count):
    i = 0
    if fuse_bn:
        stin_ref, g_ref, b_ref = refs[i:i + 3]
        i += 3
    x_ref, w_ref = refs[i:i + 2]
    i += 2
    if has_proj:
        wp_ref = refs[i]
        i += 1
    out_ref, st_ref = refs[i:i + 2]
    i += 2
    if has_proj:
        outp_ref, stp_ref = refs[i:i + 2]
        i += 2
    xs_ref = refs[i]                                  # VMEM scratch (Mpad, CP)

    Mo = H * W

    # Build the zero-halo'd flat image in VMEM; optionally apply the producing
    # conv's BN (batch stats) + ReLU here so the pre-activation never makes an
    # extra HBM round trip.  Conv padding pads the *activated* tensor with 0,
    # so the halo stays zero (written below the data overwrite).
    xs_ref[...] = jnp.zeros_like(xs_ref)
    xv = x_ref[0]                                     # (Mo, CP) bf16
    if fuse_bn:
        scale, shift = _bn_scale_shift(stin_ref[...], g_ref[...], b_ref[...],
                                       count)
        xv = jnp.maximum(xv.astype(F32) * scale + shift, 0.0).astype(BF16)
    xs_ref[base:base + Mo, :] = xv

    # Left/right image-border wrap masks (flat layout wraps across rows).
    if W > 1:
        col = jax.lax.broadcasted_iota(jnp.int32, (Mo, 1), 0) % W
        mask_l = col != 0           # valid output columns for the kj == 0 tap
        mask_r = col != (W - 1)     # valid output columns for the kj == 2 tap

    # One (Mo, CP) x (CP, CP) MXU dot per tap; single f32 accumulator.
    acc = jnp.zeros((Mo, CP), F32)
    for ki in range(3):
        if H == 1 and ki != 1:
            continue                # tap lies entirely in the top/bottom halo
        for kj in range(3):
            if W == 1 and kj != 1:
                continue            # tap lies entirely in the left/right halo
            start = base + (ki - 1) * W + (kj - 1)
            tap = xs_ref[start:start + Mo, :]
            if kj == 0:
                tap = jnp.where(mask_l, tap, jnp.zeros_like(tap))
            elif kj == 2:
                tap = jnp.where(mask_r, tap, jnp.zeros_like(tap))
            acc = acc + jnp.dot(tap, w_ref[ki * 3 + kj],
                                preferred_element_type=F32)

    out_ref[0] = acc.astype(out_ref.dtype)
    st_ref[0, 0:1, :] = jnp.sum(acc, axis=0, keepdims=True)
    st_ref[0, 1:2, :] = jnp.sum(acc * acc, axis=0, keepdims=True)

    if has_proj:
        # 1x1 stride-1 projection == the unshifted centre slab.
        accp = jnp.dot(xs_ref[base:base + Mo, :], wp_ref[...],
                       preferred_element_type=F32)
        outp_ref[0] = accp.astype(outp_ref.dtype)
        stp_ref[0, 0:1, :] = jnp.sum(accp, axis=0, keepdims=True)
        stp_ref[0, 1:2, :] = jnp.sum(accp * accp, axis=0, keepdims=True)


def conv_s1(x, H, W, w_taps, wp=None, in_bn=None):
    """3x3 stride-1 conv, pad=1, no bias.  x: (N, H*W, CP) bf16 flat.
    in_bn = (summed_stats(2,CP), gamma, beta): fuse that BN + ReLU onto the
    input inside the kernel."""
    N = x.shape[0]
    Mo = H * W
    base = max(8, _round_up(W + 1, 8))
    Mpad = _round_up(base + Mo + W + 1, 8)
    has_proj = wp is not None
    fuse_bn = in_bn is not None

    in_specs, args = [], []
    if fuse_bn:
        st, g, b = in_bn
        in_specs += [pl.BlockSpec((2, CP), lambda n: (0, 0)),
                     pl.BlockSpec((1, CP), lambda n: (0, 0)),
                     pl.BlockSpec((1, CP), lambda n: (0, 0))]
        args += [st, g, b]
    in_specs += [pl.BlockSpec((1, Mo, CP), lambda n: (n, 0, 0)),
                 pl.BlockSpec((9, CP, CP), lambda n: (0, 0, 0))]
    args += [x, w_taps]
    if has_proj:
        in_specs.append(pl.BlockSpec((CP, CP), lambda n: (0, 0)))
        args.append(wp)

    out_shape = [jax.ShapeDtypeStruct((N, Mo, CP), BF16),
                 jax.ShapeDtypeStruct((N, 2, CP), F32)]
    out_specs = [pl.BlockSpec((1, Mo, CP), lambda n: (n, 0, 0)),
                 pl.BlockSpec((1, 2, CP), lambda n: (n, 0, 0))]
    if has_proj:
        out_shape += [jax.ShapeDtypeStruct((N, Mo, CP), BF16),
                      jax.ShapeDtypeStruct((N, 2, CP), F32)]
        out_specs += [pl.BlockSpec((1, Mo, CP), lambda n: (n, 0, 0)),
                      pl.BlockSpec((1, 2, CP), lambda n: (n, 0, 0))]

    kernel = functools.partial(_conv_s1_kernel, H=H, W=W, base=base,
                               has_proj=has_proj, fuse_bn=fuse_bn,
                               count=N * Mo)
    return pl.pallas_call(
        kernel,
        grid=(N,),
        in_specs=in_specs,
        out_specs=tuple(out_specs),
        out_shape=tuple(out_shape),
        scratch_shapes=[pltpu.VMEM((Mpad, CP), BF16)],
        compiler_params=_GRID1,
    )(*args)


# ----------------------------------------------------------------------------
# Kernel: stride-2 3x3 conv (+ optional fused 1x1 projection) over a
# pre-gathered 9-tap tensor (N, 9, Mo, CP): 9 whole-image slab matmuls.
# ----------------------------------------------------------------------------
def _conv_taps_kernel(*refs, has_proj):
    if has_proj:
        x_ref, w_ref, wp_ref, out_ref, st_ref, outp_ref, stp_ref = refs
    else:
        x_ref, w_ref, out_ref, st_ref = refs

    acc = jnp.dot(x_ref[0, 0], w_ref[0], preferred_element_type=F32)
    for t in range(1, 9):
        acc = acc + jnp.dot(x_ref[0, t], w_ref[t], preferred_element_type=F32)
    out_ref[0] = acc.astype(out_ref.dtype)
    st_ref[0, 0:1, :] = jnp.sum(acc, axis=0, keepdims=True)
    st_ref[0, 1:2, :] = jnp.sum(acc * acc, axis=0, keepdims=True)

    if has_proj:
        # 1x1 stride-2 projection == the centre tap of the gathered window.
        accp = jnp.dot(x_ref[0, 4], wp_ref[...], preferred_element_type=F32)
        outp_ref[0] = accp.astype(outp_ref.dtype)
        stp_ref[0, 0:1, :] = jnp.sum(accp, axis=0, keepdims=True)
        stp_ref[0, 1:2, :] = jnp.sum(accp * accp, axis=0, keepdims=True)


def _gather_s2_taps(x, H, W):
    """Wrapper-side 9-tap stride-2 gather (XLA strided slices) producing
    dense, aligned (N, 9, Ho*Wo, CP) slabs for the MXU.
    TODO(synk): move in-kernel / into the producer for large spatial sizes."""
    N = x.shape[0]
    Ho = (H - 1) // 2 + 1
    Wo = (W - 1) // 2 + 1
    Mo = Ho * Wo
    xp = jnp.pad(x.reshape(N, H, W, CP), ((0, 0), (1, 1), (1, 1), (0, 0)))
    taps = jnp.stack(
        [xp[:, ki:ki + 2 * Ho:2, kj:kj + 2 * Wo:2, :].reshape(N, Mo, CP)
         for ki in range(3) for kj in range(3)], axis=1)
    return taps, Ho, Wo


def conv_s2(x, H, W, w_taps, wp=None):
    """3x3 stride-2 conv, pad=1, no bias.  Returns (outs, Ho, Wo)."""
    N = x.shape[0]
    taps, Ho, Wo = _gather_s2_taps(x, H, W)
    Mo = Ho * Wo
    has_proj = wp is not None

    in_specs = [pl.BlockSpec((1, 9, Mo, CP), lambda n: (n, 0, 0, 0)),
                pl.BlockSpec((9, CP, CP), lambda n: (0, 0, 0))]
    args = [taps, w_taps]
    out_shape = [jax.ShapeDtypeStruct((N, Mo, CP), BF16),
                 jax.ShapeDtypeStruct((N, 2, CP), F32)]
    out_specs = [pl.BlockSpec((1, Mo, CP), lambda n: (n, 0, 0)),
                 pl.BlockSpec((1, 2, CP), lambda n: (n, 0, 0))]
    if has_proj:
        in_specs.append(pl.BlockSpec((CP, CP), lambda n: (0, 0)))
        args.append(wp)
        out_shape += [jax.ShapeDtypeStruct((N, Mo, CP), BF16),
                      jax.ShapeDtypeStruct((N, 2, CP), F32)]
        out_specs += [pl.BlockSpec((1, Mo, CP), lambda n: (n, 0, 0)),
                      pl.BlockSpec((1, 2, CP), lambda n: (n, 0, 0))]

    outs = pl.pallas_call(
        functools.partial(_conv_taps_kernel, has_proj=has_proj),
        grid=(N,),
        in_specs=in_specs,
        out_specs=tuple(out_specs),
        out_shape=tuple(out_shape),
        compiler_params=_GRID1,
    )(*args)
    return outs, Ho, Wo


# ----------------------------------------------------------------------------
# Kernel: BN (batch stats) + ReLU (used once, for the stem conv).
# ----------------------------------------------------------------------------
def _bn_act_kernel(x_ref, st_ref, g_ref, b_ref, o_ref, *, count, relu):
    scale, shift = _bn_scale_shift(st_ref[...], g_ref[...], b_ref[...], count)
    y = x_ref[0].astype(F32) * scale + shift
    if relu:
        y = jnp.maximum(y, 0.0)
    o_ref[0] = y.astype(o_ref.dtype)


def bn_act(raw, stats, gamma, beta, *, relu=True):
    N, M, _ = raw.shape
    st = jnp.sum(stats, axis=0)          # (2, CP) total over images (tiny)
    return pl.pallas_call(
        functools.partial(_bn_act_kernel, count=N * M, relu=relu),
        grid=(N,),
        in_specs=[pl.BlockSpec((1, M, CP), lambda n: (n, 0, 0)),
                  pl.BlockSpec((2, CP), lambda n: (0, 0)),
                  pl.BlockSpec((1, CP), lambda n: (0, 0)),
                  pl.BlockSpec((1, CP), lambda n: (0, 0))],
        out_specs=pl.BlockSpec((1, M, CP), lambda n: (n, 0, 0)),
        out_shape=jax.ShapeDtypeStruct((N, M, CP), BF16),
        compiler_params=_GRID1,
    )(raw, st, gamma, beta)


# ----------------------------------------------------------------------------
# Kernel: block tail = BN(main) [+ BN(projection skip)] + add + ReLU.
# ----------------------------------------------------------------------------
def _bn_add_relu_kernel(*refs, count, has_proj):
    if has_proj:
        x_ref, stx_ref, gx_ref, bx_ref, s_ref, sts_ref, gs_ref, bs_ref, o_ref = refs
    else:
        x_ref, stx_ref, gx_ref, bx_ref, s_ref, o_ref = refs

    def affine(v, st, g, b):
        scale, shift = _bn_scale_shift(st, g, b, count)
        return v * scale + shift

    y = affine(x_ref[0].astype(F32), stx_ref[...], gx_ref[...], bx_ref[...])
    if has_proj:
        skip = affine(s_ref[0].astype(F32), sts_ref[...], gs_ref[...], bs_ref[...])
    else:
        skip = s_ref[0].astype(F32)
    o_ref[0] = jnp.maximum(y + skip, 0.0).astype(o_ref.dtype)


def bn_add_relu(raw, stats, gamma, beta, skip,
                skip_stats=None, skip_gamma=None, skip_beta=None):
    N, M, _ = raw.shape
    has_proj = skip_stats is not None
    act = pl.BlockSpec((1, M, CP), lambda n: (n, 0, 0))
    stspec = pl.BlockSpec((2, CP), lambda n: (0, 0))
    vec = pl.BlockSpec((1, CP), lambda n: (0, 0))
    in_specs = [act, stspec, vec, vec, act]
    args = [raw, jnp.sum(stats, axis=0), gamma, beta, skip]
    if has_proj:
        in_specs += [stspec, vec, vec]
        args += [jnp.sum(skip_stats, axis=0), skip_gamma, skip_beta]
    return pl.pallas_call(
        functools.partial(_bn_add_relu_kernel, count=N * M, has_proj=has_proj),
        grid=(N,),
        in_specs=in_specs,
        out_specs=act,
        out_shape=jax.ShapeDtypeStruct((N, M, CP), BF16),
        compiler_params=_GRID1,
    )(*args)


# ----------------------------------------------------------------------------
# Kernel: 3x3 stride-2 max pool as a running max over 9 pre-gathered taps.
# Inputs are post-ReLU (>= 0), so zero padding is equivalent to -inf padding.
# ----------------------------------------------------------------------------
def _maxpool_taps_kernel(x_ref, o_ref):
    m = x_ref[0, 0]
    for t in range(1, 9):
        m = jnp.maximum(m, x_ref[0, t])
    o_ref[0] = m


def maxpool_3x3_s2(x, H, W):
    N = x.shape[0]
    taps, Ho, Wo = _gather_s2_taps(x, H, W)
    Mo = Ho * Wo
    out = pl.pallas_call(
        _maxpool_taps_kernel,
        grid=(N,),
        in_specs=[pl.BlockSpec((1, 9, Mo, CP), lambda n: (n, 0, 0, 0))],
        out_specs=pl.BlockSpec((1, Mo, CP), lambda n: (n, 0, 0)),
        out_shape=jax.ShapeDtypeStruct((N, Mo, CP), BF16),
        compiler_params=_GRID1,
    )(taps)
    return out, Ho, Wo


# ----------------------------------------------------------------------------
# Kernel: head = global average pool over HW + 1x1 conv (linear) + bias.
# ----------------------------------------------------------------------------
def _head_kernel(x_ref, w_ref, b_ref, o_ref, *, M):
    pooled = jnp.sum(x_ref[...].astype(F32), axis=1) * (1.0 / M)   # (N, CP)
    o_ref[...] = jnp.dot(pooled.astype(BF16), w_ref[...],
                         preferred_element_type=F32) + b_ref[...]


def head(x_flat, w, b):
    N, M, _ = x_flat.shape
    vmem = pl.BlockSpec(memory_space=pltpu.MemorySpace.VMEM)
    return pl.pallas_call(
        functools.partial(_head_kernel, M=M),
        in_specs=[vmem, vmem, vmem],
        out_specs=vmem,
        out_shape=jax.ShapeDtypeStruct((N, CP), F32),
    )(x_flat, w, b)


# ----------------------------------------------------------------------------
# Parameter init (kaiming_normal fan_out for conv weights, BN gamma=1 beta=0;
# conv biases before batch-stat BN are dropped as exact no-ops).  Weights are
# pre-packed into lane-padded, tap-major bf16 layouts for the MXU.
# ----------------------------------------------------------------------------
def _kaiming_conv(key, cout, cin, k):
    fan_out = cout * k * k
    std = (2.0 / fan_out) ** 0.5
    return jax.random.normal(key, (cout, cin, k, k), F32) * std


def _pack_conv3x3(w):          # (Co, Ci, 3, 3) -> (9, CP, CP) bf16
    co, ci = w.shape[0], w.shape[1]
    wt = jnp.transpose(w, (2, 3, 1, 0)).reshape(9, ci, co)
    return jnp.zeros((9, CP, CP), F32).at[:, :ci, :co].set(wt).astype(BF16)


def _pack_conv1x1(w):          # (Co, Ci, 1, 1) -> (CP, CP) bf16
    co, ci = w.shape[0], w.shape[1]
    return jnp.zeros((CP, CP), F32).at[:ci, :co].set(w[:, :, 0, 0].T).astype(BF16)


def _pack_bn(c):               # gamma=1 / beta=0; padded channels get gamma=0
    g = jnp.zeros((1, CP), F32).at[0, :c].set(1.0)
    b = jnp.zeros((1, CP), F32)
    return g, b


def init_params(key, in_channels, start_num_channels, num_classes):
    keys = iter(jax.random.split(key, 64))
    p = {"num_classes": num_classes}
    p["conv0_w"] = _pack_conv3x3(
        _kaiming_conv(next(keys), start_num_channels, in_channels, 3))
    p["bn0_g"], p["bn0_b"] = _pack_bn(start_num_channels)

    c = start_num_channels
    cfg = [(c, 2 * c, False), (2 * c, 2 * c, True), (2 * c, 4 * c, False),
           (4 * c, 4 * c, True), (4 * c, 8 * c, False), (8 * c, 8 * c, True)]
    blocks = []
    for cin, cout, down in cfg:
        bp = {"stride": 2 if down else 1}
        bp["conv1_w"] = _pack_conv3x3(_kaiming_conv(next(keys), cout, cin, 3))
        bp["bn1_g"], bp["bn1_b"] = _pack_bn(cout)
        bp["conv2_w"] = _pack_conv3x3(_kaiming_conv(next(keys), cout, cout, 3))
        bp["bn2_g"], bp["bn2_b"] = _pack_bn(cout)
        if down or cin != cout:
            bp["proj_w"] = _pack_conv1x1(_kaiming_conv(next(keys), cout, cin, 1))
            bp["bnp_g"], bp["bnp_b"] = _pack_bn(cout)
        else:
            bp["proj_w"] = None
        blocks.append(bp)
    p["blocks"] = blocks

    p["head_w"] = _pack_conv1x1(_kaiming_conv(next(keys), num_classes, 8 * c, 1))
    p["head_b"] = jnp.zeros((1, CP), F32)     # head conv bias init to 0
    return p


# ----------------------------------------------------------------------------
# Forward pass.
# ----------------------------------------------------------------------------
def resnet_forward(params, x_nchw):
    N, cin, H, W = x_nchw.shape
    x = jnp.transpose(x_nchw, (0, 2, 3, 1)).astype(F32)          # NCHW -> NHWC
    x = jnp.pad(x, ((0, 0), (0, 0), (0, 0), (0, CP - cin)))      # lane-pad C
    x = x.reshape(N, H * W, CP).astype(BF16)

    # stem: Conv(3x3, s2, p1) + BN + ReLU, then MaxPool(3x3, s2, p1)
    (raw0, st0), H, W = conv_s2(x, H, W, params["conv0_w"])
    a0 = bn_act(raw0, st0, params["bn0_g"], params["bn0_b"], relu=True)
    x, H, W = maxpool_3x3_s2(a0, H, W)

    for bp in params["blocks"]:
        has_proj = bp["proj_w"] is not None
        if bp["stride"] == 2:
            outs, Ho, Wo = conv_s2(x, H, W, bp["conv1_w"], bp["proj_w"])
        else:
            outs = conv_s1(x, H, W, bp["conv1_w"], wp=bp["proj_w"])
            Ho, Wo = H, W
        if has_proj:
            raw1, st1, rawp, stp = outs
        else:
            raw1, st1 = outs
            rawp = stp = None

        # conv2 with BN1 + ReLU fused onto its input (no separate BN pass).
        raw2, st2 = conv_s1(
            raw1, Ho, Wo, bp["conv2_w"],
            in_bn=(jnp.sum(st1, axis=0), bp["bn1_g"], bp["bn1_b"]))

        if has_proj:
            x = bn_add_relu(raw2, st2, bp["bn2_g"], bp["bn2_b"],
                            rawp, stp, bp["bnp_g"], bp["bnp_b"])
        else:
            x = bn_add_relu(raw2, st2, bp["bn2_g"], bp["bn2_b"], x)
        H, W = Ho, Wo

    out = head(x, params["head_w"], params["head_b"])            # (N, CP)
    return out[:, :params["num_classes"]]                        # (N, classes)


if __name__ == "__main__":
    in_channels = 4
    start_num_channels = 8
    num_classes = 10

    key = jax.random.PRNGKey(0)
    k_param, k_x = jax.random.split(key)
    params = init_params(k_param, in_channels, start_num_channels, num_classes)
    x = jax.random.normal(k_x, (2, in_channels, 16, 16), F32)    # NCHW

    fwd = jax.jit(lambda inp: resnet_forward(params, inp))
    out = jax.block_until_ready(fwd(x))
    assert out.shape == (2, num_classes), out.shape
    assert bool(jnp.all(jnp.isfinite(out)))
    print("KERNEL_OK")
</pallas_src>

<mosaic_0001>
module attributes {stable_mosaic.version = 11 : i64} {
  func.func @_conv_taps_kernel(%arg0: i32, %arg1: memref<1x9x64x128xbf16, #tpu.memory_space<vmem>>, %arg2: memref<9x128x128xbf16, #tpu.memory_space<vmem>>, %arg3: memref<1x64x128xbf16, #tpu.memory_space<vmem>>, %arg4: memref<1x2x128xf32, #tpu.memory_space<vmem>>) attributes {dimension_semantics = [#tpu.dimension_semantics<parallel>], iteration_bounds = array<i64: 2>, scalar_prefetch = 0 : i64, scratch_operands = 0 : i64, tpu.core_type = #tpu.core_type<tc>, window_params = [{transform_indices = @transform_0, window_bounds = array<i64: 1, 9, 64, 128>}, {pipeline_mode = #tpu.pipeline_mode<synchronous>, transform_indices = @transform_1, window_bounds = array<i64: 9, 128, 128>}, {transform_indices = @transform_2, window_bounds = array<i64: 1, 64, 128>}, {transform_indices = @transform_3, window_bounds = array<i64: 1, 2, 128>}]} {
    %c0 = arith.constant 0 : index
    %c0_0 = arith.constant 0 : index
    %c0_1 = arith.constant 0 : index
    %c0_2 = arith.constant 0 : index
    %0 = vector.load %arg1[%c0, %c0_0, %c0_1, %c0_2] : memref<1x9x64x128xbf16, #tpu.memory_space<vmem>>, vector<1x1x64x128xbf16>
    %1 = vector.shape_cast %0 : vector<1x1x64x128xbf16> to vector<64x128xbf16>
    %c0_3 = arith.constant 0 : index
    %c0_4 = arith.constant 0 : index
    %c0_5 = arith.constant 0 : index
    %2 = vector.load %arg2[%c0_3, %c0_4, %c0_5] : memref<9x128x128xbf16, #tpu.memory_space<vmem>>, vector<1x128x128xbf16>
    %3 = vector.shape_cast %2 : vector<1x128x128xbf16> to vector<128x128xbf16>
    %cst = arith.constant dense<0.000000e+00> : vector<64x128xf32>
    %4 = tpu.matmul %1, %3, %cst {dimension_numbers = #tpu.dot_dimension_numbers<[1], [0], [0], [1], [0, 0, 1, 1], [], []>} : vector<64x128xbf16>, vector<128x128xbf16>, vector<64x128xf32> -> vector<64x128xf32>
    %c0_6 = arith.constant 0 : index
    %c1 = arith.constant 1 : index
    %c0_7 = arith.constant 0 : index
    %c0_8 = arith.constant 0 : index
    %5 = vector.load %arg1[%c0_6, %c1, %c0_7, %c0_8] : memref<1x9x64x128xbf16, #tpu.memory_space<vmem>>, vector<1x1x64x128xbf16>
    %6 = vector.shape_cast %5 : vector<1x1x64x128xbf16> to vector<64x128xbf16>
    %c1_9 = arith.constant 1 : index
    %c0_10 = arith.constant 0 : index
    %c0_11 = arith.constant 0 : index
    %7 = vector.load %arg2[%c1_9, %c0_10, %c0_11] : memref<9x128x128xbf16, #tpu.memory_space<vmem>>, vector<1x128x128xbf16>
    %8 = vector.shape_cast %7 : vector<1x128x128xbf16> to vector<128x128xbf16>
    %cst_12 = arith.constant dense<0.000000e+00> : vector<64x128xf32>
    %9 = tpu.matmul %6, %8, %cst_12 {dimension_numbers = #tpu.dot_dimension_numbers<[1], [0], [0], [1], [0, 0, 1, 1], [], []>} : vector<64x128xbf16>, vector<128x128xbf16>, vector<64x128xf32> -> vector<64x128xf32>
    %10 = arith.addf %4, %9 : vector<64x128xf32>
    %c0_13 = arith.constant 0 : index
    %c2 = arith.constant 2 : index
    %c0_14 = arith.constant 0 : index
    %c0_15 = arith.constant 0 : index
    %11 = vector.load %arg1[%c0_13, %c2, %c0_14, %c0_15] : memref<1x9x64x128xbf16, #tpu.memory_space<vmem>>, vector<1x1x64x128xbf16>
    %12 = vector.shape_cast %11 : vector<1x1x64x128xbf16> to vector<64x128xbf16>
    %c2_16 = arith.constant 2 : index
    %c0_17 = arith.constant 0 : index
    %c0_18 = arith.constant 0 : index
    %13 = vector.load %arg2[%c2_16, %c0_17, %c0_18] : memref<9x128x128xbf16, #tpu.memory_space<vmem>>, vector<1x128x128xbf16>
    %14 = vector.shape_cast %13 : vector<1x128x128xbf16> to vector<128x128xbf16>
    %cst_19 = arith.constant dense<0.000000e+00> : vector<64x128xf32>
    %15 = tpu.matmul %12, %14, %cst_19 {dimension_numbers = #tpu.dot_dimension_numbers<[1], [0], [0], [1], [0, 0, 1, 1], [], []>} : vector<64x128xbf16>, vector<128x128xbf16>, vector<64x128xf32> -> vector<64x128xf32>
    %16 = arith.addf %10, %15 : vector<64x128xf32>
    %c0_20 = arith.constant 0 : index
    %c3 = arith.constant 3 : index
    %c0_21 = arith.constant 0 : index
    %c0_22 = arith.constant 0 : index
    %17 = vector.load %arg1[%c0_20, %c3, %c0_21, %c0_22] : memref<1x9x64x128xbf16, #tpu.memory_space<vmem>>, vector<1x1x64x128xbf16>
    %18 = vector.shape_cast %17 : vector<1x1x64x128xbf16> to vector<64x128xbf16>
    %c3_23 = arith.constant 3 : index
    %c0_24 = arith.constant 0 : index
    %c0_25 = arith.constant 0 : index
    %19 = vector.load %arg2[%c3_23, %c0_24, %c0_25] : memref<9x128x128xbf16, #tpu.memory_space<vmem>>, vector<1x128x128xbf16>
    %20 = vector.shape_cast %19 : vector<1x128x128xbf16> to vector<128x128xbf16>
    %cst_26 = arith.constant dense<0.000000e+00> : vector<64x128xf32>
    %21 = tpu.matmul %18, %20, %cst_26 {dimension_numbers = #tpu.dot_dimension_numbers<[1], [0], [0], [1], [0, 0, 1, 1], [], []>} : vector<64x128xbf16>, vector<128x128xbf16>, vector<64x128xf32> -> vector<64x128xf32>
    %22 = arith.addf %16, %21 : vector<64x128xf32>
    %c0_27 = arith.constant 0 : index
    %c4 = arith.constant 4 : index
    %c0_28 = arith.constant 0 : index
    %c0_29 = arith.constant 0 : index
    %23 = vector.load %arg1[%c0_27, %c4, %c0_28, %c0_29] : memref<1x9x64x128xbf16, #tpu.memory_space<vmem>>, vector<1x1x64x128xbf16>
    %24 = vector.shape_cast %23 : vector<1x1x64x128xbf16> to vector<64x128xbf16>
    %c4_30 = arith.constant 4 : index
    %c0_31 = arith.constant 0 : index
    %c0_32 = arith.constant 0 : index
    %25 = vector.load %arg2[%c4_30, %c0_31, %c0_32] : memref<9x128x128xbf16, #tpu.memory_space<vmem>>, vector<1x128x128xbf16>
    %26 = vector.shape_cast %25 : vector<1x128x128xbf16> to vector<128x128xbf16>
    %cst_33 = arith.constant dense<0.000000e+00> : vector<64x128xf32>
    %27 = tpu.matmul %24, %26, %cst_33 {dimension_numbers = #tpu.dot_dimension_numbers<[1], [0], [0], [1], [0, 0, 1, 1], [], []>} : vector<64x128xbf16>, vector<128x128xbf16>, vector<64x128xf32> -> vector<64x128xf32>
    %28 = arith.addf %22, %27 : vector<64x128xf32>
    %c0_34 = arith.constant 0 : index
    %c5 = arith.constant 5 : index
    %c0_35 = arith.constant 0 : index
    %c0_36 = arith.constant 0 : index
    %29 = vector.load %arg1[%c0_34, %c5, %c0_35, %c0_36] : memref<1x9x64x128xbf16, #tpu.memory_space<vmem>>, vector<1x1x64x128xbf16>
    %30 = vector.shape_cast %29 : vector<1x1x64x128xbf16> to vector<64x128xbf16>
    %c5_37 = arith.constant 5 : index
    %c0_38 = arith.constant 0 : index
    %c0_39 = arith.constant 0 : index
    %31 = vector.load %arg2[%c5_37, %c0_38, %c0_39] : memref<9x128x128xbf16, #tpu.memory_space<vmem>>, vector<1x128x128xbf16>
    %32 = vector.shape_cast %31 : vector<1x128x128xbf16> to vector<128x128xbf16>
    %cst_40 = arith.constant dense<0.000000e+00> : vector<64x128xf32>
    %33 = tpu.matmul %30, %32, %cst_40 {dimension_numbers = #tpu.dot_dimension_numbers<[1], [0], [0], [1], [0, 0, 1, 1], [], []>} : vector<64x128xbf16>, vector<128x128xbf16>, vector<64x128xf32> -> vector<64x128xf32>
    %34 = arith.addf %28, %33 : vector<64x128xf32>
    %c0_41 = arith.constant 0 : index
    %c6 = arith.constant 6 : index
    %c0_42 = arith.constant 0 : index
    %c0_43 = arith.constant 0 : index
    %35 = vector.load %arg1[%c0_41, %c6, %c0_42, %c0_43] : memref<1x9x64x128xbf16, #tpu.memory_space<vmem>>, vector<1x1x64x128xbf16>
    %36 = vector.shape_cast %35 : vector<1x1x64x128xbf16> to vector<64x128xbf16>
    %c6_44 = arith.constant 6 : index
    %c0_45 = arith.constant 0 : index
    %c0_46 = arith.constant 0 : index
    %37 = vector.load %arg2[%c6_44, %c0_45, %c0_46] : memref<9x128x128xbf16, #tpu.memory_space<vmem>>, vector<1x128x128xbf16>
    %38 = vector.shape_cast %37 : vector<1x128x128xbf16> to vector<128x128xbf16>
    %cst_47 = arith.constant dense<0.000000e+00> : vector<64x128xf32>
    %39 = tpu.matmul %36, %38, %cst_47 {dimension_numbers = #tpu.dot_dimension_numbers<[1], [0], [0], [1], [0, 0, 1, 1], [], []>} : vector<64x128xbf16>, vector<128x128xbf16>, vector<64x128xf32> -> vector<64x128xf32>
    %40 = arith.addf %34, %39 : vector<64x128xf32>
    %c0_48 = arith.constant 0 : index
    %c7 = arith.constant 7 : index
    %c0_49 = arith.constant 0 : index
    %c0_50 = arith.constant 0 : index
    %41 = vector.load %arg1[%c0_48, %c7, %c0_49, %c0_50] : memref<1x9x64x128xbf16, #tpu.memory_space<vmem>>, vector<1x1x64x128xbf16>
    %42 = vector.shape_cast %41 : vector<1x1x64x128xbf16> to vector<64x128xbf16>
    %c7_51 = arith.constant 7 : index
    %c0_52 = arith.constant 0 : index
    %c0_53 = arith.constant 0 : index
    %43 = vector.load %arg2[%c7_51, %c0_52, %c0_53] : memref<9x128x128xbf16, #tpu.memory_space<vmem>>, vector<1x128x128xbf16>
    %44 = vector.shape_cast %43 : vector<1x128x128xbf16> to vector<128x128xbf16>
    %cst_54 = arith.constant dense<0.000000e+00> : vector<64x128xf32>
    %45 = tpu.matmul %42, %44, %cst_54 {dimension_numbers = #tpu.dot_dimension_numbers<[1], [0], [0], [1], [0, 0, 1, 1], [], []>} : vector<64x128xbf16>, vector<128x128xbf16>, vector<64x128xf32> -> vector<64x128xf32>
    %46 = arith.addf %40, %45 : vector<64x128xf32>
    %c0_55 = arith.constant 0 : index
    %c8 = arith.constant 8 : index
    %c0_56 = arith.constant 0 : index
    %c0_57 = arith.constant 0 : index
    %47 = vector.load %arg1[%c0_55, %c8, %c0_56, %c0_57] : memref<1x9x64x128xbf16, #tpu.memory_space<vmem>>, vector<1x1x64x128xbf16>
    %48 = vector.shape_cast %47 : vector<1x1x64x128xbf16> to vector<64x128xbf16>
    %c8_58 = arith.constant 8 : index
    %c0_59 = arith.constant 0 : index
    %c0_60 = arith.constant 0 : index
    %49 = vector.load %arg2[%c8_58, %c0_59, %c0_60] : memref<9x128x128xbf16, #tpu.memory_space<vmem>>, vector<1x128x128xbf16>
    %50 = vector.shape_cast %49 : vector<1x128x128xbf16> to vector<128x128xbf16>
    %cst_61 = arith.constant dense<0.000000e+00> : vector<64x128xf32>
    %51 = tpu.matmul %48, %50, %cst_61 {dimension_numbers = #tpu.dot_dimension_numbers<[1], [0], [0], [1], [0, 0, 1, 1], [], []>} : vector<64x128xbf16>, vector<128x128xbf16>, vector<64x128xf32> -> vector<64x128xf32>
    %52 = arith.addf %46, %51 : vector<64x128xf32>
    %53 = arith.truncf %52 : vector<64x128xf32> to vector<64x128xbf16>
    %c0_62 = arith.constant 0 : index
    %c0_63 = arith.constant 0 : index
    %c0_64 = arith.constant 0 : index
    %54 = vector.load %arg3[%c0_62, %c0_63, %c0_64] : memref<1x64x128xbf16, #tpu.memory_space<vmem>>, vector<1x64x128xbf16>
    %55 = vector.shape_cast %54 : vector<1x64x128xbf16> to vector<64x128xbf16>
    %56 = vector.shape_cast %53 : vector<64x128xbf16> to vector<1x64x128xbf16>
    tpu.vector_store %arg3[%c0_62, %c0_63, %c0_64], %56 {strides = array<i32>} : memref<1x64x128xbf16, #tpu.memory_space<vmem>>, vector<1x64x128xbf16>,
    %cst_65 = arith.constant dense<0.000000e+00> : vector<128xf32>
    %57 = vector.multi_reduction <add>, %52, %cst_65 [0] : vector<64x128xf32> to vector<128xf32>
    %58 = vector.shape_cast %57 : vector<128xf32> to vector<1x128xf32>
    %c0_66 = arith.constant 0 : index
    %c0_67 = arith.constant 0 : index
    %c0_68 = arith.constant 0 : index
    %59 = vector.load %arg4[%c0_66, %c0_67, %c0_68] : memref<1x2x128xf32, #tpu.memory_space<vmem>>, vector<1x1x128xf32>
    %60 = vector.shape_cast %59 : vector<1x1x128xf32> to vector<1x128xf32>
    %61 = vector.shape_cast %58 : vector<1x128xf32> to vector<1x1x128xf32>
    tpu.vector_store %arg4[%c0_66, %c0_67, %c0_68], %61 {strides = array<i32>} : memref<1x2x128xf32, #tpu.memory_space<vmem>>, vector<1x1x128xf32>,
    %62 = arith.mulf %52, %52 : vector<64x128xf32>
    %cst_69 = arith.constant dense<0.000000e+00> : vector<128xf32>
    %63 = vector.multi_reduction <add>, %62, %cst_69 [0] : vector<64x128xf32> to vector<128xf32>
    %64 = vector.shape_cast %63 : vector<128xf32> to vector<1x128xf32>
    %c0_70 = arith.constant 0 : index
    %c1_71 = arith.constant 1 : index
    %c0_72 = arith.constant 0 : index
    %65 = vector.load %arg4[%c0_70, %c1_71, %c0_72] : memref<1x2x128xf32, #tpu.memory_space<vmem>>, vector<1x1x128xf32>
    %66 = vector.shape_cast %65 : vector<1x1x128xf32> to vector<1x128xf32>
    %67 = vector.shape_cast %64 : vector<1x128xf32> to vector<1x1x128xf32>
    tpu.vector_store %arg4[%c0_70, %c1_71, %c0_72], %67 {strides = array<i32>} : memref<1x2x128xf32, #tpu.memory_space<vmem>>, vector<1x1x128xf32>,
    return
  }
  func.func @transform_0(%arg0: i32) -> (i32, i32, i32, i32) {
    %c0_i32 = arith.constant 0 : i32
    %c0_i32_0 = arith.constant 0 : i32
    %c0_i32_1 = arith.constant 0 : i32
    %c0_i32_2 = arith.constant 0 : i32
    return %arg0, %c0_i32, %c0_i32_0, %c0_i32_1 : i32, i32, i32, i32
  }
  func.func @transform_1(%arg0: i32) -> (i32, i32, i32) {
    %c0_i32 = arith.constant 0 : i32
    %c0_i32_0 = arith.constant 0 : i32
    %c0_i32_1 = arith.constant 0 : i32
    %c0_i32_2 = arith.constant 0 : i32
    return %c0_i32, %c0_i32_0, %c0_i32_1 : i32, i32, i32
  }
  func.func @transform_2(%arg0: i32) -> (i32, i32, i32) {
    %c0_i32 = arith.constant 0 : i32
    %c0_i32_0 = arith.constant 0 : i32
    %c0_i32_1 = arith.constant 0 : i32
    return %arg0, %c0_i32, %c0_i32_0 : i32, i32, i32
  }
  func.func @transform_3(%arg0: i32) -> (i32, i32, i32) {
    %c0_i32 = arith.constant 0 : i32
    %c0_i32_0 = arith.constant 0 : i32
    %c0_i32_1 = arith.constant 0 : i32
    return %arg0, %c0_i32, %c0_i32_0 : i32, i32, i32
  }
}

module attributes {stable_mosaic.version = 11 : i64} {
  func.func @_bn_act_kernel(%arg0: i32, %arg1: memref<1x64x128xbf16, #tpu.memory_space<vmem>>, %arg2: memref<2x128xf32, #tpu.memory_space<vmem>>, %arg3: memref<1x128xf32, #tpu.memory_space<vmem>>, %arg4: memref<1x128xf32, #tpu.memory_space<vmem>>, %arg5: memref<1x64x128xbf16, #tpu.memory_space<vmem>>) attributes {dimension_semantics = [#tpu.dimension_semantics<parallel>], iteration_bounds = array<i64: 2>, scalar_prefetch = 0 : i64, scratch_operands = 0 : i64, tpu.core_type = #tpu.core_type<tc>, window_params = [{transform_indices = @transform_0, window_bounds = array<i64: 1, 64, 128>}, {pipeline_mode = #tpu.pipeline_mode<synchronous>, transform_indices = @transform_1, window_bounds = array<i64: 2, 128>}, {pipeline_mode = #tpu.pipeline_mode<synchronous>, transform_indices = @transform_2, window_bounds = array<i64: 1, 128>}, {pipeline_mode = #tpu.pipeline_mode<synchronous>, transform_indices = @transform_3, window_bounds = array<i64: 1, 128>}, {transform_indices = @transform_4, window_bounds = array<i64: 1, 64, 128>}]} {
    %c0 = arith.constant 0 : index
    %c0_0 = arith.constant 0 : index
    %0 = vector.load %arg2[%c0, %c0_0] : memref<2x128xf32, #tpu.memory_space<vmem>>, vector<2x128xf32>
    %c0_1 = arith.constant 0 : index
    %c0_2 = arith.constant 0 : index
    %1 = vector.load %arg3[%c0_1, %c0_2] : memref<1x128xf32, #tpu.memory_space<vmem>>, vector<1x128xf32>
    %c0_3 = arith.constant 0 : index
    %c0_4 = arith.constant 0 : index
    %2 = vector.load %arg4[%c0_3, %c0_4] : memref<1x128xf32, #tpu.memory_space<vmem>>, vector<1x128xf32>
    %3 = vector.extract_strided_slice %0 {offsets = [0, 0], sizes = [1, 128], strides = [1, 1]} : vector<2x128xf32> to vector<1x128xf32>
    %cst = arith.constant 7.812500e-03 : f32
    %4 = vector.broadcast %cst : f32 to vector<1x128xf32>
    %5 = arith.mulf %3, %4 : vector<1x128xf32>
    %6 = vector.extract_strided_slice %0 {offsets = [1, 0], sizes = [1, 128], strides = [1, 1]} : vector<2x128xf32> to vector<1x128xf32>
    %cst_5 = arith.constant 7.812500e-03 : f32
    %7 = vector.broadcast %cst_5 : f32 to vector<1x128xf32>
    %8 = arith.mulf %6, %7 : vector<1x128xf32>
    %9 = arith.mulf %5, %5 : vector<1x128xf32>
    %10 = arith.subf %8, %9 : vector<1x128xf32>
    %cst_6 = arith.constant 0.000000e+00 : f32
    %11 = vector.broadcast %cst_6 : f32 to vector<1x128xf32>
    %12 = arith.maximumf %10, %11 : vector<1x128xf32>
    %cst_7 = arith.constant 9.99999974E-6 : f32
    %13 = vector.broadcast %cst_7 : f32 to vector<1x128xf32>
    %14 = arith.addf %12, %13 : vector<1x128xf32>
    %15 = math.rsqrt %14 : vector<1x128xf32>
    %16 = arith.mulf %1, %15 : vector<1x128xf32>
    %17 = arith.mulf %5, %16 : vector<1x128xf32>
    %18 = arith.subf %2, %17 : vector<1x128xf32>
    %c0_8 = arith.constant 0 : index
    %c0_9 = arith.constant 0 : index
    %c0_10 = arith.constant 0 : index
    %19 = vector.load %arg1[%c0_8, %c0_9, %c0_10] : memref<1x64x128xbf16, #tpu.memory_space<vmem>>, vector<1x64x128xbf16>
    %20 = vector.shape_cast %19 : vector<1x64x128xbf16> to vector<64x128xbf16>
    %21 = arith.extf %20 : vector<64x128xbf16> to vector<64x128xf32>
    %22 = vector.broadcast %16 : vector<1x128xf32> to vector<64x128xf32>
    %23 = arith.mulf %21, %22 : vector<64x128xf32>
    %24 = vector.broadcast %18 : vector<1x128xf32> to vector<64x128xf32>
    %25 = arith.addf %23, %24 : vector<64x128xf32>
    %cst_11 = arith.constant 0.000000e+00 : f32
    %26 = vector.broadcast %cst_11 : f32 to vector<64x128xf32>
    %27 = arith.maximumf %25, %26 : vector<64x128xf32>
    %28 = arith.truncf %27 : vector<64x128xf32> to vector<64x128xbf16>
    %c0_12 = arith.constant 0 : index
    %c0_13 = arith.constant 0 : index
    %c0_14 = arith.constant 0 : index
    %29 = vector.load %arg5[%c0_12, %c0_13, %c0_14] : memref<1x64x128xbf16, #tpu.memory_space<vmem>>, vector<1x64x128xbf16>
    %30 = vector.shape_cast %29 : vector<1x64x128xbf16> to vector<64x128xbf16>
    %31 = vector.shape_cast %28 : vector<64x128xbf16> to vector<1x64x128xbf16>
    tpu.vector_store %arg5[%c0_12, %c0_13, %c0_14], %31 {strides = array<i32>} : memref<1x64x128xbf16, #tpu.memory_space<vmem>>, vector<1x64x128xbf16>,
    return
  }
  func.func @transform_0(%arg0: i32) -> (i32, i32, i32) {
    %c0_i32 = arith.constant 0 : i32
    %c0_i32_0 = arith.constant 0 : i32
    %c0_i32_1 = arith.constant 0 : i32
    return %arg0, %c0_i32, %c0_i32_0 : i32, i32, i32
  }
  func.func @transform_1(%arg0: i32) -> (i32, i32) {
    %c0_i32 = arith.constant 0 : i32
    %c0_i32_0 = arith.constant 0 : i32
    %c0_i32_1 = arith.constant 0 : i32
    return %c0_i32, %c0_i32_0 : i32, i32
  }
  func.func @transform_2(%arg0: i32) -> (i32, i32) {
    %c0_i32 = arith.constant 0 : i32
    %c0_i32_0 = arith.constant 0 : i32
    %c0_i32_1 = arith.constant 0 : i32
    return %c0_i32, %c0_i32_0 : i32, i32
  }
  func.func @transform_3(%arg0: i32) -> (i32, i32) {
    %c0_i32 = arith.constant 0 : i32
    %c0_i32_0 = arith.constant 0 : i32
    %c0_i32_1 = arith.constant 0 : i32
    return %c0_i32, %c0_i32_0 : i32, i32
  }
  func.func @transform_4(%arg0: i32) -> (i32, i32, i32) {
    %c0_i32 = arith.constant 0 : i32
    %c0_i32_0 = arith.constant 0 : i32
    %c0_i32_1 = arith.constant 0 : i32
    return %arg0, %c0_i32, %c0_i32_0 : i32, i32, i32
  }
}

module attributes {stable_mosaic.version = 11 : i64} {
  func.func @_bn_add_relu_kernel(%arg0: i32, %arg1: memref<1x16x128xbf16, #tpu.memory_space<vmem>>, %arg2: memref<2x128xf32, #tpu.memory_space<vmem>>, %arg3: memref<1x128xf32, #tpu.memory_space<vmem>>, %arg4: memref<1x128xf32, #tpu.memory_space<vmem>>, %arg5: memref<1x16x128xbf16, #tpu.memory_space<vmem>>, %arg6: memref<2x128xf32, #tpu.memory_space<vmem>>, %arg7: memref<1x128xf32, #tpu.memory_space<vmem>>, %arg8: memref<1x128xf32, #tpu.memory_space<vmem>>, %arg9: memref<1x16x128xbf16, #tpu.memory_space<vmem>>) attributes {dimension_semantics = [#tpu.dimension_semantics<parallel>], iteration_bounds = array<i64: 2>, scalar_prefetch = 0 : i64, scratch_operands = 0 : i64, tpu.core_type = #tpu.core_type<tc>, window_params = [{transform_indices = @transform_0, window_bounds = array<i64: 1, 16, 128>}, {pipeline_mode = #tpu.pipeline_mode<synchronous>, transform_indices = @transform_1, window_bounds = array<i64: 2, 128>}, {pipeline_mode = #tpu.pipeline_mode<synchronous>, transform_indices = @transform_2, window_bounds = array<i64: 1, 128>}, {pipeline_mode = #tpu.pipeline_mode<synchronous>, transform_indices = @transform_3, window_bounds = array<i64: 1, 128>}, {transform_indices = @transform_4, window_bounds = array<i64: 1, 16, 128>}, {pipeline_mode = #tpu.pipeline_mode<synchronous>, transform_indices = @transform_5, window_bounds = array<i64: 2, 128>}, {pipeline_mode = #tpu.pipeline_mode<synchronous>, transform_indices = @transform_6, window_bounds = array<i64: 1, 128>}, {pipeline_mode = #tpu.pipeline_mode<synchronous>, transform_indices = @transform_7, window_bounds = array<i64: 1, 128>}, {transform_indices = @transform_8, window_bounds = array<i64: 1, 16, 128>}]} {
    %c0 = arith.constant 0 : index
    %c0_0 = arith.constant 0 : index
    %c0_1 = arith.constant 0 : index
    %0 = vector.load %arg1[%c0, %c0_0, %c0_1] : memref<1x16x128xbf16, #tpu.memory_space<vmem>>, vector<1x16x128xbf16>
    %1 = vector.shape_cast %0 : vector<1x16x128xbf16> to vector<16x128xbf16>
    %2 = arith.extf %1 : vector<16x128xbf16> to vector<16x128xf32>
    %c0_2 = arith.constant 0 : index
    %c0_3 = arith.constant 0 : index
    %3 = vector.load %arg2[%c0_2, %c0_3] : memref<2x128xf32, #tpu.memory_space<vmem>>, vector<2x128xf32>
    %c0_4 = arith.constant 0 : index
    %c0_5 = arith.constant 0 : index
    %4 = vector.load %arg3[%c0_4, %c0_5] : memref<1x128xf32, #tpu.memory_space<vmem>>, vector<1x128xf32>
    %c0_6 = arith.constant 0 : index
    %c0_7 = arith.constant 0 : index
    %5 = vector.load %arg4[%c0_6, %c0_7] : memref<1x128xf32, #tpu.memory_space<vmem>>, vector<1x128xf32>
    %6 = vector.extract_strided_slice %3 {offsets = [0, 0], sizes = [1, 128], strides = [1, 1]} : vector<2x128xf32> to vector<1x128xf32>
    %cst = arith.constant 3.125000e-02 : f32
    %7 = vector.broadcast %cst : f32 to vector<1x128xf32>
    %8 = arith.mulf %6, %7 : vector<1x128xf32>
    %9 = vector.extract_strided_slice %3 {offsets = [1, 0], sizes = [1, 128], strides = [1, 1]} : vector<2x128xf32> to vector<1x128xf32>
    %cst_8 = arith.constant 3.125000e-02 : f32
    %10 = vector.broadcast %cst_8 : f32 to vector<1x128xf32>
    %11 = arith.mulf %9, %10 : vector<1x128xf32>
    %12 = arith.mulf %8, %8 : vector<1x128xf32>
    %13 = arith.subf %11, %12 : vector<1x128xf32>
    %cst_9 = arith.constant 0.000000e+00 : f32
    %14 = vector.broadcast %cst_9 : f32 to vector<1x128xf32>
    %15 = arith.maximumf %13, %14 : vector<1x128xf32>
    %cst_10 = arith.constant 9.99999974E-6 : f32
    %16 = vector.broadcast %cst_10 : f32 to vector<1x128xf32>
    %17 = arith.addf %15, %16 : vector<1x128xf32>
    %18 = math.rsqrt %17 : vector<1x128xf32>
    %19 = arith.mulf %4, %18 : vector<1x128xf32>
    %20 = arith.mulf %8, %19 : vector<1x128xf32>
    %21 = arith.subf %5, %20 : vector<1x128xf32>
    %22 = vector.broadcast %19 : vector<1x128xf32> to vector<16x128xf32>
    %23 = arith.mulf %2, %22 : vector<16x128xf32>
    %24 = vector.broadcast %21 : vector<1x128xf32> to vector<16x128xf32>
    %25 = arith.addf %23, %24 : vector<16x128xf32>
    %c0_11 = arith.constant 0 : index
    %c0_12 = arith.constant 0 : index
    %c0_13 = arith.constant 0 : index
    %26 = vector.load %arg5[%c0_11, %c0_12, %c0_13] : memref<1x16x128xbf16, #tpu.memory_space<vmem>>, vector<1x16x128xbf16>
    %27 = vector.shape_cast %26 : vector<1x16x128xbf16> to vector<16x128xbf16>
    %28 = arith.extf %27 : vector<16x128xbf16> to vector<16x128xf32>
    %c0_14 = arith.constant 0 : index
    %c0_15 = arith.constant 0 : index
    %29 = vector.load %arg6[%c0_14, %c0_15] : memref<2x128xf32, #tpu.memory_space<vmem>>, vector<2x128xf32>
    %c0_16 = arith.constant 0 : index
    %c0_17 = arith.constant 0 : index
    %30 = vector.load %arg7[%c0_16, %c0_17] : memref<1x128xf32, #tpu.memory_space<vmem>>, vector<1x128xf32>
    %c0_18 = arith.constant 0 : index
    %c0_19 = arith.constant 0 : index
    %31 = vector.load %arg8[%c0_18, %c0_19] : memref<1x128xf32, #tpu.memory_space<vmem>>, vector<1x128xf32>
    %32 = vector.extract_strided_slice %29 {offsets = [0, 0], sizes = [1, 128], strides = [1, 1]} : vector<2x128xf32> to vector<1x128xf32>
    %cst_20 = arith.constant 3.125000e-02 : f32
    %33 = vector.broadcast %cst_20 : f32 to vector<1x128xf32>
    %34 = arith.mulf %32, %33 : vector<1x128xf32>
    %35 = vector.extract_strided_slice %29 {offsets = [1, 0], sizes = [1, 128], strides = [1, 1]} : vector<2x128xf32> to vector<1x128xf32>
    %cst_21 = arith.constant 3.125000e-02 : f32
    %36 = vector.broadcast %cst_21 : f32 to vector<1x128xf32>
    %37 = arith.mulf %35, %36 : vector<1x128xf32>
    %38 = arith.mulf %34, %34 : vector<1x128xf32>
    %39 = arith.subf %37, %38 : vector<1x128xf32>
    %cst_22 = arith.constant 0.000000e+00 : f32
    %40 = vector.broadcast %cst_22 : f32 to vector<1x128xf32>
    %41 = arith.maximumf %39, %40 : vector<1x128xf32>
    %cst_23 = arith.constant 9.99999974E-6 : f32
    %42 = vector.broadcast %cst_23 : f32 to vector<1x128xf32>
    %43 = arith.addf %41, %42 : vector<1x128xf32>
    %44 = math.rsqrt %43 : vector<1x128xf32>
    %45 = arith.mulf %30, %44 : vector<1x128xf32>
    %46 = arith.mulf %34, %45 : vector<1x128xf32>
    %47 = arith.subf %31, %46 : vector<1x128xf32>
    %48 = vector.broadcast %45 : vector<1x128xf32> to vector<16x128xf32>
    %49 = arith.mulf %28, %48 : vector<16x128xf32>
    %50 = vector.broadcast %47 : vector<1x128xf32> to vector<16x128xf32>
    %51 = arith.addf %49, %50 : vector<16x128xf32>
    %52 = arith.addf %25, %51 : vector<16x128xf32>
    %cst_24 = arith.constant 0.000000e+00 : f32
    %53 = vector.broadcast %cst_24 : f32 to vector<16x128xf32>
    %54 = arith.maximumf %52, %53 : vector<16x128xf32>
    %55 = arith.truncf %54 : vector<16x128xf32> to vector<16x128xbf16>
    %c0_25 = arith.constant 0 : index
    %c0_26 = arith.constant 0 : index
    %c0_27 = arith.constant 0 : index
    %56 = vector.load %arg9[%c0_25, %c0_26, %c0_27] : memref<1x16x128xbf16, #tpu.memory_space<vmem>>, vector<1x16x128xbf16>
    %57 = vector.shape_cast %56 : vector<1x16x128xbf16> to vector<16x128xbf16>
    %58 = vector.shape_cast %55 : vector<16x128xbf16> to vector<1x16x128xbf16>
    tpu.vector_store %arg9[%c0_25, %c0_26, %c0_27], %58 {strides = array<i32>} : memref<1x16x128xbf16, #tpu.memory_space<vmem>>, vector<1x16x128xbf16>,
    return
  }
  func.func @transform_0(%arg0: i32) -> (i32, i32, i32) {
    %c0_i32 = arith.constant 0 : i32
    %c0_i32_0 = arith.constant 0 : i32
    %c0_i32_1 = arith.constant 0 : i32
    return %arg0, %c0_i32, %c0_i32_0 : i32, i32, i32
  }
  func.func @transform_1(%arg0: i32) -> (i32, i32) {
    %c0_i32 = arith.constant 0 : i32
    %c0_i32_0 = arith.constant 0 : i32
    %c0_i32_1 = arith.constant 0 : i32
    return %c0_i32, %c0_i32_0 : i32, i32
  }
  func.func @transform_2(%arg0: i32) -> (i32, i32) {
    %c0_i32 = arith.constant 0 : i32
    %c0_i32_0 = arith.constant 0 : i32
    %c0_i32_1 = arith.constant 0 : i32
    return %c0_i32, %c0_i32_0 : i32, i32
  }
  func.func @transform_3(%arg0: i32) -> (i32, i32) {
    %c0_i32 = arith.constant 0 : i32
    %c0_i32_0 = arith.constant 0 : i32
    %c0_i32_1 = arith.constant 0 : i32
    return %c0_i32, %c0_i32_0 : i32, i32
  }
  func.func @transform_4(%arg0: i32) -> (i32, i32, i32) {
    %c0_i32 = arith.constant 0 : i32
    %c0_i32_0 = arith.constant 0 : i32
    %c0_i32_1 = arith.constant 0 : i32
    return %arg0, %c0_i32, %c0_i32_0 : i32, i32, i32
  }
  func.func @transform_5(%arg0: i32) -> (i32, i32) {
    %c0_i32 = arith.constant 0 : i32
    %c0_i32_0 = arith.constant 0 : i32
    %c0_i32_1 = arith.constant 0 : i32
    return %c0_i32, %c0_i32_0 : i32, i32
  }
  func.func @transform_6(%arg0: i32) -> (i32, i32) {
    %c0_i32 = arith.constant 0 : i32
    %c0_i32_0 = arith.constant 0 : i32
    %c0_i32_1 = arith.constant 0 : i32
    return %c0_i32, %c0_i32_0 : i32, i32
  }
  func.func @transform_7(%arg0: i32) -> (i32, i32) {
    %c0_i32 = arith.constant 0 : i32
    %c0_i32_0 = arith.constant 0 : i32
    %c0_i32_1 = arith.constant 0 : i32
    return %c0_i32, %c0_i32_0 : i32, i32
  }
  func.func @transform_8(%arg0: i32) -> (i32, i32, i32) {
    %c0_i32 = arith.constant 0 : i32
    %c0_i32_0 = arith.constant 0 : i32
    %c0_i32_1 = arith.constant 0 : i32
    return %arg0, %c0_i32, %c0_i32_0 : i32, i32, i32
  }
}

module attributes {stable_mosaic.version = 11 : i64} {
  func.func @_conv_s1_kernel(%arg0: i32, %arg1: memref<1x16x128xbf16, #tpu.memory_space<vmem>>, %arg2: memref<9x128x128xbf16, #tpu.memory_space<vmem>>, %arg3: memref<128x128xbf16, #tpu.memory_space<vmem>>, %arg4: memref<1x16x128xbf16, #tpu.memory_space<vmem>>, %arg5: memref<1x2x128xf32, #tpu.memory_space<vmem>>, %arg6: memref<1x16x128xbf16, #tpu.memory_space<vmem>>, %arg7: memref<1x2x128xf32, #tpu.memory_space<vmem>>, %arg8: memref<32x128xbf16, #tpu.memory_space<vmem>>) attributes {dimension_semantics = [#tpu.dimension_semantics<parallel>], iteration_bounds = array<i64: 2>, scalar_prefetch = 0 : i64, scratch_operands = 1 : i64, tpu.core_type = #tpu.core_type<tc>, window_params = [{transform_indices = @transform_0, window_bounds = array<i64: 1, 16, 128>}, {pipeline_mode = #tpu.pipeline_mode<synchronous>, transform_indices = @transform_1, window_bounds = array<i64: 9, 128, 128>}, {pipeline_mode = #tpu.pipeline_mode<synchronous>, transform_indices = @transform_2, window_bounds = array<i64: 128, 128>}, {transform_indices = @transform_3, window_bounds = array<i64: 1, 16, 128>}, {transform_indices = @transform_4, window_bounds = array<i64: 1, 2, 128>}, {transform_indices = @transform_5, window_bounds = array<i64: 1, 16, 128>}, {transform_indices = @transform_6, window_bounds = array<i64: 1, 2, 128>}]} {
    %cst = arith.constant 0.000000e+00 : bf16
    %0 = vector.broadcast %cst : bf16 to vector<32x128xbf16>
    %c0 = arith.constant 0 : index
    %c0_0 = arith.constant 0 : index
    %1 = vector.load %arg8[%c0, %c0_0] : memref<32x128xbf16, #tpu.memory_space<vmem>>, vector<32x128xbf16>
    tpu.vector_store %arg8[%c0, %c0_0], %0 {strides = array<i32>} : memref<32x128xbf16, #tpu.memory_space<vmem>>, vector<32x128xbf16>,
    %c0_1 = arith.constant 0 : index
    %c0_2 = arith.constant 0 : index
    %c0_3 = arith.constant 0 : index
    %2 = vector.load %arg1[%c0_1, %c0_2, %c0_3] : memref<1x16x128xbf16, #tpu.memory_space<vmem>>, vector<1x16x128xbf16>
    %3 = vector.shape_cast %2 : vector<1x16x128xbf16> to vector<16x128xbf16>
    %c8 = arith.constant 8 : index
    %c0_4 = arith.constant 0 : index
    %4 = vector.load %arg8[%c8, %c0_4] : memref<32x128xbf16, #tpu.memory_space<vmem>>, vector<16x128xbf16>
    tpu.vector_store %arg8[%c8, %c0_4], %3 {strides = array<i32>} : memref<32x128xbf16, #tpu.memory_space<vmem>>, vector<16x128xbf16>,
    %5 = tpu.iota {dimensions = array<i32: 0>} : vector<16x1xi32>
    %c4_i32 = arith.constant 4 : i32
    %c0_i32 = arith.constant 0 : i32
    %6 = arith.cmpi eq, %c4_i32, %c0_i32 : i32
    %c1_i32 = arith.constant 1 : i32
    %7 = arith.select %6, %c1_i32, %c4_i32 : i32
    %8 = vector.broadcast %7 : i32 to vector<16x1xi32>
    %9 = arith.remsi %5, %8 : vector<16x1xi32>
    %c0_i32_5 = arith.constant 0 : i32
    %10 = vector.broadcast %c0_i32_5 : i32 to vector<16x1xi32>
    %11 = arith.cmpi ne, %9, %10 : vector<16x1xi32>
    %c0_i32_6 = arith.constant 0 : i32
    %12 = vector.broadcast %c0_i32_6 : i32 to vector<16x1xi32>
    %13 = arith.cmpi slt, %9, %12 : vector<16x1xi32>
    %c0_i32_7 = arith.constant 0 : i32
    %14 = arith.cmpi slt, %7, %c0_i32_7 : i32
    %15 = vector.broadcast %14 : i1 to vector<16x1xi1>
    %16 = vector.broadcast %15 : vector<16x1xi1> to vector<16x1xi1>
    %17 = arith.xori %13, %16 : vector<16x1xi1>
    %18 = arith.andi %17, %11 : vector<16x1xi1>
    %19 = vector.broadcast %7 : i32 to vector<16x1xi32>
    %20 = arith.addi %9, %19 : vector<16x1xi32>
    %21 = arith.select %18, %20, %9 : vector<16x1xi1>, vector<16x1xi32>
    %c0_i32_8 = arith.constant 0 : i32
    %22 = vector.broadcast %c0_i32_8 : i32 to vector<16x1xi32>
    %23 = arith.cmpi ne, %21, %22 : vector<16x1xi32>
    %c3_i32 = arith.constant 3 : i32
    %24 = vector.broadcast %c3_i32 : i32 to vector<16x1xi32>
    %25 = arith.cmpi ne, %21, %24 : vector<16x1xi32>
    %cst_9 = arith.constant 0.000000e+00 : f32
    %26 = vector.broadcast %cst_9 : f32 to vector<16x128xf32>
    %c3 = arith.constant 3 : index
    %c0_10 = arith.constant 0 : index
    %27 = vector.load %arg8[%c3, %c0_10] : memref<32x128xbf16, #tpu.memory_space<vmem>>, vector<16x128xbf16>
    %cst_11 = arith.constant 0.000000e+00 : bf16
    %28 = vector.broadcast %cst_11 : bf16 to vector<16x128xbf16>
    %29 = vector.shape_cast %23 : vector<16x1xi1> to vector<16x1xi1>
    %30 = vector.broadcast %29 : vector<16x1xi1> to vector<16x128xi1>
    %31 = arith.select %30, %27, %28 : vector<16x128xi1>, vector<16x128xbf16>
    %c0_12 = arith.constant 0 : index
    %c0_13 = arith.constant 0 : index
    %c0_14 = arith.constant 0 : index
    %32 = vector.load %arg2[%c0_12, %c0_13, %c0_14] : memref<9x128x128xbf16, #tpu.memory_space<vmem>>, vector<1x128x128xbf16>
    %33 = vector.shape_cast %32 : vector<1x128x128xbf16> to vector<128x128xbf16>
    %cst_15 = arith.constant dense<0.000000e+00> : vector<16x128xf32>
    %34 = tpu.matmul %31, %33, %cst_15 {dimension_numbers = #tpu.dot_dimension_numbers<[1], [0], [0], [1], [0, 0, 1, 1], [], []>} : vector<16x128xbf16>, vector<128x128xbf16>, vector<16x128xf32> -> vector<16x128xf32>
    %35 = arith.addf %26, %34 : vector<16x128xf32>
    %c4 = arith.constant 4 : index
    %c0_16 = arith.constant 0 : index
    %36 = vector.load %arg8[%c4, %c0_16] : memref<32x128xbf16, #tpu.memory_space<vmem>>, vector<16x128xbf16>
    %c1 = arith.constant 1 : index
    %c0_17 = arith.constant 0 : index
    %c0_18 = arith.constant 0 : index
    %37 = vector.load %arg2[%c1, %c0_17, %c0_18] : memref<9x128x128xbf16, #tpu.memory_space<vmem>>, vector<1x128x128xbf16>
    %38 = vector.shape_cast %37 : vector<1x128x128xbf16> to vector<128x128xbf16>
    %cst_19 = arith.constant dense<0.000000e+00> : vector<16x128xf32>
    %39 = tpu.matmul %36, %38, %cst_19 {dimension_numbers = #tpu.dot_dimension_numbers<[1], [0], [0], [1], [0, 0, 1, 1], [], []>} : vector<16x128xbf16>, vector<128x128xbf16>, vector<16x128xf32> -> vector<16x128xf32>
    %40 = arith.addf %35, %39 : vector<16x128xf32>
    %c5 = arith.constant 5 : index
    %c0_20 = arith.constant 0 : index
    %41 = vector.load %arg8[%c5, %c0_20] : memref<32x128xbf16, #tpu.memory_space<vmem>>, vector<16x128xbf16>
    %cst_21 = arith.constant 0.000000e+00 : bf16
    %42 = vector.broadcast %cst_21 : bf16 to vector<16x128xbf16>
    %43 = vector.shape_cast %25 : vector<16x1xi1> to vector<16x1xi1>
    %44 = vector.broadcast %43 : vector<16x1xi1> to vector<16x128xi1>
    %45 = arith.select %44, %41, %42 : vector<16x128xi1>, vector<16x128xbf16>
    %c2 = arith.constant 2 : index
    %c0_22 = arith.constant 0 : index
    %c0_23 = arith.constant 0 : index
    %46 = vector.load %arg2[%c2, %c0_22, %c0_23] : memref<9x128x128xbf16, #tpu.memory_space<vmem>>, vector<1x128x128xbf16>
    %47 = vector.shape_cast %46 : vector<1x128x128xbf16> to vector<128x128xbf16>
    %cst_24 = arith.constant dense<0.000000e+00> : vector<16x128xf32>
    %48 = tpu.matmul %45, %47, %cst_24 {dimension_numbers = #tpu.dot_dimension_numbers<[1], [0], [0], [1], [0, 0, 1, 1], [], []>} : vector<16x128xbf16>, vector<128x128xbf16>, vector<16x128xf32> -> vector<16x128xf32>
    %49 = arith.addf %40, %48 : vector<16x128xf32>
    %c7 = arith.constant 7 : index
    %c0_25 = arith.constant 0 : index
    %50 = vector.load %arg8[%c7, %c0_25] : memref<32x128xbf16, #tpu.memory_space<vmem>>, vector<16x128xbf16>
    %cst_26 = arith.constant 0.000000e+00 : bf16
    %51 = vector.broadcast %cst_26 : bf16 to vector<16x128xbf16>
    %52 = vector.shape_cast %23 : vector<16x1xi1> to vector<16x1xi1>
    %53 = vector.broadcast %52 : vector<16x1xi1> to vector<16x128xi1>
    %54 = arith.select %53, %50, %51 : vector<16x128xi1>, vector<16x128xbf16>
    %c3_27 = arith.constant 3 : index
    %c0_28 = arith.constant 0 : index
    %c0_29 = arith.constant 0 : index
    %55 = vector.load %arg2[%c3_27, %c0_28, %c0_29] : memref<9x128x128xbf16, #tpu.memory_space<vmem>>, vector<1x128x128xbf16>
    %56 = vector.shape_cast %55 : vector<1x128x128xbf16> to vector<128x128xbf16>
    %cst_30 = arith.constant dense<0.000000e+00> : vector<16x128xf32>
    %57 = tpu.matmul %54, %56, %cst_30 {dimension_numbers = #tpu.dot_dimension_numbers<[1], [0], [0], [1], [0, 0, 1, 1], [], []>} : vector<16x128xbf16>, vector<128x128xbf16>, vector<16x128xf32> -> vector<16x128xf32>
    %58 = arith.addf %49, %57 : vector<16x128xf32>
    %c8_31 = arith.constant 8 : index
    %c0_32 = arith.constant 0 : index
    %59 = vector.load %arg8[%c8_31, %c0_32] : memref<32x128xbf16, #tpu.memory_space<vmem>>, vector<16x128xbf16>
    %c4_33 = arith.constant 4 : index
    %c0_34 = arith.constant 0 : index
    %c0_35 = arith.constant 0 : index
    %60 = vector.load %arg2[%c4_33, %c0_34, %c0_35] : memref<9x128x128xbf16, #tpu.memory_space<vmem>>, vector<1x128x128xbf16>
    %61 = vector.shape_cast %60 : vector<1x128x128xbf16> to vector<128x128xbf16>
    %cst_36 = arith.constant dense<0.000000e+00> : vector<16x128xf32>
    %62 = tpu.matmul %59, %61, %cst_36 {dimension_numbers = #tpu.dot_dimension_numbers<[1], [0], [0], [1], [0, 0, 1, 1], [], []>} : vector<16x128xbf16>, vector<128x128xbf16>, vector<16x128xf32> -> vector<16x128xf32>
    %63 = arith.addf %58, %62 : vector<16x128xf32>
    %c9 = arith.constant 9 : index
    %c0_37 = arith.constant 0 : index
    %64 = vector.load %arg8[%c9, %c0_37] : memref<32x128xbf16, #tpu.memory_space<vmem>>, vector<16x128xbf16>
    %cst_38 = arith.constant 0.000000e+00 : bf16
    %65 = vector.broadcast %cst_38 : bf16 to vector<16x128xbf16>
    %66 = vector.shape_cast %25 : vector<16x1xi1> to vector<16x1xi1>
    %67 = vector.broadcast %66 : vector<16x1xi1> to vector<16x128xi1>
    %68 = arith.select %67, %64, %65 : vector<16x128xi1>, vector<16x128xbf16>
    %c5_39 = arith.constant 5 : index
    %c0_40 = arith.constant 0 : index
    %c0_41 = arith.constant 0 : index
    %69 = vector.load %arg2[%c5_39, %c0_40, %c0_41] : memref<9x128x128xbf16, #tpu.memory_space<vmem>>, vector<1x128x128xbf16>
    %70 = vector.shape_cast %69 : vector<1x128x128xbf16> to vector<128x128xbf16>
    %cst_42 = arith.constant dense<0.000000e+00> : vector<16x128xf32>
    %71 = tpu.matmul %68, %70, %cst_42 {dimension_numbers = #tpu.dot_dimension_numbers<[1], [0], [0], [1], [0, 0, 1, 1], [], []>} : vector<16x128xbf16>, vector<128x128xbf16>, vector<16x128xf32> -> vector<16x128xf32>
    %72 = arith.addf %63, %71 : vector<16x128xf32>
    %c11 = arith.constant 11 : index
    %c0_43 = arith.constant 0 : index
    %73 = vector.load %arg8[%c11, %c0_43] : memref<32x128xbf16, #tpu.memory_space<vmem>>, vector<16x128xbf16>
    %cst_44 = arith.constant 0.000000e+00 : bf16
    %74 = vector.broadcast %cst_44 : bf16 to vector<16x128xbf16>
    %75 = vector.shape_cast %23 : vector<16x1xi1> to vector<16x1xi1>
    %76 = vector.broadcast %75 : vector<16x1xi1> to vector<16x128xi1>
    %77 = arith.select %76, %73, %74 : vector<16x128xi1>, vector<16x128xbf16>
    %c6 = arith.constant 6 : index
    %c0_45 = arith.constant 0 : index
    %c0_46 = arith.constant 0 : index
    %78 = vector.load %arg2[%c6, %c0_45, %c0_46] : memref<9x128x128xbf16, #tpu.memory_space<vmem>>, vector<1x128x128xbf16>
    %79 = vector.shape_cast %78 : vector<1x128x128xbf16> to vector<128x128xbf16>
    %cst_47 = arith.constant dense<0.000000e+00> : vector<16x128xf32>
    %80 = tpu.matmul %77, %79, %cst_47 {dimension_numbers = #tpu.dot_dimension_numbers<[1], [0], [0], [1], [0, 0, 1, 1], [], []>} : vector<16x128xbf16>, vector<128x128xbf16>, vector<16x128xf32> -> vector<16x128xf32>
    %81 = arith.addf %72, %80 : vector<16x128xf32>
    %c12 = arith.constant 12 : index
    %c0_48 = arith.constant 0 : index
    %82 = vector.load %arg8[%c12, %c0_48] : memref<32x128xbf16, #tpu.memory_space<vmem>>, vector<16x128xbf16>
    %c7_49 = arith.constant 7 : index
    %c0_50 = arith.constant 0 : index
    %c0_51 = arith.constant 0 : index
    %83 = vector.load %arg2[%c7_49, %c0_50, %c0_51] : memref<9x128x128xbf16, #tpu.memory_space<vmem>>, vector<1x128x128xbf16>
    %84 = vector.shape_cast %83 : vector<1x128x128xbf16> to vector<128x128xbf16>
    %cst_52 = arith.constant dense<0.000000e+00> : vector<16x128xf32>
    %85 = tpu.matmul %82, %84, %cst_52 {dimension_numbers = #tpu.dot_dimension_numbers<[1], [0], [0], [1], [0, 0, 1, 1], [], []>} : vector<16x128xbf16>, vector<128x128xbf16>, vector<16x128xf32> -> vector<16x128xf32>
    %86 = arith.addf %81, %85 : vector<16x128xf32>
    %c13 = arith.constant 13 : index
    %c0_53 = arith.constant 0 : index
    %87 = vector.load %arg8[%c13, %c0_53] : memref<32x128xbf16, #tpu.memory_space<vmem>>, vector<16x128xbf16>
    %cst_54 = arith.constant 0.000000e+00 : bf16
    %88 = vector.broadcast %cst_54 : bf16 to vector<16x128xbf16>
    %89 = vector.shape_cast %25 : vector<16x1xi1> to vector<16x1xi1>
    %90 = vector.broadcast %89 : vector<16x1xi1> to vector<16x128xi1>
    %91 = arith.select %90, %87, %88 : vector<16x128xi1>, vector<16x128xbf16>
    %c8_55 = arith.constant 8 : index
    %c0_56 = arith.constant 0 : index
    %c0_57 = arith.constant 0 : index
    %92 = vector.load %arg2[%c8_55, %c0_56, %c0_57] : memref<9x128x128xbf16, #tpu.memory_space<vmem>>, vector<1x128x128xbf16>
    %93 = vector.shape_cast %92 : vector<1x128x128xbf16> to vector<128x128xbf16>
    %cst_58 = arith.constant dense<0.000000e+00> : vector<16x128xf32>
    %94 = tpu.matmul %91, %93, %cst_58 {dimension_numbers = #tpu.dot_dimension_numbers<[1], [0], [0], [1], [0, 0, 1, 1], [], []>} : vector<16x128xbf16>, vector<128x128xbf16>, vector<16x128xf32> -> vector<16x128xf32>
    %95 = arith.addf %86, %94 : vector<16x128xf32>
    %96 = arith.truncf %95 : vector<16x128xf32> to vector<16x128xbf16>
    %c0_59 = arith.constant 0 : index
    %c0_60 = arith.constant 0 : index
    %c0_61 = arith.constant 0 : index
    %97 = vector.load %arg4[%c0_59, %c0_60, %c0_61] : memref<1x16x128xbf16, #tpu.memory_space<vmem>>, vector<1x16x128xbf16>
    %98 = vector.shape_cast %97 : vector<1x16x128xbf16> to vector<16x128xbf16>
    %99 = vector.shape_cast %96 : vector<16x128xbf16> to vector<1x16x128xbf16>
    tpu.vector_store %arg4[%c0_59, %c0_60, %c0_61], %99 {strides = array<i32>} : memref<1x16x128xbf16, #tpu.memory_space<vmem>>, vector<1x16x128xbf16>,
    %cst_62 = arith.constant dense<0.000000e+00> : vector<128xf32>
    %100 = vector.multi_reduction <add>, %95, %cst_62 [0] : vector<16x128xf32> to vector<128xf32>
    %101 = vector.shape_cast %100 : vector<128xf32> to vector<1x128xf32>
    %c0_63 = arith.constant 0 : index
    %c0_64 = arith.constant 0 : index
    %c0_65 = arith.constant 0 : index
    %102 = vector.load %arg5[%c0_63, %c0_64, %c0_65] : memref<1x2x128xf32, #tpu.memory_space<vmem>>, vector<1x1x128xf32>
    %103 = vector.shape_cast %102 : vector<1x1x128xf32> to vector<1x128xf32>
    %104 = vector.shape_cast %101 : vector<1x128xf32> to vector<1x1x128xf32>
    tpu.vector_store %arg5[%c0_63, %c0_64, %c0_65], %104 {strides = array<i32>} : memref<1x2x128xf32, #tpu.memory_space<vmem>>, vector<1x1x128xf32>,
    %105 = arith.mulf %95, %95 : vector<16x128xf32>
    %cst_66 = arith.constant dense<0.000000e+00> : vector<128xf32>
    %106 = vector.multi_reduction <add>, %105, %cst_66 [0] : vector<16x128xf32> to vector<128xf32>
    %107 = vector.shape_cast %106 : vector<128xf32> to vector<1x128xf32>
    %c0_67 = arith.constant 0 : index
    %c1_68 = arith.constant 1 : index
    %c0_69 = arith.constant 0 : index
    %108 = vector.load %arg5[%c0_67, %c1_68, %c0_69] : memref<1x2x128xf32, #tpu.memory_space<vmem>>, vector<1x1x128xf32>
    %109 = vector.shape_cast %108 : vector<1x1x128xf32> to vector<1x128xf32>
    %110 = vector.shape_cast %107 : vector<1x128xf32> to vector<1x1x128xf32>
    tpu.vector_store %arg5[%c0_67, %c1_68, %c0_69], %110 {strides = array<i32>} : memref<1x2x128xf32, #tpu.memory_space<vmem>>, vector<1x1x128xf32>,
    %c8_70 = arith.constant 8 : index
    %c0_71 = arith.constant 0 : index
    %111 = vector.load %arg8[%c8_70, %c0_71] : memref<32x128xbf16, #tpu.memory_space<vmem>>, vector<16x128xbf16>
    %c0_72 = arith.constant 0 : index
    %c0_73 = arith.constant 0 : index
    %112 = vector.load %arg3[%c0_72, %c0_73] : memref<128x128xbf16, #tpu.memory_space<vmem>>, vector<128x128xbf16>
    %cst_74 = arith.constant dense<0.000000e+00> : vector<16x128xf32>
    %113 = tpu.matmul %111, %112, %cst_74 {dimension_numbers = #tpu.dot_dimension_numbers<[1], [0], [0], [1], [0, 0, 1, 1], [], []>} : vector<16x128xbf16>, vector<128x128xbf16>, vector<16x128xf32> -> vector<16x128xf32>
    %114 = arith.truncf %113 : vector<16x128xf32> to vector<16x128xbf16>
    %c0_75 = arith.constant 0 : index
    %c0_76 = arith.constant 0 : index
    %c0_77 = arith.constant 0 : index
    %115 = vector.load %arg6[%c0_75, %c0_76, %c0_77] : memref<1x16x128xbf16, #tpu.memory_space<vmem>>, vector<1x16x128xbf16>
    %116 = vector.shape_cast %115 : vector<1x16x128xbf16> to vector<16x128xbf16>
    %117 = vector.shape_cast %114 : vector<16x128xbf16> to vector<1x16x128xbf16>
    tpu.vector_store %arg6[%c0_75, %c0_76, %c0_77], %117 {strides = array<i32>} : memref<1x16x128xbf16, #tpu.memory_space<vmem>>, vector<1x16x128xbf16>,
    %cst_78 = arith.constant dense<0.000000e+00> : vector<128xf32>
    %118 = vector.multi_reduction <add>, %113, %cst_78 [0] : vector<16x128xf32> to vector<128xf32>
    %119 = vector.shape_cast %118 : vector<128xf32> to vector<1x128xf32>
    %c0_79 = arith.constant 0 : index
    %c0_80 = arith.constant 0 : index
    %c0_81 = arith.constant 0 : index
    %120 = vector.load %arg7[%c0_79, %c0_80, %c0_81] : memref<1x2x128xf32, #tpu.memory_space<vmem>>, vector<1x1x128xf32>
    %121 = vector.shape_cast %120 : vector<1x1x128xf32> to vector<1x128xf32>
    %122 = vector.shape_cast %119 : vector<1x128xf32> to vector<1x1x128xf32>
    tpu.vector_store %arg7[%c0_79, %c0_80, %c0_81], %122 {strides = array<i32>} : memref<1x2x128xf32, #tpu.memory_space<vmem>>, vector<1x1x128xf32>,
    %123 = arith.mulf %113, %113 : vector<16x128xf32>
    %cst_82 = arith.constant dense<0.000000e+00> : vector<128xf32>
    %124 = vector.multi_reduction <add>, %123, %cst_82 [0] : vector<16x128xf32> to vector<128xf32>
    %125 = vector.shape_cast %124 : vector<128xf32> to vector<1x128xf32>
    %c0_83 = arith.constant 0 : index
    %c1_84 = arith.constant 1 : index
    %c0_85 = arith.constant 0 : index
    %126 = vector.load %arg7[%c0_83, %c1_84, %c0_85] : memref<1x2x128xf32, #tpu.memory_space<vmem>>, vector<1x1x128xf32>
    %127 = vector.shape_cast %126 : vector<1x1x128xf32> to vector<1x128xf32>
    %128 = vector.shape_cast %125 : vector<1x128xf32> to vector<1x1x128xf32>
    tpu.vector_store %arg7[%c0_83, %c1_84, %c0_85], %128 {strides = array<i32>} : memref<1x2x128xf32, #tpu.memory_space<vmem>>, vector<1x1x128xf32>,
    return
  }
  func.func @transform_0(%arg0: i32) -> (i32, i32, i32) {
    %c0_i32 = arith.constant 0 : i32
    %c0_i32_0 = arith.constant 0 : i32
    %c0_i32_1 = arith.constant 0 : i32
    return %arg0, %c0_i32, %c0_i32_0 : i32, i32, i32
  }
  func.func @transform_1(%arg0: i32) -> (i32, i32, i32) {
    %c0_i32 = arith.constant 0 : i32
    %c0_i32_0 = arith.constant 0 : i32
    %c0_i32_1 = arith.constant 0 : i32
    %c0_i32_2 = arith.constant 0 : i32
    return %c0_i32, %c0_i32_0, %c0_i32_1 : i32, i32, i32
  }
  func.func @transform_2(%arg0: i32) -> (i32, i32) {
    %c0_i32 = arith.constant 0 : i32
    %c0_i32_0 = arith.constant 0 : i32
    %c0_i32_1 = arith.constant 0 : i32
    return %c0_i32, %c0_i32_0 : i32, i32
  }
  func.func @transform_3(%arg0: i32) -> (i32, i32, i32) {
    %c0_i32 = arith.constant 0 : i32
    %c0_i32_0 = arith.constant 0 : i32
    %c0_i32_1 = arith.constant 0 : i32
    return %arg0, %c0_i32, %c0_i32_0 : i32, i32, i32
  }
  func.func @transform_4(%arg0: i32) -> (i32, i32, i32) {
    %c0_i32 = arith.constant 0 : i32
    %c0_i32_0 = arith.constant 0 : i32
    %c0_i32_1 = arith.constant 0 : i32
    return %arg0, %c0_i32, %c0_i32_0 : i32, i32, i32
  }
  func.func @transform_5(%arg0: i32) -> (i32, i32, i32) {
    %c0_i32 = arith.constant 0 : i32
    %c0_i32_0 = arith.constant 0 : i32
    %c0_i32_1 = arith.constant 0 : i32
    return %arg0, %c0_i32, %c0_i32_0 : i32, i32, i32
  }
  func.func @transform_6(%arg0: i32) -> (i32, i32, i32) {
    %c0_i32 = arith.constant 0 : i32
    %c0_i32_0 = arith.constant 0 : i32
    %c0_i32_1 = arith.constant 0 : i32
    return %arg0, %c0_i32, %c0_i32_0 : i32, i32, i32
  }
}

module attributes {stable_mosaic.version = 11 : i64} {
  func.func @_maxpool_taps_kernel(%arg0: i32, %arg1: memref<1x9x16x128xbf16, #tpu.memory_space<vmem>>, %arg2: memref<1x16x128xbf16, #tpu.memory_space<vmem>>) attributes {dimension_semantics = [#tpu.dimension_semantics<parallel>], iteration_bounds = array<i64: 2>, scalar_prefetch = 0 : i64, scratch_operands = 0 : i64, tpu.core_type = #tpu.core_type<tc>, window_params = [{transform_indices = @transform_0, window_bounds = array<i64: 1, 9, 16, 128>}, {transform_indices = @transform_1, window_bounds = array<i64: 1, 16, 128>}]} {
    %c0 = arith.constant 0 : index
    %c0_0 = arith.constant 0 : index
    %c0_1 = arith.constant 0 : index
    %c0_2 = arith.constant 0 : index
    %0 = vector.load %arg1[%c0, %c0_0, %c0_1, %c0_2] : memref<1x9x16x128xbf16, #tpu.memory_space<vmem>>, vector<1x1x16x128xbf16>
    %1 = vector.shape_cast %0 : vector<1x1x16x128xbf16> to vector<16x128xbf16>
    %c0_3 = arith.constant 0 : index
    %c1 = arith.constant 1 : index
    %c0_4 = arith.constant 0 : index
    %c0_5 = arith.constant 0 : index
    %2 = vector.load %arg1[%c0_3, %c1, %c0_4, %c0_5] : memref<1x9x16x128xbf16, #tpu.memory_space<vmem>>, vector<1x1x16x128xbf16>
    %3 = vector.shape_cast %2 : vector<1x1x16x128xbf16> to vector<16x128xbf16>
    %4 = arith.maximumf %1, %3 : vector<16x128xbf16>
    %c0_6 = arith.constant 0 : index
    %c2 = arith.constant 2 : index
    %c0_7 = arith.constant 0 : index
    %c0_8 = arith.constant 0 : index
    %5 = vector.load %arg1[%c0_6, %c2, %c0_7, %c0_8] : memref<1x9x16x128xbf16, #tpu.memory_space<vmem>>, vector<1x1x16x128xbf16>
    %6 = vector.shape_cast %5 : vector<1x1x16x128xbf16> to vector<16x128xbf16>
    %7 = arith.maximumf %4, %6 : vector<16x128xbf16>
    %c0_9 = arith.constant 0 : index
    %c3 = arith.constant 3 : index
    %c0_10 = arith.constant 0 : index
    %c0_11 = arith.constant 0 : index
    %8 = vector.load %arg1[%c0_9, %c3, %c0_10, %c0_11] : memref<1x9x16x128xbf16, #tpu.memory_space<vmem>>, vector<1x1x16x128xbf16>
    %9 = vector.shape_cast %8 : vector<1x1x16x128xbf16> to vector<16x128xbf16>
    %10 = arith.maximumf %7, %9 : vector<16x128xbf16>
    %c0_12 = arith.constant 0 : index
    %c4 = arith.constant 4 : index
    %c0_13 = arith.constant 0 : index
    %c0_14 = arith.constant 0 : index
    %11 = vector.load %arg1[%c0_12, %c4, %c0_13, %c0_14] : memref<1x9x16x128xbf16, #tpu.memory_space<vmem>>, vector<1x1x16x128xbf16>
    %12 = vector.shape_cast %11 : vector<1x1x16x128xbf16> to vector<16x128xbf16>
    %13 = arith.maximumf %10, %12 : vector<16x128xbf16>
    %c0_15 = arith.constant 0 : index
    %c5 = arith.constant 5 : index
    %c0_16 = arith.constant 0 : index
    %c0_17 = arith.constant 0 : index
    %14 = vector.load %arg1[%c0_15, %c5, %c0_16, %c0_17] : memref<1x9x16x128xbf16, #tpu.memory_space<vmem>>, vector<1x1x16x128xbf16>
    %15 = vector.shape_cast %14 : vector<1x1x16x128xbf16> to vector<16x128xbf16>
    %16 = arith.maximumf %13, %15 : vector<16x128xbf16>
    %c0_18 = arith.constant 0 : index
    %c6 = arith.constant 6 : index
    %c0_19 = arith.constant 0 : index
    %c0_20 = arith.constant 0 : index
    %17 = vector.load %arg1[%c0_18, %c6, %c0_19, %c0_20] : memref<1x9x16x128xbf16, #tpu.memory_space<vmem>>, vector<1x1x16x128xbf16>
    %18 = vector.shape_cast %17 : vector<1x1x16x128xbf16> to vector<16x128xbf16>
    %19 = arith.maximumf %16, %18 : vector<16x128xbf16>
    %c0_21 = arith.constant 0 : index
    %c7 = arith.constant 7 : index
    %c0_22 = arith.constant 0 : index
    %c0_23 = arith.constant 0 : index
    %20 = vector.load %arg1[%c0_21, %c7, %c0_22, %c0_23] : memref<1x9x16x128xbf16, #tpu.memory_space<vmem>>, vector<1x1x16x128xbf16>
    %21 = vector.shape_cast %20 : vector<1x1x16x128xbf16> to vector<16x128xbf16>
    %22 = arith.maximumf %19, %21 : vector<16x128xbf16>
    %c0_24 = arith.constant 0 : index
    %c8 = arith.constant 8 : index
    %c0_25 = arith.constant 0 : index
    %c0_26 = arith.constant 0 : index
    %23 = vector.load %arg1[%c0_24, %c8, %c0_25, %c0_26] : memref<1x9x16x128xbf16, #tpu.memory_space<vmem>>, vector<1x1x16x128xbf16>
    %24 = vector.shape_cast %23 : vector<1x1x16x128xbf16> to vector<16x128xbf16>
    %25 = arith.maximumf %22, %24 : vector<16x128xbf16>
    %c0_27 = arith.constant 0 : index
    %c0_28 = arith.constant 0 : index
    %c0_29 = arith.constant 0 : index
    %26 = vector.load %arg2[%c0_27, %c0_28, %c0_29] : memref<1x16x128xbf16, #tpu.memory_space<vmem>>, vector<1x16x128xbf16>
    %27 = vector.shape_cast %26 : vector<1x16x128xbf16> to vector<16x128xbf16>
    %28 = vector.shape_cast %25 : vector<16x128xbf16> to vector<1x16x128xbf16>
    tpu.vector_store %arg2[%c0_27, %c0_28, %c0_29], %28 {strides = array<i32>} : memref<1x16x128xbf16, #tpu.memory_space<vmem>>, vector<1x16x128xbf16>,
    return
  }
  func.func @transform_0(%arg0: i32) -> (i32, i32, i32, i32) {
    %c0_i32 = arith.constant 0 : i32
    %c0_i32_0 = arith.constant 0 : i32
    %c0_i32_1 = arith.constant 0 : i32
    %c0_i32_2 = arith.constant 0 : i32
    return %arg0, %c0_i32, %c0_i32_0, %c0_i32_1 : i32, i32, i32, i32
  }
  func.func @transform_1(%arg0: i32) -> (i32, i32, i32) {
    %c0_i32 = arith.constant 0 : i32
    %c0_i32_0 = arith.constant 0 : i32
    %c0_i32_1 = arith.constant 0 : i32
    return %arg0, %c0_i32, %c0_i32_0 : i32, i32, i32
  }
}

module attributes {stable_mosaic.version = 11 : i64} {
  func.func @_conv_s1_kernel(%arg0: i32, %arg1: memref<2x128xf32, #tpu.memory_space<vmem>>, %arg2: memref<1x128xf32, #tpu.memory_space<vmem>>, %arg3: memref<1x128xf32, #tpu.memory_space<vmem>>, %arg4: memref<1x16x128xbf16, #tpu.memory_space<vmem>>, %arg5: memref<9x128x128xbf16, #tpu.memory_space<vmem>>, %arg6: memref<1x16x128xbf16, #tpu.memory_space<vmem>>, %arg7: memref<1x2x128xf32, #tpu.memory_space<vmem>>, %arg8: memref<32x128xbf16, #tpu.memory_space<vmem>>) attributes {dimension_semantics = [#tpu.dimension_semantics<parallel>], iteration_bounds = array<i64: 2>, scalar_prefetch = 0 : i64, scratch_operands = 1 : i64, tpu.core_type = #tpu.core_type<tc>, window_params = [{pipeline_mode = #tpu.pipeline_mode<synchronous>, transform_indices = @transform_0, window_bounds = array<i64: 2, 128>}, {pipeline_mode = #tpu.pipeline_mode<synchronous>, transform_indices = @transform_1, window_bounds = array<i64: 1, 128>}, {pipeline_mode = #tpu.pipeline_mode<synchronous>, transform_indices = @transform_2, window_bounds = array<i64: 1, 128>}, {transform_indices = @transform_3, window_bounds = array<i64: 1, 16, 128>}, {pipeline_mode = #tpu.pipeline_mode<synchronous>, transform_indices = @transform_4, window_bounds = array<i64: 9, 128, 128>}, {transform_indices = @transform_5, window_bounds = array<i64: 1, 16, 128>}, {transform_indices = @transform_6, window_bounds = array<i64: 1, 2, 128>}]} {
    %cst = arith.constant 0.000000e+00 : bf16
    %0 = vector.broadcast %cst : bf16 to vector<32x128xbf16>
    %c0 = arith.constant 0 : index
    %c0_0 = arith.constant 0 : index
    %1 = vector.load %arg8[%c0, %c0_0] : memref<32x128xbf16, #tpu.memory_space<vmem>>, vector<32x128xbf16>
    tpu.vector_store %arg8[%c0, %c0_0], %0 {strides = array<i32>} : memref<32x128xbf16, #tpu.memory_space<vmem>>, vector<32x128xbf16>,
    %c0_1 = arith.constant 0 : index
    %c0_2 = arith.constant 0 : index
    %c0_3 = arith.constant 0 : index
    %2 = vector.load %arg4[%c0_1, %c0_2, %c0_3] : memref<1x16x128xbf16, #tpu.memory_space<vmem>>, vector<1x16x128xbf16>
    %3 = vector.shape_cast %2 : vector<1x16x128xbf16> to vector<16x128xbf16>
    %c0_4 = arith.constant 0 : index
    %c0_5 = arith.constant 0 : index
    %4 = vector.load %arg1[%c0_4, %c0_5] : memref<2x128xf32, #tpu.memory_space<vmem>>, vector<2x128xf32>
    %c0_6 = arith.constant 0 : index
    %c0_7 = arith.constant 0 : index
    %5 = vector.load %arg2[%c0_6, %c0_7] : memref<1x128xf32, #tpu.memory_space<vmem>>, vector<1x128xf32>
    %c0_8 = arith.constant 0 : index
    %c0_9 = arith.constant 0 : index
    %6 = vector.load %arg3[%c0_8, %c0_9] : memref<1x128xf32, #tpu.memory_space<vmem>>, vector<1x128xf32>
    %7 = vector.extract_strided_slice %4 {offsets = [0, 0], sizes = [1, 128], strides = [1, 1]} : vector<2x128xf32> to vector<1x128xf32>
    %cst_10 = arith.constant 3.125000e-02 : f32
    %8 = vector.broadcast %cst_10 : f32 to vector<1x128xf32>
    %9 = arith.mulf %7, %8 : vector<1x128xf32>
    %10 = vector.extract_strided_slice %4 {offsets = [1, 0], sizes = [1, 128], strides = [1, 1]} : vector<2x128xf32> to vector<1x128xf32>
    %cst_11 = arith.constant 3.125000e-02 : f32
    %11 = vector.broadcast %cst_11 : f32 to vector<1x128xf32>
    %12 = arith.mulf %10, %11 : vector<1x128xf32>
    %13 = arith.mulf %9, %9 : vector<1x128xf32>
    %14 = arith.subf %12, %13 : vector<1x128xf32>
    %cst_12 = arith.constant 0.000000e+00 : f32
    %15 = vector.broadcast %cst_12 : f32 to vector<1x128xf32>
    %16 = arith.maximumf %14, %15 : vector<1x128xf32>
    %cst_13 = arith.constant 9.99999974E-6 : f32
    %17 = vector.broadcast %cst_13 : f32 to vector<1x128xf32>
    %18 = arith.addf %16, %17 : vector<1x128xf32>
    %19 = math.rsqrt %18 : vector<1x128xf32>
    %20 = arith.mulf %5, %19 : vector<1x128xf32>
    %21 = arith.mulf %9, %20 : vector<1x128xf32>
    %22 = arith.subf %6, %21 : vector<1x128xf32>
    %23 = arith.extf %3 : vector<16x128xbf16> to vector<16x128xf32>
    %24 = vector.broadcast %20 : vector<1x128xf32> to vector<16x128xf32>
    %25 = arith.mulf %23, %24 : vector<16x128xf32>
    %26 = vector.broadcast %22 : vector<1x128xf32> to vector<16x128xf32>
    %27 = arith.addf %25, %26 : vector<16x128xf32>
    %cst_14 = arith.constant 0.000000e+00 : f32
    %28 = vector.broadcast %cst_14 : f32 to vector<16x128xf32>
    %29 = arith.maximumf %27, %28 : vector<16x128xf32>
    %30 = arith.truncf %29 : vector<16x128xf32> to vector<16x128xbf16>
    %c8 = arith.constant 8 : index
    %c0_15 = arith.constant 0 : index
    %31 = vector.load %arg8[%c8, %c0_15] : memref<32x128xbf16, #tpu.memory_space<vmem>>, vector<16x128xbf16>
    tpu.vector_store %arg8[%c8, %c0_15], %30 {strides = array<i32>} : memref<32x128xbf16, #tpu.memory_space<vmem>>, vector<16x128xbf16>,
    %32 = tpu.iota {dimensions = array<i32: 0>} : vector<16x1xi32>
    %c4_i32 = arith.constant 4 : i32
    %c0_i32 = arith.constant 0 : i32
    %33 = arith.cmpi eq, %c4_i32, %c0_i32 : i32
    %c1_i32 = arith.constant 1 : i32
    %34 = arith.select %33, %c1_i32, %c4_i32 : i32
    %35 = vector.broadcast %34 : i32 to vector<16x1xi32>
    %36 = arith.remsi %32, %35 : vector<16x1xi32>
    %c0_i32_16 = arith.constant 0 : i32
    %37 = vector.broadcast %c0_i32_16 : i32 to vector<16x1xi32>
    %38 = arith.cmpi ne, %36, %37 : vector<16x1xi32>
    %c0_i32_17 = arith.constant 0 : i32
    %39 = vector.broadcast %c0_i32_17 : i32 to vector<16x1xi32>
    %40 = arith.cmpi slt, %36, %39 : vector<16x1xi32>
    %c0_i32_18 = arith.constant 0 : i32
    %41 = arith.cmpi slt, %34, %c0_i32_18 : i32
    %42 = vector.broadcast %41 : i1 to vector<16x1xi1>
    %43 = vector.broadcast %42 : vector<16x1xi1> to vector<16x1xi1>
    %44 = arith.xori %40, %43 : vector<16x1xi1>
    %45 = arith.andi %44, %38 : vector<16x1xi1>
    %46 = vector.broadcast %34 : i32 to vector<16x1xi32>
    %47 = arith.addi %36, %46 : vector<16x1xi32>
    %48 = arith.select %45, %47, %36 : vector<16x1xi1>, vector<16x1xi32>
    %c0_i32_19 = arith.constant 0 : i32
    %49 = vector.broadcast %c0_i32_19 : i32 to vector<16x1xi32>
    %50 = arith.cmpi ne, %48, %49 : vector<16x1xi32>
    %c3_i32 = arith.constant 3 : i32
    %51 = vector.broadcast %c3_i32 : i32 to vector<16x1xi32>
    %52 = arith.cmpi ne, %48, %51 : vector<16x1xi32>
    %cst_20 = arith.constant 0.000000e+00 : f32
    %53 = vector.broadcast %cst_20 : f32 to vector<16x128xf32>
    %c3 = arith.constant 3 : index
    %c0_21 = arith.constant 0 : index
    %54 = vector.load %arg8[%c3, %c0_21] : memref<32x128xbf16, #tpu.memory_space<vmem>>, vector<16x128xbf16>
    %cst_22 = arith.constant 0.000000e+00 : bf16
    %55 = vector.broadcast %cst_22 : bf16 to vector<16x128xbf16>
    %56 = vector.shape_cast %50 : vector<16x1xi1> to vector<16x1xi1>
    %57 = vector.broadcast %56 : vector<16x1xi1> to vector<16x128xi1>
    %58 = arith.select %57, %54, %55 : vector<16x128xi1>, vector<16x128xbf16>
    %c0_23 = arith.constant 0 : index
    %c0_24 = arith.constant 0 : index
    %c0_25 = arith.constant 0 : index
    %59 = vector.load %arg5[%c0_23, %c0_24, %c0_25] : memref<9x128x128xbf16, #tpu.memory_space<vmem>>, vector<1x128x128xbf16>
    %60 = vector.shape_cast %59 : vector<1x128x128xbf16> to vector<128x128xbf16>
    %cst_26 = arith.constant dense<0.000000e+00> : vector<16x128xf32>
    %61 = tpu.matmul %58, %60, %cst_26 {dimension_numbers = #tpu.dot_dimension_numbers<[1], [0], [0], [1], [0, 0, 1, 1], [], []>} : vector<16x128xbf16>, vector<128x128xbf16>, vector<16x128xf32> -> vector<16x128xf32>
    %62 = arith.addf %53, %61 : vector<16x128xf32>
    %c4 = arith.constant 4 : index
    %c0_27 = arith.constant 0 : index
    %63 = vector.load %arg8[%c4, %c0_27] : memref<32x128xbf16, #tpu.memory_space<vmem>>, vector<16x128xbf16>
    %c1 = arith.constant 1 : index
    %c0_28 = arith.constant 0 : index
    %c0_29 = arith.constant 0 : index
    %64 = vector.load %arg5[%c1, %c0_28, %c0_29] : memref<9x128x128xbf16, #tpu.memory_space<vmem>>, vector<1x128x128xbf16>
    %65 = vector.shape_cast %64 : vector<1x128x128xbf16> to vector<128x128xbf16>
    %cst_30 = arith.constant dense<0.000000e+00> : vector<16x128xf32>
    %66 = tpu.matmul %63, %65, %cst_30 {dimension_numbers = #tpu.dot_dimension_numbers<[1], [0], [0], [1], [0, 0, 1, 1], [], []>} : vector<16x128xbf16>, vector<128x128xbf16>, vector<16x128xf32> -> vector<16x128xf32>
    %67 = arith.addf %62, %66 : vector<16x128xf32>
    %c5 = arith.constant 5 : index
    %c0_31 = arith.constant 0 : index
    %68 = vector.load %arg8[%c5, %c0_31] : memref<32x128xbf16, #tpu.memory_space<vmem>>, vector<16x128xbf16>
    %cst_32 = arith.constant 0.000000e+00 : bf16
    %69 = vector.broadcast %cst_32 : bf16 to vector<16x128xbf16>
    %70 = vector.shape_cast %52 : vector<16x1xi1> to vector<16x1xi1>
    %71 = vector.broadcast %70 : vector<16x1xi1> to vector<16x128xi1>
    %72 = arith.select %71, %68, %69 : vector<16x128xi1>, vector<16x128xbf16>
    %c2 = arith.constant 2 : index
    %c0_33 = arith.constant 0 : index
    %c0_34 = arith.constant 0 : index
    %73 = vector.load %arg5[%c2, %c0_33, %c0_34] : memref<9x128x128xbf16, #tpu.memory_space<vmem>>, vector<1x128x128xbf16>
    %74 = vector.shape_cast %73 : vector<1x128x128xbf16> to vector<128x128xbf16>
    %cst_35 = arith.constant dense<0.000000e+00> : vector<16x128xf32>
    %75 = tpu.matmul %72, %74, %cst_35 {dimension_numbers = #tpu.dot_dimension_numbers<[1], [0], [0], [1], [0, 0, 1, 1], [], []>} : vector<16x128xbf16>, vector<128x128xbf16>, vector<16x128xf32> -> vector<16x128xf32>
    %76 = arith.addf %67, %75 : vector<16x128xf32>
    %c7 = arith.constant 7 : index
    %c0_36 = arith.constant 0 : index
    %77 = vector.load %arg8[%c7, %c0_36] : memref<32x128xbf16, #tpu.memory_space<vmem>>, vector<16x128xbf16>
    %cst_37 = arith.constant 0.000000e+00 : bf16
    %78 = vector.broadcast %cst_37 : bf16 to vector<16x128xbf16>
    %79 = vector.shape_cast %50 : vector<16x1xi1> to vector<16x1xi1>
    %80 = vector.broadcast %79 : vector<16x1xi1> to vector<16x128xi1>
    %81 = arith.select %80, %77, %78 : vector<16x128xi1>, vector<16x128xbf16>
    %c3_38 = arith.constant 3 : index
    %c0_39 = arith.constant 0 : index
    %c0_40 = arith.constant 0 : index
    %82 = vector.load %arg5[%c3_38, %c0_39, %c0_40] : memref<9x128x128xbf16, #tpu.memory_space<vmem>>, vector<1x128x128xbf16>
    %83 = vector.shape_cast %82 : vector<1x128x128xbf16> to vector<128x128xbf16>
    %cst_41 = arith.constant dense<0.000000e+00> : vector<16x128xf32>
    %84 = tpu.matmul %81, %83, %cst_41 {dimension_numbers = #tpu.dot_dimension_numbers<[1], [0], [0], [1], [0, 0, 1, 1], [], []>} : vector<16x128xbf16>, vector<128x128xbf16>, vector<16x128xf32> -> vector<16x128xf32>
    %85 = arith.addf %76, %84 : vector<16x128xf32>
    %c8_42 = arith.constant 8 : index
    %c0_43 = arith.constant 0 : index
    %86 = vector.load %arg8[%c8_42, %c0_43] : memref<32x128xbf16, #tpu.memory_space<vmem>>, vector<16x128xbf16>
    %c4_44 = arith.constant 4 : index
    %c0_45 = arith.constant 0 : index
    %c0_46 = arith.constant 0 : index
    %87 = vector.load %arg5[%c4_44, %c0_45, %c0_46] : memref<9x128x128xbf16, #tpu.memory_space<vmem>>, vector<1x128x128xbf16>
    %88 = vector.shape_cast %87 : vector<1x128x128xbf16> to vector<128x128xbf16>
    %cst_47 = arith.constant dense<0.000000e+00> : vector<16x128xf32>
    %89 = tpu.matmul %86, %88, %cst_47 {dimension_numbers = #tpu.dot_dimension_numbers<[1], [0], [0], [1], [0, 0, 1, 1], [], []>} : vector<16x128xbf16>, vector<128x128xbf16>, vector<16x128xf32> -> vector<16x128xf32>
    %90 = arith.addf %85, %89 : vector<16x128xf32>
    %c9 = arith.constant 9 : index
    %c0_48 = arith.constant 0 : index
    %91 = vector.load %arg8[%c9, %c0_48] : memref<32x128xbf16, #tpu.memory_space<vmem>>, vector<16x128xbf16>
    %cst_49 = arith.constant 0.000000e+00 : bf16
    %92 = vector.broadcast %cst_49 : bf16 to vector<16x128xbf16>
    %93 = vector.shape_cast %52 : vector<16x1xi1> to vector<16x1xi1>
    %94 = vector.broadcast %93 : vector<16x1xi1> to vector<16x128xi1>
    %95 = arith.select %94, %91, %92 : vector<16x128xi1>, vector<16x128xbf16>
    %c5_50 = arith.constant 5 : index
    %c0_51 = arith.constant 0 : index
    %c0_52 = arith.constant 0 : index
    %96 = vector.load %arg5[%c5_50, %c0_51, %c0_52] : memref<9x128x128xbf16, #tpu.memory_space<vmem>>, vector<1x128x128xbf16>
    %97 = vector.shape_cast %96 : vector<1x128x128xbf16> to vector<128x128xbf16>
    %cst_53 = arith.constant dense<0.000000e+00> : vector<16x128xf32>
    %98 = tpu.matmul %95, %97, %cst_53 {dimension_numbers = #tpu.dot_dimension_numbers<[1], [0], [0], [1], [0, 0, 1, 1], [], []>} : vector<16x128xbf16>, vector<128x128xbf16>, vector<16x128xf32> -> vector<16x128xf32>
    %99 = arith.addf %90, %98 : vector<16x128xf32>
    %c11 = arith.constant 11 : index
    %c0_54 = arith.constant 0 : index
    %100 = vector.load %arg8[%c11, %c0_54] : memref<32x128xbf16, #tpu.memory_space<vmem>>, vector<16x128xbf16>
    %cst_55 = arith.constant 0.000000e+00 : bf16
    %101 = vector.broadcast %cst_55 : bf16 to vector<16x128xbf16>
    %102 = vector.shape_cast %50 : vector<16x1xi1> to vector<16x1xi1>
    %103 = vector.broadcast %102 : vector<16x1xi1> to vector<16x128xi1>
    %104 = arith.select %103, %100, %101 : vector<16x128xi1>, vector<16x128xbf16>
    %c6 = arith.constant 6 : index
    %c0_56 = arith.constant 0 : index
    %c0_57 = arith.constant 0 : index
    %105 = vector.load %arg5[%c6, %c0_56, %c0_57] : memref<9x128x128xbf16, #tpu.memory_space<vmem>>, vector<1x128x128xbf16>
    %106 = vector.shape_cast %105 : vector<1x128x128xbf16> to vector<128x128xbf16>
    %cst_58 = arith.constant dense<0.000000e+00> : vector<16x128xf32>
    %107 = tpu.matmul %104, %106, %cst_58 {dimension_numbers = #tpu.dot_dimension_numbers<[1], [0], [0], [1], [0, 0, 1, 1], [], []>} : vector<16x128xbf16>, vector<128x128xbf16>, vector<16x128xf32> -> vector<16x128xf32>
    %108 = arith.addf %99, %107 : vector<16x128xf32>
    %c12 = arith.constant 12 : index
    %c0_59 = arith.constant 0 : index
    %109 = vector.load %arg8[%c12, %c0_59] : memref<32x128xbf16, #tpu.memory_space<vmem>>, vector<16x128xbf16>
    %c7_60 = arith.constant 7 : index
    %c0_61 = arith.constant 0 : index
    %c0_62 = arith.constant 0 : index
    %110 = vector.load %arg5[%c7_60, %c0_61, %c0_62] : memref<9x128x128xbf16, #tpu.memory_space<vmem>>, vector<1x128x128xbf16>
    %111 = vector.shape_cast %110 : vector<1x128x128xbf16> to vector<128x128xbf16>
    %cst_63 = arith.constant dense<0.000000e+00> : vector<16x128xf32>
    %112 = tpu.matmul %109, %111, %cst_63 {dimension_numbers = #tpu.dot_dimension_numbers<[1], [0], [0], [1], [0, 0, 1, 1], [], []>} : vector<16x128xbf16>, vector<128x128xbf16>, vector<16x128xf32> -> vector<16x128xf32>
    %113 = arith.addf %108, %112 : vector<16x128xf32>
    %c13 = arith.constant 13 : index
    %c0_64 = arith.constant 0 : index
    %114 = vector.load %arg8[%c13, %c0_64] : memref<32x128xbf16, #tpu.memory_space<vmem>>, vector<16x128xbf16>
    %cst_65 = arith.constant 0.000000e+00 : bf16
    %115 = vector.broadcast %cst_65 : bf16 to vector<16x128xbf16>
    %116 = vector.shape_cast %52 : vector<16x1xi1> to vector<16x1xi1>
    %117 = vector.broadcast %116 : vector<16x1xi1> to vector<16x128xi1>
    %118 = arith.select %117, %114, %115 : vector<16x128xi1>, vector<16x128xbf16>
    %c8_66 = arith.constant 8 : index
    %c0_67 = arith.constant 0 : index
    %c0_68 = arith.constant 0 : index
    %119 = vector.load %arg5[%c8_66, %c0_67, %c0_68] : memref<9x128x128xbf16, #tpu.memory_space<vmem>>, vector<1x128x128xbf16>
    %120 = vector.shape_cast %119 : vector<1x128x128xbf16> to vector<128x128xbf16>
    %cst_69 = arith.constant dense<0.000000e+00> : vector<16x128xf32>
    %121 = tpu.matmul %118, %120, %cst_69 {dimension_numbers = #tpu.dot_dimension_numbers<[1], [0], [0], [1], [0, 0, 1, 1], [], []>} : vector<16x128xbf16>, vector<128x128xbf16>, vector<16x128xf32> -> vector<16x128xf32>
    %122 = arith.addf %113, %121 : vector<16x128xf32>
    %123 = arith.truncf %122 : vector<16x128xf32> to vector<16x128xbf16>
    %c0_70 = arith.constant 0 : index
    %c0_71 = arith.constant 0 : index
    %c0_72 = arith.constant 0 : index
    %124 = vector.load %arg6[%c0_70, %c0_71, %c0_72] : memref<1x16x128xbf16, #tpu.memory_space<vmem>>, vector<1x16x128xbf16>
    %125 = vector.shape_cast %124 : vector<1x16x128xbf16> to vector<16x128xbf16>
    %126 = vector.shape_cast %123 : vector<16x128xbf16> to vector<1x16x128xbf16>
    tpu.vector_store %arg6[%c0_70, %c0_71, %c0_72], %126 {strides = array<i32>} : memref<1x16x128xbf16, #tpu.memory_space<vmem>>, vector<1x16x128xbf16>,
    %cst_73 = arith.constant dense<0.000000e+00> : vector<128xf32>
    %127 = vector.multi_reduction <add>, %122, %cst_73 [0] : vector<16x128xf32> to vector<128xf32>
    %128 = vector.shape_cast %127 : vector<128xf32> to vector<1x128xf32>
    %c0_74 = arith.constant 0 : index
    %c0_75 = arith.constant 0 : index
    %c0_76 = arith.constant 0 : index
    %129 = vector.load %arg7[%c0_74, %c0_75, %c0_76] : memref<1x2x128xf32, #tpu.memory_space<vmem>>, vector<1x1x128xf32>
    %130 = vector.shape_cast %129 : vector<1x1x128xf32> to vector<1x128xf32>
    %131 = vector.shape_cast %128 : vector<1x128xf32> to vector<1x1x128xf32>
    tpu.vector_store %arg7[%c0_74, %c0_75, %c0_76], %131 {strides = array<i32>} : memref<1x2x128xf32, #tpu.memory_space<vmem>>, vector<1x1x128xf32>,
    %132 = arith.mulf %122, %122 : vector<16x128xf32>
    %cst_77 = arith.constant dense<0.000000e+00> : vector<128xf32>
    %133 = vector.multi_reduction <add>, %132, %cst_77 [0] : vector<16x128xf32> to vector<128xf32>
    %134 = vector.shape_cast %133 : vector<128xf32> to vector<1x128xf32>
    %c0_78 = arith.constant 0 : index
    %c1_79 = arith.constant 1 : index
    %c0_80 = arith.constant 0 : index
    %135 = vector.load %arg7[%c0_78, %c1_79, %c0_80] : memref<1x2x128xf32, #tpu.memory_space<vmem>>, vector<1x1x128xf32>
    %136 = vector.shape_cast %135 : vector<1x1x128xf32> to vector<1x128xf32>
    %137 = vector.shape_cast %134 : vector<1x128xf32> to vector<1x1x128xf32>
    tpu.vector_store %arg7[%c0_78, %c1_79, %c0_80], %137 {strides = array<i32>} : memref<1x2x128xf32, #tpu.memory_space<vmem>>, vector<1x1x128xf32>,
    return
  }
  func.func @transform_0(%arg0: i32) -> (i32, i32) {
    %c0_i32 = arith.constant 0 : i32
    %c0_i32_0 = arith.constant 0 : i32
    %c0_i32_1 = arith.constant 0 : i32
    return %c0_i32, %c0_i32_0 : i32, i32
  }
  func.func @transform_1(%arg0: i32) -> (i32, i32) {
    %c0_i32 = arith.constant 0 : i32
    %c0_i32_0 = arith.constant 0 : i32
    %c0_i32_1 = arith.constant 0 : i32
    return %c0_i32, %c0_i32_0 : i32, i32
  }
  func.func @transform_2(%arg0: i32) -> (i32, i32) {
    %c0_i32 = arith.constant 0 : i32
    %c0_i32_0 = arith.constant 0 : i32
    %c0_i32_1 = arith.constant 0 : i32
    return %c0_i32, %c0_i32_0 : i32, i32
  }
  func.func @transform_3(%arg0: i32) -> (i32, i32, i32) {
    %c0_i32 = arith.constant 0 : i32
    %c0_i32_0 = arith.constant 0 : i32
    %c0_i32_1 = arith.constant 0 : i32
    return %arg0, %c0_i32, %c0_i32_0 : i32, i32, i32
  }
  func.func @transform_4(%arg0: i32) -> (i32, i32, i32) {
    %c0_i32 = arith.constant 0 : i32
    %c0_i32_0 = arith.constant 0 : i32
    %c0_i32_1 = arith.constant 0 : i32
    %c0_i32_2 = arith.constant 0 : i32
    return %c0_i32, %c0_i32_0, %c0_i32_1 : i32, i32, i32
  }
  func.func @transform_5(%arg0: i32) -> (i32, i32, i32) {
    %c0_i32 = arith.constant 0 : i32
    %c0_i32_0 = arith.constant 0 : i32
    %c0_i32_1 = arith.constant 0 : i32
    return %arg0, %c0_i32, %c0_i32_0 : i32, i32, i32
  }
  func.func @transform_6(%arg0: i32) -> (i32, i32, i32) {
    %c0_i32 = arith.constant 0 : i32
    %c0_i32_0 = arith.constant 0 : i32
    %c0_i32_1 = arith.constant 0 : i32
    return %arg0, %c0_i32, %c0_i32_0 : i32, i32, i32
  }
}

module attributes {stable_mosaic.version = 11 : i64} {
  func.func @_conv_taps_kernel(%arg0: i32, %arg1: memref<1x9x4x128xbf16, #tpu.memory_space<vmem>>, %arg2: memref<9x128x128xbf16, #tpu.memory_space<vmem>>, %arg3: memref<128x128xbf16, #tpu.memory_space<vmem>>, %arg4: memref<1x4x128xbf16, #tpu.memory_space<vmem>>, %arg5: memref<1x2x128xf32, #tpu.memory_space<vmem>>, %arg6: memref<1x4x128xbf16, #tpu.memory_space<vmem>>, %arg7: memref<1x2x128xf32, #tpu.memory_space<vmem>>) attributes {dimension_semantics = [#tpu.dimension_semantics<parallel>], iteration_bounds = array<i64: 2>, scalar_prefetch = 0 : i64, scratch_operands = 0 : i64, tpu.core_type = #tpu.core_type<tc>, window_params = [{transform_indices = @transform_0, window_bounds = array<i64: 1, 9, 4, 128>}, {pipeline_mode = #tpu.pipeline_mode<synchronous>, transform_indices = @transform_1, window_bounds = array<i64: 9, 128, 128>}, {pipeline_mode = #tpu.pipeline_mode<synchronous>, transform_indices = @transform_2, window_bounds = array<i64: 128, 128>}, {transform_indices = @transform_3, window_bounds = array<i64: 1, 4, 128>}, {transform_indices = @transform_4, window_bounds = array<i64: 1, 2, 128>}, {transform_indices = @transform_5, window_bounds = array<i64: 1, 4, 128>}, {transform_indices = @transform_6, window_bounds = array<i64: 1, 2, 128>}]} {
    %c0 = arith.constant 0 : index
    %c0_0 = arith.constant 0 : index
    %c0_1 = arith.constant 0 : index
    %c0_2 = arith.constant 0 : index
    %0 = vector.load %arg1[%c0, %c0_0, %c0_1, %c0_2] : memref<1x9x4x128xbf16, #tpu.memory_space<vmem>>, vector<1x1x4x128xbf16>
    %1 = vector.shape_cast %0 : vector<1x1x4x128xbf16> to vector<4x128xbf16>
    %c0_3 = arith.constant 0 : index
    %c0_4 = arith.constant 0 : index
    %c0_5 = arith.constant 0 : index
    %2 = vector.load %arg2[%c0_3, %c0_4, %c0_5] : memref<9x128x128xbf16, #tpu.memory_space<vmem>>, vector<1x128x128xbf16>
    %3 = vector.shape_cast %2 : vector<1x128x128xbf16> to vector<128x128xbf16>
    %cst = arith.constant dense<0.000000e+00> : vector<4x128xf32>
    %4 = tpu.matmul %1, %3, %cst {dimension_numbers = #tpu.dot_dimension_numbers<[1], [0], [0], [1], [0, 0, 1, 1], [], []>} : vector<4x128xbf16>, vector<128x128xbf16>, vector<4x128xf32> -> vector<4x128xf32>
    %c0_6 = arith.constant 0 : index
    %c1 = arith.constant 1 : index
    %c0_7 = arith.constant 0 : index
    %c0_8 = arith.constant 0 : index
    %5 = vector.load %arg1[%c0_6, %c1, %c0_7, %c0_8] : memref<1x9x4x128xbf16, #tpu.memory_space<vmem>>, vector<1x1x4x128xbf16>
    %6 = vector.shape_cast %5 : vector<1x1x4x128xbf16> to vector<4x128xbf16>
    %c1_9 = arith.constant 1 : index
    %c0_10 = arith.constant 0 : index
    %c0_11 = arith.constant 0 : index
    %7 = vector.load %arg2[%c1_9, %c0_10, %c0_11] : memref<9x128x128xbf16, #tpu.memory_space<vmem>>, vector<1x128x128xbf16>
    %8 = vector.shape_cast %7 : vector<1x128x128xbf16> to vector<128x128xbf16>
    %cst_12 = arith.constant dense<0.000000e+00> : vector<4x128xf32>
    %9 = tpu.matmul %6, %8, %cst_12 {dimension_numbers = #tpu.dot_dimension_numbers<[1], [0], [0], [1], [0, 0, 1, 1], [], []>} : vector<4x128xbf16>, vector<128x128xbf16>, vector<4x128xf32> -> vector<4x128xf32>
    %10 = arith.addf %4, %9 : vector<4x128xf32>
    %c0_13 = arith.constant 0 : index
    %c2 = arith.constant 2 : index
    %c0_14 = arith.constant 0 : index
    %c0_15 = arith.constant 0 : index
    %11 = vector.load %arg1[%c0_13, %c2, %c0_14, %c0_15] : memref<1x9x4x128xbf16, #tpu.memory_space<vmem>>, vector<1x1x4x128xbf16>
    %12 = vector.shape_cast %11 : vector<1x1x4x128xbf16> to vector<4x128xbf16>
    %c2_16 = arith.constant 2 : index
    %c0_17 = arith.constant 0 : index
    %c0_18 = arith.constant 0 : index
    %13 = vector.load %arg2[%c2_16, %c0_17, %c0_18] : memref<9x128x128xbf16, #tpu.memory_space<vmem>>, vector<1x128x128xbf16>
    %14 = vector.shape_cast %13 : vector<1x128x128xbf16> to vector<128x128xbf16>
    %cst_19 = arith.constant dense<0.000000e+00> : vector<4x128xf32>
    %15 = tpu.matmul %12, %14, %cst_19 {dimension_numbers = #tpu.dot_dimension_numbers<[1], [0], [0], [1], [0, 0, 1, 1], [], []>} : vector<4x128xbf16>, vector<128x128xbf16>, vector<4x128xf32> -> vector<4x128xf32>
    %16 = arith.addf %10, %15 : vector<4x128xf32>
    %c0_20 = arith.constant 0 : index
    %c3 = arith.constant 3 : index
    %c0_21 = arith.constant 0 : index
    %c0_22 = arith.constant 0 : index
    %17 = vector.load %arg1[%c0_20, %c3, %c0_21, %c0_22] : memref<1x9x4x128xbf16, #tpu.memory_space<vmem>>, vector<1x1x4x128xbf16>
    %18 = vector.shape_cast %17 : vector<1x1x4x128xbf16> to vector<4x128xbf16>
    %c3_23 = arith.constant 3 : index
    %c0_24 = arith.constant 0 : index
    %c0_25 = arith.constant 0 : index
    %19 = vector.load %arg2[%c3_23, %c0_24, %c0_25] : memref<9x128x128xbf16, #tpu.memory_space<vmem>>, vector<1x128x128xbf16>
    %20 = vector.shape_cast %19 : vector<1x128x128xbf16> to vector<128x128xbf16>
    %cst_26 = arith.constant dense<0.000000e+00> : vector<4x128xf32>
    %21 = tpu.matmul %18, %20, %cst_26 {dimension_numbers = #tpu.dot_dimension_numbers<[1], [0], [0], [1], [0, 0, 1, 1], [], []>} : vector<4x128xbf16>, vector<128x128xbf16>, vector<4x128xf32> -> vector<4x128xf32>
    %22 = arith.addf %16, %21 : vector<4x128xf32>
    %c0_27 = arith.constant 0 : index
    %c4 = arith.constant 4 : index
    %c0_28 = arith.constant 0 : index
    %c0_29 = arith.constant 0 : index
    %23 = vector.load %arg1[%c0_27, %c4, %c0_28, %c0_29] : memref<1x9x4x128xbf16, #tpu.memory_space<vmem>>, vector<1x1x4x128xbf16>
    %24 = vector.shape_cast %23 : vector<1x1x4x128xbf16> to vector<4x128xbf16>
    %c4_30 = arith.constant 4 : index
    %c0_31 = arith.constant 0 : index
    %c0_32 = arith.constant 0 : index
    %25 = vector.load %arg2[%c4_30, %c0_31, %c0_32] : memref<9x128x128xbf16, #tpu.memory_space<vmem>>, vector<1x128x128xbf16>
    %26 = vector.shape_cast %25 : vector<1x128x128xbf16> to vector<128x128xbf16>
    %cst_33 = arith.constant dense<0.000000e+00> : vector<4x128xf32>
    %27 = tpu.matmul %24, %26, %cst_33 {dimension_numbers = #tpu.dot_dimension_numbers<[1], [0], [0], [1], [0, 0, 1, 1], [], []>} : vector<4x128xbf16>, vector<128x128xbf16>, vector<4x128xf32> -> vector<4x128xf32>
    %28 = arith.addf %22, %27 : vector<4x128xf32>
    %c0_34 = arith.constant 0 : index
    %c5 = arith.constant 5 : index
    %c0_35 = arith.constant 0 : index
    %c0_36 = arith.constant 0 : index
    %29 = vector.load %arg1[%c0_34, %c5, %c0_35, %c0_36] : memref<1x9x4x128xbf16, #tpu.memory_space<vmem>>, vector<1x1x4x128xbf16>
    %30 = vector.shape_cast %29 : vector<1x1x4x128xbf16> to vector<4x128xbf16>
    %c5_37 = arith.constant 5 : index
    %c0_38 = arith.constant 0 : index
    %c0_39 = arith.constant 0 : index
    %31 = vector.load %arg2[%c5_37, %c0_38, %c0_39] : memref<9x128x128xbf16, #tpu.memory_space<vmem>>, vector<1x128x128xbf16>
    %32 = vector.shape_cast %31 : vector<1x128x128xbf16> to vector<128x128xbf16>
    %cst_40 = arith.constant dense<0.000000e+00> : vector<4x128xf32>
    %33 = tpu.matmul %30, %32, %cst_40 {dimension_numbers = #tpu.dot_dimension_numbers<[1], [0], [0], [1], [0, 0, 1, 1], [], []>} : vector<4x128xbf16>, vector<128x128xbf16>, vector<4x128xf32> -> vector<4x128xf32>
    %34 = arith.addf %28, %33 : vector<4x128xf32>
    %c0_41 = arith.constant 0 : index
    %c6 = arith.constant 6 : index
    %c0_42 = arith.constant 0 : index
    %c0_43 = arith.constant 0 : index
    %35 = vector.load %arg1[%c0_41, %c6, %c0_42, %c0_43] : memref<1x9x4x128xbf16, #tpu.memory_space<vmem>>, vector<1x1x4x128xbf16>
    %36 = vector.shape_cast %35 : vector<1x1x4x128xbf16> to vector<4x128xbf16>
    %c6_44 = arith.constant 6 : index
    %c0_45 = arith.constant 0 : index
    %c0_46 = arith.constant 0 : index
    %37 = vector.load %arg2[%c6_44, %c0_45, %c0_46] : memref<9x128x128xbf16, #tpu.memory_space<vmem>>, vector<1x128x128xbf16>
    %38 = vector.shape_cast %37 : vector<1x128x128xbf16> to vector<128x128xbf16>
    %cst_47 = arith.constant dense<0.000000e+00> : vector<4x128xf32>
    %39 = tpu.matmul %36, %38, %cst_47 {dimension_numbers = #tpu.dot_dimension_numbers<[1], [0], [0], [1], [0, 0, 1, 1], [], []>} : vector<4x128xbf16>, vector<128x128xbf16>, vector<4x128xf32> -> vector<4x128xf32>
    %40 = arith.addf %34, %39 : vector<4x128xf32>
    %c0_48 = arith.constant 0 : index
    %c7 = arith.constant 7 : index
    %c0_49 = arith.constant 0 : index
    %c0_50 = arith.constant 0 : index
    %41 = vector.load %arg1[%c0_48, %c7, %c0_49, %c0_50] : memref<1x9x4x128xbf16, #tpu.memory_space<vmem>>, vector<1x1x4x128xbf16>
    %42 = vector.shape_cast %41 : vector<1x1x4x128xbf16> to vector<4x128xbf16>
    %c7_51 = arith.constant 7 : index
    %c0_52 = arith.constant 0 : index
    %c0_53 = arith.constant 0 : index
    %43 = vector.load %arg2[%c7_51, %c0_52, %c0_53] : memref<9x128x128xbf16, #tpu.memory_space<vmem>>, vector<1x128x128xbf16>
    %44 = vector.shape_cast %43 : vector<1x128x128xbf16> to vector<128x128xbf16>
    %cst_54 = arith.constant dense<0.000000e+00> : vector<4x128xf32>
    %45 = tpu.matmul %42, %44, %cst_54 {dimension_numbers = #tpu.dot_dimension_numbers<[1], [0], [0], [1], [0, 0, 1, 1], [], []>} : vector<4x128xbf16>, vector<128x128xbf16>, vector<4x128xf32> -> vector<4x128xf32>
    %46 = arith.addf %40, %45 : vector<4x128xf32>
    %c0_55 = arith.constant 0 : index
    %c8 = arith.constant 8 : index
    %c0_56 = arith.constant 0 : index
    %c0_57 = arith.constant 0 : index
    %47 = vector.load %arg1[%c0_55, %c8, %c0_56, %c0_57] : memref<1x9x4x128xbf16, #tpu.memory_space<vmem>>, vector<1x1x4x128xbf16>
    %48 = vector.shape_cast %47 : vector<1x1x4x128xbf16> to vector<4x128xbf16>
    %c8_58 = arith.constant 8 : index
    %c0_59 = arith.constant 0 : index
    %c0_60 = arith.constant 0 : index
    %49 = vector.load %arg2[%c8_58, %c0_59, %c0_60] : memref<9x128x128xbf16, #tpu.memory_space<vmem>>, vector<1x128x128xbf16>
    %50 = vector.shape_cast %49 : vector<1x128x128xbf16> to vector<128x128xbf16>
    %cst_61 = arith.constant dense<0.000000e+00> : vector<4x128xf32>
    %51 = tpu.matmul %48, %50, %cst_61 {dimension_numbers = #tpu.dot_dimension_numbers<[1], [0], [0], [1], [0, 0, 1, 1], [], []>} : vector<4x128xbf16>, vector<128x128xbf16>, vector<4x128xf32> -> vector<4x128xf32>
    %52 = arith.addf %46, %51 : vector<4x128xf32>
    %53 = arith.truncf %52 : vector<4x128xf32> to vector<4x128xbf16>
    %c0_62 = arith.constant 0 : index
    %c0_63 = arith.constant 0 : index
    %c0_64 = arith.constant 0 : index
    %54 = vector.load %arg4[%c0_62, %c0_63, %c0_64] : memref<1x4x128xbf16, #tpu.memory_space<vmem>>, vector<1x4x128xbf16>
    %55 = vector.shape_cast %54 : vector<1x4x128xbf16> to vector<4x128xbf16>
    %56 = vector.shape_cast %53 : vector<4x128xbf16> to vector<1x4x128xbf16>
    tpu.vector_store %arg4[%c0_62, %c0_63, %c0_64], %56 {strides = array<i32>} : memref<1x4x128xbf16, #tpu.memory_space<vmem>>, vector<1x4x128xbf16>,
    %cst_65 = arith.constant dense<0.000000e+00> : vector<128xf32>
    %57 = vector.multi_reduction <add>, %52, %cst_65 [0] : vector<4x128xf32> to vector<128xf32>
    %58 = vector.shape_cast %57 : vector<128xf32> to vector<1x128xf32>
    %c0_66 = arith.constant 0 : index
    %c0_67 = arith.constant 0 : index
    %c0_68 = arith.constant 0 : index
    %59 = vector.load %arg5[%c0_66, %c0_67, %c0_68] : memref<1x2x128xf32, #tpu.memory_space<vmem>>, vector<1x1x128xf32>
    %60 = vector.shape_cast %59 : vector<1x1x128xf32> to vector<1x128xf32>
    %61 = vector.shape_cast %58 : vector<1x128xf32> to vector<1x1x128xf32>
    tpu.vector_store %arg5[%c0_66, %c0_67, %c0_68], %61 {strides = array<i32>} : memref<1x2x128xf32, #tpu.memory_space<vmem>>, vector<1x1x128xf32>,
    %62 = arith.mulf %52, %52 : vector<4x128xf32>
    %cst_69 = arith.constant dense<0.000000e+00> : vector<128xf32>
    %63 = vector.multi_reduction <add>, %62, %cst_69 [0] : vector<4x128xf32> to vector<128xf32>
    %64 = vector.shape_cast %63 : vector<128xf32> to vector<1x128xf32>
    %c0_70 = arith.constant 0 : index
    %c1_71 = arith.constant 1 : index
    %c0_72 = arith.constant 0 : index
    %65 = vector.load %arg5[%c0_70, %c1_71, %c0_72] : memref<1x2x128xf32, #tpu.memory_space<vmem>>, vector<1x1x128xf32>
    %66 = vector.shape_cast %65 : vector<1x1x128xf32> to vector<1x128xf32>
    %67 = vector.shape_cast %64 : vector<1x128xf32> to vector<1x1x128xf32>
    tpu.vector_store %arg5[%c0_70, %c1_71, %c0_72], %67 {strides = array<i32>} : memref<1x2x128xf32, #tpu.memory_space<vmem>>, vector<1x1x128xf32>,
    %c0_73 = arith.constant 0 : index
    %c4_74 = arith.constant 4 : index
    %c0_75 = arith.constant 0 : index
    %c0_76 = arith.constant 0 : index
    %68 = vector.load %arg1[%c0_73, %c4_74, %c0_75, %c0_76] : memref<1x9x4x128xbf16, #tpu.memory_space<vmem>>, vector<1x1x4x128xbf16>
    %69 = vector.shape_cast %68 : vector<1x1x4x128xbf16> to vector<4x128xbf16>
    %c0_77 = arith.constant 0 : index
    %c0_78 = arith.constant 0 : index
    %70 = vector.load %arg3[%c0_77, %c0_78] : memref<128x128xbf16, #tpu.memory_space<vmem>>, vector<128x128xbf16>
    %cst_79 = arith.constant dense<0.000000e+00> : vector<4x128xf32>
    %71 = tpu.matmul %69, %70, %cst_79 {dimension_numbers = #tpu.dot_dimension_numbers<[1], [0], [0], [1], [0, 0, 1, 1], [], []>} : vector<4x128xbf16>, vector<128x128xbf16>, vector<4x128xf32> -> vector<4x128xf32>
    %72 = arith.truncf %71 : vector<4x128xf32> to vector<4x128xbf16>
    %c0_80 = arith.constant 0 : index
    %c0_81 = arith.constant 0 : index
    %c0_82 = arith.constant 0 : index
    %73 = vector.load %arg6[%c0_80, %c0_81, %c0_82] : memref<1x4x128xbf16, #tpu.memory_space<vmem>>, vector<1x4x128xbf16>
    %74 = vector.shape_cast %73 : vector<1x4x128xbf16> to vector<4x128xbf16>
    %75 = vector.shape_cast %72 : vector<4x128xbf16> to vector<1x4x128xbf16>
    tpu.vector_store %arg6[%c0_80, %c0_81, %c0_82], %75 {strides = array<i32>} : memref<1x4x128xbf16, #tpu.memory_space<vmem>>, vector<1x4x128xbf16>,
    %cst_83 = arith.constant dense<0.000000e+00> : vector<128xf32>
    %76 = vector.multi_reduction <add>, %71, %cst_83 [0] : vector<4x128xf32> to vector<128xf32>
    %77 = vector.shape_cast %76 : vector<128xf32> to vector<1x128xf32>
    %c0_84 = arith.constant 0 : index
    %c0_85 = arith.constant 0 : index
    %c0_86 = arith.constant 0 : index
    %78 = vector.load %arg7[%c0_84, %c0_85, %c0_86] : memref<1x2x128xf32, #tpu.memory_space<vmem>>, vector<1x1x128xf32>
    %79 = vector.shape_cast %78 : vector<1x1x128xf32> to vector<1x128xf32>
    %80 = vector.shape_cast %77 : vector<1x128xf32> to vector<1x1x128xf32>
    tpu.vector_store %arg7[%c0_84, %c0_85, %c0_86], %80 {strides = array<i32>} : memref<1x2x128xf32, #tpu.memory_space<vmem>>, vector<1x1x128xf32>,
    %81 = arith.mulf %71, %71 : vector<4x128xf32>
    %cst_87 = arith.constant dense<0.000000e+00> : vector<128xf32>
    %82 = vector.multi_reduction <add>, %81, %cst_87 [0] : vector<4x128xf32> to vector<128xf32>
    %83 = vector.shape_cast %82 : vector<128xf32> to vector<1x128xf32>
    %c0_88 = arith.constant 0 : index
    %c1_89 = arith.constant 1 : index
    %c0_90 = arith.constant 0 : index
    %84 = vector.load %arg7[%c0_88, %c1_89, %c0_90] : memref<1x2x128xf32, #tpu.memory_space<vmem>>, vector<1x1x128xf32>
    %85 = vector.shape_cast %84 : vector<1x1x128xf32> to vector<1x128xf32>
    %86 = vector.shape_cast %83 : vector<1x128xf32> to vector<1x1x128xf32>
    tpu.vector_store %arg7[%c0_88, %c1_89, %c0_90], %86 {strides = array<i32>} : memref<1x2x128xf32, #tpu.memory_space<vmem>>, vector<1x1x128xf32>,
    return
  }
  func.func @transform_0(%arg0: i32) -> (i32, i32, i32, i32) {
    %c0_i32 = arith.constant 0 : i32
    %c0_i32_0 = arith.constant 0 : i32
    %c0_i32_1 = arith.constant 0 : i32
    %c0_i32_2 = arith.constant 0 : i32
    return %arg0, %c0_i32, %c0_i32_0, %c0_i32_1 : i32, i32, i32, i32
  }
  func.func @transform_1(%arg0: i32) -> (i32, i32, i32) {
    %c0_i32 = arith.constant 0 : i32
    %c0_i32_0 = arith.constant 0 : i32
    %c0_i32_1 = arith.constant 0 : i32
    %c0_i32_2 = arith.constant 0 : i32
    return %c0_i32, %c0_i32_0, %c0_i32_1 : i32, i32, i32
  }
  func.func @transform_2(%arg0: i32) -> (i32, i32) {
    %c0_i32 = arith.constant 0 : i32
    %c0_i32_0 = arith.constant 0 : i32
    %c0_i32_1 = arith.constant 0 : i32
    return %c0_i32, %c0_i32_0 : i32, i32
  }
  func.func @transform_3(%arg0: i32) -> (i32, i32, i32) {
    %c0_i32 = arith.constant 0 : i32
    %c0_i32_0 = arith.constant 0 : i32
    %c0_i32_1 = arith.constant 0 : i32
    return %arg0, %c0_i32, %c0_i32_0 : i32, i32, i32
  }
  func.func @transform_4(%arg0: i32) -> (i32, i32, i32) {
    %c0_i32 = arith.constant 0 : i32
    %c0_i32_0 = arith.constant 0 : i32
    %c0_i32_1 = arith.constant 0 : i32
    return %arg0, %c0_i32, %c0_i32_0 : i32, i32, i32
  }
  func.func @transform_5(%arg0: i32) -> (i32, i32, i32) {
    %c0_i32 = arith.constant 0 : i32
    %c0_i32_0 = arith.constant 0 : i32
    %c0_i32_1 = arith.constant 0 : i32
    return %arg0, %c0_i32, %c0_i32_0 : i32, i32, i32
  }
  func.func @transform_6(%arg0: i32) -> (i32, i32, i32) {
    %c0_i32 = arith.constant 0 : i32
    %c0_i32_0 = arith.constant 0 : i32
    %c0_i32_1 = arith.constant 0 : i32
    return %arg0, %c0_i32, %c0_i32_0 : i32, i32, i32
  }
}

module attributes {stable_mosaic.version = 11 : i64} {
  func.func @_conv_s1_kernel(%arg0: i32, %arg1: memref<2x128xf32, #tpu.memory_space<vmem>>, %arg2: memref<1x128xf32, #tpu.memory_space<vmem>>, %arg3: memref<1x128xf32, #tpu.memory_space<vmem>>, %arg4: memref<1x4x128xbf16, #tpu.memory_space<vmem>>, %arg5: memref<9x128x128xbf16, #tpu.memory_space<vmem>>, %arg6: memref<1x4x128xbf16, #tpu.memory_space<vmem>>, %arg7: memref<1x2x128xf32, #tpu.memory_space<vmem>>, %arg8: memref<16x128xbf16, #tpu.memory_space<vmem>>) attributes {dimension_semantics = [#tpu.dimension_semantics<parallel>], iteration_bounds = array<i64: 2>, scalar_prefetch = 0 : i64, scratch_operands = 1 : i64, tpu.core_type = #tpu.core_type<tc>, window_params = [{pipeline_mode = #tpu.pipeline_mode<synchronous>, transform_indices = @transform_0, window_bounds = array<i64: 2, 128>}, {pipeline_mode = #tpu.pipeline_mode<synchronous>, transform_indices = @transform_1, window_bounds = array<i64: 1, 128>}, {pipeline_mode = #tpu.pipeline_mode<synchronous>, transform_indices = @transform_2, window_bounds = array<i64: 1, 128>}, {transform_indices = @transform_3, window_bounds = array<i64: 1, 4, 128>}, {pipeline_mode = #tpu.pipeline_mode<synchronous>, transform_indices = @transform_4, window_bounds = array<i64: 9, 128, 128>}, {transform_indices = @transform_5, window_bounds = array<i64: 1, 4, 128>}, {transform_indices = @transform_6, window_bounds = array<i64: 1, 2, 128>}]} {
    %cst = arith.constant 0.000000e+00 : bf16
    %0 = vector.broadcast %cst : bf16 to vector<16x128xbf16>
    %c0 = arith.constant 0 : index
    %c0_0 = arith.constant 0 : index
    %1 = vector.load %arg8[%c0, %c0_0] : memref<16x128xbf16, #tpu.memory_space<vmem>>, vector<16x128xbf16>
    tpu.vector_store %arg8[%c0, %c0_0], %0 {strides = array<i32>} : memref<16x128xbf16, #tpu.memory_space<vmem>>, vector<16x128xbf16>,
    %c0_1 = arith.constant 0 : index
    %c0_2 = arith.constant 0 : index
    %c0_3 = arith.constant 0 : index
    %2 = vector.load %arg4[%c0_1, %c0_2, %c0_3] : memref<1x4x128xbf16, #tpu.memory_space<vmem>>, vector<1x4x128xbf16>
    %3 = vector.shape_cast %2 : vector<1x4x128xbf16> to vector<4x128xbf16>
    %c0_4 = arith.constant 0 : index
    %c0_5 = arith.constant 0 : index
    %4 = vector.load %arg1[%c0_4, %c0_5] : memref<2x128xf32, #tpu.memory_space<vmem>>, vector<2x128xf32>
    %c0_6 = arith.constant 0 : index
    %c0_7 = arith.constant 0 : index
    %5 = vector.load %arg2[%c0_6, %c0_7] : memref<1x128xf32, #tpu.memory_space<vmem>>, vector<1x128xf32>
    %c0_8 = arith.constant 0 : index
    %c0_9 = arith.constant 0 : index
    %6 = vector.load %arg3[%c0_8, %c0_9] : memref<1x128xf32, #tpu.memory_space<vmem>>, vector<1x128xf32>
    %7 = vector.extract_strided_slice %4 {offsets = [0, 0], sizes = [1, 128], strides = [1, 1]} : vector<2x128xf32> to vector<1x128xf32>
    %cst_10 = arith.constant 1.250000e-01 : f32
    %8 = vector.broadcast %cst_10 : f32 to vector<1x128xf32>
    %9 = arith.mulf %7, %8 : vector<1x128xf32>
    %10 = vector.extract_strided_slice %4 {offsets = [1, 0], sizes = [1, 128], strides = [1, 1]} : vector<2x128xf32> to vector<1x128xf32>
    %cst_11 = arith.constant 1.250000e-01 : f32
    %11 = vector.broadcast %cst_11 : f32 to vector<1x128xf32>
    %12 = arith.mulf %10, %11 : vector<1x128xf32>
    %13 = arith.mulf %9, %9 : vector<1x128xf32>
    %14 = arith.subf %12, %13 : vector<1x128xf32>
    %cst_12 = arith.constant 0.000000e+00 : f32
    %15 = vector.broadcast %cst_12 : f32 to vector<1x128xf32>
    %16 = arith.maximumf %14, %15 : vector<1x128xf32>
    %cst_13 = arith.constant 9.99999974E-6 : f32
    %17 = vector.broadcast %cst_13 : f32 to vector<1x128xf32>
    %18 = arith.addf %16, %17 : vector<1x128xf32>
    %19 = math.rsqrt %18 : vector<1x128xf32>
    %20 = arith.mulf %5, %19 : vector<1x128xf32>
    %21 = arith.mulf %9, %20 : vector<1x128xf32>
    %22 = arith.subf %6, %21 : vector<1x128xf32>
    %23 = arith.extf %3 : vector<4x128xbf16> to vector<4x128xf32>
    %24 = vector.broadcast %20 : vector<1x128xf32> to vector<4x128xf32>
    %25 = arith.mulf %23, %24 : vector<4x128xf32>
    %26 = vector.broadcast %22 : vector<1x128xf32> to vector<4x128xf32>
    %27 = arith.addf %25, %26 : vector<4x128xf32>
    %cst_14 = arith.constant 0.000000e+00 : f32
    %28 = vector.broadcast %cst_14 : f32 to vector<4x128xf32>
    %29 = arith.maximumf %27, %28 : vector<4x128xf32>
    %30 = arith.truncf %29 : vector<4x128xf32> to vector<4x128xbf16>
    %c8 = arith.constant 8 : index
    %c0_15 = arith.constant 0 : index
    %31 = vector.load %arg8[%c8, %c0_15] : memref<16x128xbf16, #tpu.memory_space<vmem>>, vector<4x128xbf16>
    tpu.vector_store %arg8[%c8, %c0_15], %30 {strides = array<i32>} : memref<16x128xbf16, #tpu.memory_space<vmem>>, vector<4x128xbf16>,
    %32 = tpu.iota {dimensions = array<i32: 0>} : vector<4x1xi32>
    %c2_i32 = arith.constant 2 : i32
    %c0_i32 = arith.constant 0 : i32
    %33 = arith.cmpi eq, %c2_i32, %c0_i32 : i32
    %c1_i32 = arith.constant 1 : i32
    %34 = arith.select %33, %c1_i32, %c2_i32 : i32
    %35 = vector.broadcast %34 : i32 to vector<4x1xi32>
    %36 = arith.remsi %32, %35 : vector<4x1xi32>
    %c0_i32_16 = arith.constant 0 : i32
    %37 = vector.broadcast %c0_i32_16 : i32 to vector<4x1xi32>
    %38 = arith.cmpi ne, %36, %37 : vector<4x1xi32>
    %c0_i32_17 = arith.constant 0 : i32
    %39 = vector.broadcast %c0_i32_17 : i32 to vector<4x1xi32>
    %40 = arith.cmpi slt, %36, %39 : vector<4x1xi32>
    %c0_i32_18 = arith.constant 0 : i32
    %41 = arith.cmpi slt, %34, %c0_i32_18 : i32
    %42 = vector.broadcast %41 : i1 to vector<4x1xi1>
    %43 = vector.broadcast %42 : vector<4x1xi1> to vector<4x1xi1>
    %44 = arith.xori %40, %43 : vector<4x1xi1>
    %45 = arith.andi %44, %38 : vector<4x1xi1>
    %46 = vector.broadcast %34 : i32 to vector<4x1xi32>
    %47 = arith.addi %36, %46 : vector<4x1xi32>
    %48 = arith.select %45, %47, %36 : vector<4x1xi1>, vector<4x1xi32>
    %c0_i32_19 = arith.constant 0 : i32
    %49 = vector.broadcast %c0_i32_19 : i32 to vector<4x1xi32>
    %50 = arith.cmpi ne, %48, %49 : vector<4x1xi32>
    %c1_i32_20 = arith.constant 1 : i32
    %51 = vector.broadcast %c1_i32_20 : i32 to vector<4x1xi32>
    %52 = arith.cmpi ne, %48, %51 : vector<4x1xi32>
    %cst_21 = arith.constant 0.000000e+00 : f32
    %53 = vector.broadcast %cst_21 : f32 to vector<4x128xf32>
    %c5 = arith.constant 5 : index
    %c0_22 = arith.constant 0 : index
    %54 = vector.load %arg8[%c5, %c0_22] : memref<16x128xbf16, #tpu.memory_space<vmem>>, vector<4x128xbf16>
    %cst_23 = arith.constant 0.000000e+00 : bf16
    %55 = vector.broadcast %cst_23 : bf16 to vector<4x128xbf16>
    %56 = vector.shape_cast %50 : vector<4x1xi1> to vector<4x1xi1>
    %57 = vector.broadcast %56 : vector<4x1xi1> to vector<4x128xi1>
    %58 = arith.select %57, %54, %55 : vector<4x128xi1>, vector<4x128xbf16>
    %c0_24 = arith.constant 0 : index
    %c0_25 = arith.constant 0 : index
    %c0_26 = arith.constant 0 : index
    %59 = vector.load %arg5[%c0_24, %c0_25, %c0_26] : memref<9x128x128xbf16, #tpu.memory_space<vmem>>, vector<1x128x128xbf16>
    %60 = vector.shape_cast %59 : vector<1x128x128xbf16> to vector<128x128xbf16>
    %cst_27 = arith.constant dense<0.000000e+00> : vector<4x128xf32>
    %61 = tpu.matmul %58, %60, %cst_27 {dimension_numbers = #tpu.dot_dimension_numbers<[1], [0], [0], [1], [0, 0, 1, 1], [], []>} : vector<4x128xbf16>, vector<128x128xbf16>, vector<4x128xf32> -> vector<4x128xf32>
    %62 = arith.addf %53, %61 : vector<4x128xf32>
    %c6 = arith.constant 6 : index
    %c0_28 = arith.constant 0 : index
    %63 = vector.load %arg8[%c6, %c0_28] : memref<16x128xbf16, #tpu.memory_space<vmem>>, vector<4x128xbf16>
    %c1 = arith.constant 1 : index
    %c0_29 = arith.constant 0 : index
    %c0_30 = arith.constant 0 : index
    %64 = vector.load %arg5[%c1, %c0_29, %c0_30] : memref<9x128x128xbf16, #tpu.memory_space<vmem>>, vector<1x128x128xbf16>
    %65 = vector.shape_cast %64 : vector<1x128x128xbf16> to vector<128x128xbf16>
    %cst_31 = arith.constant dense<0.000000e+00> : vector<4x128xf32>
    %66 = tpu.matmul %63, %65, %cst_31 {dimension_numbers = #tpu.dot_dimension_numbers<[1], [0], [0], [1], [0, 0, 1, 1], [], []>} : vector<4x128xbf16>, vector<128x128xbf16>, vector<4x128xf32> -> vector<4x128xf32>
    %67 = arith.addf %62, %66 : vector<4x128xf32>
    %c7 = arith.constant 7 : index
    %c0_32 = arith.constant 0 : index
    %68 = vector.load %arg8[%c7, %c0_32] : memref<16x128xbf16, #tpu.memory_space<vmem>>, vector<4x128xbf16>
    %cst_33 = arith.constant 0.000000e+00 : bf16
    %69 = vector.broadcast %cst_33 : bf16 to vector<4x128xbf16>
    %70 = vector.shape_cast %52 : vector<4x1xi1> to vector<4x1xi1>
    %71 = vector.broadcast %70 : vector<4x1xi1> to vector<4x128xi1>
    %72 = arith.select %71, %68, %69 : vector<4x128xi1>, vector<4x128xbf16>
    %c2 = arith.constant 2 : index
    %c0_34 = arith.constant 0 : index
    %c0_35 = arith.constant 0 : index
    %73 = vector.load %arg5[%c2, %c0_34, %c0_35] : memref<9x128x128xbf16, #tpu.memory_space<vmem>>, vector<1x128x128xbf16>
    %74 = vector.shape_cast %73 : vector<1x128x128xbf16> to vector<128x128xbf16>
    %cst_36 = arith.constant dense<0.000000e+00> : vector<4x128xf32>
    %75 = tpu.matmul %72, %74, %cst_36 {dimension_numbers = #tpu.dot_dimension_numbers<[1], [0], [0], [1], [0, 0, 1, 1], [], []>} : vector<4x128xbf16>, vector<128x128xbf16>, vector<4x128xf32> -> vector<4x128xf32>
    %76 = arith.addf %67, %75 : vector<4x128xf32>
    %c7_37 = arith.constant 7 : index
    %c0_38 = arith.constant 0 : index
    %77 = vector.load %arg8[%c7_37, %c0_38] : memref<16x128xbf16, #tpu.memory_space<vmem>>, vector<4x128xbf16>
    %cst_39 = arith.constant 0.000000e+00 : bf16
    %78 = vector.broadcast %cst_39 : bf16 to vector<4x128xbf16>
    %79 = vector.shape_cast %50 : vector<4x1xi1> to vector<4x1xi1>
    %80 = vector.broadcast %79 : vector<4x1xi1> to vector<4x128xi1>
    %81 = arith.select %80, %77, %78 : vector<4x128xi1>, vector<4x128xbf16>
    %c3 = arith.constant 3 : index
    %c0_40 = arith.constant 0 : index
    %c0_41 = arith.constant 0 : index
    %82 = vector.load %arg5[%c3, %c0_40, %c0_41] : memref<9x128x128xbf16, #tpu.memory_space<vmem>>, vector<1x128x128xbf16>
    %83 = vector.shape_cast %82 : vector<1x128x128xbf16> to vector<128x128xbf16>
    %cst_42 = arith.constant dense<0.000000e+00> : vector<4x128xf32>
    %84 = tpu.matmul %81, %83, %cst_42 {dimension_numbers = #tpu.dot_dimension_numbers<[1], [0], [0], [1], [0, 0, 1, 1], [], []>} : vector<4x128xbf16>, vector<128x128xbf16>, vector<4x128xf32> -> vector<4x128xf32>
    %85 = arith.addf %76, %84 : vector<4x128xf32>
    %c8_43 = arith.constant 8 : index
    %c0_44 = arith.constant 0 : index
    %86 = vector.load %arg8[%c8_43, %c0_44] : memref<16x128xbf16, #tpu.memory_space<vmem>>, vector<4x128xbf16>
    %c4 = arith.constant 4 : index
    %c0_45 = arith.constant 0 : index
    %c0_46 = arith.constant 0 : index
    %87 = vector.load %arg5[%c4, %c0_45, %c0_46] : memref<9x128x128xbf16, #tpu.memory_space<vmem>>, vector<1x128x128xbf16>
    %88 = vector.shape_cast %87 : vector<1x128x128xbf16> to vector<128x128xbf16>
    %cst_47 = arith.constant dense<0.000000e+00> : vector<4x128xf32>
    %89 = tpu.matmul %86, %88, %cst_47 {dimension_numbers = #tpu.dot_dimension_numbers<[1], [0], [0], [1], [0, 0, 1, 1], [], []>} : vector<4x128xbf16>, vector<128x128xbf16>, vector<4x128xf32> -> vector<4x128xf32>
    %90 = arith.addf %85, %89 : vector<4x128xf32>
    %c9 = arith.constant 9 : index
    %c0_48 = arith.constant 0 : index
    %91 = vector.load %arg8[%c9, %c0_48] : memref<16x128xbf16, #tpu.memory_space<vmem>>, vector<4x128xbf16>
    %cst_49 = arith.constant 0.000000e+00 : bf16
    %92 = vector.broadcast %cst_49 : bf16 to vector<4x128xbf16>
    %93 = vector.shape_cast %52 : vector<4x1xi1> to vector<4x1xi1>
    %94 = vector.broadcast %93 : vector<4x1xi1> to vector<4x128xi1>
    %95 = arith.select %94, %91, %92 : vector<4x128xi1>, vector<4x128xbf16>
    %c5_50 = arith.constant 5 : index
    %c0_51 = arith.constant 0 : index
    %c0_52 = arith.constant 0 : index
    %96 = vector.load %arg5[%c5_50, %c0_51, %c0_52] : memref<9x128x128xbf16, #tpu.memory_space<vmem>>, vector<1x128x128xbf16>
    %97 = vector.shape_cast %96 : vector<1x128x128xbf16> to vector<128x128xbf16>
    %cst_53 = arith.constant dense<0.000000e+00> : vector<4x128xf32>
    %98 = tpu.matmul %95, %97, %cst_53 {dimension_numbers = #tpu.dot_dimension_numbers<[1], [0], [0], [1], [0, 0, 1, 1], [], []>} : vector<4x128xbf16>, vector<128x128xbf16>, vector<4x128xf32> -> vector<4x128xf32>
    %99 = arith.addf %90, %98 : vector<4x128xf32>
    %c9_54 = arith.constant 9 : index
    %c0_55 = arith.constant 0 : index
    %100 = vector.load %arg8[%c9_54, %c0_55] : memref<16x128xbf16, #tpu.memory_space<vmem>>, vector<4x128xbf16>
    %cst_56 = arith.constant 0.000000e+00 : bf16
    %101 = vector.broadcast %cst_56 : bf16 to vector<4x128xbf16>
    %102 = vector.shape_cast %50 : vector<4x1xi1> to vector<4x1xi1>
    %103 = vector.broadcast %102 : vector<4x1xi1> to vector<4x128xi1>
    %104 = arith.select %103, %100, %101 : vector<4x128xi1>, vector<4x128xbf16>
    %c6_57 = arith.constant 6 : index
    %c0_58 = arith.constant 0 : index
    %c0_59 = arith.constant 0 : index
    %105 = vector.load %arg5[%c6_57, %c0_58, %c0_59] : memref<9x128x128xbf16, #tpu.memory_space<vmem>>, vector<1x128x128xbf16>
    %106 = vector.shape_cast %105 : vector<1x128x128xbf16> to vector<128x128xbf16>
    %cst_60 = arith.constant dense<0.000000e+00> : vector<4x128xf32>
    %107 = tpu.matmul %104, %106, %cst_60 {dimension_numbers = #tpu.dot_dimension_numbers<[1], [0], [0], [1], [0, 0, 1, 1], [], []>} : vector<4x128xbf16>, vector<128x128xbf16>, vector<4x128xf32> -> vector<4x128xf32>
    %108 = arith.addf %99, %107 : vector<4x128xf32>
    %c10 = arith.constant 10 : index
    %c0_61 = arith.constant 0 : index
    %109 = vector.load %arg8[%c10, %c0_61] : memref<16x128xbf16, #tpu.memory_space<vmem>>, vector<4x128xbf16>
    %c7_62 = arith.constant 7 : index
    %c0_63 = arith.constant 0 : index
    %c0_64 = arith.constant 0 : index
    %110 = vector.load %arg5[%c7_62, %c0_63, %c0_64] : memref<9x128x128xbf16, #tpu.memory_space<vmem>>, vector<1x128x128xbf16>
    %111 = vector.shape_cast %110 : vector<1x128x128xbf16> to vector<128x128xbf16>
    %cst_65 = arith.constant dense<0.000000e+00> : vector<4x128xf32>
    %112 = tpu.matmul %109, %111, %cst_65 {dimension_numbers = #tpu.dot_dimension_numbers<[1], [0], [0], [1], [0, 0, 1, 1], [], []>} : vector<4x128xbf16>, vector<128x128xbf16>, vector<4x128xf32> -> vector<4x128xf32>
    %113 = arith.addf %108, %112 : vector<4x128xf32>
    %c11 = arith.constant 11 : index
    %c0_66 = arith.constant 0 : index
    %114 = vector.load %arg8[%c11, %c0_66] : memref<16x128xbf16, #tpu.memory_space<vmem>>, vector<4x128xbf16>
    %cst_67 = arith.constant 0.000000e+00 : bf16
    %115 = vector.broadcast %cst_67 : bf16 to vector<4x128xbf16>
    %116 = vector.shape_cast %52 : vector<4x1xi1> to vector<4x1xi1>
    %117 = vector.broadcast %116 : vector<4x1xi1> to vector<4x128xi1>
    %118 = arith.select %117, %114, %115 : vector<4x128xi1>, vector<4x128xbf16>
    %c8_68 = arith.constant 8 : index
    %c0_69 = arith.constant 0 : index
    %c0_70 = arith.constant 0 : index
    %119 = vector.load %arg5[%c8_68, %c0_69, %c0_70] : memref<9x128x128xbf16, #tpu.memory_space<vmem>>, vector<1x128x128xbf16>
    %120 = vector.shape_cast %119 : vector<1x128x128xbf16> to vector<128x128xbf16>
    %cst_71 = arith.constant dense<0.000000e+00> : vector<4x128xf32>
    %121 = tpu.matmul %118, %120, %cst_71 {dimension_numbers = #tpu.dot_dimension_numbers<[1], [0], [0], [1], [0, 0, 1, 1], [], []>} : vector<4x128xbf16>, vector<128x128xbf16>, vector<4x128xf32> -> vector<4x128xf32>
    %122 = arith.addf %113, %121 : vector<4x128xf32>
    %123 = arith.truncf %122 : vector<4x128xf32> to vector<4x128xbf16>
    %c0_72 = arith.constant 0 : index
    %c0_73 = arith.constant 0 : index
    %c0_74 = arith.constant 0 : index
    %124 = vector.load %arg6[%c0_72, %c0_73, %c0_74] : memref<1x4x128xbf16, #tpu.memory_space<vmem>>, vector<1x4x128xbf16>
    %125 = vector.shape_cast %124 : vector<1x4x128xbf16> to vector<4x128xbf16>
    %126 = vector.shape_cast %123 : vector<4x128xbf16> to vector<1x4x128xbf16>
    tpu.vector_store %arg6[%c0_72, %c0_73, %c0_74], %126 {strides = array<i32>} : memref<1x4x128xbf16, #tpu.memory_space<vmem>>, vector<1x4x128xbf16>,
    %cst_75 = arith.constant dense<0.000000e+00> : vector<128xf32>
    %127 = vector.multi_reduction <add>, %122, %cst_75 [0] : vector<4x128xf32> to vector<128xf32>
    %128 = vector.shape_cast %127 : vector<128xf32> to vector<1x128xf32>
    %c0_76 = arith.constant 0 : index
    %c0_77 = arith.constant 0 : index
    %c0_78 = arith.constant 0 : index
    %129 = vector.load %arg7[%c0_76, %c0_77, %c0_78] : memref<1x2x128xf32, #tpu.memory_space<vmem>>, vector<1x1x128xf32>
    %130 = vector.shape_cast %129 : vector<1x1x128xf32> to vector<1x128xf32>
    %131 = vector.shape_cast %128 : vector<1x128xf32> to vector<1x1x128xf32>
    tpu.vector_store %arg7[%c0_76, %c0_77, %c0_78], %131 {strides = array<i32>} : memref<1x2x128xf32, #tpu.memory_space<vmem>>, vector<1x1x128xf32>,
    %132 = arith.mulf %122, %122 : vector<4x128xf32>
    %cst_79 = arith.constant dense<0.000000e+00> : vector<128xf32>
    %133 = vector.multi_reduction <add>, %132, %cst_79 [0] : vector<4x128xf32> to vector<128xf32>
    %134 = vector.shape_cast %133 : vector<128xf32> to vector<1x128xf32>
    %c0_80 = arith.constant 0 : index
    %c1_81 = arith.constant 1 : index
    %c0_82 = arith.constant 0 : index
    %135 = vector.load %arg7[%c0_80, %c1_81, %c0_82] : memref<1x2x128xf32, #tpu.memory_space<vmem>>, vector<1x1x128xf32>
    %136 = vector.shape_cast %135 : vector<1x1x128xf32> to vector<1x128xf32>
    %137 = vector.shape_cast %134 : vector<1x128xf32> to vector<1x1x128xf32>
    tpu.vector_store %arg7[%c0_80, %c1_81, %c0_82], %137 {strides = array<i32>} : memref<1x2x128xf32, #tpu.memory_space<vmem>>, vector<1x1x128xf32>,
    return
  }
  func.func @transform_0(%arg0: i32) -> (i32, i32) {
    %c0_i32 = arith.constant 0 : i32
    %c0_i32_0 = arith.constant 0 : i32
    %c0_i32_1 = arith.constant 0 : i32
    return %c0_i32, %c0_i32_0 : i32, i32
  }
  func.func @transform_1(%arg0: i32) -> (i32, i32) {
    %c0_i32 = arith.constant 0 : i32
    %c0_i32_0 = arith.constant 0 : i32
    %c0_i32_1 = arith.constant 0 : i32
    return %c0_i32, %c0_i32_0 : i32, i32
  }
  func.func @transform_2(%arg0: i32) -> (i32, i32) {
    %c0_i32 = arith.constant 0 : i32
    %c0_i32_0 = arith.constant 0 : i32
    %c0_i32_1 = arith.constant 0 : i32
    return %c0_i32, %c0_i32_0 : i32, i32
  }
  func.func @transform_3(%arg0: i32) -> (i32, i32, i32) {
    %c0_i32 = arith.constant 0 : i32
    %c0_i32_0 = arith.constant 0 : i32
    %c0_i32_1 = arith.constant 0 : i32
    return %arg0, %c0_i32, %c0_i32_0 : i32, i32, i32
  }
  func.func @transform_4(%arg0: i32) -> (i32, i32, i32) {
    %c0_i32 = arith.constant 0 : i32
    %c0_i32_0 = arith.constant 0 : i32
    %c0_i32_1 = arith.constant 0 : i32
    %c0_i32_2 = arith.constant 0 : i32
    return %c0_i32, %c0_i32_0, %c0_i32_1 : i32, i32, i32
  }
  func.func @transform_5(%arg0: i32) -> (i32, i32, i32) {
    %c0_i32 = arith.constant 0 : i32
    %c0_i32_0 = arith.constant 0 : i32
    %c0_i32_1 = arith.constant 0 : i32
    return %arg0, %c0_i32, %c0_i32_0 : i32, i32, i32
  }
  func.func @transform_6(%arg0: i32) -> (i32, i32, i32) {
    %c0_i32 = arith.constant 0 : i32
    %c0_i32_0 = arith.constant 0 : i32
    %c0_i32_1 = arith.constant 0 : i32
    return %arg0, %c0_i32, %c0_i32_0 : i32, i32, i32
  }
}

module attributes {stable_mosaic.version = 11 : i64} {
  func.func @_bn_add_relu_kernel(%arg0: i32, %arg1: memref<1x4x128xbf16, #tpu.memory_space<vmem>>, %arg2: memref<2x128xf32, #tpu.memory_space<vmem>>, %arg3: memref<1x128xf32, #tpu.memory_space<vmem>>, %arg4: memref<1x128xf32, #tpu.memory_space<vmem>>, %arg5: memref<1x4x128xbf16, #tpu.memory_space<vmem>>, %arg6: memref<2x128xf32, #tpu.memory_space<vmem>>, %arg7: memref<1x128xf32, #tpu.memory_space<vmem>>, %arg8: memref<1x128xf32, #tpu.memory_space<vmem>>, %arg9: memref<1x4x128xbf16, #tpu.memory_space<vmem>>) attributes {dimension_semantics = [#tpu.dimension_semantics<parallel>], iteration_bounds = array<i64: 2>, scalar_prefetch = 0 : i64, scratch_operands = 0 : i64, tpu.core_type = #tpu.core_type<tc>, window_params = [{transform_indices = @transform_0, window_bounds = array<i64: 1, 4, 128>}, {pipeline_mode = #tpu.pipeline_mode<synchronous>, transform_indices = @transform_1, window_bounds = array<i64: 2, 128>}, {pipeline_mode = #tpu.pipeline_mode<synchronous>, transform_indices = @transform_2, window_bounds = array<i64: 1, 128>}, {pipeline_mode = #tpu.pipeline_mode<synchronous>, transform_indices = @transform_3, window_bounds = array<i64: 1, 128>}, {transform_indices = @transform_4, window_bounds = array<i64: 1, 4, 128>}, {pipeline_mode = #tpu.pipeline_mode<synchronous>, transform_indices = @transform_5, window_bounds = array<i64: 2, 128>}, {pipeline_mode = #tpu.pipeline_mode<synchronous>, transform_indices = @transform_6, window_bounds = array<i64: 1, 128>}, {pipeline_mode = #tpu.pipeline_mode<synchronous>, transform_indices = @transform_7, window_bounds = array<i64: 1, 128>}, {transform_indices = @transform_8, window_bounds = array<i64: 1, 4, 128>}]} {
    %c0 = arith.constant 0 : index
    %c0_0 = arith.constant 0 : index
    %c0_1 = arith.constant 0 : index
    %0 = vector.load %arg1[%c0, %c0_0, %c0_1] : memref<1x4x128xbf16, #tpu.memory_space<vmem>>, vector<1x4x128xbf16>
    %1 = vector.shape_cast %0 : vector<1x4x128xbf16> to vector<4x128xbf16>
    %2 = arith.extf %1 : vector<4x128xbf16> to vector<4x128xf32>
    %c0_2 = arith.constant 0 : index
    %c0_3 = arith.constant 0 : index
    %3 = vector.load %arg2[%c0_2, %c0_3] : memref<2x128xf32, #tpu.memory_space<vmem>>, vector<2x128xf32>
    %c0_4 = arith.constant 0 : index
    %c0_5 = arith.constant 0 : index
    %4 = vector.load %arg3[%c0_4, %c0_5] : memref<1x128xf32, #tpu.memory_space<vmem>>, vector<1x128xf32>
    %c0_6 = arith.constant 0 : index
    %c0_7 = arith.constant 0 : index
    %5 = vector.load %arg4[%c0_6, %c0_7] : memref<1x128xf32, #tpu.memory_space<vmem>>, vector<1x128xf32>
    %6 = vector.extract_strided_slice %3 {offsets = [0, 0], sizes = [1, 128], strides = [1, 1]} : vector<2x128xf32> to vector<1x128xf32>
    %cst = arith.constant 1.250000e-01 : f32
    %7 = vector.broadcast %cst : f32 to vector<1x128xf32>
    %8 = arith.mulf %6, %7 : vector<1x128xf32>
    %9 = vector.extract_strided_slice %3 {offsets = [1, 0], sizes = [1, 128], strides = [1, 1]} : vector<2x128xf32> to vector<1x128xf32>
    %cst_8 = arith.constant 1.250000e-01 : f32
    %10 = vector.broadcast %cst_8 : f32 to vector<1x128xf32>
    %11 = arith.mulf %9, %10 : vector<1x128xf32>
    %12 = arith.mulf %8, %8 : vector<1x128xf32>
    %13 = arith.subf %11, %12 : vector<1x128xf32>
    %cst_9 = arith.constant 0.000000e+00 : f32
    %14 = vector.broadcast %cst_9 : f32 to vector<1x128xf32>
    %15 = arith.maximumf %13, %14 : vector<1x128xf32>
    %cst_10 = arith.constant 9.99999974E-6 : f32
    %16 = vector.broadcast %cst_10 : f32 to vector<1x128xf32>
    %17 = arith.addf %15, %16 : vector<1x128xf32>
    %18 = math.rsqrt %17 : vector<1x128xf32>
    %19 = arith.mulf %4, %18 : vector<1x128xf32>
    %20 = arith.mulf %8, %19 : vector<1x128xf32>
    %21 = arith.subf %5, %20 : vector<1x128xf32>
    %22 = vector.broadcast %19 : vector<1x128xf32> to vector<4x128xf32>
    %23 = arith.mulf %2, %22 : vector<4x128xf32>
    %24 = vector.broadcast %21 : vector<1x128xf32> to vector<4x128xf32>
    %25 = arith.addf %23, %24 : vector<4x128xf32>
    %c0_11 = arith.constant 0 : index
    %c0_12 = arith.constant 0 : index
    %c0_13 = arith.constant 0 : index
    %26 = vector.load %arg5[%c0_11, %c0_12, %c0_13] : memref<1x4x128xbf16, #tpu.memory_space<vmem>>, vector<1x4x128xbf16>
    %27 = vector.shape_cast %26 : vector<1x4x128xbf16> to vector<4x128xbf16>
    %28 = arith.extf %27 : vector<4x128xbf16> to vector<4x128xf32>
    %c0_14 = arith.constant 0 : index
    %c0_15 = arith.constant 0 : index
    %29 = vector.load %arg6[%c0_14, %c0_15] : memref<2x128xf32, #tpu.memory_space<vmem>>, vector<2x128xf32>
    %c0_16 = arith.constant 0 : index
    %c0_17 = arith.constant 0 : index
    %30 = vector.load %arg7[%c0_16, %c0_17] : memref<1x128xf32, #tpu.memory_space<vmem>>, vector<1x128xf32>
    %c0_18 = arith.constant 0 : index
    %c0_19 = arith.constant 0 : index
    %31 = vector.load %arg8[%c0_18, %c0_19] : memref<1x128xf32, #tpu.memory_space<vmem>>, vector<1x128xf32>
    %32 = vector.extract_strided_slice %29 {offsets = [0, 0], sizes = [1, 128], strides = [1, 1]} : vector<2x128xf32> to vector<1x128xf32>
    %cst_20 = arith.constant 1.250000e-01 : f32
    %33 = vector.broadcast %cst_20 : f32 to vector<1x128xf32>
    %34 = arith.mulf %32, %33 : vector<1x128xf32>
    %35 = vector.extract_strided_slice %29 {offsets = [1, 0], sizes = [1, 128], strides = [1, 1]} : vector<2x128xf32> to vector<1x128xf32>
    %cst_21 = arith.constant 1.250000e-01 : f32
    %36 = vector.broadcast %cst_21 : f32 to vector<1x128xf32>
    %37 = arith.mulf %35, %36 : vector<1x128xf32>
    %38 = arith.mulf %34, %34 : vector<1x128xf32>
    %39 = arith.subf %37, %38 : vector<1x128xf32>
    %cst_22 = arith.constant 0.000000e+00 : f32
    %40 = vector.broadcast %cst_22 : f32 to vector<1x128xf32>
    %41 = arith.maximumf %39, %40 : vector<1x128xf32>
    %cst_23 = arith.constant 9.99999974E-6 : f32
    %42 = vector.broadcast %cst_23 : f32 to vector<1x128xf32>
    %43 = arith.addf %41, %42 : vector<1x128xf32>
    %44 = math.rsqrt %43 : vector<1x128xf32>
    %45 = arith.mulf %30, %44 : vector<1x128xf32>
    %46 = arith.mulf %34, %45 : vector<1x128xf32>
    %47 = arith.subf %31, %46 : vector<1x128xf32>
    %48 = vector.broadcast %45 : vector<1x128xf32> to vector<4x128xf32>
    %49 = arith.mulf %28, %48 : vector<4x128xf32>
    %50 = vector.broadcast %47 : vector<1x128xf32> to vector<4x128xf32>
    %51 = arith.addf %49, %50 : vector<4x128xf32>
    %52 = arith.addf %25, %51 : vector<4x128xf32>
    %cst_24 = arith.constant 0.000000e+00 : f32
    %53 = vector.broadcast %cst_24 : f32 to vector<4x128xf32>
    %54 = arith.maximumf %52, %53 : vector<4x128xf32>
    %55 = arith.truncf %54 : vector<4x128xf32> to vector<4x128xbf16>
    %c0_25 = arith.constant 0 : index
    %c0_26 = arith.constant 0 : index
    %c0_27 = arith.constant 0 : index
    %56 = vector.load %arg9[%c0_25, %c0_26, %c0_27] : memref<1x4x128xbf16, #tpu.memory_space<vmem>>, vector<1x4x128xbf16>
    %57 = vector.shape_cast %56 : vector<1x4x128xbf16> to vector<4x128xbf16>
    %58 = vector.shape_cast %55 : vector<4x128xbf16> to vector<1x4x128xbf16>
    tpu.vector_store %arg9[%c0_25, %c0_26, %c0_27], %58 {strides = array<i32>} : memref<1x4x128xbf16, #tpu.memory_space<vmem>>, vector<1x4x128xbf16>,
    return
  }
  func.func @transform_0(%arg0: i32) -> (i32, i32, i32) {
    %c0_i32 = arith.constant 0 : i32
    %c0_i32_0 = arith.constant 0 : i32
    %c0_i32_1 = arith.constant 0 : i32
    return %arg0, %c0_i32, %c0_i32_0 : i32, i32, i32
  }
  func.func @transform_1(%arg0: i32) -> (i32, i32) {
    %c0_i32 = arith.constant 0 : i32
    %c0_i32_0 = arith.constant 0 : i32
    %c0_i32_1 = arith.constant 0 : i32
    return %c0_i32, %c0_i32_0 : i32, i32
  }
  func.func @transform_2(%arg0: i32) -> (i32, i32) {
    %c0_i32 = arith.constant 0 : i32
    %c0_i32_0 = arith.constant 0 : i32
    %c0_i32_1 = arith.constant 0 : i32
    return %c0_i32, %c0_i32_0 : i32, i32
  }
  func.func @transform_3(%arg0: i32) -> (i32, i32) {
    %c0_i32 = arith.constant 0 : i32
    %c0_i32_0 = arith.constant 0 : i32
    %c0_i32_1 = arith.constant 0 : i32
    return %c0_i32, %c0_i32_0 : i32, i32
  }
  func.func @transform_4(%arg0: i32) -> (i32, i32, i32) {
    %c0_i32 = arith.constant 0 : i32
    %c0_i32_0 = arith.constant 0 : i32
    %c0_i32_1 = arith.constant 0 : i32
    return %arg0, %c0_i32, %c0_i32_0 : i32, i32, i32
  }
  func.func @transform_5(%arg0: i32) -> (i32, i32) {
    %c0_i32 = arith.constant 0 : i32
    %c0_i32_0 = arith.constant 0 : i32
    %c0_i32_1 = arith.constant 0 : i32
    return %c0_i32, %c0_i32_0 : i32, i32
  }
  func.func @transform_6(%arg0: i32) -> (i32, i32) {
    %c0_i32 = arith.constant 0 : i32
    %c0_i32_0 = arith.constant 0 : i32
    %c0_i32_1 = arith.constant 0 : i32
    return %c0_i32, %c0_i32_0 : i32, i32
  }
  func.func @transform_7(%arg0: i32) -> (i32, i32) {
    %c0_i32 = arith.constant 0 : i32
    %c0_i32_0 = arith.constant 0 : i32
    %c0_i32_1 = arith.constant 0 : i32
    return %c0_i32, %c0_i32_0 : i32, i32
  }
  func.func @transform_8(%arg0: i32) -> (i32, i32, i32) {
    %c0_i32 = arith.constant 0 : i32
    %c0_i32_0 = arith.constant 0 : i32
    %c0_i32_1 = arith.constant 0 : i32
    return %arg0, %c0_i32, %c0_i32_0 : i32, i32, i32
  }
}

module attributes {stable_mosaic.version = 11 : i64} {
  func.func @_conv_s1_kernel(%arg0: i32, %arg1: memref<1x4x128xbf16, #tpu.memory_space<vmem>>, %arg2: memref<9x128x128xbf16, #tpu.memory_space<vmem>>, %arg3: memref<128x128xbf16, #tpu.memory_space<vmem>>, %arg4: memref<1x4x128xbf16, #tpu.memory_space<vmem>>, %arg5: memref<1x2x128xf32, #tpu.memory_space<vmem>>, %arg6: memref<1x4x128xbf16, #tpu.memory_space<vmem>>, %arg7: memref<1x2x128xf32, #tpu.memory_space<vmem>>, %arg8: memref<16x128xbf16, #tpu.memory_space<vmem>>) attributes {dimension_semantics = [#tpu.dimension_semantics<parallel>], iteration_bounds = array<i64: 2>, scalar_prefetch = 0 : i64, scratch_operands = 1 : i64, tpu.core_type = #tpu.core_type<tc>, window_params = [{transform_indices = @transform_0, window_bounds = array<i64: 1, 4, 128>}, {pipeline_mode = #tpu.pipeline_mode<synchronous>, transform_indices = @transform_1, window_bounds = array<i64: 9, 128, 128>}, {pipeline_mode = #tpu.pipeline_mode<synchronous>, transform_indices = @transform_2, window_bounds = array<i64: 128, 128>}, {transform_indices = @transform_3, window_bounds = array<i64: 1, 4, 128>}, {transform_indices = @transform_4, window_bounds = array<i64: 1, 2, 128>}, {transform_indices = @transform_5, window_bounds = array<i64: 1, 4, 128>}, {transform_indices = @transform_6, window_bounds = array<i64: 1, 2, 128>}]} {
    %cst = arith.constant 0.000000e+00 : bf16
    %0 = vector.broadcast %cst : bf16 to vector<16x128xbf16>
    %c0 = arith.constant 0 : index
    %c0_0 = arith.constant 0 : index
    %1 = vector.load %arg8[%c0, %c0_0] : memref<16x128xbf16, #tpu.memory_space<vmem>>, vector<16x128xbf16>
    tpu.vector_store %arg8[%c0, %c0_0], %0 {strides = array<i32>} : memref<16x128xbf16, #tpu.memory_space<vmem>>, vector<16x128xbf16>,
    %c0_1 = arith.constant 0 : index
    %c0_2 = arith.constant 0 : index
    %c0_3 = arith.constant 0 : index
    %2 = vector.load %arg1[%c0_1, %c0_2, %c0_3] : memref<1x4x128xbf16, #tpu.memory_space<vmem>>, vector<1x4x128xbf16>
    %3 = vector.shape_cast %2 : vector<1x4x128xbf16> to vector<4x128xbf16>
    %c8 = arith.constant 8 : index
    %c0_4 = arith.constant 0 : index
    %4 = vector.load %arg8[%c8, %c0_4] : memref<16x128xbf16, #tpu.memory_space<vmem>>, vector<4x128xbf16>
    tpu.vector_store %arg8[%c8, %c0_4], %3 {strides = array<i32>} : memref<16x128xbf16, #tpu.memory_space<vmem>>, vector<4x128xbf16>,
    %5 = tpu.iota {dimensions = array<i32: 0>} : vector<4x1xi32>
    %c2_i32 = arith.constant 2 : i32
    %c0_i32 = arith.constant 0 : i32
    %6 = arith.cmpi eq, %c2_i32, %c0_i32 : i32
    %c1_i32 = arith.constant 1 : i32
    %7 = arith.select %6, %c1_i32, %c2_i32 : i32
    %8 = vector.broadcast %7 : i32 to vector<4x1xi32>
    %9 = arith.remsi %5, %8 : vector<4x1xi32>
    %c0_i32_5 = arith.constant 0 : i32
    %10 = vector.broadcast %c0_i32_5 : i32 to vector<4x1xi32>
    %11 = arith.cmpi ne, %9, %10 : vector<4x1xi32>
    %c0_i32_6 = arith.constant 0 : i32
    %12 = vector.broadcast %c0_i32_6 : i32 to vector<4x1xi32>
    %13 = arith.cmpi slt, %9, %12 : vector<4x1xi32>
    %c0_i32_7 = arith.constant 0 : i32
    %14 = arith.cmpi slt, %7, %c0_i32_7 : i32
    %15 = vector.broadcast %14 : i1 to vector<4x1xi1>
    %16 = vector.broadcast %15 : vector<4x1xi1> to vector<4x1xi1>
    %17 = arith.xori %13, %16 : vector<4x1xi1>
    %18 = arith.andi %17, %11 : vector<4x1xi1>
    %19 = vector.broadcast %7 : i32 to vector<4x1xi32>
    %20 = arith.addi %9, %19 : vector<4x1xi32>
    %21 = arith.select %18, %20, %9 : vector<4x1xi1>, vector<4x1xi32>
    %c0_i32_8 = arith.constant 0 : i32
    %22 = vector.broadcast %c0_i32_8 : i32 to vector<4x1xi32>
    %23 = arith.cmpi ne, %21, %22 : vector<4x1xi32>
    %c1_i32_9 = arith.constant 1 : i32
    %24 = vector.broadcast %c1_i32_9 : i32 to vector<4x1xi32>
    %25 = arith.cmpi ne, %21, %24 : vector<4x1xi32>
    %cst_10 = arith.constant 0.000000e+00 : f32
    %26 = vector.broadcast %cst_10 : f32 to vector<4x128xf32>
    %c5 = arith.constant 5 : index
    %c0_11 = arith.constant 0 : index
    %27 = vector.load %arg8[%c5, %c0_11] : memref<16x128xbf16, #tpu.memory_space<vmem>>, vector<4x128xbf16>
    %cst_12 = arith.constant 0.000000e+00 : bf16
    %28 = vector.broadcast %cst_12 : bf16 to vector<4x128xbf16>
    %29 = vector.shape_cast %23 : vector<4x1xi1> to vector<4x1xi1>
    %30 = vector.broadcast %29 : vector<4x1xi1> to vector<4x128xi1>
    %31 = arith.select %30, %27, %28 : vector<4x128xi1>, vector<4x128xbf16>
    %c0_13 = arith.constant 0 : index
    %c0_14 = arith.constant 0 : index
    %c0_15 = arith.constant 0 : index
    %32 = vector.load %arg2[%c0_13, %c0_14, %c0_15] : memref<9x128x128xbf16, #tpu.memory_space<vmem>>, vector<1x128x128xbf16>
    %33 = vector.shape_cast %32 : vector<1x128x128xbf16> to vector<128x128xbf16>
    %cst_16 = arith.constant dense<0.000000e+00> : vector<4x128xf32>
    %34 = tpu.matmul %31, %33, %cst_16 {dimension_numbers = #tpu.dot_dimension_numbers<[1], [0], [0], [1], [0, 0, 1, 1], [], []>} : vector<4x128xbf16>, vector<128x128xbf16>, vector<4x128xf32> -> vector<4x128xf32>
    %35 = arith.addf %26, %34 : vector<4x128xf32>
    %c6 = arith.constant 6 : index
    %c0_17 = arith.constant 0 : index
    %36 = vector.load %arg8[%c6, %c0_17] : memref<16x128xbf16, #tpu.memory_space<vmem>>, vector<4x128xbf16>
    %c1 = arith.constant 1 : index
    %c0_18 = arith.constant 0 : index
    %c0_19 = arith.constant 0 : index
    %37 = vector.load %arg2[%c1, %c0_18, %c0_19] : memref<9x128x128xbf16, #tpu.memory_space<vmem>>, vector<1x128x128xbf16>
    %38 = vector.shape_cast %37 : vector<1x128x128xbf16> to vector<128x128xbf16>
    %cst_20 = arith.constant dense<0.000000e+00> : vector<4x128xf32>
    %39 = tpu.matmul %36, %38, %cst_20 {dimension_numbers = #tpu.dot_dimension_numbers<[1], [0], [0], [1], [0, 0, 1, 1], [], []>} : vector<4x128xbf16>, vector<128x128xbf16>, vector<4x128xf32> -> vector<4x128xf32>
    %40 = arith.addf %35, %39 : vector<4x128xf32>
    %c7 = arith.constant 7 : index
    %c0_21 = arith.constant 0 : index
    %41 = vector.load %arg8[%c7, %c0_21] : memref<16x128xbf16, #tpu.memory_space<vmem>>, vector<4x128xbf16>
    %cst_22 = arith.constant 0.000000e+00 : bf16
    %42 = vector.broadcast %cst_22 : bf16 to vector<4x128xbf16>
    %43 = vector.shape_cast %25 : vector<4x1xi1> to vector<4x1xi1>
    %44 = vector.broadcast %43 : vector<4x1xi1> to vector<4x128xi1>
    %45 = arith.select %44, %41, %42 : vector<4x128xi1>, vector<4x128xbf16>
    %c2 = arith.constant 2 : index
    %c0_23 = arith.constant 0 : index
    %c0_24 = arith.constant 0 : index
    %46 = vector.load %arg2[%c2, %c0_23, %c0_24] : memref<9x128x128xbf16, #tpu.memory_space<vmem>>, vector<1x128x128xbf16>
    %47 = vector.shape_cast %46 : vector<1x128x128xbf16> to vector<128x128xbf16>
    %cst_25 = arith.constant dense<0.000000e+00> : vector<4x128xf32>
    %48 = tpu.matmul %45, %47, %cst_25 {dimension_numbers = #tpu.dot_dimension_numbers<[1], [0], [0], [1], [0, 0, 1, 1], [], []>} : vector<4x128xbf16>, vector<128x128xbf16>, vector<4x128xf32> -> vector<4x128xf32>
    %49 = arith.addf %40, %48 : vector<4x128xf32>
    %c7_26 = arith.constant 7 : index
    %c0_27 = arith.constant 0 : index
    %50 = vector.load %arg8[%c7_26, %c0_27] : memref<16x128xbf16, #tpu.memory_space<vmem>>, vector<4x128xbf16>
    %cst_28 = arith.constant 0.000000e+00 : bf16
    %51 = vector.broadcast %cst_28 : bf16 to vector<4x128xbf16>
    %52 = vector.shape_cast %23 : vector<4x1xi1> to vector<4x1xi1>
    %53 = vector.broadcast %52 : vector<4x1xi1> to vector<4x128xi1>
    %54 = arith.select %53, %50, %51 : vector<4x128xi1>, vector<4x128xbf16>
    %c3 = arith.constant 3 : index
    %c0_29 = arith.constant 0 : index
    %c0_30 = arith.constant 0 : index
    %55 = vector.load %arg2[%c3, %c0_29, %c0_30] : memref<9x128x128xbf16, #tpu.memory_space<vmem>>, vector<1x128x128xbf16>
    %56 = vector.shape_cast %55 : vector<1x128x128xbf16> to vector<128x128xbf16>
    %cst_31 = arith.constant dense<0.000000e+00> : vector<4x128xf32>
    %57 = tpu.matmul %54, %56, %cst_31 {dimension_numbers = #tpu.dot_dimension_numbers<[1], [0], [0], [1], [0, 0, 1, 1], [], []>} : vector<4x128xbf16>, vector<128x128xbf16>, vector<4x128xf32> -> vector<4x128xf32>
    %58 = arith.addf %49, %57 : vector<4x128xf32>
    %c8_32 = arith.constant 8 : index
    %c0_33 = arith.constant 0 : index
    %59 = vector.load %arg8[%c8_32, %c0_33] : memref<16x128xbf16, #tpu.memory_space<vmem>>, vector<4x128xbf16>
    %c4 = arith.constant 4 : index
    %c0_34 = arith.constant 0 : index
    %c0_35 = arith.constant 0 : index
    %60 = vector.load %arg2[%c4, %c0_34, %c0_35] : memref<9x128x128xbf16, #tpu.memory_space<vmem>>, vector<1x128x128xbf16>
    %61 = vector.shape_cast %60 : vector<1x128x128xbf16> to vector<128x128xbf16>
    %cst_36 = arith.constant dense<0.000000e+00> : vector<4x128xf32>
    %62 = tpu.matmul %59, %61, %cst_36 {dimension_numbers = #tpu.dot_dimension_numbers<[1], [0], [0], [1], [0, 0, 1, 1], [], []>} : vector<4x128xbf16>, vector<128x128xbf16>, vector<4x128xf32> -> vector<4x128xf32>
    %63 = arith.addf %58, %62 : vector<4x128xf32>
    %c9 = arith.constant 9 : index
    %c0_37 = arith.constant 0 : index
    %64 = vector.load %arg8[%c9, %c0_37] : memref<16x128xbf16, #tpu.memory_space<vmem>>, vector<4x128xbf16>
    %cst_38 = arith.constant 0.000000e+00 : bf16
    %65 = vector.broadcast %cst_38 : bf16 to vector<4x128xbf16>
    %66 = vector.shape_cast %25 : vector<4x1xi1> to vector<4x1xi1>
    %67 = vector.broadcast %66 : vector<4x1xi1> to vector<4x128xi1>
    %68 = arith.select %67, %64, %65 : vector<4x128xi1>, vector<4x128xbf16>
    %c5_39 = arith.constant 5 : index
    %c0_40 = arith.constant 0 : index
    %c0_41 = arith.constant 0 : index
    %69 = vector.load %arg2[%c5_39, %c0_40, %c0_41] : memref<9x128x128xbf16, #tpu.memory_space<vmem>>, vector<1x128x128xbf16>
    %70 = vector.shape_cast %69 : vector<1x128x128xbf16> to vector<128x128xbf16>
    %cst_42 = arith.constant dense<0.000000e+00> : vector<4x128xf32>
    %71 = tpu.matmul %68, %70, %cst_42 {dimension_numbers = #tpu.dot_dimension_numbers<[1], [0], [0], [1], [0, 0, 1, 1], [], []>} : vector<4x128xbf16>, vector<128x128xbf16>, vector<4x128xf32> -> vector<4x128xf32>
    %72 = arith.addf %63, %71 : vector<4x128xf32>
    %c9_43 = arith.constant 9 : index
    %c0_44 = arith.constant 0 : index
    %73 = vector.load %arg8[%c9_43, %c0_44] : memref<16x128xbf16, #tpu.memory_space<vmem>>, vector<4x128xbf16>
    %cst_45 = arith.constant 0.000000e+00 : bf16
    %74 = vector.broadcast %cst_45 : bf16 to vector<4x128xbf16>
    %75 = vector.shape_cast %23 : vector<4x1xi1> to vector<4x1xi1>
    %76 = vector.broadcast %75 : vector<4x1xi1> to vector<4x128xi1>
    %77 = arith.select %76, %73, %74 : vector<4x128xi1>, vector<4x128xbf16>
    %c6_46 = arith.constant 6 : index
    %c0_47 = arith.constant 0 : index
    %c0_48 = arith.constant 0 : index
    %78 = vector.load %arg2[%c6_46, %c0_47, %c0_48] : memref<9x128x128xbf16, #tpu.memory_space<vmem>>, vector<1x128x128xbf16>
    %79 = vector.shape_cast %78 : vector<1x128x128xbf16> to vector<128x128xbf16>
    %cst_49 = arith.constant dense<0.000000e+00> : vector<4x128xf32>
    %80 = tpu.matmul %77, %79, %cst_49 {dimension_numbers = #tpu.dot_dimension_numbers<[1], [0], [0], [1], [0, 0, 1, 1], [], []>} : vector<4x128xbf16>, vector<128x128xbf16>, vector<4x128xf32> -> vector<4x128xf32>
    %81 = arith.addf %72, %80 : vector<4x128xf32>
    %c10 = arith.constant 10 : index
    %c0_50 = arith.constant 0 : index
    %82 = vector.load %arg8[%c10, %c0_50] : memref<16x128xbf16, #tpu.memory_space<vmem>>, vector<4x128xbf16>
    %c7_51 = arith.constant 7 : index
    %c0_52 = arith.constant 0 : index
    %c0_53 = arith.constant 0 : index
    %83 = vector.load %arg2[%c7_51, %c0_52, %c0_53] : memref<9x128x128xbf16, #tpu.memory_space<vmem>>, vector<1x128x128xbf16>
    %84 = vector.shape_cast %83 : vector<1x128x128xbf16> to vector<128x128xbf16>
    %cst_54 = arith.constant dense<0.000000e+00> : vector<4x128xf32>
    %85 = tpu.matmul %82, %84, %cst_54 {dimension_numbers = #tpu.dot_dimension_numbers<[1], [0], [0], [1], [0, 0, 1, 1], [], []>} : vector<4x128xbf16>, vector<128x128xbf16>, vector<4x128xf32> -> vector<4x128xf32>
    %86 = arith.addf %81, %85 : vector<4x128xf32>
    %c11 = arith.constant 11 : index
    %c0_55 = arith.constant 0 : index
    %87 = vector.load %arg8[%c11, %c0_55] : memref<16x128xbf16, #tpu.memory_space<vmem>>, vector<4x128xbf16>
    %cst_56 = arith.constant 0.000000e+00 : bf16
    %88 = vector.broadcast %cst_56 : bf16 to vector<4x128xbf16>
    %89 = vector.shape_cast %25 : vector<4x1xi1> to vector<4x1xi1>
    %90 = vector.broadcast %89 : vector<4x1xi1> to vector<4x128xi1>
    %91 = arith.select %90, %87, %88 : vector<4x128xi1>, vector<4x128xbf16>
    %c8_57 = arith.constant 8 : index
    %c0_58 = arith.constant 0 : index
    %c0_59 = arith.constant 0 : index
    %92 = vector.load %arg2[%c8_57, %c0_58, %c0_59] : memref<9x128x128xbf16, #tpu.memory_space<vmem>>, vector<1x128x128xbf16>
    %93 = vector.shape_cast %92 : vector<1x128x128xbf16> to vector<128x128xbf16>
    %cst_60 = arith.constant dense<0.000000e+00> : vector<4x128xf32>
    %94 = tpu.matmul %91, %93, %cst_60 {dimension_numbers = #tpu.dot_dimension_numbers<[1], [0], [0], [1], [0, 0, 1, 1], [], []>} : vector<4x128xbf16>, vector<128x128xbf16>, vector<4x128xf32> -> vector<4x128xf32>
    %95 = arith.addf %86, %94 : vector<4x128xf32>
    %96 = arith.truncf %95 : vector<4x128xf32> to vector<4x128xbf16>
    %c0_61 = arith.constant 0 : index
    %c0_62 = arith.constant 0 : index
    %c0_63 = arith.constant 0 : index
    %97 = vector.load %arg4[%c0_61, %c0_62, %c0_63] : memref<1x4x128xbf16, #tpu.memory_space<vmem>>, vector<1x4x128xbf16>
    %98 = vector.shape_cast %97 : vector<1x4x128xbf16> to vector<4x128xbf16>
    %99 = vector.shape_cast %96 : vector<4x128xbf16> to vector<1x4x128xbf16>
    tpu.vector_store %arg4[%c0_61, %c0_62, %c0_63], %99 {strides = array<i32>} : memref<1x4x128xbf16, #tpu.memory_space<vmem>>, vector<1x4x128xbf16>,
    %cst_64 = arith.constant dense<0.000000e+00> : vector<128xf32>
    %100 = vector.multi_reduction <add>, %95, %cst_64 [0] : vector<4x128xf32> to vector<128xf32>
    %101 = vector.shape_cast %100 : vector<128xf32> to vector<1x128xf32>
    %c0_65 = arith.constant 0 : index
    %c0_66 = arith.constant 0 : index
    %c0_67 = arith.constant 0 : index
    %102 = vector.load %arg5[%c0_65, %c0_66, %c0_67] : memref<1x2x128xf32, #tpu.memory_space<vmem>>, vector<1x1x128xf32>
    %103 = vector.shape_cast %102 : vector<1x1x128xf32> to vector<1x128xf32>
    %104 = vector.shape_cast %101 : vector<1x128xf32> to vector<1x1x128xf32>
    tpu.vector_store %arg5[%c0_65, %c0_66, %c0_67], %104 {strides = array<i32>} : memref<1x2x128xf32, #tpu.memory_space<vmem>>, vector<1x1x128xf32>,
    %105 = arith.mulf %95, %95 : vector<4x128xf32>
    %cst_68 = arith.constant dense<0.000000e+00> : vector<128xf32>
    %106 = vector.multi_reduction <add>, %105, %cst_68 [0] : vector<4x128xf32> to vector<128xf32>
    %107 = vector.shape_cast %106 : vector<128xf32> to vector<1x128xf32>
    %c0_69 = arith.constant 0 : index
    %c1_70 = arith.constant 1 : index
    %c0_71 = arith.constant 0 : index
    %108 = vector.load %arg5[%c0_69, %c1_70, %c0_71] : memref<1x2x128xf32, #tpu.memory_space<vmem>>, vector<1x1x128xf32>
    %109 = vector.shape_cast %108 : vector<1x1x128xf32> to vector<1x128xf32>
    %110 = vector.shape_cast %107 : vector<1x128xf32> to vector<1x1x128xf32>
    tpu.vector_store %arg5[%c0_69, %c1_70, %c0_71], %110 {strides = array<i32>} : memref<1x2x128xf32, #tpu.memory_space<vmem>>, vector<1x1x128xf32>,
    %c8_72 = arith.constant 8 : index
    %c0_73 = arith.constant 0 : index
    %111 = vector.load %arg8[%c8_72, %c0_73] : memref<16x128xbf16, #tpu.memory_space<vmem>>, vector<4x128xbf16>
    %c0_74 = arith.constant 0 : index
    %c0_75 = arith.constant 0 : index
    %112 = vector.load %arg3[%c0_74, %c0_75] : memref<128x128xbf16, #tpu.memory_space<vmem>>, vector<128x128xbf16>
    %cst_76 = arith.constant dense<0.000000e+00> : vector<4x128xf32>
    %113 = tpu.matmul %111, %112, %cst_76 {dimension_numbers = #tpu.dot_dimension_numbers<[1], [0], [0], [1], [0, 0, 1, 1], [], []>} : vector<4x128xbf16>, vector<128x128xbf16>, vector<4x128xf32> -> vector<4x128xf32>
    %114 = arith.truncf %113 : vector<4x128xf32> to vector<4x128xbf16>
    %c0_77 = arith.constant 0 : index
    %c0_78 = arith.constant 0 : index
    %c0_79 = arith.constant 0 : index
    %115 = vector.load %arg6[%c0_77, %c0_78, %c0_79] : memref<1x4x128xbf16, #tpu.memory_space<vmem>>, vector<1x4x128xbf16>
    %116 = vector.shape_cast %115 : vector<1x4x128xbf16> to vector<4x128xbf16>
    %117 = vector.shape_cast %114 : vector<4x128xbf16> to vector<1x4x128xbf16>
    tpu.vector_store %arg6[%c0_77, %c0_78, %c0_79], %117 {strides = array<i32>} : memref<1x4x128xbf16, #tpu.memory_space<vmem>>, vector<1x4x128xbf16>,
    %cst_80 = arith.constant dense<0.000000e+00> : vector<128xf32>
    %118 = vector.multi_reduction <add>, %113, %cst_80 [0] : vector<4x128xf32> to vector<128xf32>
    %119 = vector.shape_cast %118 : vector<128xf32> to vector<1x128xf32>
    %c0_81 = arith.constant 0 : index
    %c0_82 = arith.constant 0 : index
    %c0_83 = arith.constant 0 : index
    %120 = vector.load %arg7[%c0_81, %c0_82, %c0_83] : memref<1x2x128xf32, #tpu.memory_space<vmem>>, vector<1x1x128xf32>
    %121 = vector.shape_cast %120 : vector<1x1x128xf32> to vector<1x128xf32>
    %122 = vector.shape_cast %119 : vector<1x128xf32> to vector<1x1x128xf32>
    tpu.vector_store %arg7[%c0_81, %c0_82, %c0_83], %122 {strides = array<i32>} : memref<1x2x128xf32, #tpu.memory_space<vmem>>, vector<1x1x128xf32>,
    %123 = arith.mulf %113, %113 : vector<4x128xf32>
    %cst_84 = arith.constant dense<0.000000e+00> : vector<128xf32>
    %124 = vector.multi_reduction <add>, %123, %cst_84 [0] : vector<4x128xf32> to vector<128xf32>
    %125 = vector.shape_cast %124 : vector<128xf32> to vector<1x128xf32>
    %c0_85 = arith.constant 0 : index
    %c1_86 = arith.constant 1 : index
    %c0_87 = arith.constant 0 : index
    %126 = vector.load %arg7[%c0_85, %c1_86, %c0_87] : memref<1x2x128xf32, #tpu.memory_space<vmem>>, vector<1x1x128xf32>
    %127 = vector.shape_cast %126 : vector<1x1x128xf32> to vector<1x128xf32>
    %128 = vector.shape_cast %125 : vector<1x128xf32> to vector<1x1x128xf32>
    tpu.vector_store %arg7[%c0_85, %c1_86, %c0_87], %128 {strides = array<i32>} : memref<1x2x128xf32, #tpu.memory_space<vmem>>, vector<1x1x128xf32>,
    return
  }
  func.func @transform_0(%arg0: i32) -> (i32, i32, i32) {
    %c0_i32 = arith.constant 0 : i32
    %c0_i32_0 = arith.constant 0 : i32
    %c0_i32_1 = arith.constant 0 : i32
    return %arg0, %c0_i32, %c0_i32_0 : i32, i32, i32
  }
  func.func @transform_1(%arg0: i32) -> (i32, i32, i32) {
    %c0_i32 = arith.constant 0 : i32
    %c0_i32_0 = arith.constant 0 : i32
    %c0_i32_1 = arith.constant 0 : i32
    %c0_i32_2 = arith.constant 0 : i32
    return %c0_i32, %c0_i32_0, %c0_i32_1 : i32, i32, i32
  }
  func.func @transform_2(%arg0: i32) -> (i32, i32) {
    %c0_i32 = arith.constant 0 : i32
    %c0_i32_0 = arith.constant 0 : i32
    %c0_i32_1 = arith.constant 0 : i32
    return %c0_i32, %c0_i32_0 : i32, i32
  }
  func.func @transform_3(%arg0: i32) -> (i32, i32, i32) {
    %c0_i32 = arith.constant 0 : i32
    %c0_i32_0 = arith.constant 0 : i32
    %c0_i32_1 = arith.constant 0 : i32
    return %arg0, %c0_i32, %c0_i32_0 : i32, i32, i32
  }
  func.func @transform_4(%arg0: i32) -> (i32, i32, i32) {
    %c0_i32 = arith.constant 0 : i32
    %c0_i32_0 = arith.constant 0 : i32
    %c0_i32_1 = arith.constant 0 : i32
    return %arg0, %c0_i32, %c0_i32_0 : i32, i32, i32
  }
  func.func @transform_5(%arg0: i32) -> (i32, i32, i32) {
    %c0_i32 = arith.constant 0 : i32
    %c0_i32_0 = arith.constant 0 : i32
    %c0_i32_1 = arith.constant 0 : i32
    return %arg0, %c0_i32, %c0_i32_0 : i32, i32, i32
  }
  func.func @transform_6(%arg0: i32) -> (i32, i32, i32) {
    %c0_i32 = arith.constant 0 : i32
    %c0_i32_0 = arith.constant 0 : i32
    %c0_i32_1 = arith.constant 0 : i32
    return %arg0, %c0_i32, %c0_i32_0 : i32, i32, i32
  }
}

module attributes {stable_mosaic.version = 11 : i64} {
  func.func @_conv_s1_kernel(%arg0: i32, %arg1: memref<2x128xf32, #tpu.memory_space<vmem>>, %arg2: memref<1x128xf32, #tpu.memory_space<vmem>>, %arg3: memref<1x128xf32, #tpu.memory_space<vmem>>, %arg4: memref<1x1x128xbf16, #tpu.memory_space<vmem>>, %arg5: memref<9x128x128xbf16, #tpu.memory_space<vmem>>, %arg6: memref<1x1x128xbf16, #tpu.memory_space<vmem>>, %arg7: memref<1x2x128xf32, #tpu.memory_space<vmem>>, %arg8: memref<16x128xbf16, #tpu.memory_space<vmem>>) attributes {dimension_semantics = [#tpu.dimension_semantics<parallel>], iteration_bounds = array<i64: 2>, scalar_prefetch = 0 : i64, scratch_operands = 1 : i64, tpu.core_type = #tpu.core_type<tc>, window_params = [{pipeline_mode = #tpu.pipeline_mode<synchronous>, transform_indices = @transform_0, window_bounds = array<i64: 2, 128>}, {pipeline_mode = #tpu.pipeline_mode<synchronous>, transform_indices = @transform_1, window_bounds = array<i64: 1, 128>}, {pipeline_mode = #tpu.pipeline_mode<synchronous>, transform_indices = @transform_2, window_bounds = array<i64: 1, 128>}, {transform_indices = @transform_3, window_bounds = array<i64: 1, 1, 128>}, {pipeline_mode = #tpu.pipeline_mode<synchronous>, transform_indices = @transform_4, window_bounds = array<i64: 9, 128, 128>}, {transform_indices = @transform_5, window_bounds = array<i64: 1, 1, 128>}, {transform_indices = @transform_6, window_bounds = array<i64: 1, 2, 128>}]} {
    %cst = arith.constant 0.000000e+00 : bf16
    %0 = vector.broadcast %cst : bf16 to vector<16x128xbf16>
    %c0 = arith.constant 0 : index
    %c0_0 = arith.constant 0 : index
    %1 = vector.load %arg8[%c0, %c0_0] : memref<16x128xbf16, #tpu.memory_space<vmem>>, vector<16x128xbf16>
    tpu.vector_store %arg8[%c0, %c0_0], %0 {strides = array<i32>} : memref<16x128xbf16, #tpu.memory_space<vmem>>, vector<16x128xbf16>,
    %c0_1 = arith.constant 0 : index
    %c0_2 = arith.constant 0 : index
    %c0_3 = arith.constant 0 : index
    %2 = vector.load %arg4[%c0_1, %c0_2, %c0_3] : memref<1x1x128xbf16, #tpu.memory_space<vmem>>, vector<1x1x128xbf16>
    %3 = vector.shape_cast %2 : vector<1x1x128xbf16> to vector<1x128xbf16>
    %c0_4 = arith.constant 0 : index
    %c0_5 = arith.constant 0 : index
    %4 = vector.load %arg1[%c0_4, %c0_5] : memref<2x128xf32, #tpu.memory_space<vmem>>, vector<2x128xf32>
    %c0_6 = arith.constant 0 : index
    %c0_7 = arith.constant 0 : index
    %5 = vector.load %arg2[%c0_6, %c0_7] : memref<1x128xf32, #tpu.memory_space<vmem>>, vector<1x128xf32>
    %c0_8 = arith.constant 0 : index
    %c0_9 = arith.constant 0 : index
    %6 = vector.load %arg3[%c0_8, %c0_9] : memref<1x128xf32, #tpu.memory_space<vmem>>, vector<1x128xf32>
    %7 = vector.extract_strided_slice %4 {offsets = [0, 0], sizes = [1, 128], strides = [1, 1]} : vector<2x128xf32> to vector<1x128xf32>
    %cst_10 = arith.constant 5.000000e-01 : f32
    %8 = vector.broadcast %cst_10 : f32 to vector<1x128xf32>
    %9 = arith.mulf %7, %8 : vector<1x128xf32>
    %10 = vector.extract_strided_slice %4 {offsets = [1, 0], sizes = [1, 128], strides = [1, 1]} : vector<2x128xf32> to vector<1x128xf32>
    %cst_11 = arith.constant 5.000000e-01 : f32
    %11 = vector.broadcast %cst_11 : f32 to vector<1x128xf32>
    %12 = arith.mulf %10, %11 : vector<1x128xf32>
    %13 = arith.mulf %9, %9 : vector<1x128xf32>
    %14 = arith.subf %12, %13 : vector<1x128xf32>
    %cst_12 = arith.constant 0.000000e+00 : f32
    %15 = vector.broadcast %cst_12 : f32 to vector<1x128xf32>
    %16 = arith.maximumf %14, %15 : vector<1x128xf32>
    %cst_13 = arith.constant 9.99999974E-6 : f32
    %17 = vector.broadcast %cst_13 : f32 to vector<1x128xf32>
    %18 = arith.addf %16, %17 : vector<1x128xf32>
    %19 = math.rsqrt %18 : vector<1x128xf32>
    %20 = arith.mulf %5, %19 : vector<1x128xf32>
    %21 = arith.mulf %9, %20 : vector<1x128xf32>
    %22 = arith.subf %6, %21 : vector<1x128xf32>
    %23 = arith.extf %3 : vector<1x128xbf16> to vector<1x128xf32>
    %24 = arith.mulf %23, %20 : vector<1x128xf32>
    %25 = arith.addf %24, %22 : vector<1x128xf32>
    %cst_14 = arith.constant 0.000000e+00 : f32
    %26 = vector.broadcast %cst_14 : f32 to vector<1x128xf32>
    %27 = arith.maximumf %25, %26 : vector<1x128xf32>
    %28 = arith.truncf %27 : vector<1x128xf32> to vector<1x128xbf16>
    %c8 = arith.constant 8 : index
    %c0_15 = arith.constant 0 : index
    %29 = vector.load %arg8[%c8, %c0_15] : memref<16x128xbf16, #tpu.memory_space<vmem>>, vector<1x128xbf16>
    tpu.vector_store %arg8[%c8, %c0_15], %28 {strides = array<i32>} : memref<16x128xbf16, #tpu.memory_space<vmem>>, vector<1x128xbf16>,
    %cst_16 = arith.constant 0.000000e+00 : f32
    %30 = vector.broadcast %cst_16 : f32 to vector<1x128xf32>
    %c8_17 = arith.constant 8 : index
    %c0_18 = arith.constant 0 : index
    %31 = vector.load %arg8[%c8_17, %c0_18] : memref<16x128xbf16, #tpu.memory_space<vmem>>, vector<1x128xbf16>
    %c4 = arith.constant 4 : index
    %c0_19 = arith.constant 0 : index
    %c0_20 = arith.constant 0 : index
    %32 = vector.load %arg5[%c4, %c0_19, %c0_20] : memref<9x128x128xbf16, #tpu.memory_space<vmem>>, vector<1x128x128xbf16>
    %33 = vector.shape_cast %32 : vector<1x128x128xbf16> to vector<128x128xbf16>
    %cst_21 = arith.constant dense<0.000000e+00> : vector<1x128xf32>
    %34 = tpu.matmul %31, %33, %cst_21 {dimension_numbers = #tpu.dot_dimension_numbers<[1], [0], [0], [1], [0, 0, 1, 1], [], []>} : vector<1x128xbf16>, vector<128x128xbf16>, vector<1x128xf32> -> vector<1x128xf32>
    %35 = arith.addf %30, %34 : vector<1x128xf32>
    %36 = arith.truncf %35 : vector<1x128xf32> to vector<1x128xbf16>
    %c0_22 = arith.constant 0 : index
    %c0_23 = arith.constant 0 : index
    %c0_24 = arith.constant 0 : index
    %37 = vector.load %arg6[%c0_22, %c0_23, %c0_24] : memref<1x1x128xbf16, #tpu.memory_space<vmem>>, vector<1x1x128xbf16>
    %38 = vector.shape_cast %37 : vector<1x1x128xbf16> to vector<1x128xbf16>
    %39 = vector.shape_cast %36 : vector<1x128xbf16> to vector<1x1x128xbf16>
    tpu.vector_store %arg6[%c0_22, %c0_23, %c0_24], %39 {strides = array<i32>} : memref<1x1x128xbf16, #tpu.memory_space<vmem>>, vector<1x1x128xbf16>,
    %cst_25 = arith.constant dense<0.000000e+00> : vector<128xf32>
    %40 = vector.multi_reduction <add>, %35, %cst_25 [0] : vector<1x128xf32> to vector<128xf32>
    %41 = vector.shape_cast %40 : vector<128xf32> to vector<1x128xf32>
    %c0_26 = arith.constant 0 : index
    %c0_27 = arith.constant 0 : index
    %c0_28 = arith.constant 0 : index
    %42 = vector.load %arg7[%c0_26, %c0_27, %c0_28] : memref<1x2x128xf32, #tpu.memory_space<vmem>>, vector<1x1x128xf32>
    %43 = vector.shape_cast %42 : vector<1x1x128xf32> to vector<1x128xf32>
    %44 = vector.shape_cast %41 : vector<1x128xf32> to vector<1x1x128xf32>
    tpu.vector_store %arg7[%c0_26, %c0_27, %c0_28], %44 {strides = array<i32>} : memref<1x2x128xf32, #tpu.memory_space<vmem>>, vector<1x1x128xf32>,
    %45 = arith.mulf %35, %35 : vector<1x128xf32>
    %cst_29 = arith.constant dense<0.000000e+00> : vector<128xf32>
    %46 = vector.multi_reduction <add>, %45, %cst_29 [0] : vector<1x128xf32> to vector<128xf32>
    %47 = vector.shape_cast %46 : vector<128xf32> to vector<1x128xf32>
    %c0_30 = arith.constant 0 : index
    %c1 = arith.constant 1 : index
    %c0_31 = arith.constant 0 : index
    %48 = vector.load %arg7[%c0_30, %c1, %c0_31] : memref<1x2x128xf32, #tpu.memory_space<vmem>>, vector<1x1x128xf32>
    %49 = vector.shape_cast %48 : vector<1x1x128xf32> to vector<1x128xf32>
    %50 = vector.shape_cast %47 : vector<1x128xf32> to vector<1x1x128xf32>
    tpu.vector_store %arg7[%c0_30, %c1, %c0_31], %50 {strides = array<i32>} : memref<1x2x128xf32, #tpu.memory_space<vmem>>, vector<1x1x128xf32>,
    return
  }
  func.func @transform_0(%arg0: i32) -> (i32, i32) {
    %c0_i32 = arith.constant 0 : i32
    %c0_i32_0 = arith.constant 0 : i32
    %c0_i32_1 = arith.constant 0 : i32
    return %c0_i32, %c0_i32_0 : i32, i32
  }
  func.func @transform_1(%arg0: i32) -> (i32, i32) {
    %c0_i32 = arith.constant 0 : i32
    %c0_i32_0 = arith.constant 0 : i32
    %c0_i32_1 = arith.constant 0 : i32
    return %c0_i32, %c0_i32_0 : i32, i32
  }
  func.func @transform_2(%arg0: i32) -> (i32, i32) {
    %c0_i32 = arith.constant 0 : i32
    %c0_i32_0 = arith.constant 0 : i32
    %c0_i32_1 = arith.constant 0 : i32
    return %c0_i32, %c0_i32_0 : i32, i32
  }
  func.func @transform_3(%arg0: i32) -> (i32, i32, i32) {
    %c0_i32 = arith.constant 0 : i32
    %c0_i32_0 = arith.constant 0 : i32
    %c0_i32_1 = arith.constant 0 : i32
    return %arg0, %c0_i32, %c0_i32_0 : i32, i32, i32
  }
  func.func @transform_4(%arg0: i32) -> (i32, i32, i32) {
    %c0_i32 = arith.constant 0 : i32
    %c0_i32_0 = arith.constant 0 : i32
    %c0_i32_1 = arith.constant 0 : i32
    %c0_i32_2 = arith.constant 0 : i32
    return %c0_i32, %c0_i32_0, %c0_i32_1 : i32, i32, i32
  }
  func.func @transform_5(%arg0: i32) -> (i32, i32, i32) {
    %c0_i32 = arith.constant 0 : i32
    %c0_i32_0 = arith.constant 0 : i32
    %c0_i32_1 = arith.constant 0 : i32
    return %arg0, %c0_i32, %c0_i32_0 : i32, i32, i32
  }
  func.func @transform_6(%arg0: i32) -> (i32, i32, i32) {
    %c0_i32 = arith.constant 0 : i32
    %c0_i32_0 = arith.constant 0 : i32
    %c0_i32_1 = arith.constant 0 : i32
    return %arg0, %c0_i32, %c0_i32_0 : i32, i32, i32
  }
}

module attributes {stable_mosaic.version = 11 : i64} {
  func.func @_conv_taps_kernel(%arg0: i32, %arg1: memref<1x9x1x128xbf16, #tpu.memory_space<vmem>>, %arg2: memref<9x128x128xbf16, #tpu.memory_space<vmem>>, %arg3: memref<128x128xbf16, #tpu.memory_space<vmem>>, %arg4: memref<1x1x128xbf16, #tpu.memory_space<vmem>>, %arg5: memref<1x2x128xf32, #tpu.memory_space<vmem>>, %arg6: memref<1x1x128xbf16, #tpu.memory_space<vmem>>, %arg7: memref<1x2x128xf32, #tpu.memory_space<vmem>>) attributes {dimension_semantics = [#tpu.dimension_semantics<parallel>], iteration_bounds = array<i64: 2>, scalar_prefetch = 0 : i64, scratch_operands = 0 : i64, tpu.core_type = #tpu.core_type<tc>, window_params = [{transform_indices = @transform_0, window_bounds = array<i64: 1, 9, 1, 128>}, {pipeline_mode = #tpu.pipeline_mode<synchronous>, transform_indices = @transform_1, window_bounds = array<i64: 9, 128, 128>}, {pipeline_mode = #tpu.pipeline_mode<synchronous>, transform_indices = @transform_2, window_bounds = array<i64: 128, 128>}, {transform_indices = @transform_3, window_bounds = array<i64: 1, 1, 128>}, {transform_indices = @transform_4, window_bounds = array<i64: 1, 2, 128>}, {transform_indices = @transform_5, window_bounds = array<i64: 1, 1, 128>}, {transform_indices = @transform_6, window_bounds = array<i64: 1, 2, 128>}]} {
    %c0 = arith.constant 0 : index
    %c0_0 = arith.constant 0 : index
    %c0_1 = arith.constant 0 : index
    %c0_2 = arith.constant 0 : index
    %0 = vector.load %arg1[%c0, %c0_0, %c0_1, %c0_2] : memref<1x9x1x128xbf16, #tpu.memory_space<vmem>>, vector<1x1x1x128xbf16>
    %1 = vector.shape_cast %0 : vector<1x1x1x128xbf16> to vector<1x128xbf16>
    %c0_3 = arith.constant 0 : index
    %c0_4 = arith.constant 0 : index
    %c0_5 = arith.constant 0 : index
    %2 = vector.load %arg2[%c0_3, %c0_4, %c0_5] : memref<9x128x128xbf16, #tpu.memory_space<vmem>>, vector<1x128x128xbf16>
    %3 = vector.shape_cast %2 : vector<1x128x128xbf16> to vector<128x128xbf16>
    %cst = arith.constant dense<0.000000e+00> : vector<1x128xf32>
    %4 = tpu.matmul %1, %3, %cst {dimension_numbers = #tpu.dot_dimension_numbers<[1], [0], [0], [1], [0, 0, 1, 1], [], []>} : vector<1x128xbf16>, vector<128x128xbf16>, vector<1x128xf32> -> vector<1x128xf32>
    %c0_6 = arith.constant 0 : index
    %c1 = arith.constant 1 : index
    %c0_7 = arith.constant 0 : index
    %c0_8 = arith.constant 0 : index
    %5 = vector.load %arg1[%c0_6, %c1, %c0_7, %c0_8] : memref<1x9x1x128xbf16, #tpu.memory_space<vmem>>, vector<1x1x1x128xbf16>
    %6 = vector.shape_cast %5 : vector<1x1x1x128xbf16> to vector<1x128xbf16>
    %c1_9 = arith.constant 1 : index
    %c0_10 = arith.constant 0 : index
    %c0_11 = arith.constant 0 : index
    %7 = vector.load %arg2[%c1_9, %c0_10, %c0_11] : memref<9x128x128xbf16, #tpu.memory_space<vmem>>, vector<1x128x128xbf16>
    %8 = vector.shape_cast %7 : vector<1x128x128xbf16> to vector<128x128xbf16>
    %cst_12 = arith.constant dense<0.000000e+00> : vector<1x128xf32>
    %9 = tpu.matmul %6, %8, %cst_12 {dimension_numbers = #tpu.dot_dimension_numbers<[1], [0], [0], [1], [0, 0, 1, 1], [], []>} : vector<1x128xbf16>, vector<128x128xbf16>, vector<1x128xf32> -> vector<1x128xf32>
    %10 = arith.addf %4, %9 : vector<1x128xf32>
    %c0_13 = arith.constant 0 : index
    %c2 = arith.constant 2 : index
    %c0_14 = arith.constant 0 : index
    %c0_15 = arith.constant 0 : index
    %11 = vector.load %arg1[%c0_13, %c2, %c0_14, %c0_15] : memref<1x9x1x128xbf16, #tpu.memory_space<vmem>>, vector<1x1x1x128xbf16>
    %12 = vector.shape_cast %11 : vector<1x1x1x128xbf16> to vector<1x128xbf16>
    %c2_16 = arith.constant 2 : index
    %c0_17 = arith.constant 0 : index
    %c0_18 = arith.constant 0 : index
    %13 = vector.load %arg2[%c2_16, %c0_17, %c0_18] : memref<9x128x128xbf16, #tpu.memory_space<vmem>>, vector<1x128x128xbf16>
    %14 = vector.shape_cast %13 : vector<1x128x128xbf16> to vector<128x128xbf16>
    %cst_19 = arith.constant dense<0.000000e+00> : vector<1x128xf32>
    %15 = tpu.matmul %12, %14, %cst_19 {dimension_numbers = #tpu.dot_dimension_numbers<[1], [0], [0], [1], [0, 0, 1, 1], [], []>} : vector<1x128xbf16>, vector<128x128xbf16>, vector<1x128xf32> -> vector<1x128xf32>
    %16 = arith.addf %10, %15 : vector<1x128xf32>
    %c0_20 = arith.constant 0 : index
    %c3 = arith.constant 3 : index
    %c0_21 = arith.constant 0 : index
    %c0_22 = arith.constant 0 : index
    %17 = vector.load %arg1[%c0_20, %c3, %c0_21, %c0_22] : memref<1x9x1x128xbf16, #tpu.memory_space<vmem>>, vector<1x1x1x128xbf16>
    %18 = vector.shape_cast %17 : vector<1x1x1x128xbf16> to vector<1x128xbf16>
    %c3_23 = arith.constant 3 : index
    %c0_24 = arith.constant 0 : index
    %c0_25 = arith.constant 0 : index
    %19 = vector.load %arg2[%c3_23, %c0_24, %c0_25] : memref<9x128x128xbf16, #tpu.memory_space<vmem>>, vector<1x128x128xbf16>
    %20 = vector.shape_cast %19 : vector<1x128x128xbf16> to vector<128x128xbf16>
    %cst_26 = arith.constant dense<0.000000e+00> : vector<1x128xf32>
    %21 = tpu.matmul %18, %20, %cst_26 {dimension_numbers = #tpu.dot_dimension_numbers<[1], [0], [0], [1], [0, 0, 1, 1], [], []>} : vector<1x128xbf16>, vector<128x128xbf16>, vector<1x128xf32> -> vector<1x128xf32>
    %22 = arith.addf %16, %21 : vector<1x128xf32>
    %c0_27 = arith.constant 0 : index
    %c4 = arith.constant 4 : index
    %c0_28 = arith.constant 0 : index
    %c0_29 = arith.constant 0 : index
    %23 = vector.load %arg1[%c0_27, %c4, %c0_28, %c0_29] : memref<1x9x1x128xbf16, #tpu.memory_space<vmem>>, vector<1x1x1x128xbf16>
    %24 = vector.shape_cast %23 : vector<1x1x1x128xbf16> to vector<1x128xbf16>
    %c4_30 = arith.constant 4 : index
    %c0_31 = arith.constant 0 : index
    %c0_32 = arith.constant 0 : index
    %25 = vector.load %arg2[%c4_30, %c0_31, %c0_32] : memref<9x128x128xbf16, #tpu.memory_space<vmem>>, vector<1x128x128xbf16>
    %26 = vector.shape_cast %25 : vector<1x128x128xbf16> to vector<128x128xbf16>
    %cst_33 = arith.constant dense<0.000000e+00> : vector<1x128xf32>
    %27 = tpu.matmul %24, %26, %cst_33 {dimension_numbers = #tpu.dot_dimension_numbers<[1], [0], [0], [1], [0, 0, 1, 1], [], []>} : vector<1x128xbf16>, vector<128x128xbf16>, vector<1x128xf32> -> vector<1x128xf32>
    %28 = arith.addf %22, %27 : vector<1x128xf32>
    %c0_34 = arith.constant 0 : index
    %c5 = arith.constant 5 : index
    %c0_35 = arith.constant 0 : index
    %c0_36 = arith.constant 0 : index
    %29 = vector.load %arg1[%c0_34, %c5, %c0_35, %c0_36] : memref<1x9x1x128xbf16, #tpu.memory_space<vmem>>, vector<1x1x1x128xbf16>
    %30 = vector.shape_cast %29 : vector<1x1x1x128xbf16> to vector<1x128xbf16>
    %c5_37 = arith.constant 5 : index
    %c0_38 = arith.constant 0 : index
    %c0_39 = arith.constant 0 : index
    %31 = vector.load %arg2[%c5_37, %c0_38, %c0_39] : memref<9x128x128xbf16, #tpu.memory_space<vmem>>, vector<1x128x128xbf16>
    %32 = vector.shape_cast %31 : vector<1x128x128xbf16> to vector<128x128xbf16>
    %cst_40 = arith.constant dense<0.000000e+00> : vector<1x128xf32>
    %33 = tpu.matmul %30, %32, %cst_40 {dimension_numbers = #tpu.dot_dimension_numbers<[1], [0], [0], [1], [0, 0, 1, 1], [], []>} : vector<1x128xbf16>, vector<128x128xbf16>, vector<1x128xf32> -> vector<1x128xf32>
    %34 = arith.addf %28, %33 : vector<1x128xf32>
    %c0_41 = arith.constant 0 : index
    %c6 = arith.constant 6 : index
    %c0_42 = arith.constant 0 : index
    %c0_43 = arith.constant 0 : index
    %35 = vector.load %arg1[%c0_41, %c6, %c0_42, %c0_43] : memref<1x9x1x128xbf16, #tpu.memory_space<vmem>>, vector<1x1x1x128xbf16>
    %36 = vector.shape_cast %35 : vector<1x1x1x128xbf16> to vector<1x128xbf16>
    %c6_44 = arith.constant 6 : index
    %c0_45 = arith.constant 0 : index
    %c0_46 = arith.constant 0 : index
    %37 = vector.load %arg2[%c6_44, %c0_45, %c0_46] : memref<9x128x128xbf16, #tpu.memory_space<vmem>>, vector<1x128x128xbf16>
    %38 = vector.shape_cast %37 : vector<1x128x128xbf16> to vector<128x128xbf16>
    %cst_47 = arith.constant dense<0.000000e+00> : vector<1x128xf32>
    %39 = tpu.matmul %36, %38, %cst_47 {dimension_numbers = #tpu.dot_dimension_numbers<[1], [0], [0], [1], [0, 0, 1, 1], [], []>} : vector<1x128xbf16>, vector<128x128xbf16>, vector<1x128xf32> -> vector<1x128xf32>
    %40 = arith.addf %34, %39 : vector<1x128xf32>
    %c0_48 = arith.constant 0 : index
    %c7 = arith.constant 7 : index
    %c0_49 = arith.constant 0 : index
    %c0_50 = arith.constant 0 : index
    %41 = vector.load %arg1[%c0_48, %c7, %c0_49, %c0_50] : memref<1x9x1x128xbf16, #tpu.memory_space<vmem>>, vector<1x1x1x128xbf16>
    %42 = vector.shape_cast %41 : vector<1x1x1x128xbf16> to vector<1x128xbf16>
    %c7_51 = arith.constant 7 : index
    %c0_52 = arith.constant 0 : index
    %c0_53 = arith.constant 0 : index
    %43 = vector.load %arg2[%c7_51, %c0_52, %c0_53] : memref<9x128x128xbf16, #tpu.memory_space<vmem>>, vector<1x128x128xbf16>
    %44 = vector.shape_cast %43 : vector<1x128x128xbf16> to vector<128x128xbf16>
    %cst_54 = arith.constant dense<0.000000e+00> : vector<1x128xf32>
    %45 = tpu.matmul %42, %44, %cst_54 {dimension_numbers = #tpu.dot_dimension_numbers<[1], [0], [0], [1], [0, 0, 1, 1], [], []>} : vector<1x128xbf16>, vector<128x128xbf16>, vector<1x128xf32> -> vector<1x128xf32>
    %46 = arith.addf %40, %45 : vector<1x128xf32>
    %c0_55 = arith.constant 0 : index
    %c8 = arith.constant 8 : index
    %c0_56 = arith.constant 0 : index
    %c0_57 = arith.constant 0 : index
    %47 = vector.load %arg1[%c0_55, %c8, %c0_56, %c0_57] : memref<1x9x1x128xbf16, #tpu.memory_space<vmem>>, vector<1x1x1x128xbf16>
    %48 = vector.shape_cast %47 : vector<1x1x1x128xbf16> to vector<1x128xbf16>
    %c8_58 = arith.constant 8 : index
    %c0_59 = arith.constant 0 : index
    %c0_60 = arith.constant 0 : index
    %49 = vector.load %arg2[%c8_58, %c0_59, %c0_60] : memref<9x128x128xbf16, #tpu.memory_space<vmem>>, vector<1x128x128xbf16>
    %50 = vector.shape_cast %49 : vector<1x128x128xbf16> to vector<128x128xbf16>
    %cst_61 = arith.constant dense<0.000000e+00> : vector<1x128xf32>
    %51 = tpu.matmul %48, %50, %cst_61 {dimension_numbers = #tpu.dot_dimension_numbers<[1], [0], [0], [1], [0, 0, 1, 1], [], []>} : vector<1x128xbf16>, vector<128x128xbf16>, vector<1x128xf32> -> vector<1x128xf32>
    %52 = arith.addf %46, %51 : vector<1x128xf32>
    %53 = arith.truncf %52 : vector<1x128xf32> to vector<1x128xbf16>
    %c0_62 = arith.constant 0 : index
    %c0_63 = arith.constant 0 : index
    %c0_64 = arith.constant 0 : index
    %54 = vector.load %arg4[%c0_62, %c0_63, %c0_64] : memref<1x1x128xbf16, #tpu.memory_space<vmem>>, vector<1x1x128xbf16>
    %55 = vector.shape_cast %54 : vector<1x1x128xbf16> to vector<1x128xbf16>
    %56 = vector.shape_cast %53 : vector<1x128xbf16> to vector<1x1x128xbf16>
    tpu.vector_store %arg4[%c0_62, %c0_63, %c0_64], %56 {strides = array<i32>} : memref<1x1x128xbf16, #tpu.memory_space<vmem>>, vector<1x1x128xbf16>,
    %cst_65 = arith.constant dense<0.000000e+00> : vector<128xf32>
    %57 = vector.multi_reduction <add>, %52, %cst_65 [0] : vector<1x128xf32> to vector<128xf32>
    %58 = vector.shape_cast %57 : vector<128xf32> to vector<1x128xf32>
    %c0_66 = arith.constant 0 : index
    %c0_67 = arith.constant 0 : index
    %c0_68 = arith.constant 0 : index
    %59 = vector.load %arg5[%c0_66, %c0_67, %c0_68] : memref<1x2x128xf32, #tpu.memory_space<vmem>>, vector<1x1x128xf32>
    %60 = vector.shape_cast %59 : vector<1x1x128xf32> to vector<1x128xf32>
    %61 = vector.shape_cast %58 : vector<1x128xf32> to vector<1x1x128xf32>
    tpu.vector_store %arg5[%c0_66, %c0_67, %c0_68], %61 {strides = array<i32>} : memref<1x2x128xf32, #tpu.memory_space<vmem>>, vector<1x1x128xf32>,
    %62 = arith.mulf %52, %52 : vector<1x128xf32>
    %cst_69 = arith.constant dense<0.000000e+00> : vector<128xf32>
    %63 = vector.multi_reduction <add>, %62, %cst_69 [0] : vector<1x128xf32> to vector<128xf32>
    %64 = vector.shape_cast %63 : vector<128xf32> to vector<1x128xf32>
    %c0_70 = arith.constant 0 : index
    %c1_71 = arith.constant 1 : index
    %c0_72 = arith.constant 0 : index
    %65 = vector.load %arg5[%c0_70, %c1_71, %c0_72] : memref<1x2x128xf32, #tpu.memory_space<vmem>>, vector<1x1x128xf32>
    %66 = vector.shape_cast %65 : vector<1x1x128xf32> to vector<1x128xf32>
    %67 = vector.shape_cast %64 : vector<1x128xf32> to vector<1x1x128xf32>
    tpu.vector_store %arg5[%c0_70, %c1_71, %c0_72], %67 {strides = array<i32>} : memref<1x2x128xf32, #tpu.memory_space<vmem>>, vector<1x1x128xf32>,
    %c0_73 = arith.constant 0 : index
    %c4_74 = arith.constant 4 : index
    %c0_75 = arith.constant 0 : index
    %c0_76 = arith.constant 0 : index
    %68 = vector.load %arg1[%c0_73, %c4_74, %c0_75, %c0_76] : memref<1x9x1x128xbf16, #tpu.memory_space<vmem>>, vector<1x1x1x128xbf16>
    %69 = vector.shape_cast %68 : vector<1x1x1x128xbf16> to vector<1x128xbf16>
    %c0_77 = arith.constant 0 : index
    %c0_78 = arith.constant 0 : index
    %70 = vector.load %arg3[%c0_77, %c0_78] : memref<128x128xbf16, #tpu.memory_space<vmem>>, vector<128x128xbf16>
    %cst_79 = arith.constant dense<0.000000e+00> : vector<1x128xf32>
    %71 = tpu.matmul %69, %70, %cst_79 {dimension_numbers = #tpu.dot_dimension_numbers<[1], [0], [0], [1], [0, 0, 1, 1], [], []>} : vector<1x128xbf16>, vector<128x128xbf16>, vector<1x128xf32> -> vector<1x128xf32>
    %72 = arith.truncf %71 : vector<1x128xf32> to vector<1x128xbf16>
    %c0_80 = arith.constant 0 : index
    %c0_81 = arith.constant 0 : index
    %c0_82 = arith.constant 0 : index
    %73 = vector.load %arg6[%c0_80, %c0_81, %c0_82] : memref<1x1x128xbf16, #tpu.memory_space<vmem>>, vector<1x1x128xbf16>
    %74 = vector.shape_cast %73 : vector<1x1x128xbf16> to vector<1x128xbf16>
    %75 = vector.shape_cast %72 : vector<1x128xbf16> to vector<1x1x128xbf16>
    tpu.vector_store %arg6[%c0_80, %c0_81, %c0_82], %75 {strides = array<i32>} : memref<1x1x128xbf16, #tpu.memory_space<vmem>>, vector<1x1x128xbf16>,
    %cst_83 = arith.constant dense<0.000000e+00> : vector<128xf32>
    %76 = vector.multi_reduction <add>, %71, %cst_83 [0] : vector<1x128xf32> to vector<128xf32>
    %77 = vector.shape_cast %76 : vector<128xf32> to vector<1x128xf32>
    %c0_84 = arith.constant 0 : index
    %c0_85 = arith.constant 0 : index
    %c0_86 = arith.constant 0 : index
    %78 = vector.load %arg7[%c0_84, %c0_85, %c0_86] : memref<1x2x128xf32, #tpu.memory_space<vmem>>, vector<1x1x128xf32>
    %79 = vector.shape_cast %78 : vector<1x1x128xf32> to vector<1x128xf32>
    %80 = vector.shape_cast %77 : vector<1x128xf32> to vector<1x1x128xf32>
    tpu.vector_store %arg7[%c0_84, %c0_85, %c0_86], %80 {strides = array<i32>} : memref<1x2x128xf32, #tpu.memory_space<vmem>>, vector<1x1x128xf32>,
    %81 = arith.mulf %71, %71 : vector<1x128xf32>
    %cst_87 = arith.constant dense<0.000000e+00> : vector<128xf32>
    %82 = vector.multi_reduction <add>, %81, %cst_87 [0] : vector<1x128xf32> to vector<128xf32>
    %83 = vector.shape_cast %82 : vector<128xf32> to vector<1x128xf32>
    %c0_88 = arith.constant 0 : index
    %c1_89 = arith.constant 1 : index
    %c0_90 = arith.constant 0 : index
    %84 = vector.load %arg7[%c0_88, %c1_89, %c0_90] : memref<1x2x128xf32, #tpu.memory_space<vmem>>, vector<1x1x128xf32>
    %85 = vector.shape_cast %84 : vector<1x1x128xf32> to vector<1x128xf32>
    %86 = vector.shape_cast %83 : vector<1x128xf32> to vector<1x1x128xf32>
    tpu.vector_store %arg7[%c0_88, %c1_89, %c0_90], %86 {strides = array<i32>} : memref<1x2x128xf32, #tpu.memory_space<vmem>>, vector<1x1x128xf32>,
    return
  }
  func.func @transform_0(%arg0: i32) -> (i32, i32, i32, i32) {
    %c0_i32 = arith.constant 0 : i32
    %c0_i32_0 = arith.constant 0 : i32
    %c0_i32_1 = arith.constant 0 : i32
    %c0_i32_2 = arith.constant 0 : i32
    return %arg0, %c0_i32, %c0_i32_0, %c0_i32_1 : i32, i32, i32, i32
  }
  func.func @transform_1(%arg0: i32) -> (i32, i32, i32) {
    %c0_i32 = arith.constant 0 : i32
    %c0_i32_0 = arith.constant 0 : i32
    %c0_i32_1 = arith.constant 0 : i32
    %c0_i32_2 = arith.constant 0 : i32
    return %c0_i32, %c0_i32_0, %c0_i32_1 : i32, i32, i32
  }
  func.func @transform_2(%arg0: i32) -> (i32, i32) {
    %c0_i32 = arith.constant 0 : i32
    %c0_i32_0 = arith.constant 0 : i32
    %c0_i32_1 = arith.constant 0 : i32
    return %c0_i32, %c0_i32_0 : i32, i32
  }
  func.func @transform_3(%arg0: i32) -> (i32, i32, i32) {
    %c0_i32 = arith.constant 0 : i32
    %c0_i32_0 = arith.constant 0 : i32
    %c0_i32_1 = arith.constant 0 : i32
    return %arg0, %c0_i32, %c0_i32_0 : i32, i32, i32
  }
  func.func @transform_4(%arg0: i32) -> (i32, i32, i32) {
    %c0_i32 = arith.constant 0 : i32
    %c0_i32_0 = arith.constant 0 : i32
    %c0_i32_1 = arith.constant 0 : i32
    return %arg0, %c0_i32, %c0_i32_0 : i32, i32, i32
  }
  func.func @transform_5(%arg0: i32) -> (i32, i32, i32) {
    %c0_i32 = arith.constant 0 : i32
    %c0_i32_0 = arith.constant 0 : i32
    %c0_i32_1 = arith.constant 0 : i32
    return %arg0, %c0_i32, %c0_i32_0 : i32, i32, i32
  }
  func.func @transform_6(%arg0: i32) -> (i32, i32, i32) {
    %c0_i32 = arith.constant 0 : i32
    %c0_i32_0 = arith.constant 0 : i32
    %c0_i32_1 = arith.constant 0 : i32
    return %arg0, %c0_i32, %c0_i32_0 : i32, i32, i32
  }
}

module attributes {stable_mosaic.version = 11 : i64} {
  func.func @_bn_add_relu_kernel(%arg0: i32, %arg1: memref<1x1x128xbf16, #tpu.memory_space<vmem>>, %arg2: memref<2x128xf32, #tpu.memory_space<vmem>>, %arg3: memref<1x128xf32, #tpu.memory_space<vmem>>, %arg4: memref<1x128xf32, #tpu.memory_space<vmem>>, %arg5: memref<1x1x128xbf16, #tpu.memory_space<vmem>>, %arg6: memref<2x128xf32, #tpu.memory_space<vmem>>, %arg7: memref<1x128xf32, #tpu.memory_space<vmem>>, %arg8: memref<1x128xf32, #tpu.memory_space<vmem>>, %arg9: memref<1x1x128xbf16, #tpu.memory_space<vmem>>) attributes {dimension_semantics = [#tpu.dimension_semantics<parallel>], iteration_bounds = array<i64: 2>, scalar_prefetch = 0 : i64, scratch_operands = 0 : i64, tpu.core_type = #tpu.core_type<tc>, window_params = [{transform_indices = @transform_0, window_bounds = array<i64: 1, 1, 128>}, {pipeline_mode = #tpu.pipeline_mode<synchronous>, transform_indices = @transform_1, window_bounds = array<i64: 2, 128>}, {pipeline_mode = #tpu.pipeline_mode<synchronous>, transform_indices = @transform_2, window_bounds = array<i64: 1, 128>}, {pipeline_mode = #tpu.pipeline_mode<synchronous>, transform_indices = @transform_3, window_bounds = array<i64: 1, 128>}, {transform_indices = @transform_4, window_bounds = array<i64: 1, 1, 128>}, {pipeline_mode = #tpu.pipeline_mode<synchronous>, transform_indices = @transform_5, window_bounds = array<i64: 2, 128>}, {pipeline_mode = #tpu.pipeline_mode<synchronous>, transform_indices = @transform_6, window_bounds = array<i64: 1, 128>}, {pipeline_mode = #tpu.pipeline_mode<synchronous>, transform_indices = @transform_7, window_bounds = array<i64: 1, 128>}, {transform_indices = @transform_8, window_bounds = array<i64: 1, 1, 128>}]} {
    %c0 = arith.constant 0 : index
    %c0_0 = arith.constant 0 : index
    %c0_1 = arith.constant 0 : index
    %0 = vector.load %arg1[%c0, %c0_0, %c0_1] : memref<1x1x128xbf16, #tpu.memory_space<vmem>>, vector<1x1x128xbf16>
    %1 = vector.shape_cast %0 : vector<1x1x128xbf16> to vector<1x128xbf16>
    %2 = arith.extf %1 : vector<1x128xbf16> to vector<1x128xf32>
    %c0_2 = arith.constant 0 : index
    %c0_3 = arith.constant 0 : index
    %3 = vector.load %arg2[%c0_2, %c0_3] : memref<2x128xf32, #tpu.memory_space<vmem>>, vector<2x128xf32>
    %c0_4 = arith.constant 0 : index
    %c0_5 = arith.constant 0 : index
    %4 = vector.load %arg3[%c0_4, %c0_5] : memref<1x128xf32, #tpu.memory_space<vmem>>, vector<1x128xf32>
    %c0_6 = arith.constant 0 : index
    %c0_7 = arith.constant 0 : index
    %5 = vector.load %arg4[%c0_6, %c0_7] : memref<1x128xf32, #tpu.memory_space<vmem>>, vector<1x128xf32>
    %6 = vector.extract_strided_slice %3 {offsets = [0, 0], sizes = [1, 128], strides = [1, 1]} : vector<2x128xf32> to vector<1x128xf32>
    %cst = arith.constant 5.000000e-01 : f32
    %7 = vector.broadcast %cst : f32 to vector<1x128xf32>
    %8 = arith.mulf %6, %7 : vector<1x128xf32>
    %9 = vector.extract_strided_slice %3 {offsets = [1, 0], sizes = [1, 128], strides = [1, 1]} : vector<2x128xf32> to vector<1x128xf32>
    %cst_8 = arith.constant 5.000000e-01 : f32
    %10 = vector.broadcast %cst_8 : f32 to vector<1x128xf32>
    %11 = arith.mulf %9, %10 : vector<1x128xf32>
    %12 = arith.mulf %8, %8 : vector<1x128xf32>
    %13 = arith.subf %11, %12 : vector<1x128xf32>
    %cst_9 = arith.constant 0.000000e+00 : f32
    %14 = vector.broadcast %cst_9 : f32 to vector<1x128xf32>
    %15 = arith.maximumf %13, %14 : vector<1x128xf32>
    %cst_10 = arith.constant 9.99999974E-6 : f32
    %16 = vector.broadcast %cst_10 : f32 to vector<1x128xf32>
    %17 = arith.addf %15, %16 : vector<1x128xf32>
    %18 = math.rsqrt %17 : vector<1x128xf32>
    %19 = arith.mulf %4, %18 : vector<1x128xf32>
    %20 = arith.mulf %8, %19 : vector<1x128xf32>
    %21 = arith.subf %5, %20 : vector<1x128xf32>
    %22 = arith.mulf %2, %19 : vector<1x128xf32>
    %23 = arith.addf %22, %21 : vector<1x128xf32>
    %c0_11 = arith.constant 0 : index
    %c0_12 = arith.constant 0 : index
    %c0_13 = arith.constant 0 : index
    %24 = vector.load %arg5[%c0_11, %c0_12, %c0_13] : memref<1x1x128xbf16, #tpu.memory_space<vmem>>, vector<1x1x128xbf16>
    %25 = vector.shape_cast %24 : vector<1x1x128xbf16> to vector<1x128xbf16>
    %26 = arith.extf %25 : vector<1x128xbf16> to vector<1x128xf32>
    %c0_14 = arith.constant 0 : index
    %c0_15 = arith.constant 0 : index
    %27 = vector.load %arg6[%c0_14, %c0_15] : memref<2x128xf32, #tpu.memory_space<vmem>>, vector<2x128xf32>
    %c0_16 = arith.constant 0 : index
    %c0_17 = arith.constant 0 : index
    %28 = vector.load %arg7[%c0_16, %c0_17] : memref<1x128xf32, #tpu.memory_space<vmem>>, vector<1x128xf32>
    %c0_18 = arith.constant 0 : index
    %c0_19 = arith.constant 0 : index
    %29 = vector.load %arg8[%c0_18, %c0_19] : memref<1x128xf32, #tpu.memory_space<vmem>>, vector<1x128xf32>
    %30 = vector.extract_strided_slice %27 {offsets = [0, 0], sizes = [1, 128], strides = [1, 1]} : vector<2x128xf32> to vector<1x128xf32>
    %cst_20 = arith.constant 5.000000e-01 : f32
    %31 = vector.broadcast %cst_20 : f32 to vector<1x128xf32>
    %32 = arith.mulf %30, %31 : vector<1x128xf32>
    %33 = vector.extract_strided_slice %27 {offsets = [1, 0], sizes = [1, 128], strides = [1, 1]} : vector<2x128xf32> to vector<1x128xf32>
    %cst_21 = arith.constant 5.000000e-01 : f32
    %34 = vector.broadcast %cst_21 : f32 to vector<1x128xf32>
    %35 = arith.mulf %33, %34 : vector<1x128xf32>
    %36 = arith.mulf %32, %32 : vector<1x128xf32>
    %37 = arith.subf %35, %36 : vector<1x128xf32>
    %cst_22 = arith.constant 0.000000e+00 : f32
    %38 = vector.broadcast %cst_22 : f32 to vector<1x128xf32>
    %39 = arith.maximumf %37, %38 : vector<1x128xf32>
    %cst_23 = arith.constant 9.99999974E-6 : f32
    %40 = vector.broadcast %cst_23 : f32 to vector<1x128xf32>
    %41 = arith.addf %39, %40 : vector<1x128xf32>
    %42 = math.rsqrt %41 : vector<1x128xf32>
    %43 = arith.mulf %28, %42 : vector<1x128xf32>
    %44 = arith.mulf %32, %43 : vector<1x128xf32>
    %45 = arith.subf %29, %44 : vector<1x128xf32>
    %46 = arith.mulf %26, %43 : vector<1x128xf32>
    %47 = arith.addf %46, %45 : vector<1x128xf32>
    %48 = arith.addf %23, %47 : vector<1x128xf32>
    %cst_24 = arith.constant 0.000000e+00 : f32
    %49 = vector.broadcast %cst_24 : f32 to vector<1x128xf32>
    %50 = arith.maximumf %48, %49 : vector<1x128xf32>
    %51 = arith.truncf %50 : vector<1x128xf32> to vector<1x128xbf16>
    %c0_25 = arith.constant 0 : index
    %c0_26 = arith.constant 0 : index
    %c0_27 = arith.constant 0 : index
    %52 = vector.load %arg9[%c0_25, %c0_26, %c0_27] : memref<1x1x128xbf16, #tpu.memory_space<vmem>>, vector<1x1x128xbf16>
    %53 = vector.shape_cast %52 : vector<1x1x128xbf16> to vector<1x128xbf16>
    %54 = vector.shape_cast %51 : vector<1x128xbf16> to vector<1x1x128xbf16>
    tpu.vector_store %arg9[%c0_25, %c0_26, %c0_27], %54 {strides = array<i32>} : memref<1x1x128xbf16, #tpu.memory_space<vmem>>, vector<1x1x128xbf16>,
    return
  }
  func.func @transform_0(%arg0: i32) -> (i32, i32, i32) {
    %c0_i32 = arith.constant 0 : i32
    %c0_i32_0 = arith.constant 0 : i32
    %c0_i32_1 = arith.constant 0 : i32
    return %arg0, %c0_i32, %c0_i32_0 : i32, i32, i32
  }
  func.func @transform_1(%arg0: i32) -> (i32, i32) {
    %c0_i32 = arith.constant 0 : i32
    %c0_i32_0 = arith.constant 0 : i32
    %c0_i32_1 = arith.constant 0 : i32
    return %c0_i32, %c0_i32_0 : i32, i32
  }
  func.func @transform_2(%arg0: i32) -> (i32, i32) {
    %c0_i32 = arith.constant 0 : i32
    %c0_i32_0 = arith.constant 0 : i32
    %c0_i32_1 = arith.constant 0 : i32
    return %c0_i32, %c0_i32_0 : i32, i32
  }
  func.func @transform_3(%arg0: i32) -> (i32, i32) {
    %c0_i32 = arith.constant 0 : i32
    %c0_i32_0 = arith.constant 0 : i32
    %c0_i32_1 = arith.constant 0 : i32
    return %c0_i32, %c0_i32_0 : i32, i32
  }
  func.func @transform_4(%arg0: i32) -> (i32, i32, i32) {
    %c0_i32 = arith.constant 0 : i32
    %c0_i32_0 = arith.constant 0 : i32
    %c0_i32_1 = arith.constant 0 : i32
    return %arg0, %c0_i32, %c0_i32_0 : i32, i32, i32
  }
  func.func @transform_5(%arg0: i32) -> (i32, i32) {
    %c0_i32 = arith.constant 0 : i32
    %c0_i32_0 = arith.constant 0 : i32
    %c0_i32_1 = arith.constant 0 : i32
    return %c0_i32, %c0_i32_0 : i32, i32
  }
  func.func @transform_6(%arg0: i32) -> (i32, i32) {
    %c0_i32 = arith.constant 0 : i32
    %c0_i32_0 = arith.constant 0 : i32
    %c0_i32_1 = arith.constant 0 : i32
    return %c0_i32, %c0_i32_0 : i32, i32
  }
  func.func @transform_7(%arg0: i32) -> (i32, i32) {
    %c0_i32 = arith.constant 0 : i32
    %c0_i32_0 = arith.constant 0 : i32
    %c0_i32_1 = arith.constant 0 : i32
    return %c0_i32, %c0_i32_0 : i32, i32
  }
  func.func @transform_8(%arg0: i32) -> (i32, i32, i32) {
    %c0_i32 = arith.constant 0 : i32
    %c0_i32_0 = arith.constant 0 : i32
    %c0_i32_1 = arith.constant 0 : i32
    return %arg0, %c0_i32, %c0_i32_0 : i32, i32, i32
  }
}

module attributes {stable_mosaic.version = 11 : i64} {
  func.func @_conv_s1_kernel(%arg0: i32, %arg1: memref<1x1x128xbf16, #tpu.memory_space<vmem>>, %arg2: memref<9x128x128xbf16, #tpu.memory_space<vmem>>, %arg3: memref<128x128xbf16, #tpu.memory_space<vmem>>, %arg4: memref<1x1x128xbf16, #tpu.memory_space<vmem>>, %arg5: memref<1x2x128xf32, #tpu.memory_space<vmem>>, %arg6: memref<1x1x128xbf16, #tpu.memory_space<vmem>>, %arg7: memref<1x2x128xf32, #tpu.memory_space<vmem>>, %arg8: memref<16x128xbf16, #tpu.memory_space<vmem>>) attributes {dimension_semantics = [#tpu.dimension_semantics<parallel>], iteration_bounds = array<i64: 2>, scalar_prefetch = 0 : i64, scratch_operands = 1 : i64, tpu.core_type = #tpu.core_type<tc>, window_params = [{transform_indices = @transform_0, window_bounds = array<i64: 1, 1, 128>}, {pipeline_mode = #tpu.pipeline_mode<synchronous>, transform_indices = @transform_1, window_bounds = array<i64: 9, 128, 128>}, {pipeline_mode = #tpu.pipeline_mode<synchronous>, transform_indices = @transform_2, window_bounds = array<i64: 128, 128>}, {transform_indices = @transform_3, window_bounds = array<i64: 1, 1, 128>}, {transform_indices = @transform_4, window_bounds = array<i64: 1, 2, 128>}, {transform_indices = @transform_5, window_bounds = array<i64: 1, 1, 128>}, {transform_indices = @transform_6, window_bounds = array<i64: 1, 2, 128>}]} {
    %cst = arith.constant 0.000000e+00 : bf16
    %0 = vector.broadcast %cst : bf16 to vector<16x128xbf16>
    %c0 = arith.constant 0 : index
    %c0_0 = arith.constant 0 : index
    %1 = vector.load %arg8[%c0, %c0_0] : memref<16x128xbf16, #tpu.memory_space<vmem>>, vector<16x128xbf16>
    tpu.vector_store %arg8[%c0, %c0_0], %0 {strides = array<i32>} : memref<16x128xbf16, #tpu.memory_space<vmem>>, vector<16x128xbf16>,
    %c0_1 = arith.constant 0 : index
    %c0_2 = arith.constant 0 : index
    %c0_3 = arith.constant 0 : index
    %2 = vector.load %arg1[%c0_1, %c0_2, %c0_3] : memref<1x1x128xbf16, #tpu.memory_space<vmem>>, vector<1x1x128xbf16>
    %3 = vector.shape_cast %2 : vector<1x1x128xbf16> to vector<1x128xbf16>
    %c8 = arith.constant 8 : index
    %c0_4 = arith.constant 0 : index
    %4 = vector.load %arg8[%c8, %c0_4] : memref<16x128xbf16, #tpu.memory_space<vmem>>, vector<1x128xbf16>
    tpu.vector_store %arg8[%c8, %c0_4], %3 {strides = array<i32>} : memref<16x128xbf16, #tpu.memory_space<vmem>>, vector<1x128xbf16>,
    %cst_5 = arith.constant 0.000000e+00 : f32
    %5 = vector.broadcast %cst_5 : f32 to vector<1x128xf32>
    %c8_6 = arith.constant 8 : index
    %c0_7 = arith.constant 0 : index
    %6 = vector.load %arg8[%c8_6, %c0_7] : memref<16x128xbf16, #tpu.memory_space<vmem>>, vector<1x128xbf16>
    %c4 = arith.constant 4 : index
    %c0_8 = arith.constant 0 : index
    %c0_9 = arith.constant 0 : index
    %7 = vector.load %arg2[%c4, %c0_8, %c0_9] : memref<9x128x128xbf16, #tpu.memory_space<vmem>>, vector<1x128x128xbf16>
    %8 = vector.shape_cast %7 : vector<1x128x128xbf16> to vector<128x128xbf16>
    %cst_10 = arith.constant dense<0.000000e+00> : vector<1x128xf32>
    %9 = tpu.matmul %6, %8, %cst_10 {dimension_numbers = #tpu.dot_dimension_numbers<[1], [0], [0], [1], [0, 0, 1, 1], [], []>} : vector<1x128xbf16>, vector<128x128xbf16>, vector<1x128xf32> -> vector<1x128xf32>
    %10 = arith.addf %5, %9 : vector<1x128xf32>
    %11 = arith.truncf %10 : vector<1x128xf32> to vector<1x128xbf16>
    %c0_11 = arith.constant 0 : index
    %c0_12 = arith.constant 0 : index
    %c0_13 = arith.constant 0 : index
    %12 = vector.load %arg4[%c0_11, %c0_12, %c0_13] : memref<1x1x128xbf16, #tpu.memory_space<vmem>>, vector<1x1x128xbf16>
    %13 = vector.shape_cast %12 : vector<1x1x128xbf16> to vector<1x128xbf16>
    %14 = vector.shape_cast %11 : vector<1x128xbf16> to vector<1x1x128xbf16>
    tpu.vector_store %arg4[%c0_11, %c0_12, %c0_13], %14 {strides = array<i32>} : memref<1x1x128xbf16, #tpu.memory_space<vmem>>, vector<1x1x128xbf16>,
    %cst_14 = arith.constant dense<0.000000e+00> : vector<128xf32>
    %15 = vector.multi_reduction <add>, %10, %cst_14 [0] : vector<1x128xf32> to vector<128xf32>
    %16 = vector.shape_cast %15 : vector<128xf32> to vector<1x128xf32>
    %c0_15 = arith.constant 0 : index
    %c0_16 = arith.constant 0 : index
    %c0_17 = arith.constant 0 : index
    %17 = vector.load %arg5[%c0_15, %c0_16, %c0_17] : memref<1x2x128xf32, #tpu.memory_space<vmem>>, vector<1x1x128xf32>
    %18 = vector.shape_cast %17 : vector<1x1x128xf32> to vector<1x128xf32>
    %19 = vector.shape_cast %16 : vector<1x128xf32> to vector<1x1x128xf32>
    tpu.vector_store %arg5[%c0_15, %c0_16, %c0_17], %19 {strides = array<i32>} : memref<1x2x128xf32, #tpu.memory_space<vmem>>, vector<1x1x128xf32>,
    %20 = arith.mulf %10, %10 : vector<1x128xf32>
    %cst_18 = arith.constant dense<0.000000e+00> : vector<128xf32>
    %21 = vector.multi_reduction <add>, %20, %cst_18 [0] : vector<1x128xf32> to vector<128xf32>
    %22 = vector.shape_cast %21 : vector<128xf32> to vector<1x128xf32>
    %c0_19 = arith.constant 0 : index
    %c1 = arith.constant 1 : index
    %c0_20 = arith.constant 0 : index
    %23 = vector.load %arg5[%c0_19, %c1, %c0_20] : memref<1x2x128xf32, #tpu.memory_space<vmem>>, vector<1x1x128xf32>
    %24 = vector.shape_cast %23 : vector<1x1x128xf32> to vector<1x128xf32>
    %25 = vector.shape_cast %22 : vector<1x128xf32> to vector<1x1x128xf32>
    tpu.vector_store %arg5[%c0_19, %c1, %c0_20], %25 {strides = array<i32>} : memref<1x2x128xf32, #tpu.memory_space<vmem>>, vector<1x1x128xf32>,
    %c8_21 = arith.constant 8 : index
    %c0_22 = arith.constant 0 : index
    %26 = vector.load %arg8[%c8_21, %c0_22] : memref<16x128xbf16, #tpu.memory_space<vmem>>, vector<1x128xbf16>
    %c0_23 = arith.constant 0 : index
    %c0_24 = arith.constant 0 : index
    %27 = vector.load %arg3[%c0_23, %c0_24] : memref<128x128xbf16, #tpu.memory_space<vmem>>, vector<128x128xbf16>
    %cst_25 = arith.constant dense<0.000000e+00> : vector<1x128xf32>
    %28 = tpu.matmul %26, %27, %cst_25 {dimension_numbers = #tpu.dot_dimension_numbers<[1], [0], [0], [1], [0, 0, 1, 1], [], []>} : vector<1x128xbf16>, vector<128x128xbf16>, vector<1x128xf32> -> vector<1x128xf32>
    %29 = arith.truncf %28 : vector<1x128xf32> to vector<1x128xbf16>
    %c0_26 = arith.constant 0 : index
    %c0_27 = arith.constant 0 : index
    %c0_28 = arith.constant 0 : index
    %30 = vector.load %arg6[%c0_26, %c0_27, %c0_28] : memref<1x1x128xbf16, #tpu.memory_space<vmem>>, vector<1x1x128xbf16>
    %31 = vector.shape_cast %30 : vector<1x1x128xbf16> to vector<1x128xbf16>
    %32 = vector.shape_cast %29 : vector<1x128xbf16> to vector<1x1x128xbf16>
    tpu.vector_store %arg6[%c0_26, %c0_27, %c0_28], %32 {strides = array<i32>} : memref<1x1x128xbf16, #tpu.memory_space<vmem>>, vector<1x1x128xbf16>,
    %cst_29 = arith.constant dense<0.000000e+00> : vector<128xf32>
    %33 = vector.multi_reduction <add>, %28, %cst_29 [0] : vector<1x128xf32> to vector<128xf32>
    %34 = vector.shape_cast %33 : vector<128xf32> to vector<1x128xf32>
    %c0_30 = arith.constant 0 : index
    %c0_31 = arith.constant 0 : index
    %c0_32 = arith.constant 0 : index
    %35 = vector.load %arg7[%c0_30, %c0_31, %c0_32] : memref<1x2x128xf32, #tpu.memory_space<vmem>>, vector<1x1x128xf32>
    %36 = vector.shape_cast %35 : vector<1x1x128xf32> to vector<1x128xf32>
    %37 = vector.shape_cast %34 : vector<1x128xf32> to vector<1x1x128xf32>
    tpu.vector_store %arg7[%c0_30, %c0_31, %c0_32], %37 {strides = array<i32>} : memref<1x2x128xf32, #tpu.memory_space<vmem>>, vector<1x1x128xf32>,
    %38 = arith.mulf %28, %28 : vector<1x128xf32>
    %cst_33 = arith.constant dense<0.000000e+00> : vector<128xf32>
    %39 = vector.multi_reduction <add>, %38, %cst_33 [0] : vector<1x128xf32> to vector<128xf32>
    %40 = vector.shape_cast %39 : vector<128xf32> to vector<1x128xf32>
    %c0_34 = arith.constant 0 : index
    %c1_35 = arith.constant 1 : index
    %c0_36 = arith.constant 0 : index
    %41 = vector.load %arg7[%c0_34, %c1_35, %c0_36] : memref<1x2x128xf32, #tpu.memory_space<vmem>>, vector<1x1x128xf32>
    %42 = vector.shape_cast %41 : vector<1x1x128xf32> to vector<1x128xf32>
    %43 = vector.shape_cast %40 : vector<1x128xf32> to vector<1x1x128xf32>
    tpu.vector_store %arg7[%c0_34, %c1_35, %c0_36], %43 {strides = array<i32>} : memref<1x2x128xf32, #tpu.memory_space<vmem>>, vector<1x1x128xf32>,
    return
  }
  func.func @transform_0(%arg0: i32) -> (i32, i32, i32) {
    %c0_i32 = arith.constant 0 : i32
    %c0_i32_0 = arith.constant 0 : i32
    %c0_i32_1 = arith.constant 0 : i32
    return %arg0, %c0_i32, %c0_i32_0 : i32, i32, i32
  }
  func.func @transform_1(%arg0: i32) -> (i32, i32, i32) {
    %c0_i32 = arith.constant 0 : i32
    %c0_i32_0 = arith.constant 0 : i32
    %c0_i32_1 = arith.constant 0 : i32
    %c0_i32_2 = arith.constant 0 : i32
    return %c0_i32, %c0_i32_0, %c0_i32_1 : i32, i32, i32
  }
  func.func @transform_2(%arg0: i32) -> (i32, i32) {
    %c0_i32 = arith.constant 0 : i32
    %c0_i32_0 = arith.constant 0 : i32
    %c0_i32_1 = arith.constant 0 : i32
    return %c0_i32, %c0_i32_0 : i32, i32
  }
  func.func @transform_3(%arg0: i32) -> (i32, i32, i32) {
    %c0_i32 = arith.constant 0 : i32
    %c0_i32_0 = arith.constant 0 : i32
    %c0_i32_1 = arith.constant 0 : i32
    return %arg0, %c0_i32, %c0_i32_0 : i32, i32, i32
  }
  func.func @transform_4(%arg0: i32) -> (i32, i32, i32) {
    %c0_i32 = arith.constant 0 : i32
    %c0_i32_0 = arith.constant 0 : i32
    %c0_i32_1 = arith.constant 0 : i32
    return %arg0, %c0_i32, %c0_i32_0 : i32, i32, i32
  }
  func.func @transform_5(%arg0: i32) -> (i32, i32, i32) {
    %c0_i32 = arith.constant 0 : i32
    %c0_i32_0 = arith.constant 0 : i32
    %c0_i32_1 = arith.constant 0 : i32
    return %arg0, %c0_i32, %c0_i32_0 : i32, i32, i32
  }
  func.func @transform_6(%arg0: i32) -> (i32, i32, i32) {
    %c0_i32 = arith.constant 0 : i32
    %c0_i32_0 = arith.constant 0 : i32
    %c0_i32_1 = arith.constant 0 : i32
    return %arg0, %c0_i32, %c0_i32_0 : i32, i32, i32
  }
}

module attributes {stable_mosaic.version = 11 : i64} {
  func.func @_head_kernel(%arg0: memref<2x1x128xbf16, #tpu.memory_space<vmem>>, %arg1: memref<128x128xbf16, #tpu.memory_space<vmem>>, %arg2: memref<1x128xf32, #tpu.memory_space<vmem>>, %arg3: memref<2x128xf32, #tpu.memory_space<vmem>>) attributes {dimension_semantics = [], scalar_prefetch = 0 : i64, scratch_operands = 0 : i64, tpu.core_type = #tpu.core_type<tc>} {
    %c0 = arith.constant 0 : index
    %c0_0 = arith.constant 0 : index
    %c0_1 = arith.constant 0 : index
    %0 = vector.load %arg0[%c0, %c0_0, %c0_1] : memref<2x1x128xbf16, #tpu.memory_space<vmem>>, vector<2x1x128xbf16>
    %1 = arith.extf %0 : vector<2x1x128xbf16> to vector<2x1x128xf32>
    %cst = arith.constant dense<0.000000e+00> : vector<2x128xf32>
    %2 = vector.multi_reduction <add>, %1, %cst [1] : vector<2x1x128xf32> to vector<2x128xf32>
    %cst_2 = arith.constant 1.000000e+00 : f32
    %3 = vector.broadcast %cst_2 : f32 to vector<2x128xf32>
    %4 = arith.mulf %2, %3 : vector<2x128xf32>
    %5 = arith.truncf %4 : vector<2x128xf32> to vector<2x128xbf16>
    %c0_3 = arith.constant 0 : index
    %c0_4 = arith.constant 0 : index
    %6 = vector.load %arg1[%c0_3, %c0_4] : memref<128x128xbf16, #tpu.memory_space<vmem>>, vector<128x128xbf16>
    %cst_5 = arith.constant dense<0.000000e+00> : vector<2x128xf32>
    %7 = tpu.matmul %5, %6, %cst_5 {dimension_numbers = #tpu.dot_dimension_numbers<[1], [0], [0], [1], [0, 0, 1, 1], [], []>} : vector<2x128xbf16>, vector<128x128xbf16>, vector<2x128xf32> -> vector<2x128xf32>
    %c0_6 = arith.constant 0 : index
    %c0_7 = arith.constant 0 : index
    %8 = vector.load %arg2[%c0_6, %c0_7] : memref<1x128xf32, #tpu.memory_space<vmem>>, vector<1x128xf32>
    %9 = vector.broadcast %8 : vector<1x128xf32> to vector<2x128xf32>
    %10 = arith.addf %7, %9 : vector<2x128xf32>
    %c0_8 = arith.constant 0 : index
    %c0_9 = arith.constant 0 : index
    %11 = vector.load %arg3[%c0_8, %c0_9] : memref<2x128xf32, #tpu.memory_space<vmem>>, vector<2x128xf32>
    tpu.vector_store %arg3[%c0_8, %c0_9], %10 {strides = array<i32>} : memref<2x128xf32, #tpu.memory_space<vmem>>, vector<2x128xf32>,
    return
  }
}

</mosaic_0001>

<bundles_post_ra>
// kernel: _lambda_.23
= control target key start
LH: loop header
LB: loop body
LE: loop exit
PB: predicated region body
PF: predicated region fallthrough
CT: control target
= control target key end

     0   :  { %s493_s15 = smov 0   ;;  %s526_s0 = inlined_call_operand.vmem [shape: bf16[2,64,128], index: 0, kind: input, shape index: {}]   ;;  %s527_s1 = inlined_call_operand.vmem [shape: f32[2,128], index: 1, kind: input, shape index: {}]   ;;  %s528_s2 = inlined_call_operand.vmem [shape: f32[1,128], index: 2, kind: input, shape index: {}]   ;;  %s529_s3 = inlined_call_operand.vmem [shape: f32[1,128], index: 3, kind: input, shape index: {}]   ;;  %s530_s4 = inlined_call_operand.vmem [shape: bf16[2,64,128], index: 4, kind: output, shape index: {}]  }
   0x1 LB: > { %s377_s16 = sadd.s32 4294967295, %s465_s15   ;;  %p381_p0 = scmp.ge.s32.totalorder %s465_s15, 1  ;;  %s465_s15 = sphi %s493_s15, %s14_s15  }
   0x2   : > { %p162_p1 = scmp.lt.s32.totalorder %s465_s15, 3 }
   0x4   : > { %p163_p2 = pnand %p381_p0, %p162_p1 }
   0x5   : > { %p188_p3 = scmp.lt.s32.totalorder (!%p163_p2), %s377_s16, 1 }
   0x6   : > { %166 = sbr.rel (%p163_p2) target bundleno = 60 (0x3c), region = 36 }
   0xb   : > { %v198_v0 = vld [vmem:[%s527_s1] sm:$0x3]  ;;  %v467_v7 = vmov 1966171168   ;;  %v214_v9 = vlaneseq  ;;  %s532_s16 = smov (!%p188_p3, %s377_s16), 1 }
   0xc   : > { %v201_v1 = vmul.f32 0.0078125, %v198_v0  ;;  %v212_v8 = vunpack.c.l.s4 %v467_v7  ;;  %s396_s19 = sshll.u32 %s532_s16, 5  ;;  %v199_v16 = vld [vmem:[%s528_s2] sm:$0x1] }
   0xd   : > { %v215_v11 = vshrl.u32 %v214_v9, 7  ;;  %s192_s22 = scalar_lea.vmem %s526_s0, %s396_s19  ;;  %v200_v27 = vld [vmem:[%s529_s3] sm:$0x1]  ;;  %s197_s29 = scalar_lea.vmem %s530_s4, %s396_s19 }
   0xe   : > { %v202_v2 = vmul.f32 %v201_v1, %v201_v1  ;;  %v213_v10 = vunpack.c.0.s8 %v212_v8  ;;  %v407_v17 = vld [vmem:[%s192_s22] sm:$0xff]   ;;  %v442_v18 = vld [vmem:[%s192_s22 + $0x8] sm:$0xff]   ;;  %v443_v21 = vld [vmem:[%s192_s22 + $0x10] sm:$0xff]  }
   0xf   : > { %v249_v20 = vsub.s32 0, %v215_v11  ;;  %v444_v22 = vld [vmem:[%s192_s22 + $0x18] sm:$0xff]   ;;  %v408_v24 = vunpack.c.l.bf16 %v407_v17  ;;  %v409_v25 = vunpack.c.h.bf16 %v407_v17  ;;  %v412_v26 = vunpack.c.l.bf16 %v442_v18 }
  0x10   : > { %v204_v3 = vrot.slane %v202_v2, 7  ;;  %v216_v12 = vsub.s32 %v213_v10, %v215_v11  ;;  %v413_v28 = vunpack.c.h.bf16 %v442_v18  ;;  %v416_v29 = vunpack.c.l.bf16 %v443_v21 }
  0x11   : > { %v417_v30 = vunpack.c.h.bf16 %v443_v21  ;;  %v420_v31 = vunpack.c.l.bf16 %v444_v22  ;;  %v421_v34 = vunpack.c.h.bf16 %v444_v22 }
  0x12   : > { %v206_v4 = vsub.f32 %v201_v1, %v204_v3 }
  0x14   : > { %v207_v5 = vmax.f32 %v206_v4, 0.0 }
  0x16   : > { %v208_v6 = vadd.f32 1e-05, %v207_v5 }
  0x18   : > { %457 = vrsqrt.f32 %v208_v6 }
  0x25   : > { %v458_v13 = vpop.eup %457 }
  0x26   : > { %v217_v14 = vrot.slane %v458_v13, %v216_v12 }
  0x28   : > { %v218_v15 = vcombine.high %v217_v14, %v217_v14 }
  0x2a   : > { %v225_v19 = vrot.slane %v218_v15, %v216_v12 }
  0x2c   : > { %v227_v23 = vmul.f32 %v225_v19, %v199_v16 }
  0x2e   : > { %v228_v32 = vmul.f32 %v227_v23, %v201_v1  ;;  %v250_v33 = vrot.slane %v227_v23, %v249_v20 }
  0x30   : > { %v229_v35 = vsub.f32 %v200_v27, %v228_v32  ;;  %v252_v36 = vmul.f32 %v408_v24, %v250_v33  ;;  %v253_v37 = vmul.f32 %v409_v25, %v250_v33  ;;  %v254_v38 = vmul.f32 %v412_v26, %v250_v33 }
  0x31   : > { %v255_v39 = vmul.f32 %v413_v28, %v250_v33  ;;  %v256_v40 = vmul.f32 %v416_v29, %v250_v33  ;;  %v257_v41 = vmul.f32 %v417_v30, %v250_v33  ;;  %v258_v42 = vmul.f32 %v420_v31, %v250_v33 }
  0x32   : > { %v264_v43 = vrot.slane %v229_v35, %v249_v20  ;;  %v259_v44 = vmul.f32 %v421_v34, %v250_v33 }
  0x34   : > { %v266_v45 = vadd.f32 %v264_v43, %v252_v36  ;;  %v267_v46 = vadd.f32 %v264_v43, %v253_v37  ;;  %v268_v47 = vadd.f32 %v264_v43, %v254_v38  ;;  %v269_v48 = vadd.f32 %v264_v43, %v255_v39 }
  0x35   : > { %v270_v49 = vadd.f32 %v264_v43, %v256_v40  ;;  %v271_v50 = vadd.f32 %v264_v43, %v257_v41  ;;  %v272_v51 = vadd.f32 %v264_v43, %v258_v42  ;;  %v273_v52 = vadd.f32 %v264_v43, %v259_v44 }
  0x36   : > { %v274_v53 = vmax.f32 %v266_v45, 0.0  ;;  %v275_v54 = vmax.f32 %v267_v46, 0.0  ;;  %v276_v55 = vmax.f32 %v268_v47, 0.0  ;;  %v277_v56 = vmax.f32 %v269_v48, 0.0 }
  0x37   : > { %v278_v57 = vmax.f32 %v270_v49, 0.0  ;;  %v279_v58 = vmax.f32 %v271_v50, 0.0  ;;  %v280_v59 = vmax.f32 %v272_v51, 0.0  ;;  %v281_v60 = vmax.f32 %v273_v52, 0.0 }
  0x38   : > { %v425_v61 = vpack.c.bf16 %v275_v54, %v274_v53  ;;  %v430_v62 = vpack.c.bf16 %v277_v56, %v276_v55 }
  0x39   : > { %v435_v63 = vpack.c.bf16 %v279_v58, %v278_v57  ;;  %v440_v0 = vpack.c.bf16 %v281_v60, %v280_v59 }
  0x3a   : > { %426 = vst [vmem:[%s197_s29] sm:$0xff] %v425_v61   ;;  %445 = vst [vmem:[%s197_s29 + $0x8] sm:$0xff] %v430_v62  }
  0x3b   : > { %446 = vst [vmem:[%s197_s29 + $0x10] sm:$0xff] %v435_v63   ;;  %447 = vst [vmem:[%s197_s29 + $0x18] sm:$0xff] %v440_v0  }
  0x3c PF: > { %s14_s15 = sadd.s32 1, %s465_s15  }
  0x3d   : > { %p11_p4 = scmp.ge.s32.totalorder %s14_s15, 4  }
  0x3f   :  { %13 = sbr.rel (!%p11_p4) target bundleno = 1 (0x1), region = 66 }

// kernel: _lambda_.22
= control target key start
LH: loop header
LB: loop body
LE: loop exit
PB: predicated region body
PF: predicated region fallthrough
CT: control target
= control target key end

     0   :  { %s2702_s12 = smov 0   ;;  %s2993_s0 = inlined_call_operand.vmem [shape: bf16[2,9,64,128], index: 0, kind: input, shape index: {}]   ;;  %s2994_s1 = inlined_call_operand.vmem [shape: bf16[9,128,128], index: 1, kind: input, shape index: {}]   ;;  %s2995_s2 = inlined_call_operand.vmem [shape: bf16[2,64,128], index: 2, kind: output, shape index: {0}]   ;;  %s2996_s3 = inlined_call_operand.vmem [shape: f32[2,2,128], index: 3, kind: output, shape index: {1}]  }
   0x1 LB: > { %s1866_s13 = sadd.s32 4294967295, %s2680_s12   ;;  %p1870_p0 = scmp.ge.s32.totalorder %s2680_s12, 1  ;;  %s2680_s12 = sphi %s2702_s12, %s14_s12  }
   0x2   : > { %p140_p1 = scmp.lt.s32.totalorder %s2680_s12, 3 }
   0x4   : > { %p141_p2 = pnand %p1870_p0, %p140_p1 }
   0x6   : > { %144 = sbr.rel (%p141_p2) target bundleno = 402 (0x192), region = 28 }
   0xb   : > { %v2566_v0 = vld [vmem:[%s2994_s1 + $0x78] sm:$0xff]   ;;  %p168_p3 = scmp.lt.s32.totalorder %s1866_s13, 1  ;;  %v2568_v2 = vld [vmem:[%s2994_s1 + $0x70] sm:$0xff]   ;;  %v2570_v4 = vld [vmem:[%s2994_s1 + $0x68] sm:$0xff]  }
   0xc   : > { %v2567_v1 = vld [vmem:[%s2994_s1 + $0x38] sm:$0xff]   ;;  %2325 = vmatprep.subr.bf16.mxu0 %v2566_v0  ;;  %v2569_v3 = vld [vmem:[%s2994_s1 + $0x30] sm:$0xff]   ;;  %v2571_v5 = vld [vmem:[%s2994_s1 + $0x28] sm:$0xff]  }
   0xd   : > { %2349 = vmatprep.subr.bf16.mxu1 %v2567_v1  ;;  %2326 = vmatpush3.bf16.msra.mxu0 %v2566_v0  ;;  %s3006_s13 = smov (!%p168_p3, %s1866_s13), 1  ;;  %v2572_v6 = vld [vmem:[%s2994_s1 + $0x60] sm:$0xff]   ;;  %v2574_v8 = vld [vmem:[%s2994_s1 + $0x58] sm:$0xff]   ;;  %v2576_v10 = vld [vmem:[%s2994_s1 + $0x50] sm:$0xff]  }
   0xe   : > { %2350 = vmatpush3.bf16.msra.mxu1 %v2567_v1  ;;  %2327 = vmatprep.subr.bf16.mxu0 %v2568_v2  ;;  %v2573_v7 = vld [vmem:[%s2994_s1 + $0x20] sm:$0xff]   ;;  %s2557_s30 = smul.u32 288, %s3006_s13  ;;  %v2575_v9 = vld [vmem:[%s2994_s1 + $0x18] sm:$0xff]   ;;  %v2577_v11 = vld [vmem:[%s2994_s1 + $0x10] sm:$0xff]   ;;  %s1874_s20 = sshll.u32 %s3006_s13, 1 }
   0xf   : > { %2351 = vmatprep.subr.bf16.mxu1 %v2569_v3  ;;  %v2578_v14 = vld [vmem:[%s2994_s1 + $0x48] sm:$0xff]   ;;  %v2580_v16 = vld [vmem:[%s2994_s1 + $0x40] sm:$0xff]   ;;  %v2586_v19 = vld [vmem:[%s2994_s1 + $0xb8] sm:$0xff]   ;;  %s181_s23 = scalar_lea.vmem %s2996_s3, %s1874_s20 }
  0x10   : > { %s2746_s10 = scalar_lea.vmem %s2993_s0, %s2557_s30  ;;  %v2579_v15 = vld [vmem:[%s2994_s1 + $0x8] sm:$0xff]   ;;  %v2581_v17 = vld [vmem:[%s2994_s1] sm:$0xff]   ;;  %v2587_v20 = vld [vmem:[%s2994_s1 + $0xf8] sm:$0xff]  }
  0x11   : > { %2328 = vmatpush3.bf16.msra.mxu0 %v2568_v2  ;;  %v2582_v12 = vld [vmem:[%s2746_s10 + $0x20] sm:$0xff]   ;;  %v2584_v18 = vld [vmem:[%s2746_s10 + $0x28] sm:$0xff]   ;;  %v2588_v22 = vld [vmem:[%s2994_s1 + $0xb0] sm:$0xff]  }
  0x12   : > { %2352 = vmatpush3.bf16.msra.mxu1 %v2569_v3  ;;  %2329 = vmatprep.subr.bf16.mxu0 %v2570_v4  ;;  %v2583_v13 = vld [vmem:[%s2746_s10] sm:$0xff]   ;;  %v2585_v21 = vld [vmem:[%s2746_s10 + $0x8] sm:$0xff]   ;;  %v2589_v23 = vld [vmem:[%s2994_s1 + $0xf0] sm:$0xff]  }
  0x13   : > { %2353 = vmatprep.subr.bf16.mxu1 %v2571_v5  ;;  %2341 = vmatprep.mubr.bf16.mxu0 %v2582_v12  ;;  %v2596_v24 = vld [vmem:[%s2746_s10 + $0x30] sm:$0xff]   ;;  %v2590_v26 = vld [vmem:[%s2994_s1 + $0xa8] sm:$0xff]   ;;  %v2592_v28 = vld [vmem:[%s2994_s1 + $0xa0] sm:$0xff]  }
  0x14   : > { %2365 = vmatprep.mubr.bf16.mxu1 %v2583_v13  ;;  %v2597_v25 = vld [vmem:[%s2746_s10 + $0x10] sm:$0xff]   ;;  %v2591_v27 = vld [vmem:[%s2994_s1 + $0xe8] sm:$0xff]   ;;  %v2598_v29 = vld [vmem:[%s2746_s10 + $0x38] sm:$0xff]  }
  0x15   : > { %2330 = vmatpush3.bf16.msra.mxu0 %v2570_v4  ;;  %v2599_v30 = vld [vmem:[%s2746_s10 + $0x18] sm:$0xff]   ;;  %v2593_v31 = vld [vmem:[%s2994_s1 + $0xe0] sm:$0xff]   ;;  %v2600_v36 = vld [vmem:[%s2994_s1 + $0x90] sm:$0xff]  }
  0x16   : > { %2354 = vmatpush3.bf16.msra.mxu1 %v2571_v5  ;;  %2331 = vmatprep.subr.bf16.mxu0 %v2572_v6  ;;  %v2606_v32 = vld [vmem:[%s2746_s10 + $0x40] sm:$0xff]   ;;  %v2594_v34 = vld [vmem:[%s2994_s1 + $0x98] sm:$0xff]   ;;  %v2601_v37 = vld [vmem:[%s2994_s1 + $0xd0] sm:$0xff]  }
  0x17   : > { %2355 = vmatprep.subr.bf16.mxu1 %v2573_v7  ;;  %v2608_v33 = vld [vmem:[%s2746_s10 + $0x60] sm:$0xff]   ;;  %v2595_v35 = vld [vmem:[%s2994_s1 + $0xd8] sm:$0xff]   ;;  %v2602_v38 = vld [vmem:[%s2994_s1 + $0x88] sm:$0xff]  }
  0x18   : > { %v2603_v39 = vld [vmem:[%s2994_s1 + $0xc8] sm:$0xff]   ;;  %v2604_v40 = vld [vmem:[%s2994_s1 + $0x80] sm:$0xff]   ;;  %v2609_v43 = vld [vmem:[%s2994_s1 + $0x138] sm:$0xff]  }
  0x19   : > { %2332 = vmatpush3.bf16.msra.mxu0 %v2572_v6  ;;  %v2605_v41 = vld [vmem:[%s2994_s1 + $0xc0] sm:$0xff]   ;;  %v2607_v42 = vld [vmem:[%s2746_s10 + $0x48] sm:$0xff]   ;;  %v2610_v44 = vld [vmem:[%s2994_s1 + $0x178] sm:$0xff]  }
  0x1a   : > { %2356 = vmatpush3.bf16.msra.mxu1 %v2573_v7  ;;  %2333 = vmatprep.subr.bf16.mxu0 %v2574_v8  ;;  %v2611_v45 = vld [vmem:[%s2746_s10 + $0x68] sm:$0xff]   ;;  %v2612_v46 = vld [vmem:[%s2994_s1 + $0x130] sm:$0xff]   ;;  %v2615_v50 = vld [vmem:[%s2746_s10 + $0x58] sm:$0xff]  }
  0x1b   : > { %2357 = vmatprep.subr.bf16.mxu1 %v2575_v9  ;;  %v2613_v47 = vld [vmem:[%s2994_s1 + $0x170] sm:$0xff]   ;;  %v2616_v51 = vld [vmem:[%s2994_s1 + $0x128] sm:$0xff]   ;;  %v2619_v53 = vld [vmem:[%s2746_s10 + $0x78] sm:$0xff]  }
  0x1c   : > { %v2614_v48 = vld [vmem:[%s2746_s10 + $0x50] sm:$0xff]   ;;  %v2617_v52 = vld [vmem:[%s2994_s1 + $0x168] sm:$0xff]   ;;  %v2620_v54 = vld [vmem:[%s2994_s1 + $0x120] sm:$0xff]  }
  0x1d   : > { %2334 = vmatpush3.bf16.msra.mxu0 %v2574_v8  ;;  %v2618_v49 = vld [vmem:[%s2746_s10 + $0x70] sm:$0xff]   ;;  %v2621_v55 = vld [vmem:[%s2994_s1 + $0x160] sm:$0xff]   ;;  %v2622_v58 = vld [vmem:[%s2994_s1 + $0x118] sm:$0xff]  }
  0x1e   : > { %2358 = vmatpush3.bf16.msra.mxu1 %v2575_v9  ;;  %2335 = vmatprep.subr.bf16.mxu0 %v2576_v10  ;;  %v2630_v56 = vld [vmem:[%s2746_s10 + $0x80] sm:$0xff]   ;;  %v2623_v59 = vld [vmem:[%s2994_s1 + $0x158] sm:$0xff]   ;;  %v2624_v60 = vld [vmem:[%s2994_s1 + $0x110] sm:$0xff]  }
  0x1f   : > { %2359 = vmatprep.subr.bf16.mxu1 %v2577_v11  ;;  %v2632_v57 = vld [vmem:[%s2746_s10 + $0xa0] sm:$0xff]   ;;  %v2625_v61 = vld [vmem:[%s2994_s1 + $0x150] sm:$0xff]   ;;  %v2626_v62 = vld [vmem:[%s2994_s1 + $0x108] sm:$0xff]  }
  0x20   : > { %v2627_v63 = vld [vmem:[%s2994_s1 + $0x148] sm:$0xff]   ;;  %v2628_v0 = vld [vmem:[%s2994_s1 + $0x100] sm:$0xff]   ;;  %v2633_v3 = vld [vmem:[%s2994_s1 + $0x1b8] sm:$0xff]  }
  0x21   : > { %2336 = vmatpush3.bf16.msra.mxu0 %v2576_v10  ;;  %v2629_v1 = vld [vmem:[%s2994_s1 + $0x140] sm:$0xff]   ;;  %v2631_v2 = vld [vmem:[%s2746_s10 + $0x88] sm:$0xff]   ;;  %v2634_v4 = vld [vmem:[%s2994_s1 + $0x1f8] sm:$0xff]  }
  0x22   : > { %2360 = vmatpush3.bf16.msra.mxu1 %v2577_v11  ;;  %2337 = vmatprep.subr.bf16.mxu0 %v2578_v14  ;;  %v2635_v5 = vld [vmem:[%s2746_s10 + $0xa8] sm:$0xff]   ;;  %v2636_v6 = vld [vmem:[%s2994_s1 + $0x1b0] sm:$0xff]   ;;  %v2639_v10 = vld [vmem:[%s2746_s10 + $0x98] sm:$0xff]  }
  0x23   : > { %2361 = vmatprep.subr.bf16.mxu1 %v2579_v15  ;;  %v2637_v7 = vld [vmem:[%s2994_s1 + $0x1f0] sm:$0xff]   ;;  %v2640_v11 = vld [vmem:[%s2994_s1 + $0x1a8] sm:$0xff]   ;;  %v2643_v13 = vld [vmem:[%s2746_s10 + $0xb8] sm:$0xff]  }
  0x24   : > { %v2638_v8 = vld [vmem:[%s2746_s10 + $0x90] sm:$0xff]   ;;  %v2641_v12 = vld [vmem:[%s2994_s1 + $0x1e8] sm:$0xff]  }
  0x25   : > { %2338 = vmatpush3.bf16.msra.mxu0 %v2578_v14  ;;  %v2642_v9 = vld [vmem:[%s2746_s10 + $0xb0] sm:$0xff]   ;;  %v2644_v14 = vld [vmem:[%s2994_s1 + $0x1a0] sm:$0xff]  }
  0x26   : > { %2362 = vmatpush3.bf16.msra.mxu1 %v2579_v15  ;;  %2339 = vmatprep.subr.bf16.mxu0 %v2580_v16  ;;  %v2645_v15 = vld [vmem:[%s2994_s1 + $0x1e0] sm:$0xff]  }
  0x27   : > { %2363 = vmatprep.subr.bf16.mxu1 %v2581_v17 }
  0x29   : > { %2340 = vmatpush3.bf16.msra.mxu0 %v2580_v16  ;;  %v2654_v16 = vld [vmem:[%s2746_s10 + $0xc0] sm:$0xff]  }
  0x2a   : > { %2364 = vmatpush3.bf16.msra.mxu1 %v2581_v17  ;;  %2373 = vmatprep.subr.bf16.mxu0 %v2586_v19  ;;  %v2656_v17 = vld [vmem:[%s2746_s10 + $0xe0] sm:$0xff]  }
  0x2b   : > { %2397 = vmatprep.subr.bf16.mxu1 %v2587_v20 }
  0x2c   : > { %2342 = vmatmul.mubr.bf16.vlgmr.msra.gmra.mxu0 %v2584_v18  ;;  %v2646_v18 = vld [vmem:[%s2994_s1 + $0x198] sm:$0xff]  }
  0x2d   : > { %2366 = vmatmul.mubr.bf16.vlgmr.msra.gmra.mxu1 %v2585_v21  ;;  %2374 = vmatpush3.bf16.msra.mxu0 %v2586_v19  ;;  %v2647_v19 = vld [vmem:[%s2994_s1 + $0x1d8] sm:$0xff]   ;;  %v2649_v21 = vld [vmem:[%s2994_s1 + $0x1d0] sm:$0xff]  }
  0x2e   : > { %2398 = vmatpush3.bf16.msra.mxu1 %v2587_v20  ;;  %2375 = vmatprep.subr.bf16.mxu0 %v2588_v22  ;;  %v2648_v20 = vld [vmem:[%s2994_s1 + $0x190] sm:$0xff]  }
  0x2f   : > { %2399 = vmatprep.subr.bf16.mxu1 %v2589_v23  ;;  %2345 = vmatprep.mubr.bf16.mxu0 %v2596_v24  ;;  %v2652_v24 = vld [vmem:[%s2994_s1 + $0x180] sm:$0xff]  }
  0x30   : > { %2369 = vmatprep.mubr.bf16.mxu1 %v2597_v25  ;;  %v2653_v25 = vld [vmem:[%s2994_s1 + $0x1c0] sm:$0xff]  }
  0x31   : > { %2376 = vmatpush3.bf16.msra.mxu0 %v2588_v22  ;;  %v2650_v22 = vld [vmem:[%s2994_s1 + $0x188] sm:$0xff]  }
  0x32   : > { %2400 = vmatpush3.bf16.msra.mxu1 %v2589_v23  ;;  %2377 = vmatprep.subr.bf16.mxu0 %v2590_v26  ;;  %v2651_v23 = vld [vmem:[%s2994_s1 + $0x1c8] sm:$0xff]  }
  0x33   : > { %2401 = vmatprep.subr.bf16.mxu1 %v2591_v27 }
  0x34   : > { %2346 = vmatmul.mubr.bf16.gmra.mxu0 %v2598_v29  ;;  %v2659_v29 = vld [vmem:[%s2994_s1 + $0x230] sm:$0xff]  }
  0x35   : > { %2378 = vmatpush3.bf16.msra.mxu0 %v2590_v26  ;;  %2370 = vmatmul.mubr.bf16.gmra.mxu1 %v2599_v30  ;;  %v2657_v26 = vld [vmem:[%s2994_s1 + $0x238] sm:$0xff]   ;;  %v2660_v30 = vld [vmem:[%s2746_s10 + $0xd0] sm:$0xff]  }
  0x36   : > { %2402 = vmatpush3.bf16.msra.mxu1 %v2591_v27  ;;  %2379 = vmatprep.subr.bf16.mxu0 %v2592_v28  ;;  %v2655_v27 = vld [vmem:[%s2746_s10 + $0xc8] sm:$0xff]  }
  0x37   : > { %2403 = vmatprep.subr.bf16.mxu1 %v2593_v31  ;;  %2389 = vmatprep.mubr.bf16.mxu0 %v2606_v32  ;;  %v2662_v32 = vld [vmem:[%s2994_s1 + $0x228] sm:$0xff]  }
  0x38   : > { %2413 = vmatprep.mubr.bf16.mxu1 %v2608_v33  ;;  %v2661_v33 = vld [vmem:[%s2746_s10 + $0xd8] sm:$0xff]  }
  0x39   : > { %2380 = vmatpush3.bf16.msra.mxu0 %v2592_v28  ;;  %v2658_v28 = vld [vmem:[%s2746_s10 + $0xe8] sm:$0xff]  }
  0x3a   : > { %2404 = vmatpush3.bf16.msra.mxu1 %v2593_v31  ;;  %2381 = vmatprep.subr.bf16.mxu0 %v2594_v34  ;;  %v2663_v31 = vld [vmem:[%s2746_s10 + $0xf0] sm:$0xff]  }
  0x3b   : > { %2405 = vmatprep.subr.bf16.mxu1 %v2595_v35 }
  0x3d   : > { %2382 = vmatpush3.bf16.msra.mxu0 %v2594_v34  ;;  %v2664_v34 = vld [vmem:[%s2746_s10 + $0xf8] sm:$0xff]  }
  0x3e   : > { %2406 = vmatpush3.bf16.msra.mxu1 %v2595_v35  ;;  %2383 = vmatprep.subr.bf16.mxu0 %v2600_v36  ;;  %v2665_v35 = vld [vmem:[%s2994_s1 + $0x220] sm:$0xff]  }
  0x3f   : > { %2407 = vmatprep.subr.bf16.mxu1 %v2601_v37 }
  0x41   : > { %2384 = vmatpush3.bf16.msra.mxu0 %v2600_v36  ;;  %v2670_v36 = vld [vmem:[%s2746_s10 + $0x100] sm:$0xff]  }
  0x42   : > { %2408 = vmatpush3.bf16.msra.mxu1 %v2601_v37  ;;  %2385 = vmatprep.subr.bf16.mxu0 %v2602_v38  ;;  %v2671_v37 = vld [vmem:[%s2746_s10 + $0x110] sm:$0xff]  }
  0x43   : > { %2409 = vmatprep.subr.bf16.mxu1 %v2603_v39 }
  0x45   : > { %2386 = vmatpush3.bf16.msra.mxu0 %v2602_v38  ;;  %v2666_v38 = vld [vmem:[%s2994_s1 + $0x218] sm:$0xff]  }
  0x46   : > { %2410 = vmatpush3.bf16.msra.mxu1 %v2603_v39  ;;  %2387 = vmatprep.subr.bf16.mxu0 %v2604_v40  ;;  %v2667_v39 = vld [vmem:[%s2994_s1 + $0x210] sm:$0xff]  }
  0x47   : > { %2411 = vmatprep.subr.bf16.mxu1 %v2605_v41 }
  0x49   : > { %2388 = vmatpush3.bf16.msra.mxu0 %v2604_v40  ;;  %v2668_v40 = vld [vmem:[%s2994_s1 + $0x208] sm:$0xff]  }
  0x4a   : > { %2412 = vmatpush3.bf16.msra.mxu1 %v2605_v41  ;;  %2421 = vmatprep.subr.bf16.mxu0 %v2609_v43  ;;  %v2669_v41 = vld [vmem:[%s2994_s1 + $0x200] sm:$0xff]  }
  0x4b   : > { %2445 = vmatprep.subr.bf16.mxu1 %v2610_v44 }
  0x4c   : > { %2390 = vmatmul.mubr.bf16.vlgmr.msra.gmra.mxu0 %v2607_v42  ;;  %v2672_v42 = vld [vmem:[%s2746_s10 + $0x108] sm:$0xff]  }
  0x4d   : > { %2414 = vmatmul.mubr.bf16.vlgmr.msra.gmra.mxu1 %v2611_v45  ;;  %2422 = vmatpush3.bf16.msra.mxu0 %v2609_v43  ;;  %v2673_v43 = vld [vmem:[%s2746_s10 + $0x118] sm:$0xff]   ;;  %s2185_s10 = sshll.u32 %s3006_s13, 5 }
  0x4e   : > { %2446 = vmatpush3.bf16.msra.mxu1 %v2610_v44  ;;  %2423 = vmatprep.subr.bf16.mxu0 %v2612_v46  ;;  %s177_s19 = scalar_lea.vmem %s2995_s2, %s2185_s10 }
  0x4f   : > { %2447 = vmatprep.subr.bf16.mxu1 %v2613_v47  ;;  %2393 = vmatprep.mubr.bf16.mxu0 %v2614_v48 }
  0x50   : > { %2417 = vmatprep.mubr.bf16.mxu1 %v2618_v49 }
  0x51   : > { %2424 = vmatpush3.bf16.msra.mxu0 %v2612_v46 }
  0x52   : > { %2448 = vmatpush3.bf16.msra.mxu1 %v2613_v47  ;;  %2425 = vmatprep.subr.bf16.mxu0 %v2616_v51 }
  0x53   : > { %2449 = vmatprep.subr.bf16.mxu1 %v2617_v52 }
  0x54   : > { %2394 = vmatmul.mubr.bf16.gmra.mxu0 %v2615_v50 }
  0x55   : > { %2426 = vmatpush3.bf16.msra.mxu0 %v2616_v51  ;;  %2418 = vmatmul.mubr.bf16.gmra.mxu1 %v2619_v53 }
  0x56   : > { %2450 = vmatpush3.bf16.msra.mxu1 %v2617_v52  ;;  %2427 = vmatprep.subr.bf16.mxu0 %v2620_v54 }
  0x57   : > { %2451 = vmatprep.subr.bf16.mxu1 %v2621_v55  ;;  %2437 = vmatprep.mubr.bf16.mxu0 %v2630_v56 }
  0x58   : > { %2461 = vmatprep.mubr.bf16.mxu1 %v2632_v57 }
  0x59   : > { %2428 = vmatpush3.bf16.msra.mxu0 %v2620_v54 }
  0x5a   : > { %2452 = vmatpush3.bf16.msra.mxu1 %v2621_v55  ;;  %2429 = vmatprep.subr.bf16.mxu0 %v2622_v58 }
  0x5b   : > { %2453 = vmatprep.subr.bf16.mxu1 %v2623_v59 }
  0x5d   : > { %2430 = vmatpush3.bf16.msra.mxu0 %v2622_v58 }
  0x5e   : > { %2454 = vmatpush3.bf16.msra.mxu1 %v2623_v59  ;;  %2431 = vmatprep.subr.bf16.mxu0 %v2624_v60 }
  0x5f   : > { %2455 = vmatprep.subr.bf16.mxu1 %v2625_v61 }
  0x61   : > { %2432 = vmatpush3.bf16.msra.mxu0 %v2624_v60 }
  0x62   : > { %2456 = vmatpush3.bf16.msra.mxu1 %v2625_v61  ;;  %2433 = vmatprep.subr.bf16.mxu0 %v2626_v62 }
  0x63   : > { %2457 = vmatprep.subr.bf16.mxu1 %v2627_v63 }
  0x65   : > { %2434 = vmatpush3.bf16.msra.mxu0 %v2626_v62 }
  0x66   : > { %2458 = vmatpush3.bf16.msra.mxu1 %v2627_v63  ;;  %2435 = vmatprep.subr.bf16.mxu0 %v2628_v0 }
  0x67   : > { %2459 = vmatprep.subr.bf16.mxu1 %v2629_v1 }
  0x69   : > { %2436 = vmatpush3.bf16.msra.mxu0 %v2628_v0 }
  0x6a   : > { %2460 = vmatpush3.bf16.msra.mxu1 %v2629_v1  ;;  %2469 = vmatprep.subr.bf16.mxu0 %v2633_v3 }
  0x6b   : > { %2493 = vmatprep.subr.bf16.mxu1 %v2634_v4 }
  0x6c   : > { %2438 = vmatmul.mubr.bf16.vlgmr.msra.gmra.mxu0 %v2631_v2 }
  0x6d   : > { %2462 = vmatmul.mubr.bf16.vlgmr.msra.gmra.mxu1 %v2635_v5  ;;  %2470 = vmatpush3.bf16.msra.mxu0 %v2633_v3 }
  0x6e   : > { %2494 = vmatpush3.bf16.msra.mxu1 %v2634_v4  ;;  %2471 = vmatprep.subr.bf16.mxu0 %v2636_v6 }
  0x6f   : > { %2495 = vmatprep.subr.bf16.mxu1 %v2637_v7  ;;  %2441 = vmatprep.mubr.bf16.mxu0 %v2638_v8 }
  0x70   : > { %2465 = vmatprep.mubr.bf16.mxu1 %v2642_v9 }
  0x71   : > { %2472 = vmatpush3.bf16.msra.mxu0 %v2636_v6 }
  0x72   : > { %2496 = vmatpush3.bf16.msra.mxu1 %v2637_v7  ;;  %2473 = vmatprep.subr.bf16.mxu0 %v2640_v11 }
  0x73   : > { %2497 = vmatprep.subr.bf16.mxu1 %v2641_v12 }
  0x74   : > { %2442 = vmatmul.mubr.bf16.gmra.mxu0 %v2639_v10 }
  0x75   : > { %2474 = vmatpush3.bf16.msra.mxu0 %v2640_v11  ;;  %2466 = vmatmul.mubr.bf16.gmra.mxu1 %v2643_v13 }
  0x76   : > { %2498 = vmatpush3.bf16.msra.mxu1 %v2641_v12  ;;  %2475 = vmatprep.subr.bf16.mxu0 %v2644_v14 }
  0x77   : > { %2499 = vmatprep.subr.bf16.mxu1 %v2645_v15  ;;  %2485 = vmatprep.mubr.bf16.mxu0 %v2654_v16 }
  0x78   : > { %2509 = vmatprep.mubr.bf16.mxu1 %v2656_v17 }
  0x79   : > { %2476 = vmatpush3.bf16.msra.mxu0 %v2644_v14 }
  0x7a   : > { %2500 = vmatpush3.bf16.msra.mxu1 %v2645_v15  ;;  %2477 = vmatprep.subr.bf16.mxu0 %v2646_v18 }
  0x7b   : > { %2501 = vmatprep.subr.bf16.mxu1 %v2647_v19 }
  0x7d   : > { %2478 = vmatpush3.bf16.msra.mxu0 %v2646_v18 }
  0x7e   : > { %2502 = vmatpush3.bf16.msra.mxu1 %v2647_v19  ;;  %2479 = vmatprep.subr.bf16.mxu0 %v2648_v20 }
  0x7f   : > { %2503 = vmatprep.subr.bf16.mxu1 %v2649_v21 }
  0x81   : > { %2480 = vmatpush3.bf16.msra.mxu0 %v2648_v20 }
  0x82   : > { %2504 = vmatpush3.bf16.msra.mxu1 %v2649_v21  ;;  %2481 = vmatprep.subr.bf16.mxu0 %v2650_v22 }
  0x83   : > { %2505 = vmatprep.subr.bf16.mxu1 %v2651_v23 }
  0x85   : > { %2482 = vmatpush3.bf16.msra.mxu0 %v2650_v22 }
  0x86   : > { %2506 = vmatpush3.bf16.msra.mxu1 %v2651_v23  ;;  %2483 = vmatprep.subr.bf16.mxu0 %v2652_v24 }
  0x87   : > { %2507 = vmatprep.subr.bf16.mxu1 %v2653_v25 }
  0x89   : > { %2484 = vmatpush3.bf16.msra.mxu0 %v2652_v24 }
  0x8a   : > { %2508 = vmatpush3.bf16.msra.mxu1 %v2653_v25  ;;  %2517 = vmatprep.subr.bf16.mxu0 %v2657_v26 }
  0x8b   : > { %2541 = vmatprep.subr.bf16.mxu1 %v2657_v26 }
  0x8c   : > { %2486 = vmatmul.mubr.bf16.vlgmr.msra.gmra.mxu0 %v2655_v27 }
  0x8d   : > { %2510 = vmatmul.mubr.bf16.vlgmr.msra.gmra.mxu1 %v2658_v28  ;;  %2518 = vmatpush3.bf16.msra.mxu0 %v2657_v26 }
  0x8e   : > { %2549 = vmatpush3.bf16.msra.mxu1 %v2657_v26  ;;  %2519 = vmatprep.subr.bf16.mxu0 %v2659_v29 }
  0x8f   : > { %2542 = vmatprep.subr.bf16.mxu1 %v2659_v29  ;;  %2489 = vmatprep.mubr.bf16.mxu0 %v2660_v30 }
  0x90   : > { %2513 = vmatprep.mubr.bf16.mxu1 %v2663_v31 }
  0x91   : > { %2520 = vmatpush3.bf16.msra.mxu0 %v2659_v29 }
  0x92   : > { %2550 = vmatpush3.bf16.msra.mxu1 %v2659_v29  ;;  %2521 = vmatprep.subr.bf16.mxu0 %v2662_v32 }
  0x93   : > { %2543 = vmatprep.subr.bf16.mxu1 %v2662_v32 }
  0x94   : > { %2490 = vmatmul.mubr.bf16.gmra.mxu0 %v2661_v33 }
  0x95   : > { %2522 = vmatpush3.bf16.msra.mxu0 %v2662_v32  ;;  %2514 = vmatmul.mubr.bf16.gmra.mxu1 %v2664_v34 }
  0x96   : > { %2551 = vmatpush3.bf16.msra.mxu1 %v2662_v32  ;;  %2523 = vmatprep.subr.bf16.mxu0 %v2665_v35 }
  0x97   : > { %2544 = vmatprep.subr.bf16.mxu1 %v2665_v35  ;;  %2533 = vmatprep.mubr.bf16.mxu0 %v2670_v36 }
  0x98   : > { %2537 = vmatprep.mubr.bf16.mxu1 %v2671_v37 }
  0x99   : > { %2524 = vmatpush3.bf16.msra.mxu0 %v2665_v35 }
  0x9a   : > { %2552 = vmatpush3.bf16.msra.mxu1 %v2665_v35  ;;  %2525 = vmatprep.subr.bf16.mxu0 %v2666_v38 }
  0x9b   : > { %2545 = vmatprep.subr.bf16.mxu1 %v2666_v38 }
  0x9d   : > { %2526 = vmatpush3.bf16.msra.mxu0 %v2666_v38 }
  0x9e   : > { %2553 = vmatpush3.bf16.msra.mxu1 %v2666_v38  ;;  %2527 = vmatprep.subr.bf16.mxu0 %v2667_v39 }
  0x9f   : > { %2546 = vmatprep.subr.bf16.mxu1 %v2667_v39 }
  0xa1   : > { %2528 = vmatpush3.bf16.msra.mxu0 %v2667_v39 }
  0xa2   : > { %2554 = vmatpush3.bf16.msra.mxu1 %v2667_v39  ;;  %2529 = vmatprep.subr.bf16.mxu0 %v2668_v40 }
  0xa3   : > { %2547 = vmatprep.subr.bf16.mxu1 %v2668_v40 }
  0xa5   : > { %2530 = vmatpush3.bf16.msra.mxu0 %v2668_v40 }
  0xa6   : > { %2555 = vmatpush3.bf16.msra.mxu1 %v2668_v40  ;;  %2531 = vmatprep.subr.bf16.mxu0 %v2669_v41 }
  0xa7   : > { %2548 = vmatprep.subr.bf16.mxu1 %v2669_v41 }
  0xa9   : > { %2532 = vmatpush3.bf16.msra.mxu0 %v2669_v41 }
  0xaa   : > { %2556 = vmatpush3.bf16.msra.mxu1 %v2669_v41 }
  0xac   : > { %2534 = vmatmul.mubr.bf16.vlgmr.msra.gmra.mxu0 %v2672_v42 }
  0xad   : > { %2538 = vmatmul.mubr.bf16.vlgmr.msra.gmra.mxu1 %v2673_v43 }
  0xec   : > { %v2343_v44 = vpop.f32.mrf.mxu0 }
  0xed   : > { %v2367_v45 = vpop.f32.mrf.mxu1 }
  0xee   : > { %v339_v46 = vpop.f32.mrf.mxu0  ;;  %v485_v36 = vadd.f32 %v2367_v45, %v2343_v44 }
  0xef   : > { %v476_v47 = vpop.f32.mrf.mxu1 }
  0xf0   : > { %v2344_v48 = vpop.f32.mrf.mxu0  ;;  %v477_v37 = vadd.f32 %v476_v47, %v339_v46 }
  0xf1   : > { %v2368_v49 = vpop.f32.mrf.mxu1 }
  0xf2   : > { %v342_v50 = vpop.f32.mrf.mxu0  ;;  %v488_v38 = vadd.f32 %v2368_v49, %v2344_v48 }
  0xf3   : > { %v479_v51 = vpop.f32.mrf.mxu1 }
  0xf4   : > { %v2347_v52 = vpop.f32.mrf.mxu0  ;;  %v480_v42 = vadd.f32 %v479_v51, %v342_v50 }
  0xf5   : > { %v2371_v53 = vpop.f32.mrf.mxu1 }
  0xf6   : > { %v355_v54 = vpop.f32.mrf.mxu0  ;;  %v501_v39 = vadd.f32 %v2371_v53, %v2347_v52 }
  0xf7   : > { %v492_v55 = vpop.f32.mrf.mxu1 }
  0xf8   : > { %v2348_v56 = vpop.f32.mrf.mxu0 }
  0xf9   : > { %v2372_v57 = vpop.f32.mrf.mxu1 }
  0xfa   : > { %v358_v58 = vpop.f32.mrf.mxu0  ;;  %v504_v40 = vadd.f32 %v2372_v57, %v2348_v56 }
  0xfb   : > { %v495_v59 = vpop.f32.mrf.mxu1 }
  0xfc   : > { %v496_v44 = vadd.f32 %v495_v59, %v358_v58 }
 0x10c   : > { %v2391_v60 = vpop.f32.mrf.mxu0 }
 0x10d   : > { %v2415_v61 = vpop.f32.mrf.mxu1  ;;  %v672_v43 = vadd.f32 %v2391_v60, %v485_v36 }
 0x10e   : > { %v639_v62 = vpop.f32.mrf.mxu0 }
 0x10f   : > { %v810_v63 = vpop.f32.mrf.mxu1  ;;  %v843_v53 = vadd.f32 %v2415_v61, %v672_v43 }
 0x110   : > { %v2392_v0 = vpop.f32.mrf.mxu0 }
 0x111   : > { %v2416_v1 = vpop.f32.mrf.mxu1 }
 0x112   : > { %v642_v2 = vpop.f32.mrf.mxu0 }
 0x113   : > { %v813_v3 = vpop.f32.mrf.mxu1  ;;  %v671_v47 = vadd.f32 %v642_v2, %v480_v42 }
 0x114   : > { %v2395_v4 = vpop.f32.mrf.mxu0 }
 0x115   : > { %v2419_v5 = vpop.f32.mrf.mxu1  ;;  %v676_v45 = vadd.f32 %v2395_v4, %v501_v39  ;;  %v842_v60 = vadd.f32 %v813_v3, %v671_v47 }
 0x116   : > { %v655_v6 = vpop.f32.mrf.mxu0 }
 0x117   : > { %v826_v7 = vpop.f32.mrf.mxu1  ;;  %v847_v51 = vadd.f32 %v2419_v5, %v676_v45 }
 0x118   : > { %v2396_v8 = vpop.f32.mrf.mxu0 }
 0x119   : > { %v2420_v9 = vpop.f32.mrf.mxu1  ;;  %v677_v46 = vadd.f32 %v2396_v8, %v504_v40 }
 0x11a   : > { %v658_v10 = vpop.f32.mrf.mxu0 }
 0x11b   : > { %v829_v11 = vpop.f32.mrf.mxu1  ;;  %v675_v49 = vadd.f32 %v658_v10, %v496_v44  ;;  %v848_v36 = vadd.f32 %v2420_v9, %v677_v46 }
 0x12c   : > { %v2439_v12 = vpop.f32.mrf.mxu0 }
 0x12d   : > { %v2463_v13 = vpop.f32.mrf.mxu1 }
 0x12e   : > { %v981_v14 = vpop.f32.mrf.mxu0 }
 0x12f   : > { %v1152_v15 = vpop.f32.mrf.mxu1 }
 0x130   : > { %v2440_v16 = vpop.f32.mrf.mxu0 }
 0x131   : > { %v2464_v17 = vpop.f32.mrf.mxu1 }
 0x132   : > { %v984_v18 = vpop.f32.mrf.mxu0 }
 0x133   : > { %v1155_v19 = vpop.f32.mrf.mxu1  ;;  %v1013_v4 = vadd.f32 %v984_v18, %v842_v60 }
 0x134   : > { %v2443_v20 = vpop.f32.mrf.mxu0 }
 0x135   : > { %v2467_v21 = vpop.f32.mrf.mxu1  ;;  %v1184_v9 = vadd.f32 %v1155_v19, %v1013_v4 }
 0x136   : > { %v997_v22 = vpop.f32.mrf.mxu0 }
 0x137   : > { %v1168_v23 = vpop.f32.mrf.mxu1 }
 0x138   : > { %v2444_v24 = vpop.f32.mrf.mxu0 }
 0x139   : > { %v2468_v25 = vpop.f32.mrf.mxu1  ;;  %v1019_v58 = vadd.f32 %v2444_v24, %v848_v36 }
 0x13a   : > { %v1000_v26 = vpop.f32.mrf.mxu0 }
 0x13b   : > { %v1171_v27 = vpop.f32.mrf.mxu1 }
 0x14c   : > { %v2487_v28 = vpop.f32.mrf.mxu0 }
 0x14d   : > { %v2970_v29 = vpop.f32.mrf.mxu1 }
 0x14e   : > { %2997 = vst [vmem:[#allocation2_spill] sm:$0xff] %v2970_v29  ;;  %v1323_v30 = vpop.f32.mrf.mxu0  ;;  %v670_v29 = vadd.f32 %v639_v62, %v477_v37  ;;  %v1014_v37 = vadd.f32 %v2439_v12, %v843_v53 }
 0x14f   : > { %v2972_v31 = vpop.f32.mrf.mxu1 }
 0x150   : > { %2998 = vst [vmem:[#allocation3_spill] sm:$0xff] %v2972_v31  ;;  %v2488_v32 = vpop.f32.mrf.mxu0  ;;  %v673_v31 = vadd.f32 %v2392_v0, %v488_v38  ;;  %v841_v56 = vadd.f32 %v810_v63, %v670_v29  ;;  %v1185_v10 = vadd.f32 %v2463_v13, %v1014_v37  ;;  %v1190_v29 = vadd.f32 %v2468_v25, %v1019_v58 }
 0x151   : > { %v2974_v33 = vpop.f32.mrf.mxu1 }
 0x152   : > { %2999 = vst [vmem:[#allocation4_spill] sm:$0xff] %v2974_v33  ;;  %v1326_v34 = vpop.f32.mrf.mxu0  ;;  %v844_v57 = vadd.f32 %v2416_v1, %v673_v31  ;;  %v1012_v62 = vadd.f32 %v981_v14, %v841_v56  ;;  %v1356_v3 = vadd.f32 %v2487_v28, %v1185_v10 }
 0x153   : > { %v2976_v35 = vpop.f32.mrf.mxu1  ;;  %v1355_v31 = vadd.f32 %v1326_v34, %v1184_v9 }
 0x154   : > { %3000 = vst [vmem:[#allocation5_spill] sm:$0xff] %v2976_v35  ;;  %v2491_v41 = vpop.f32.mrf.mxu0  ;;  %v493_v35 = vadd.f32 %v492_v55, %v355_v54  ;;  %v1015_v0 = vadd.f32 %v2440_v16, %v844_v57  ;;  %v846_v54 = vadd.f32 %v829_v11, %v675_v49  ;;  %v1018_v55 = vadd.f32 %v2443_v20, %v847_v51 }
 0x155   : > { %v2515_v33 = vpop.f32.mrf.mxu1  ;;  %v1183_v61 = vadd.f32 %v1152_v15, %v1012_v62 }
 0x156   : > { %v674_v48 = vadd.f32 %v655_v6, %v493_v35  ;;  %v1339_v52 = vpop.f32.mrf.mxu0  ;;  %v1017_v8 = vadd.f32 %v1000_v26, %v846_v54  ;;  %v1186_v63 = vadd.f32 %v2464_v17, %v1015_v0  ;;  %v1189_v1 = vadd.f32 %v2467_v21, %v1018_v55  ;;  %v3001_v17 = vld [vmem:[#allocation2_spill] sm:$0xff] }
 0x157   : > { %v1510_v50 = vpop.f32.mrf.mxu1  ;;  %v1354_v12 = vadd.f32 %v1323_v30, %v1183_v61  ;;  %v1527_v21 = vadd.f32 %v3001_v17, %v1356_v3  ;;  %v3002_v25 = vld [vmem:[#allocation3_spill] sm:$0xff] }
 0x158   : > { %v845_v38 = vadd.f32 %v826_v7, %v674_v48  ;;  %v2492_v59 = vpop.f32.mrf.mxu0  ;;  %v1357_v14 = vadd.f32 %v2488_v32, %v1186_v63  ;;  %v1188_v16 = vadd.f32 %v1171_v27, %v1017_v8  ;;  %v1360_v20 = vadd.f32 %v2491_v41, %v1189_v1 }
 0x159   : > { %v2516_v2 = vpop.f32.mrf.mxu1  ;;  %v1361_v24 = vadd.f32 %v2492_v59, %v1190_v29  ;;  %v1525_v35 = vadd.f32 %v3002_v25, %v1354_v12  ;;  %v3003_v19 = vld [vmem:[#allocation4_spill] sm:$0xff] }
 0x15a   : > { %v1016_v6 = vadd.f32 %v997_v22, %v845_v38  ;;  %v1342_v5 = vpop.f32.mrf.mxu0  ;;  %v1528_v28 = vadd.f32 %v3003_v19, %v1357_v14  ;;  %v1531_v32 = vadd.f32 %v2515_v33, %v1360_v20 }
 0x15b   : > { %v1513_v7 = vpop.f32.mrf.mxu1  ;;  %v1359_v13 = vadd.f32 %v1342_v5, %v1188_v16  ;;  %v1532_v39 = vadd.f32 %v2516_v2, %v1361_v24  ;;  %v3004_v27 = vld [vmem:[#allocation5_spill] sm:$0xff] }
 0x15c   : > { %v1187_v11 = vadd.f32 %v1168_v23, %v1016_v6  ;;  %v1526_v40 = vadd.f32 %v3004_v27, %v1355_v31 }
 0x15d   : > { %v1530_v45 = vadd.f32 %v1513_v7, %v1359_v13 }
 0x15e   : > { %v1358_v26 = vadd.f32 %v1339_v52, %v1187_v11 }
 0x160   : > { %v1529_v44 = vadd.f32 %v1510_v50, %v1358_v26 }
 0x16c   : > { %v2535_v18 = vpop.f32.mrf.mxu0 }
 0x16d   : > { %v2539_v22 = vpop.f32.mrf.mxu1  ;;  %v1698_v41 = vadd.f32 %v2535_v18, %v1527_v21 }
 0x16e   : > { %v1665_v15 = vpop.f32.mrf.mxu0  ;;  %v1702_v46 = vadd.f32 %v2539_v22, %v1531_v32 }
 0x16f   : > { %v1681_v30 = vpop.f32.mrf.mxu1  ;;  %v1696_v42 = vadd.f32 %v1665_v15, %v1525_v35  ;;  %v1760_v62 = vmul.f32 %v1698_v41, %v1698_v41 }
 0x170   : > { %v2536_v23 = vpop.f32.mrf.mxu0  ;;  %v1700_v53 = vadd.f32 %v1681_v30, %v1529_v44  ;;  %v1764_v61 = vmul.f32 %v1702_v46, %v1702_v46 }
 0x171   : > { %v1699_v34 = vadd.f32 %v2536_v23, %v1528_v28  ;;  %v2540_v43 = vpop.f32.mrf.mxu1  ;;  %v1758_v51 = vmul.f32 %v1696_v42, %v1696_v42 }
 0x172   : > { %v1703_v47 = vadd.f32 %v2540_v43, %v1532_v39  ;;  %v1668_v48 = vpop.f32.mrf.mxu0  ;;  %v1762_v59 = vmul.f32 %v1700_v53, %v1700_v53 }
 0x173   : > { %v2202_v49 = vpack.c.bf16 %v1699_v34, %v1698_v41  ;;  %v1697_v52 = vadd.f32 %v1668_v48, %v1526_v40  ;;  %v1684_v33 = vpop.f32.mrf.mxu1  ;;  %v1761_v54 = vmul.f32 %v1699_v34, %v1699_v34 }
 0x174   : > { %v2212_v56 = vpack.c.bf16 %v1703_v47, %v1702_v46  ;;  %v1701_v57 = vadd.f32 %v1684_v33, %v1530_v45  ;;  %v1765_v29 = vmul.f32 %v1703_v47, %v1703_v47 }
 0x175   : > { %2214 = vst [vmem:[%s177_s19 + $0x8] sm:$0xff] %v2202_v49   ;;  %v2197_v36 = vpack.c.bf16 %v1697_v52, %v1696_v42  ;;  %v1744_v60 = vadd.f32 %v1697_v52, %v1696_v42  ;;  %v1759_v37 = vmul.f32 %v1697_v52, %v1697_v52 }
 0x176   : > { %2216 = vst [vmem:[%s177_s19 + $0x18] sm:$0xff] %v2212_v56   ;;  %v2207_v50 = vpack.c.bf16 %v1701_v57, %v1700_v53  ;;  %v1763_v8 = vmul.f32 %v1701_v57, %v1701_v57 }
 0x177   : > { %2198 = vst [vmem:[%s177_s19] sm:$0xff] %v2197_v36   ;;  %v1745_v0 = vadd.f32 %v1744_v60, %v1698_v41  ;;  %v1766_v38 = vadd.f32 %v1759_v37, %v1758_v51 }
 0x178   : > { %2215 = vst [vmem:[%s177_s19 + $0x10] sm:$0xff] %v2207_v50  }
 0x179   : > { %v1767_v55 = vadd.f32 %v1766_v38, %v1760_v62  ;;  %v1746_v58 = vadd.f32 %v1745_v0, %v1699_v34 }
 0x17b   : > { %v1747_v4 = vadd.f32 %v1746_v58, %v1700_v53  ;;  %v1768_v2 = vadd.f32 %v1767_v55, %v1761_v54 }
 0x17d   : > { %v1748_v6 = vadd.f32 %v1747_v4, %v1701_v57  ;;  %v1769_v10 = vadd.f32 %v1768_v2, %v1762_v59 }
 0x17f   : > { %v1749_v63 = vadd.f32 %v1748_v6, %v1702_v46  ;;  %v1770_v1 = vadd.f32 %v1769_v10, %v1763_v8 }
 0x181   : > { %v1750_v5 = vadd.f32 %v1749_v63, %v1703_v47  ;;  %v1771_v9 = vadd.f32 %v1770_v1, %v1764_v61 }
 0x183   : > { %v1751_v3 = vrot.slane %v1750_v5, 4  ;;  %v1772_v12 = vadd.f32 %v1771_v9, %v1765_v29 }
 0x185   : > { %v1752_v14 = vadd.f32 %v1751_v3, %v1750_v5  ;;  %v1773_v7 = vrot.slane %v1772_v12, 4 }
 0x187   : > { %v1753_v11 = vrot.slane %v1752_v14, 2  ;;  %v1774_v16 = vadd.f32 %v1773_v7, %v1772_v12 }
 0x189   : > { %v1754_v20 = vadd.f32 %v1753_v11, %v1752_v14  ;;  %v1775_v24 = vrot.slane %v1774_v16, 2 }
 0x18b   : > { %v1755_v18 = vrot.slane %v1754_v20, 1  ;;  %v1776_v31 = vadd.f32 %v1775_v24, %v1774_v16 }
 0x18d   : > { %v1756_v22 = vadd.f32 %v1755_v18, %v1754_v20  ;;  %v1777_v26 = vrot.slane %v1776_v31, 1 }
 0x18f   : > { %1757 = vst [vmem:[%s181_s23] sm:$0x1] %v1756_v22  ;;  %v1778_v13 = vadd.f32 %v1777_v26, %v1776_v31 }
 0x191   : > { %1779 = vst [vmem:[%s181_s23 + $0x1] sm:$0x1] %v1778_v13 }
 0x192 PF: > { %s14_s12 = sadd.s32 1, %s2680_s12  }
 0x193   : > { %p11_p4 = scmp.ge.s32.totalorder %s14_s12, 4  }
 0x195   :  { %13 = sbr.rel (!%p11_p4) target bundleno = 1 (0x1), region = 86 }

// kernel: _lambda_.27
= control target key start
LH: loop header
LB: loop body
LE: loop exit
PB: predicated region body
PF: predicated region fallthrough
CT: control target
= control target key end

     0   :  { %s611_s27 = smov 0   ;;  %s654_s0 = inlined_call_operand.vmem [shape: bf16[2,16,128], index: 0, kind: input, shape index: {}]   ;;  %s655_s1 = inlined_call_operand.vmem [shape: f32[2,128], index: 1, kind: input, shape index: {}]   ;;  %s656_s2 = inlined_call_operand.vmem [shape: f32[1,128], index: 2, kind: input, shape index: {}, may-alias: {2,6}]   ;;  %s657_s3 = inlined_call_operand.vmem [shape: f32[1,128], index: 3, kind: input, shape index: {}, may-alias: {3,7}]   ;;  %s658_s4 = inlined_call_operand.vmem [shape: bf16[2,16,128], index: 4, kind: input, shape index: {}]   ;;  %s659_s5 = inlined_call_operand.vmem [shape: f32[2,128], index: 5, kind: input, shape index: {}]   ;;  %s660_s6 = inlined_call_operand.vmem [shape: f32[1,128], index: 6, kind: input, shape index: {}, may-alias: {2,6}]   ;;  %s661_s7 = inlined_call_operand.vmem [shape: f32[1,128], index: 7, kind: input, shape index: {}, may-alias: {3,7}]   ;;  %s662_s8 = inlined_call_operand.vmem [shape: bf16[2,16,128], index: 8, kind: output, shape index: {}]  }
   0x1 LB: > { %s511_s28 = sadd.s32 4294967295, %s563_s27   ;;  %p515_p0 = scmp.ge.s32.totalorder %s563_s27, 1  ;;  %s563_s27 = sphi %s611_s27, %s18_s27  }
   0x2   : > { %p272_p1 = scmp.lt.s32.totalorder %s563_s27, 3 }
   0x4   : > { %p273_p2 = pnand %p515_p0, %p272_p1 }
   0x5   : > { %p311_p3 = scmp.lt.s32.totalorder (!%p273_p2), %s511_s28, 1 }
   0x6   : > { %276 = sbr.rel (%p273_p2) target bundleno = 62 (0x3e), region = 52 }
   0xb   : > { %v330_v0 = vld [vmem:[%s655_s1] sm:$0x3]  ;;  %v565_v14 = vmov 1966171168   ;;  %v346_v16 = vlaneseq  ;;  %s664_s28 = smov (!%p311_p3, %s511_s28), 1 }
   0xc   : > { %v333_v1 = vmul.f32 0.03125, %v330_v0  ;;  %v382_v2 = vld [vmem:[%s659_s5] sm:$0x3]  ;;  %v344_v15 = vunpack.c.l.s4 %v565_v14  ;;  %s625_s11 = sshll.u32 %s664_s28, 3 }
   0xd   : > { %v385_v4 = vmul.f32 0.03125, %v382_v2  ;;  %v347_v18 = vshrl.u32 %v346_v16, 7  ;;  %s315_s14 = scalar_lea.vmem %s654_s0, %s625_s11  ;;  %s320_s17 = scalar_lea.vmem %s658_s4, %s625_s11  ;;  %v331_v24 = vld [vmem:[%s656_s2] sm:$0x1] }
   0xe   : > { %v334_v3 = vmul.f32 %v333_v1, %v333_v1  ;;  %v345_v17 = vunpack.c.0.s8 %v344_v15  ;;  %v532_v26 = vld [vmem:[%s315_s14] sm:$0xff]   ;;  %s325_s29 = scalar_lea.vmem %s662_s8, %s625_s11 }
   0xf   : > { %v386_v6 = vmul.f32 %v385_v4, %v385_v4  ;;  %v365_v28 = vsub.s32 0, %v347_v18  ;;  %v536_v31 = vld [vmem:[%s320_s17] sm:$0xff]   ;;  %v533_v33 = vunpack.c.l.bf16 %v532_v26  ;;  %v534_v34 = vunpack.c.h.bf16 %v532_v26 }
  0x10   : > { %v336_v5 = vrot.slane %v334_v3, 7  ;;  %v348_v19 = vsub.s32 %v345_v17, %v347_v18  ;;  %v383_v32 = vld [vmem:[%s660_s6] sm:$0x1]  ;;  %v537_v39 = vunpack.c.l.bf16 %v536_v31  ;;  %v538_v40 = vunpack.c.h.bf16 %v536_v31 }
  0x11   : > { %v388_v8 = vrot.slane %v386_v6, 7  ;;  %v332_v35 = vld [vmem:[%s657_s3] sm:$0x1] }
  0x12   : > { %v338_v7 = vsub.f32 %v333_v1, %v336_v5  ;;  %v384_v43 = vld [vmem:[%s661_s7] sm:$0x1] }
  0x13   : > { %v390_v10 = vsub.f32 %v385_v4, %v388_v8 }
  0x14   : > { %v339_v9 = vmax.f32 %v338_v7, 0.0 }
  0x15   : > { %v391_v12 = vmax.f32 %v390_v10, 0.0 }
  0x16   : > { %v340_v11 = vadd.f32 1e-05, %v339_v9 }
  0x17   : > { %v392_v13 = vadd.f32 1e-05, %v391_v12 }
  0x18   : > { %553 = vrsqrt.f32 %v340_v11 }
  0x19   : > { %555 = vrsqrt.f32 %v392_v13 }
  0x25   : > { %v554_v20 = vpop.eup %553 }
  0x26   : > { %v349_v21 = vrot.slane %v554_v20, %v348_v19  ;;  %v556_v22 = vpop.eup %555 }
  0x27   : > { %v401_v25 = vrot.slane %v556_v22, %v348_v19 }
  0x28   : > { %v350_v23 = vcombine.high %v349_v21, %v349_v21 }
  0x29   : > { %v402_v29 = vcombine.high %v401_v25, %v401_v25 }
  0x2a   : > { %v357_v27 = vrot.slane %v350_v23, %v348_v19 }
  0x2b   : > { %v409_v36 = vrot.slane %v402_v29, %v348_v19 }
  0x2c   : > { %v359_v30 = vmul.f32 %v357_v27, %v331_v24 }
  0x2d   : > { %v411_v41 = vmul.f32 %v409_v36, %v383_v32 }
  0x2e   : > { %v360_v37 = vmul.f32 %v359_v30, %v333_v1  ;;  %v366_v38 = vrot.slane %v359_v30, %v365_v28 }
  0x2f   : > { %v412_v46 = vmul.f32 %v411_v41, %v385_v4  ;;  %v418_v47 = vrot.slane %v411_v41, %v365_v28 }
  0x30   : > { %v361_v42 = vsub.f32 %v332_v35, %v360_v37  ;;  %v368_v44 = vmul.f32 %v533_v33, %v366_v38  ;;  %v369_v45 = vmul.f32 %v534_v34, %v366_v38 }
  0x31   : > { %v413_v49 = vsub.f32 %v384_v43, %v412_v46  ;;  %v420_v50 = vmul.f32 %v537_v39, %v418_v47  ;;  %v421_v51 = vmul.f32 %v538_v40, %v418_v47 }
  0x32   : > { %v374_v48 = vrot.slane %v361_v42, %v365_v28 }
  0x33   : > { %v426_v54 = vrot.slane %v413_v49, %v365_v28 }
  0x34   : > { %v376_v52 = vadd.f32 %v374_v48, %v368_v44  ;;  %v377_v53 = vadd.f32 %v374_v48, %v369_v45 }
  0x35   : > { %v428_v55 = vadd.f32 %v426_v54, %v420_v50  ;;  %v429_v56 = vadd.f32 %v426_v54, %v421_v51 }
  0x37   : > { %v430_v57 = vadd.f32 %v428_v55, %v376_v52  ;;  %v431_v58 = vadd.f32 %v429_v56, %v377_v53 }
  0x39   : > { %v432_v59 = vmax.f32 %v430_v57, 0.0  ;;  %v433_v60 = vmax.f32 %v431_v58, 0.0 }
  0x3b   : > { %v542_v61 = vpack.c.bf16 %v433_v60, %v432_v59 }
  0x3d   : > { %543 = vst [vmem:[%s325_s29] sm:$0xff] %v542_v61  }
  0x3e PF: > { %s18_s27 = sadd.s32 1, %s563_s27  }
  0x3f   : > { %p15_p4 = scmp.ge.s32.totalorder %s18_s27, 4  }
  0x41   :  { %17 = sbr.rel (!%p15_p4) target bundleno = 1 (0x1), region = 85 }

// kernel: _lambda_.24
= control target key start
LH: loop header
LB: loop body
LE: loop exit
PB: predicated region body
PF: predicated region fallthrough
CT: control target
= control target key end

     0   :  { %s276_s6 = smov 0   ;;  %s317_s0 = inlined_call_operand.vmem [shape: bf16[2,9,16,128], index: 0, kind: input, shape index: {}]   ;;  %s318_s1 = inlined_call_operand.vmem [shape: bf16[2,16,128], index: 1, kind: output, shape index: {}]  }
   0x1 LB: > { %s216_s7 = sadd.s32 4294967295, %s264_s6   ;;  %p220_p0 = scmp.ge.s32.totalorder %s264_s6, 1  ;;  %s264_s6 = sphi %s276_s6, %s11_s6  }
   0x2   : > { %p87_p1 = scmp.lt.s32.totalorder %s264_s6, 3 }
   0x4   : > { %p88_p2 = pnand %p220_p0, %p87_p1 }
   0x5   : > { %p107_p3 = scmp.lt.s32.totalorder (!%p88_p2), %s216_s7, 1 }
   0x6   : > { %91 = sbr.rel (%p88_p2) target bundleno = 36 (0x24), region = 24 }
   0xb   : > { %s320_s7 = smov (!%p107_p3, %s216_s7), 1 }
   0xc   : > { %s249_s8 = smul.u32 72, %s320_s7  ;;  %s242_s12 = sshll.u32 %s320_s7, 3 }
   0xd   : > { %s116_s15 = scalar_lea.vmem %s318_s1, %s242_s12 }
   0xe   : > { %s290_s11 = scalar_lea.vmem %s317_s0, %s249_s8 }
   0xf   : > { %v117_v0 = vld [vmem:[%s290_s11] sm:$0xf]  ;;  %v118_v1 = vld [vmem:[%s290_s11 + $0x4] sm:$0xf]  ;;  %v224_v2 = vld [vmem:[%s290_s11 + $0x8] sm:$0xf] }
  0x10   : > { %v225_v3 = vld [vmem:[%s290_s11 + $0xc] sm:$0xf]  ;;  %v122_v4 = vmax.bf16 %v224_v2, %v117_v0  ;;  %v226_v5 = vld [vmem:[%s290_s11 + $0x10] sm:$0xf]  ;;  %v227_v6 = vld [vmem:[%s290_s11 + $0x14] sm:$0xf] }
  0x11   : > { %v123_v7 = vmax.bf16 %v225_v3, %v118_v1  ;;  %v228_v8 = vld [vmem:[%s290_s11 + $0x18] sm:$0xf]  ;;  %v229_v10 = vld [vmem:[%s290_s11 + $0x1c] sm:$0xf]  ;;  %v230_v12 = vld [vmem:[%s290_s11 + $0x20] sm:$0xf] }
  0x12   : > { %v127_v9 = vmax.bf16 %v226_v5, %v122_v4  ;;  %v231_v14 = vld [vmem:[%s290_s11 + $0x24] sm:$0xf]  ;;  %v232_v16 = vld [vmem:[%s290_s11 + $0x28] sm:$0xf]  ;;  %v233_v18 = vld [vmem:[%s290_s11 + $0x2c] sm:$0xf] }
  0x13   : > { %v128_v11 = vmax.bf16 %v227_v6, %v123_v7  ;;  %v234_v20 = vld [vmem:[%s290_s11 + $0x30] sm:$0xf]  ;;  %v235_v22 = vld [vmem:[%s290_s11 + $0x34] sm:$0xf]  ;;  %v236_v24 = vld [vmem:[%s290_s11 + $0x38] sm:$0xf] }
  0x14   : > { %v132_v13 = vmax.bf16 %v228_v8, %v127_v9  ;;  %v237_v26 = vld [vmem:[%s290_s11 + $0x3c] sm:$0xf]  ;;  %v238_v28 = vld [vmem:[%s290_s11 + $0x40] sm:$0xf]  ;;  %v239_v30 = vld [vmem:[%s290_s11 + $0x44] sm:$0xf] }
  0x15   : > { %v133_v15 = vmax.bf16 %v229_v10, %v128_v11 }
  0x16   : > { %v137_v17 = vmax.bf16 %v230_v12, %v132_v13 }
  0x17   : > { %v138_v19 = vmax.bf16 %v231_v14, %v133_v15 }
  0x18   : > { %v142_v21 = vmax.bf16 %v232_v16, %v137_v17 }
  0x19   : > { %v143_v23 = vmax.bf16 %v233_v18, %v138_v19 }
  0x1a   : > { %v147_v25 = vmax.bf16 %v234_v20, %v142_v21 }
  0x1b   : > { %v148_v27 = vmax.bf16 %v235_v22, %v143_v23 }
  0x1c   : > { %v152_v29 = vmax.bf16 %v236_v24, %v147_v25 }
  0x1d   : > { %v153_v31 = vmax.bf16 %v237_v26, %v148_v27 }
  0x1e   : > { %v157_v32 = vmax.bf16 %v238_v28, %v152_v29 }
  0x1f   : > { %v158_v33 = vmax.bf16 %v239_v30, %v153_v31 }
  0x21   : > { %v248_v34 = vcombine.low %v157_v32, %v158_v33 }
  0x23   : > { %247 = vst [vmem:[%s116_s15] sm:$0xff] %v248_v34  }
  0x24 PF: > { %s11_s6 = sadd.s32 1, %s264_s6  }
  0x25   : > { %p8_p4 = scmp.ge.s32.totalorder %s11_s6, 4  }
  0x27   :  { %10 = sbr.rel (!%p8_p4) target bundleno = 1 (0x1), region = 62 }

// kernel: _lambda_.25
= control target key start
LH: loop header
LB: loop body
LE: loop exit
PB: predicated region body
PF: predicated region fallthrough
CT: control target
= control target key end

     0   :  { %s2618_s21 = smov 0   ;;  %s3183_s0 = inlined_call_operand.vmem [shape: bf16[2,16,128], index: 0, kind: input, shape index: {}]   ;;  %s3184_s1 = inlined_call_operand.vmem [shape: bf16[9,128,128], index: 1, kind: input, shape index: {}]   ;;  %s3185_s2 = inlined_call_operand.vmem [shape: bf16[128,128], index: 2, kind: input, shape index: {}]   ;;  %s3186_s3 = inlined_call_operand.vmem [shape: bf16[2,16,128], index: 3, kind: output, shape index: {0}]   ;;  %s3187_s4 = inlined_call_operand.vmem [shape: f32[2,2,128], index: 4, kind: output, shape index: {1}]   ;;  %s3188_s5 = inlined_call_operand.vmem [shape: bf16[2,16,128], index: 5, kind: output, shape index: {2}]   ;;  %s3189_s6 = inlined_call_operand.vmem [shape: f32[2,2,128], index: 6, kind: output, shape index: {3}]  }
   0x1 LB: > { %s1923_s22 = sadd.s32 4294967295, %s2578_s21   ;;  %p1927_p0 = scmp.ge.s32.totalorder %s2578_s21, 1  ;;  %s2578_s21 = sphi %s2618_s21, %s17_s21  }
   0x2   : > { %p219_p1 = scmp.lt.s32.totalorder %s2578_s21, 3 }
   0x4   : > { %p220_p2 = pnand %p1927_p0, %p219_p1 }
   0x5   : > { %p2639_p3 = scmp.lt.s32.totalorder (!%p220_p2), %s1923_s22, 1 }
   0x6   : > { %223 = sbr.rel (%p220_p2) target bundleno = 389 (0x185), region = 32 }
   0xb   : > { %v2486_v0 = vld [vmem:[%s3184_s1 + $0x78] sm:$0xff]   ;;  %v2580_v1 = vmov 0.0   ;;  %v296_v3 = vlaneseq  ;;  %v2488_v4 = vld [vmem:[%s3184_s1 + $0x70] sm:$0xff]   ;;  %vm2581_vm0 = vmmov 0   ;;  %v2582_v6 = vmov 0   ;;  %v2490_v8 = vld [vmem:[%s3184_s1 + $0x68] sm:$0xff]  }
   0xc   : > { %2275 = vmatprep.subr.bf16.mxu0 %v2580_v1  ;;  %2295 = vmatprep.subr.bf16.mxu1 %v2580_v1  ;;  %v2487_v2 = vld [vmem:[%s3184_s1 + $0x38] sm:$0xff]   ;;  %v2489_v5 = vld [vmem:[%s3184_s1 + $0x30] sm:$0xff]   ;;  %288 = vst [vmem:[#allocation2] sm:$0xf] %v2582_v6  ;;  %289 = vst [vmem:[#allocation2 + $0x4] sm:$0xf] %v2582_v6 }
   0xd   : > { %2276 = vmatpush3.bf16.msra.mxu0 %v2486_v0  ;;  %2291 = vmatprep.mubr.msk.bf16.mxu0 %vm2581_vm0, %v2580_v1  ;;  %290 = vst [vmem:[#allocation2 + $0x8] sm:$0xf] %v2582_v6  ;;  %291 = vst [vmem:[#allocation2 + $0xc] sm:$0xf] %v2582_v6  ;;  %v297_v7 = vshrl.u32 %v296_v3, 7  ;;  %s3206_s22 = smov (!%p2639_p3, %s1923_s22), 1 }
   0xe   : > { %2296 = vmatpush3.bf16.msra.mxu1 %v2487_v2  ;;  %2277 = vmatprep.subr.bf16.mxu0 %v2580_v1  ;;  %v2491_v9 = vld [vmem:[%s3184_s1 + $0x28] sm:$0xff]   ;;  %v2492_v12 = vld [vmem:[%s3184_s1 + $0x60] sm:$0xff]   ;;  %s2670_s14 = sshll.u32 %s3206_s22, 3  ;;  %v2494_v15 = vld [vmem:[%s3184_s1 + $0x58] sm:$0xff]   ;;  %vm627_vm8 = vsmask.f32 2304 }
   0xf   : > { %2297 = vmatprep.subr.bf16.mxu1 %v2580_v1  ;;  %2311 = vmatprep.mubr.msk.bf16.mxu1 %vm2581_vm0, %v2580_v1  ;;  %v298_v10 = vadd.s32 8, %v297_v7  ;;  %v2493_v13 = vld [vmem:[%s3184_s1 + $0x20] sm:$0xff]   ;;  %v303_v14 = vand.u32 3, %v297_v7  ;;  %s266_s19 = scalar_lea.vmem %s3183_s0, %s2670_s14  ;;  %v2495_v17 = vld [vmem:[%s3184_s1 + $0x18] sm:$0xff]   ;;  %v2496_v22 = vld [vmem:[%s3184_s1 + $0x50] sm:$0xff]   ;;  %vm408_vm10 = vcmask 1045504   ;;  %s280_s24 = scalar_lea.vmem %s3188_s5, %s2670_s14 }
  0x10   : > { %v292_v19 = vld [vmem:[%s266_s19] sm:$0xff]   ;;  %v2497_v26 = vld [vmem:[%s3184_s1 + $0x10] sm:$0xff]   ;;  %v2498_v30 = vld [vmem:[%s3184_s1 + $0x48] sm:$0xff]   ;;  %vm628_vm11 = vsmask.f32 6416  ;;  %s271_s19 = scalar_lea.vmem %s3186_s3, %s2670_s14  ;;  %s1932_s25 = sshll.u32 %s3206_s22, 1 }
  0x11   : > { %2278 = vmatpush3.bf16.msra.mxu0 %v2488_v4  ;;  %v310_v11 = vand.u32 3, %v298_v10  ;;  %vm2684_vm2 = vcmp.ne.s32.totalorder %v303_v14, 3  ;;  %294 = vst [vmem:[#allocation2 + $0x4] sm:$0xff] %v292_v19   ;;  %vm2703_vm6 = vcmp.ne.s32.totalorder %v303_v14, 0  ;;  %v2499_v34 = vld [vmem:[%s3184_s1 + $0x8] sm:$0xff]   ;;  %v2500_v48 = vld [vmem:[%s3184_s1 + $0x40] sm:$0xff]   ;;  %s275_s28 = scalar_lea.vmem %s3187_s4, %s1932_s25  ;;  %s284_s29 = scalar_lea.vmem %s3189_s6, %s1932_s25 }
  0x12   : > { %2298 = vmatpush3.bf16.msra.mxu1 %v2489_v5  ;;  %2279 = vmatprep.subr.bf16.mxu0 %v2580_v1  ;;  %vm623_vm5 = vmpackc.low %vm2684_vm2, %vm2684_vm2  ;;  %vm338_vm12 = vsmask.f32 1280  ;;  %vm339_vm14 = vsmask.f32 5392  ;;  %v2501_v55 = vld [vmem:[%s3184_s1] sm:$0xff]   ;;  %v2504_v4 = vld [vmem:[%s3184_s1 + $0xb8] sm:$0xff]  }
  0x13   : > { %2299 = vmatprep.subr.bf16.mxu1 %v2580_v1  ;;  %vm324_vm1 = vcmp.ne.s32.totalorder %v310_v11, 0  ;;  %vm2692_vm3 = vcmp.ne.s32.totalorder %v310_v11, 3  ;;  %v2716_v25 = vsel %vm623_vm5, 65537, %v2582_v6  ;;  %vm334_vm9 = vmpackc.low %vm2703_vm6, %vm2703_vm6  ;;  %v2742_v35 = vld [vmem:[#allocation2] sm:$0xc] }
  0x14   : > { %vm335_vm4 = vmpackc.low %vm324_vm1, %vm324_vm1  ;;  %v631_v28 = vshrl.u32 %v2716_v25, 16  ;;  %v634_v29 = vshll.u32 %v2716_v25, 16  ;;  %v2750_v39 = vsel %vm334_vm9, 65537, %v2582_v6  ;;  %v327_v60 = vld [vmem:[#allocation2] sm:$0xe] }
  0x15   : > { %2280 = vmatpush3.bf16.msra.mxu0 %v2490_v8  ;;  %v2698_v20 = vsel %vm335_vm4, 65537, %v2582_v6  ;;  %vm624_vm7 = vmpackc.low %vm2692_vm3, %vm2692_vm3  ;;  %v342_v41 = vshrl.u32 %v2750_v39, 16  ;;  %v345_v43 = vshll.u32 %v2750_v39, 16  ;;  %v2506_v8 = vld [vmem:[%s3184_s1 + $0xb0] sm:$0xff]   ;;  %v2508_v14 = vld [vmem:[%s3184_s1 + $0xa8] sm:$0xff]  }
  0x16   : > { %2300 = vmatpush3.bf16.msra.mxu1 %v2491_v9  ;;  %2281 = vmatprep.subr.bf16.mxu0 %v2580_v1  ;;  %v351_v23 = vshrl.u32 %v2698_v20, 16  ;;  %v354_v24 = vshll.u32 %v2698_v20, 16  ;;  %v2723_v27 = vsel %vm624_vm7, 65537, %v2582_v6  ;;  %v633_v36 = vrot.slane %v631_v28, 5  ;;  %vm340_vm15 = vmor %vm338_vm12, %vm339_vm14 }
  0x17   : > { %2301 = vmatprep.subr.bf16.mxu1 %v2580_v1  ;;  %v640_v33 = vshrl.u32 %v2723_v27, 16  ;;  %v636_v37 = vrot.slane %v634_v29, 6  ;;  %v643_v38 = vshll.u32 %v2723_v27, 16  ;;  %v344_v47 = vrot.slane %v342_v41, 6  ;;  %vm629_vm2 = vmor %vm627_vm8, %vm628_vm11 }
  0x18   : > { %v353_v31 = vrot.slane %v351_v23, 6  ;;  %v356_v32 = vrot.slane %v354_v24, 7  ;;  %v2758_v44 = vld [vmem:[#allocation2 + $0x4] sm:$0xf]  ;;  %v329_v45 = vld [vmem:[#allocation2 + $0x8] sm:$0x3] }
  0x19   : > { %2282 = vmatpush3.bf16.msra.mxu0 %v2492_v12  ;;  %v642_v42 = vrot.slane %v640_v33, 5  ;;  %v1952_v49 = vcombine.low %v2742_v35, %v2758_v44  ;;  %v1953_v50 = vcombine.low %v329_v45, %v329_v45  ;;  %v2767_v51 = vor.u32 %v636_v37, %v633_v36  ;;  %v618_v21 = vld [vmem:[#allocation2 + $0x8] sm:$0x7]  ;;  %v2541_v36 = vld [vmem:[%s3184_s1 + $0x1a8] sm:$0xff]  }
  0x1a   : > { %2302 = vmatpush3.bf16.msra.mxu1 %v2493_v13  ;;  %2283 = vmatprep.subr.bf16.mxu0 %v2580_v1  ;;  %v357_v40 = vor.u32 %v356_v32, %v353_v31  ;;  %v645_v52 = vrot.slane %v643_v38, 6  ;;  %v347_v54 = vrot.slane %v345_v43, 7  ;;  %vm510_vm6 = vsmask.f32 6400  ;;  %v2505_v32 = vld [vmem:[%s3184_s1 + $0xf8] sm:$0xff]  }
  0x1b   : > { %2303 = vmatprep.subr.bf16.mxu1 %v2580_v1  ;;  %v409_v57 = vrot.slane %v1952_v49, 2  ;;  %v410_v58 = vrot.slane %v1953_v50, 2  ;;  %v638_v62 = vrot.slane %v2767_v51, 4  ;;  %vm649_vm4 = vcmp.ne.s16.totalorder %v2767_v51, 0  ;;  %v2861_v49 = vld [vmem:[#allocation2 + $0x8] sm:$0xf] }
  0x1c   : > { %v359_v46 = vrot.slane %v357_v40, 4  ;;  %v2784_v61 = vor.u32 %v347_v54, %v344_v47  ;;  %v646_v63 = vor.u32 %v645_v52, %v642_v42  ;;  %vm792_vm8 = vsmask.f32 3328  ;;  %v2514_v52 = vld [vmem:[%s3184_s1 + $0x90] sm:$0xff]  }
  0x1d   : > { %2284 = vmatpush3.bf16.msra.mxu0 %v2494_v15  ;;  %v411_v0 = vsel %vm408_vm10, %v409_v57, %v410_v58  ;;  %vm793_vm9 = vsmask.f32 7440  ;;  %v801_v47 = vrot.slane %v351_v23, 4  ;;  %v2509_v23 = vld [vmem:[%s3184_s1 + $0xe8] sm:$0xff]   ;;  %v1066_v53 = vrot.slane %v640_v33, 7  ;;  %v2528_v33 = vld [vmem:[%s3184_s1 + $0x118] sm:$0xff]  }
  0x1e   : > { %2304 = vmatpush3.bf16.msra.mxu1 %v2495_v17  ;;  %2285 = vmatprep.subr.bf16.mxu0 %v2580_v1  ;;  %vm2771_vm13 = vcmp.ne.s16.totalorder %v359_v46, 0  ;;  %v349_v2 = vrot.slane %v2784_v61, 4  ;;  %vm360_vm1 = vcmp.ne.s16.totalorder %v2784_v61, 0  ;;  %v2806_v10 = vsel %vm629_vm2, %v638_v62, %v646_v63  ;;  %vm2865_vm11 = vmor %vm792_vm8, %vm793_vm9  ;;  %v2511_v62 = vld [vmem:[%s3184_s1 + $0xe0] sm:$0xff]   ;;  %v1059_v61 = vld [vmem:[#allocation2 + $0xc] sm:$0x1] }
  0x1f   : > { %2305 = vmatprep.subr.bf16.mxu1 %v2580_v1  ;;  %v365_v56 = vsel %vm2771_vm13, %v329_v45, 0  ;;  %v363_v7 = vsel %vm360_vm1, %v327_v60, 0  ;;  %vm650_vm5 = vcmp.ne.s16.totalorder %v2806_v10, 0  ;;  %v796_v45 = vrot.slane %v342_v41, 4 }
  0x20   : > { %v1963_v59 = vcombine.low %v365_v56, %v365_v56  ;;  %v2797_v6 = vsel %vm340_vm15, %v349_v2, %v357_v40  ;;  %v799_v46 = vrot.slane %v354_v24, 5  ;;  %v790_v24 = vld [vmem:[#allocation2] sm:$0x8]  ;;  %vm680_vm2 = vsmask.f32 5376 }
  0x21   : > { %2286 = vmatpush3.bf16.msra.mxu0 %v2496_v22  ;;  %vm361_vm3 = vcmp.ne.s16.totalorder %v2797_v6, 0  ;;  %v648_v22 = vrot.slane %v646_v63, 4  ;;  %vm835_vm8 = vsmask.f32 4352  ;;  %vm1061_vm9 = vsmask.f32 4368 }
  0x22   : > { %2306 = vmatpush3.bf16.msra.mxu1 %v2497_v26  ;;  %2287 = vmatprep.subr.bf16.mxu0 %v2580_v1  ;;  %v520_v3 = vshrl.u32 %v1963_v59, 16  ;;  %v523_v5 = vshll.u32 %v1963_v59, 16  ;;  %v364_v11 = vsel %vm361_vm3, %v2758_v44, 0  ;;  %v652_v26 = vsel %vm649_vm4, %v2742_v35, 0 }
  0x23   : > { %2307 = vmatprep.subr.bf16.mxu1 %v2580_v1  ;;  %v1962_v13 = vcombine.low %v363_v7, %v364_v11  ;;  %vm2832_vm7 = vcmp.ne.s16.totalorder %v648_v22, 0  ;;  %v795_v35 = vrot.slane %v345_v43, 5  ;;  %v2507_v43 = vld [vmem:[%s3184_s1 + $0xf0] sm:$0xff]   ;;  %v802_v20 = vor.u32 %v801_v47, %v799_v46  ;;  %v2513_v11 = vld [vmem:[%s3184_s1 + $0xd8] sm:$0xff]  }
  0x24   : > { %v522_v9 = vrot.slane %v520_v3, 1  ;;  %v525_v12 = vrot.slane %v523_v5, 2  ;;  %v654_v40 = vsel %vm2832_vm7, %v618_v21, 0  ;;  %v2515_v21 = vld [vmem:[%s3184_s1 + $0xd0] sm:$0xff]   ;;  %v1063_v47 = vrot.slane %v631_v28, 7  ;;  %v2526_v28 = vld [vmem:[%s3184_s1 + $0x120] sm:$0xff]  }
  0x25   : > { %2288 = vmatpush3.bf16.msra.mxu0 %v2498_v30  ;;  %v512_v15 = vshrl.u32 %v1962_v13, 16  ;;  %v515_v16 = vshll.u32 %v1962_v13, 16  ;;  %v653_v30 = vsel %vm650_vm5, %v2758_v44, 0  ;;  %v1989_v39 = vcombine.low %v654_v40, %v654_v40  ;;  %v2518_v13 = vld [vmem:[%s3184_s1 + $0x80] sm:$0xff]   ;;  %v2910_v40 = vld [vmem:[#allocation2 + $0xc] sm:$0x3] }
  0x26   : > { %2308 = vmatpush3.bf16.msra.mxu1 %v2499_v34  ;;  %2289 = vmatprep.subr.bf16.mxu0 %v2580_v1  ;;  %v526_v19 = vor.u32 %v525_v12, %v522_v9  ;;  %v2510_v34 = vld [vmem:[%s3184_s1 + $0xa0] sm:$0xff]   ;;  %v1988_v42 = vcombine.low %v652_v26, %v653_v30  ;;  %v797_v41 = vor.u32 %v796_v45, %v795_v35  ;;  %v803_v56 = vrot.slane %v802_v20, 4  ;;  %v2520_v26 = vld [vmem:[%s3184_s1 + $0x138] sm:$0xff]   ;;  %v2517_v30 = vld [vmem:[%s3184_s1 + $0xc8] sm:$0xff]  }
  0x27   : > { %2309 = vmatprep.subr.bf16.mxu1 %v2580_v1  ;;  %v514_v17 = vrot.slane %v512_v15, 1  ;;  %v517_v18 = vrot.slane %v515_v16, 2  ;;  %vm804_vm12 = vcmp.ne.s16.totalorder %v795_v35, 0  ;;  %v690_v58 = vshrl.u32 %v1989_v39, 16 }
  0x28   : > { %v682_v54 = vshrl.u32 %v1988_v42, 16  ;;  %v685_v57 = vshll.u32 %v1988_v42, 16  ;;  %v693_v59 = vshll.u32 %v1989_v39, 16  ;;  %vm806_vm14 = vcmp.ne.s16.totalorder %v803_v56, 0  ;;  %v2519_v42 = vld [vmem:[%s3184_s1 + $0xc0] sm:$0xff]   ;;  %v2521_v39 = vld [vmem:[%s3184_s1 + $0x178] sm:$0xff]  }
  0x29   : > { %2290 = vmatpush3.bf16.msra.mxu0 %v2500_v48  ;;  %v518_v31 = vor.u32 %v517_v18, %v514_v17  ;;  %v2512_v48 = vld [vmem:[%s3184_s1 + $0x98] sm:$0xff]   ;;  %v807_v63 = vsel %vm804_vm12, %v790_v24, 0  ;;  %v809_v3 = vsel %vm806_vm14, %v2861_v49, 0  ;;  %v692_v7 = vrot.slane %v690_v58, 2  ;;  %v2525_v56 = vld [vmem:[%s3184_s1 + $0x168] sm:$0xff]  }
  0x2a   : > { %2310 = vmatpush3.bf16.msra.mxu1 %v2501_v55  ;;  %2315 = vmatprep.subr.bf16.mxu0 %v2580_v1  ;;  %v798_v55 = vrot.slane %v797_v41, 4  ;;  %v687_v5 = vrot.slane %v685_v57, 3  ;;  %v2015_v9 = vcombine.low %v809_v3, %v809_v3  ;;  %v1064_v41 = vor.u32 %v1063_v47, %v634_v29  ;;  %v2530_v57 = vld [vmem:[%s3184_s1 + $0x110] sm:$0xff]   ;;  %v1057_v58 = vld [vmem:[#allocation2 + $0x4] sm:$0xf] }
  0x2b   : > { %2335 = vmatprep.subr.bf16.mxu1 %v2580_v1  ;;  %v527_v37 = vsel %vm510_vm6, %v518_v31, %v526_v19  ;;  %v1065_v50 = vrot.slane %v1063_v47, 4  ;;  %v1067_v25 = vor.u32 %v1066_v53, %v643_v38  ;;  %v1069_v29 = vrot.slane %v1066_v53, 4 }
  0x2c   : > { %2292 = vmatmul.mubr.bf16.vlgmr.msra.gmra.mxu0 %v411_v0  ;;  %v800_v60 = vsel %vm2865_vm11, %v798_v55, %v799_v46  ;;  %v2516_v0 = vld [vmem:[%s3184_s1 + $0x88] sm:$0xff]   ;;  %v845_v16 = vshrl.u32 %v2015_v9, 16  ;;  %v848_v17 = vshll.u32 %v2015_v9, 16  ;;  %vm1070_vm12 = vcmp.ne.s16.totalorder %v1064_v41, 0 }
  0x2d   : > { %2316 = vmatpush3.bf16.msra.mxu0 %v2504_v4  ;;  %2331 = vmatprep.mubr.msk.bf16.mxu0 %vm2581_vm0, %v2580_v1  ;;  %vm805_vm15 = vcmp.ne.s16.totalorder %v800_v60, 0  ;;  %v684_v4 = vrot.slane %v682_v54, 2  ;;  %v1206_v60 = vld [vmem:[#allocation2 + $0x4] sm:$0xe]  ;;  %v1073_v51 = vsel %vm1070_vm12, %v1057_v58, 0  ;;  %v2547_v58 = vld [vmem:[%s3184_s1 + $0x190] sm:$0xff]  }
  0x2e   : > { %2317 = vmatprep.subr.bf16.mxu0 %v2580_v1  ;;  %2312 = vmatmul.mubr.bf16.vlgmr.msra.gmra.mxu1 %v527_v37  ;;  %v808_v2 = vsel %vm805_vm15, %v2758_v44, 0  ;;  %v850_v35 = vrot.slane %v848_v17, 4  ;;  %v2522_v37 = vld [vmem:[%s3184_s1 + $0x130] sm:$0xff]   ;;  %v2532_v9 = vld [vmem:[%s3184_s1 + $0x108] sm:$0xff]  }
  0x2f   : > { %2336 = vmatpush3.bf16.msra.mxu1 %v2505_v32  ;;  %2351 = vmatprep.mubr.msk.bf16.mxu1 %vm2581_vm0, %v2580_v1  ;;  %v2014_v12 = vcombine.low %v807_v63, %v808_v2  ;;  %v1208_v63 = vsel %vm360_vm1, %v1206_v60, 0  ;;  %vm2979_vm1 = vcmp.ne.s16.totalorder %v1069_v29, 0  ;;  %v2538_v29 = vld [vmem:[%s3184_s1 + $0x1f8] sm:$0xff]   ;;  %v2549_v60 = vld [vmem:[%s3184_s1 + $0x188] sm:$0xff]  }
  0x30   : > { %2337 = vmatprep.subr.bf16.mxu1 %v2580_v1  ;;  %v1075_v17 = vsel %vm2979_vm1, %v1059_v61, 0  ;;  %v2557_v61 = vld [vmem:[%s3184_s1 + $0x230] sm:$0xff]  }
  0x31   : > { %2318 = vmatpush3.bf16.msra.mxu0 %v2506_v8  ;;  %v695_v8 = vrot.slane %v693_v59, 3  ;;  %v837_v18 = vshrl.u32 %v2014_v12, 16  ;;  %v840_v19 = vshll.u32 %v2014_v12, 16 }
  0x32   : > { %2319 = vmatprep.subr.bf16.mxu0 %v2580_v1 }
  0x33   : > { %2338 = vmatpush3.bf16.msra.mxu1 %v2507_v43  ;;  %v696_v15 = vor.u32 %v695_v8, %v692_v7  ;;  %v839_v31 = vrot.slane %v837_v18, 3  ;;  %v842_v32 = vrot.slane %v840_v19, 4  ;;  %v1210_v43 = vsel %vm2771_vm13, %v2910_v40, 0  ;;  %v2534_v19 = vld [vmem:[%s3184_s1 + $0x100] sm:$0xff]  }
  0x34   : > { %2339 = vmatprep.subr.bf16.mxu1 %v2580_v1  ;;  %vm1060_vm13 = vsmask.f32 256  ;;  %v2092_v20 = vcombine.low %v1210_v43, %v1210_v43 }
  0x35   : > { %2320 = vmatpush3.bf16.msra.mxu0 %v2508_v14  ;;  %v688_v14 = vor.u32 %v687_v5, %v684_v4  ;;  %v843_v45 = vor.u32 %v842_v32, %v839_v31  ;;  %vm1062_vm11 = vmor %vm1060_vm13, %vm1061_vm9  ;;  %v2527_v4 = vld [vmem:[%s3184_s1 + $0x160] sm:$0xff]   ;;  %v2537_v32 = vld [vmem:[%s3184_s1 + $0x1b8] sm:$0xff]  }
  0x36   : > { %2321 = vmatprep.subr.bf16.mxu0 %v2580_v1  ;;  %v1245_v54 = vshrl.u32 %v2092_v20, 16  ;;  %v1248_v55 = vshll.u32 %v2092_v20, 16  ;;  %v1068_v59 = vsel %vm1062_vm11, %v1065_v50, %v1067_v25 }
  0x37   : > { %2340 = vmatpush3.bf16.msra.mxu1 %v2509_v23  ;;  %v697_v22 = vsel %vm680_vm2, %v688_v14, %v696_v15  ;;  %v2523_v23 = vld [vmem:[%s3184_s1 + $0x170] sm:$0xff]  }
  0x38   : > { %2341 = vmatprep.subr.bf16.mxu1 %v2580_v1  ;;  %v1250_v2 = vrot.slane %v1248_v55, 2  ;;  %v2543_v55 = vld [vmem:[%s3184_s1 + $0x1a0] sm:$0xff]  }
  0x39   : > { %2322 = vmatpush3.bf16.msra.mxu0 %v2510_v34  ;;  %v847_v34 = vrot.slane %v845_v16, 3  ;;  %v2529_v16 = vld [vmem:[%s3184_s1 + $0x158] sm:$0xff]  }
  0x3a   : > { %2323 = vmatprep.subr.bf16.mxu0 %v2580_v1 }
  0x3b   : > { %2342 = vmatpush3.bf16.msra.mxu1 %v2511_v62  ;;  %v851_v46 = vor.u32 %v850_v35, %v847_v34  ;;  %v2967_v62 = vld [vmem:[#allocation2 + $0x4] sm:$0xc] }
  0x3c   : > { %2343 = vmatprep.subr.bf16.mxu1 %v2580_v1  ;;  %v1467_v6 = vsel %vm649_vm4, %v2967_v62, 0  ;;  %vm1101_vm4 = vsmask.f32 7424 }
  0x3d   : > { %2324 = vmatpush3.bf16.msra.mxu0 %v2512_v48  ;;  %v2524_v48 = vld [vmem:[%s3184_s1 + $0x128] sm:$0xff]   ;;  %v852_v24 = vsel %vm835_vm8, %v843_v45, %v851_v46  ;;  %v1466_v45 = vld [vmem:[#allocation2 + $0xc] sm:$0x7] }
  0x3e   : > { %2325 = vmatprep.subr.bf16.mxu0 %v2580_v1  ;;  %v2539_v46 = vld [vmem:[%s3184_s1 + $0x1b0] sm:$0xff]   ;;  %v1469_v47 = vsel %vm2832_vm7, %v1466_v45, 0 }
  0x3f   : > { %2344 = vmatpush3.bf16.msra.mxu1 %v2513_v11  ;;  %v2144_v43 = vcombine.low %v1469_v47, %v1469_v47 }
  0x40   : > { %2345 = vmatprep.subr.bf16.mxu1 %v2580_v1 }
  0x41   : > { %2326 = vmatpush3.bf16.msra.mxu0 %v2514_v52  ;;  %v2946_v52 = vld [vmem:[#allocation2 + $0x8] sm:$0xf]  ;;  %v1504_v41 = vshrl.u32 %v2144_v43, 16  ;;  %v1507_v20 = vshll.u32 %v2144_v43, 16 }
  0x42   : > { %2327 = vmatprep.subr.bf16.mxu0 %v2580_v1  ;;  %v1209_v27 = vsel %vm361_vm3, %v2946_v52, 0  ;;  %v1468_v38 = vsel %vm650_vm5, %v2946_v52, 0  ;;  %vm1071_vm3 = vcmp.ne.s16.totalorder %v1068_v59, 0  ;;  %v2544_v59 = vld [vmem:[%s3184_s1 + $0x1e0] sm:$0xff]  }
  0x43   : > { %2346 = vmatpush3.bf16.msra.mxu1 %v2515_v21  ;;  %v2091_v10 = vcombine.low %v1208_v63, %v1209_v27  ;;  %v2143_v3 = vcombine.low %v1467_v6, %v1468_v38  ;;  %v1074_v11 = vsel %vm1071_vm3, %v2946_v52, 0  ;;  %v1506_v50 = vrot.slane %v1504_v41, 2  ;;  %v2540_v27 = vld [vmem:[%s3184_s1 + $0x1f0] sm:$0xff]   ;;  %v2545_v38 = vld [vmem:[%s3184_s1 + $0x198] sm:$0xff]   ;;  %v2551_v6 = vld [vmem:[%s3184_s1 + $0x180] sm:$0xff]  }
  0x44   : > { %2347 = vmatprep.subr.bf16.mxu1 %v2580_v1  ;;  %v2065_v18 = vcombine.low %v1073_v51, %v1074_v11  ;;  %v2546_v63 = vld [vmem:[%s3184_s1 + $0x1d8] sm:$0xff]  }
  0x45   : > { %2328 = vmatpush3.bf16.msra.mxu0 %v2516_v0  ;;  %v1247_v0 = vrot.slane %v1245_v54, 1  ;;  %v1237_v7 = vshrl.u32 %v2091_v10, 16  ;;  %v1240_v8 = vshll.u32 %v2091_v10, 16  ;;  %v1496_v34 = vshrl.u32 %v2143_v3, 16  ;;  %v2548_v10 = vld [vmem:[%s3184_s1 + $0x1d0] sm:$0xff]   ;;  %v2563_v11 = vld [vmem:[%s3184_s1 + $0x218] sm:$0xff]  }
  0x46   : > { %2329 = vmatprep.subr.bf16.mxu0 %v2580_v1  ;;  %v1105_v31 = vshll.u32 %v2065_v18, 16  ;;  %v1499_v35 = vshll.u32 %v2143_v3, 16  ;;  %v2117_v3 = vcombine.low %v2967_v62, %v2946_v52  ;;  %v2552_v52 = vld [vmem:[%s3184_s1 + $0x1c0] sm:$0xff]  }
  0x47   : > { %2348 = vmatpush3.bf16.msra.mxu1 %v2517_v30  ;;  %v1239_v12 = vrot.slane %v1237_v7, 1  ;;  %v1251_v14 = vor.u32 %v1250_v2, %v1247_v0  ;;  %v2040_v30 = vcombine.low %v2758_v44, %v2861_v49  ;;  %v1103_v44 = vshrl.u32 %v2065_v18, 16  ;;  %v2555_v0 = vld [vmem:[%s3184_s1 + $0x238] sm:$0xff]   ;;  %v2550_v2 = vld [vmem:[%s3184_s1 + $0x1c8] sm:$0xff]   ;;  %v2566_v18 = vld [vmem:[%s3185_s2 + $0x10] sm:$0xff]  }
  0x48   : > { %2349 = vmatprep.subr.bf16.mxu1 %v2580_v1  ;;  %v1107_v49 = vrot.slane %v1105_v31, 1  ;;  %v1371_v62 = vrot.slane %v2117_v3, 2  ;;  %v2556_v7 = vld [vmem:[%s3185_s2 + $0x38] sm:$0xff]  }
  0x49   : > { %2330 = vmatpush3.bf16.msra.mxu0 %v2518_v13  ;;  %v1242_v13 = vrot.slane %v1240_v8, 2  ;;  %v2561_v8 = vld [vmem:[%s3184_s1 + $0x220] sm:$0xff]  }
  0x4a   : > { %2355 = vmatprep.subr.bf16.mxu0 %v2580_v1  ;;  %v1108_v53 = vor.u32 %v1107_v49, %v1103_v44 }
  0x4b   : > { %2350 = vmatpush3.bf16.msra.mxu1 %v2519_v42  ;;  %v1243_v15 = vor.u32 %v1242_v13, %v1239_v12  ;;  %v2560_v12 = vld [vmem:[%s3185_s2 + $0x28] sm:$0xff]   ;;  %v2565_v13 = vld [vmem:[%s3184_s1 + $0x210] sm:$0xff]  }
  0x4c   : > { %2332 = vmatmul.mubr.bf16.vlgmr.msra.gmra.mxu0 %v697_v22  ;;  %2375 = vmatprep.subr.bf16.mxu1 %v2580_v1  ;;  %v2066_v22 = vcombine.low %v1075_v17, %v1075_v17  ;;  %v2569_v17 = vld [vmem:[%s3184_s1 + $0x200] sm:$0xff]  }
  0x4d   : > { %2356 = vmatpush3.bf16.msra.mxu0 %v2520_v26  ;;  %2371 = vmatprep.mubr.msk.bf16.mxu0 %vm2581_vm0, %v2580_v1  ;;  %v3000_v21 = vsel %vm510_vm6, %v1243_v15, %v1251_v14  ;;  %v2531_v26 = vld [vmem:[%s3184_s1 + $0x150] sm:$0xff]   ;;  %v2562_v14 = vld [vmem:[%s3185_s2 + $0x20] sm:$0xff]   ;;  %v2567_v15 = vld [vmem:[%s3184_s1 + $0x208] sm:$0xff]  }
  0x4e   : > { %2357 = vmatprep.subr.bf16.mxu0 %v2580_v1  ;;  %2352 = vmatmul.mubr.bf16.vlgmr.msra.gmra.mxu1 %v852_v24  ;;  %v1110_v42 = vshll.u32 %v2066_v22, 16  ;;  %v2571_v22 = vld [vmem:[#allocation2 + $0x4] sm:$0xff]  }
  0x4f   : > { %2376 = vmatpush3.bf16.msra.mxu1 %v2521_v39  ;;  %2391 = vmatprep.mubr.msk.bf16.mxu1 %vm2581_vm0, %v2580_v1  ;;  %v1501_v39 = vrot.slane %v1499_v35, 3 }
  0x50   : > { %2377 = vmatprep.subr.bf16.mxu1 %v2580_v1  ;;  %v1112_v24 = vrot.slane %v1110_v42, 1 }
  0x51   : > { %2358 = vmatpush3.bf16.msra.mxu0 %v2522_v37  ;;  %v2533_v37 = vld [vmem:[%s3184_s1 + $0x148] sm:$0xff]  }
  0x52   : > { %2359 = vmatprep.subr.bf16.mxu0 %v2580_v1  ;;  %v1113_v25 = vsel %vm1101_vm4, %v1108_v53, %v1112_v24 }
  0x53   : > { %2378 = vmatpush3.bf16.msra.mxu1 %v2523_v23 }
  0x54   : > { %2379 = vmatprep.subr.bf16.mxu1 %v2580_v1 }
  0x55   : > { %2360 = vmatpush3.bf16.msra.mxu0 %v2524_v48  ;;  %v1498_v48 = vrot.slane %v1496_v34, 2 }
  0x56   : > { %2361 = vmatprep.subr.bf16.mxu0 %v2580_v1 }
  0x57   : > { %2380 = vmatpush3.bf16.msra.mxu1 %v2525_v56  ;;  %v1502_v23 = vor.u32 %v1501_v39, %v1498_v48 }
  0x58   : > { %2381 = vmatprep.subr.bf16.mxu1 %v2580_v1 }
  0x59   : > { %2362 = vmatpush3.bf16.msra.mxu0 %v2526_v28  ;;  %v2535_v28 = vld [vmem:[%s3184_s1 + $0x140] sm:$0xff]  }
  0x5a   : > { %2363 = vmatprep.subr.bf16.mxu0 %v2580_v1 }
  0x5b   : > { %2382 = vmatpush3.bf16.msra.mxu1 %v2527_v4  ;;  %v2118_v4 = vcombine.low %v2910_v40, %v2910_v40  ;;  %v2559_v40 = vld [vmem:[%s3184_s1 + $0x228] sm:$0xff]  }
  0x5c   : > { %2383 = vmatprep.subr.bf16.mxu1 %v2580_v1 }
  0x5d   : > { %2364 = vmatpush3.bf16.msra.mxu0 %v2528_v33  ;;  %v1509_v33 = vrot.slane %v1507_v20, 3  ;;  %v1372_v5 = vrot.slane %v2118_v4, 2 }
  0x5e   : > { %2365 = vmatprep.subr.bf16.mxu0 %v2580_v1 }
  0x5f   : > { %2384 = vmatpush3.bf16.msra.mxu1 %v2529_v16  ;;  %v1510_v54 = vor.u32 %v1509_v33, %v1506_v50  ;;  %v1373_v51 = vsel %vm408_vm10, %v1371_v62, %v1372_v5  ;;  %v2564_v16 = vld [vmem:[%s3185_s2 + $0x18] sm:$0xff]  }
  0x60   : > { %2385 = vmatprep.subr.bf16.mxu1 %v2580_v1 }
  0x61   : > { %2366 = vmatpush3.bf16.msra.mxu0 %v2530_v57  ;;  %v3042_v56 = vsel %vm680_vm2, %v1502_v23, %v1510_v54  ;;  %v2542_v57 = vld [vmem:[%s3184_s1 + $0x1e8] sm:$0xff]  }
  0x62   : > { %2367 = vmatprep.subr.bf16.mxu0 %v2580_v1 }
  0x63   : > { %2386 = vmatpush3.bf16.msra.mxu1 %v2531_v26 }
  0x64   : > { %2387 = vmatprep.subr.bf16.mxu1 %v2580_v1 }
  0x65   : > { %2368 = vmatpush3.bf16.msra.mxu0 %v2532_v9  ;;  %v2558_v9 = vld [vmem:[%s3185_s2 + $0x30] sm:$0xff]  }
  0x66   : > { %2369 = vmatprep.subr.bf16.mxu0 %v2580_v1 }
  0x67   : > { %2388 = vmatpush3.bf16.msra.mxu1 %v2533_v37 }
  0x68   : > { %2389 = vmatprep.subr.bf16.mxu1 %v2580_v1 }
  0x69   : > { %2370 = vmatpush3.bf16.msra.mxu0 %v2534_v19  ;;  %v2568_v19 = vld [vmem:[%s3185_s2 + $0x8] sm:$0xff]  }
  0x6a   : > { %2395 = vmatprep.subr.bf16.mxu0 %v2580_v1 }
  0x6b   : > { %2390 = vmatpush3.bf16.msra.mxu1 %v2535_v28 }
  0x6c   : > { %2372 = vmatmul.mubr.bf16.vlgmr.msra.gmra.mxu0 %v2040_v30  ;;  %2415 = vmatprep.subr.bf16.mxu1 %v2580_v1 }
  0x6d   : > { %2396 = vmatpush3.bf16.msra.mxu0 %v2537_v32  ;;  %2411 = vmatprep.mubr.msk.bf16.mxu0 %vm2581_vm0, %v2580_v1 }
  0x6e   : > { %2397 = vmatprep.subr.bf16.mxu0 %v2580_v1  ;;  %2392 = vmatmul.mubr.bf16.vlgmr.msra.gmra.mxu1 %v1113_v25 }
  0x6f   : > { %2416 = vmatpush3.bf16.msra.mxu1 %v2538_v29  ;;  %2431 = vmatprep.mubr.msk.bf16.mxu1 %vm2581_vm0, %v2580_v1 }
  0x70   : > { %2417 = vmatprep.subr.bf16.mxu1 %v2580_v1 }
  0x71   : > { %2398 = vmatpush3.bf16.msra.mxu0 %v2539_v46 }
  0x72   : > { %2399 = vmatprep.subr.bf16.mxu0 %v2580_v1 }
  0x73   : > { %2418 = vmatpush3.bf16.msra.mxu1 %v2540_v27 }
  0x74   : > { %2419 = vmatprep.subr.bf16.mxu1 %v2580_v1 }
  0x75   : > { %2400 = vmatpush3.bf16.msra.mxu0 %v2541_v36 }
  0x76   : > { %2401 = vmatprep.subr.bf16.mxu0 %v2580_v1 }
  0x77   : > { %2420 = vmatpush3.bf16.msra.mxu1 %v2542_v57 }
  0x78   : > { %2421 = vmatprep.subr.bf16.mxu1 %v2580_v1 }
  0x79   : > { %2402 = vmatpush3.bf16.msra.mxu0 %v2543_v55 }
  0x7a   : > { %2403 = vmatprep.subr.bf16.mxu0 %v2580_v1 }
  0x7b   : > { %2422 = vmatpush3.bf16.msra.mxu1 %v2544_v59 }
  0x7c   : > { %2423 = vmatprep.subr.bf16.mxu1 %v2580_v1 }
  0x7d   : > { %2404 = vmatpush3.bf16.msra.mxu0 %v2545_v38 }
  0x7e   : > { %2405 = vmatprep.subr.bf16.mxu0 %v2580_v1 }
  0x7f   : > { %2424 = vmatpush3.bf16.msra.mxu1 %v2546_v63 }
  0x80   : > { %2425 = vmatprep.subr.bf16.mxu1 %v2580_v1 }
  0x81   : > { %2406 = vmatpush3.bf16.msra.mxu0 %v2547_v58 }
  0x82   : > { %2407 = vmatprep.subr.bf16.mxu0 %v2580_v1 }
  0x83   : > { %2426 = vmatpush3.bf16.msra.mxu1 %v2548_v10 }
  0x84   : > { %2427 = vmatprep.subr.bf16.mxu1 %v2580_v1 }
  0x85   : > { %2408 = vmatpush3.bf16.msra.mxu0 %v2549_v60 }
  0x86   : > { %2409 = vmatprep.subr.bf16.mxu0 %v2580_v1 }
  0x87   : > { %2428 = vmatpush3.bf16.msra.mxu1 %v2550_v2 }
  0x88   : > { %2429 = vmatprep.subr.bf16.mxu1 %v2580_v1 }
  0x89   : > { %2410 = vmatpush3.bf16.msra.mxu0 %v2551_v6 }
  0x8a   : > { %2435 = vmatprep.subr.bf16.mxu0 %v2580_v1 }
  0x8b   : > { %2430 = vmatpush3.bf16.msra.mxu1 %v2552_v52 }
  0x8c   : > { %2412 = vmatmul.mubr.bf16.vlgmr.msra.gmra.mxu0 %v3000_v21  ;;  %2455 = vmatprep.subr.bf16.mxu1 %v2580_v1  ;;  %v2570_v21 = vld [vmem:[%s3185_s2] sm:$0xff]  }
  0x8d   : > { %2436 = vmatpush3.bf16.msra.mxu0 %v2555_v0  ;;  %2451 = vmatprep.mubr.msk.bf16.mxu0 %vm2581_vm0, %v2580_v1 }
  0x8e   : > { %2437 = vmatprep.subr.bf16.mxu0 %v2580_v1  ;;  %2432 = vmatmul.mubr.bf16.vlgmr.msra.gmra.mxu1 %v1373_v51 }
  0x8f   : > { %2456 = vmatpush3.bf16.msra.mxu1 %v2556_v7  ;;  %2471 = vmatprep.mubr.msk.bf16.mxu1 %vm2581_vm0, %v2580_v1 }
  0x90   : > { %2457 = vmatprep.subr.bf16.mxu1 %v2580_v1 }
  0x91   : > { %2438 = vmatpush3.bf16.msra.mxu0 %v2557_v61 }
  0x92   : > { %2439 = vmatprep.subr.bf16.mxu0 %v2580_v1 }
  0x93   : > { %2458 = vmatpush3.bf16.msra.mxu1 %v2558_v9 }
  0x94   : > { %2459 = vmatprep.subr.bf16.mxu1 %v2580_v1 }
  0x95   : > { %2440 = vmatpush3.bf16.msra.mxu0 %v2559_v40 }
  0x96   : > { %2441 = vmatprep.subr.bf16.mxu0 %v2580_v1 }
  0x97   : > { %2460 = vmatpush3.bf16.msra.mxu1 %v2560_v12 }
  0x98   : > { %2461 = vmatprep.subr.bf16.mxu1 %v2580_v1 }
  0x99   : > { %2442 = vmatpush3.bf16.msra.mxu0 %v2561_v8 }
  0x9a   : > { %2443 = vmatprep.subr.bf16.mxu0 %v2580_v1 }
  0x9b   : > { %2462 = vmatpush3.bf16.msra.mxu1 %v2562_v14 }
  0x9c   : > { %2463 = vmatprep.subr.bf16.mxu1 %v2580_v1 }
  0x9d   : > { %2444 = vmatpush3.bf16.msra.mxu0 %v2563_v11 }
  0x9e   : > { %2445 = vmatprep.subr.bf16.mxu0 %v2580_v1 }
  0x9f   : > { %2464 = vmatpush3.bf16.msra.mxu1 %v2564_v16 }
  0xa0   : > { %2465 = vmatprep.subr.bf16.mxu1 %v2580_v1 }
  0xa1   : > { %2446 = vmatpush3.bf16.msra.mxu0 %v2565_v13 }
  0xa2   : > { %2447 = vmatprep.subr.bf16.mxu0 %v2580_v1 }
  0xa3   : > { %2466 = vmatpush3.bf16.msra.mxu1 %v2566_v18 }
  0xa4   : > { %2467 = vmatprep.subr.bf16.mxu1 %v2580_v1 }
  0xa5   : > { %2448 = vmatpush3.bf16.msra.mxu0 %v2567_v15 }
  0xa6   : > { %2449 = vmatprep.subr.bf16.mxu0 %v2580_v1 }
  0xa7   : > { %2468 = vmatpush3.bf16.msra.mxu1 %v2568_v19 }
  0xa8   : > { %2469 = vmatprep.subr.bf16.mxu1 %v2580_v1 }
  0xa9   : > { %2450 = vmatpush3.bf16.msra.mxu0 %v2569_v17 }
  0xab   : > { %2470 = vmatpush3.bf16.msra.mxu1 %v2570_v21 }
  0xac   : > { %2452 = vmatmul.mubr.bf16.vlgmr.msra.gmra.mxu0 %v3042_v56 }
  0xae   : > { %2472 = vmatmul.mubr.bf16.vlgmr.msra.gmra.mxu1 %v2571_v22 }
  0xec   : > { %v495_v26 = vpop.f32.mrf.mxu0 }
  0xee   : > { %v2293_v30 = vpop.f32.mrf.mxu0  ;;  %v611_v34 = vpop.f32.mrf.mxu1 }
  0xef   : > { %v612_v35 = vadd.f32 %v611_v34, %v495_v26 }
  0xf0   : > { %v498_v31 = vpop.f32.mrf.mxu0  ;;  %v2313_v37 = vpop.f32.mrf.mxu1 }
  0xf2   : > { %v2294_v32 = vpop.f32.mrf.mxu0  ;;  %v614_v42 = vpop.f32.mrf.mxu1 }
  0xf3   : > { %v615_v44 = vadd.f32 %v614_v42, %v498_v31 }
  0xf4   : > { %v2314_v49 = vpop.f32.mrf.mxu1 }
 0x10c   : > { %v781_v45 = vpop.f32.mrf.mxu0 }
 0x10d   : > { %v788_v46 = vadd.f32 %v781_v45, %v612_v35 }
 0x10e   : > { %v2333_v47 = vpop.f32.mrf.mxu0  ;;  %v936_v1 = vpop.f32.mrf.mxu1 }
 0x10f   : > { %v943_v28 = vadd.f32 %v936_v1, %v788_v46 }
 0x110   : > { %v784_v43 = vpop.f32.mrf.mxu0  ;;  %v2353_v53 = vpop.f32.mrf.mxu1 }
 0x111   : > { %v789_v48 = vadd.f32 %v784_v43, %v615_v44 }
 0x112   : > { %v2334_v39 = vpop.f32.mrf.mxu0  ;;  %v939_v24 = vpop.f32.mrf.mxu1 }
 0x113   : > { %v944_v41 = vadd.f32 %v939_v24, %v789_v48 }
 0x114   : > { %v2354_v20 = vpop.f32.mrf.mxu1 }
 0x12c   : > { %v1048_v36 = vpop.f32.mrf.mxu0 }
 0x12d   : > { %v1055_v6 = vadd.f32 %v1048_v36, %v943_v28 }
 0x12e   : > { %v2373_v23 = vpop.f32.mrf.mxu0  ;;  %v1197_v25 = vpop.f32.mrf.mxu1 }
 0x12f   : > { %v1204_v0 = vadd.f32 %v1197_v25, %v1055_v6 }
 0x130   : > { %v1051_v50 = vpop.f32.mrf.mxu0  ;;  %v2393_v29 = vpop.f32.mrf.mxu1 }
 0x131   : > { %v1056_v10 = vadd.f32 %v1051_v50, %v944_v41 }
 0x132   : > { %v2374_v33 = vpop.f32.mrf.mxu0  ;;  %v1200_v54 = vpop.f32.mrf.mxu1 }
 0x133   : > { %v1205_v2 = vadd.f32 %v1200_v54, %v1056_v10 }
 0x134   : > { %v2394_v55 = vpop.f32.mrf.mxu1 }
 0x14c   : > { %v1336_v56 = vpop.f32.mrf.mxu0 }
 0x14d   : > { %v1343_v3 = vadd.f32 %v1336_v56, %v1204_v0 }
 0x14e   : > { %v2413_v27 = vpop.f32.mrf.mxu0  ;;  %v1457_v58 = vpop.f32.mrf.mxu1 }
 0x14f   : > { %v1464_v52 = vadd.f32 %v1457_v58, %v1343_v3 }
 0x150   : > { %v1339_v38 = vpop.f32.mrf.mxu0  ;;  %v2433_v59 = vpop.f32.mrf.mxu1 }
 0x151   : > { %v1344_v4 = vadd.f32 %v1339_v38, %v1205_v2 }
 0x152   : > { %v2414_v57 = vpop.f32.mrf.mxu0  ;;  %v1460_v60 = vpop.f32.mrf.mxu1 }
 0x153   : > { %v1465_v5 = vadd.f32 %v1460_v60, %v1344_v4 }
 0x154   : > { %v2434_v63 = vpop.f32.mrf.mxu1 }
 0x16c   : > { %v1595_v61 = vpop.f32.mrf.mxu0 }
 0x16d   : > { %v1602_v40 = vadd.f32 %v1595_v61, %v1464_v52 }
 0x16e   : > { %v2453_v62 = vpop.f32.mrf.mxu0  ;;  %v1738_v16 = vpop.f32.mrf.mxu1 }
 0x16f   : > { %v1622_v9 = vmul.f32 %v1602_v40, %v1602_v40  ;;  %v1763_v32 = vmul.f32 %v1738_v16, %v1738_v16 }
 0x170   : > { %v1598_v51 = vpop.f32.mrf.mxu0  ;;  %v2473_v19 = vpop.f32.mrf.mxu1 }
 0x171   : > { %v1603_v7 = vadd.f32 %v1598_v51, %v1465_v5 }
 0x172   : > { %v2454_v8 = vpop.f32.mrf.mxu0  ;;  %v1741_v31 = vpop.f32.mrf.mxu1 }
 0x173   : > { %v2178_v11 = vpack.c.bf16 %v1603_v7, %v1602_v40  ;;  %v1614_v12 = vadd.f32 %v1603_v7, %v1602_v40  ;;  %v1623_v13 = vmul.f32 %v1603_v7, %v1603_v7  ;;  %v2183_v34 = vpack.c.bf16 %v1741_v31, %v1738_v16 }
 0x174   : > { %v1755_v35 = vadd.f32 %v1741_v31, %v1738_v16  ;;  %v1764_v37 = vmul.f32 %v1741_v31, %v1741_v31  ;;  %v2474_v49 = vpop.f32.mrf.mxu1 }
 0x175   : > { %2179 = vst [vmem:[%s271_s19] sm:$0xff] %v2178_v11   ;;  %v1615_v14 = vrot.slane %v1614_v12, 4  ;;  %v1624_v15 = vadd.f32 %v1623_v13, %v1622_v9  ;;  %2184 = vst [vmem:[%s280_s24] sm:$0xff] %v2183_v34  }
 0x176   : > { %v1756_v45 = vrot.slane %v1755_v35, 4  ;;  %v1765_v46 = vadd.f32 %v1764_v37, %v1763_v32 }
 0x177   : > { %v1616_v17 = vadd.f32 %v1615_v14, %v1614_v12  ;;  %v1625_v18 = vrot.slane %v1624_v15, 4 }
 0x178   : > { %v1757_v48 = vadd.f32 %v1756_v45, %v1755_v35  ;;  %v1766_v39 = vrot.slane %v1765_v46, 4 }
 0x179   : > { %v1617_v21 = vrot.slane %v1616_v17, 2  ;;  %v1626_v22 = vadd.f32 %v1625_v18, %v1624_v15 }
 0x17a   : > { %v1758_v28 = vrot.slane %v1757_v48, 2  ;;  %v1767_v53 = vadd.f32 %v1766_v39, %v1765_v46 }
 0x17b   : > { %v1618_v26 = vadd.f32 %v1617_v21, %v1616_v17  ;;  %v1627_v30 = vrot.slane %v1626_v22, 2 }
 0x17c   : > { %v1759_v24 = vadd.f32 %v1758_v28, %v1757_v48  ;;  %v1768_v41 = vrot.slane %v1767_v53, 2 }
 0x17d   : > { %v1619_v42 = vrot.slane %v1618_v26, 1  ;;  %v1628_v44 = vadd.f32 %v1627_v30, %v1626_v22 }
 0x17e   : > { %v1760_v20 = vrot.slane %v1759_v24, 1  ;;  %v1769_v36 = vadd.f32 %v1768_v41, %v1767_v53 }
 0x17f   : > { %v1620_v47 = vadd.f32 %v1619_v42, %v1618_v26  ;;  %v1629_v43 = vrot.slane %v1628_v44, 1 }
 0x180   : > { %v1761_v23 = vadd.f32 %v1760_v20, %v1759_v24  ;;  %v1770_v50 = vrot.slane %v1769_v36, 1 }
 0x181   : > { %1621 = vst [vmem:[%s275_s28] sm:$0x1] %v1620_v47  ;;  %v1630_v1 = vadd.f32 %v1629_v43, %v1628_v44 }
 0x182   : > { %1762 = vst [vmem:[%s284_s29] sm:$0x1] %v1761_v23  ;;  %v1771_v33 = vadd.f32 %v1770_v50, %v1769_v36 }
 0x183   : > { %1631 = vst [vmem:[%s275_s28 + $0x1] sm:$0x1] %v1630_v1 }
 0x184   : > { %1772 = vst [vmem:[%s284_s29 + $0x1] sm:$0x1] %v1771_v33 }
 0x185 PF: > { %s17_s21 = sadd.s32 1, %s2578_s21  }
 0x186   : > { %p14_p4 = scmp.ge.s32.totalorder %s17_s21, 4  }
 0x188   :  { %16 = sbr.rel (!%p14_p4) target bundleno = 1 (0x1), region = 106 }

// kernel: _lambda_.26
= control target key start
LH: loop header
LB: loop body
LE: loop exit
PB: predicated region body
PF: predicated region fallthrough
CT: control target
= control target key end

     0   :  { %s2403_s21 = smov 0   ;;  %s2926_s0 = inlined_call_operand.vmem [shape: f32[2,128], index: 0, kind: input, shape index: {}]   ;;  %s2927_s1 = inlined_call_operand.vmem [shape: f32[1,128], index: 1, kind: input, shape index: {}]   ;;  %s2928_s2 = inlined_call_operand.vmem [shape: f32[1,128], index: 2, kind: input, shape index: {}]   ;;  %s2929_s3 = inlined_call_operand.vmem [shape: bf16[2,16,128], index: 3, kind: input, shape index: {}]   ;;  %s2930_s4 = inlined_call_operand.vmem [shape: bf16[9,128,128], index: 4, kind: input, shape index: {}]   ;;  %s2931_s5 = inlined_call_operand.vmem [shape: bf16[2,16,128], index: 5, kind: output, shape index: {0}]   ;;  %s2932_s6 = inlined_call_operand.vmem [shape: f32[2,2,128], index: 6, kind: output, shape index: {1}]  }
   0x1 LB: > { %s1756_s22 = sadd.s32 4294967295, %s2362_s21   ;;  %p1760_p0 = scmp.ge.s32.totalorder %s2362_s21, 1  ;;  %s2362_s21 = sphi %s2403_s21, %s17_s21  }
   0x2   : > { %p215_p1 = scmp.lt.s32.totalorder %s2362_s21, 3 }
   0x4   : > { %p216_p2 = pnand %p1760_p0, %p215_p1 }
   0x5   : > { %p249_p3 = scmp.lt.s32.totalorder (!%p216_p2), %s1756_s22, 1 }
   0x6   : > { %219 = sbr.rel (%p216_p2) target bundleno = 419 (0x1a3), region = 40 }
   0xb   : > { %v2277_v0 = vld [vmem:[%s2930_s4 + $0x78] sm:$0xff]   ;;  %v2364_v1 = vmov 0.0   ;;  %v2278_v2 = vld [vmem:[%s2930_s4 + $0x70] sm:$0xff]   ;;  %vm2365_vm0 = vmmov 0   ;;  %v2366_v5 = vmov 0   ;;  %v2280_v6 = vld [vmem:[%s2930_s4 + $0x68] sm:$0xff]   ;;  %v288_v20 = vlaneseq }
   0xc   : > { %2085 = vmatprep.subr.bf16.mxu0 %v2364_v1  ;;  %2105 = vmatprep.subr.bf16.mxu1 %v2364_v1  ;;  %v2279_v3 = vld [vmem:[%s2930_s4 + $0x38] sm:$0xff]   ;;  %v2281_v4 = vld [vmem:[%s2930_s4 + $0x30] sm:$0xff]   ;;  %266 = vst [vmem:[#allocation2] sm:$0xf] %v2366_v5  ;;  %267 = vst [vmem:[#allocation2 + $0x4] sm:$0xf] %v2366_v5 }
   0xd   : > { %2086 = vmatpush3.bf16.msra.mxu0 %v2277_v0  ;;  %2101 = vmatprep.mubr.msk.bf16.mxu0 %vm2365_vm0, %v2364_v1  ;;  %268 = vst [vmem:[#allocation2 + $0x8] sm:$0xf] %v2366_v5  ;;  %269 = vst [vmem:[#allocation2 + $0xc] sm:$0xf] %v2366_v5  ;;  %v2283_v7 = vld [vmem:[%s2930_s4 + $0x28] sm:$0xff]   ;;  %v2282_v8 = vld [vmem:[%s2930_s4 + $0x60] sm:$0xff]  }
   0xe   : > { %2087 = vmatprep.subr.bf16.mxu0 %v2364_v1  ;;  %2121 = vmatprep.mubr.msk.bf16.mxu1 %vm2365_vm0, %v2364_v1  ;;  %v2285_v9 = vld [vmem:[%s2930_s4 + $0x20] sm:$0xff]   ;;  %v2284_v10 = vld [vmem:[%s2930_s4 + $0x58] sm:$0xff]   ;;  %v2286_v14 = vld [vmem:[%s2930_s4 + $0x50] sm:$0xff]   ;;  %v289_v25 = vshrl.u32 %v288_v20, 7  ;;  %v2367_v28 = vmov 1966171168  }
   0xf   : > { %2106 = vmatpush3.bf16.msra.mxu1 %v2279_v3  ;;  %v272_v11 = vld [vmem:[%s2926_s0] sm:$0x3]  ;;  %v2287_v12 = vld [vmem:[%s2930_s4 + $0x18] sm:$0xff]   ;;  %v2289_v16 = vld [vmem:[%s2930_s4 + $0x10] sm:$0xff]   ;;  %v286_v29 = vunpack.c.l.s4 %v2367_v28  ;;  %s2946_s22 = smov (!%p249_p3, %s1756_s22), 1 }
  0x10   : > { %2107 = vmatprep.subr.bf16.mxu1 %v2364_v1  ;;  %v2461_v13 = vmul.f32 0.03125, %v272_v11  ;;  %v2288_v18 = vld [vmem:[%s2930_s4 + $0x48] sm:$0xff]   ;;  %v2290_v23 = vld [vmem:[%s2930_s4 + $0x40] sm:$0xff]   ;;  %v336_v26 = vadd.s32 8, %v289_v25  ;;  %v341_v32 = vand.u32 3, %v289_v25  ;;  %s1989_s11 = sshll.u32 %s2946_s22, 3 }
  0x11   : > { %2088 = vmatpush3.bf16.msra.mxu0 %v2278_v2  ;;  %v2291_v21 = vld [vmem:[%s2930_s4 + $0x8] sm:$0xff]   ;;  %v2295_v27 = vld [vmem:[%s2930_s4] sm:$0xff]   ;;  %v287_v31 = vunpack.c.0.s8 %v286_v29  ;;  %s253_s14 = scalar_lea.vmem %s2929_s3, %s1989_s11  ;;  %v309_v36 = vsub.s32 0, %v289_v25  ;;  %vm376_vm9 = vsmask.f32 1280  ;;  %s258_s30 = scalar_lea.vmem %s2931_s5, %s1989_s11 }
  0x12   : > { %2089 = vmatprep.subr.bf16.mxu0 %v2364_v1  ;;  %v276_v15 = vmul.f32 %v2461_v13, %v2461_v13  ;;  %v348_v30 = vand.u32 3, %v336_v26  ;;  %vm361_vm3 = vcmp.ne.s32.totalorder %v341_v32, 0  ;;  %vm2505_vm4 = vcmp.ne.s32.totalorder %v341_v32, 3  ;;  %v1996_v39 = vld [vmem:[%s253_s14] sm:$0xff]   ;;  %s1765_s7 = sshll.u32 %s2946_s22, 1 }
  0x13   : > { %2108 = vmatpush3.bf16.msra.mxu1 %v2281_v4  ;;  %v290_v33 = vsub.s32 %v287_v31, %v289_v25  ;;  %vm372_vm5 = vmpackc.low %vm361_vm3, %vm361_vm3  ;;  %v273_v42 = vld [vmem:[%s2927_s1] sm:$0x1]  ;;  %v1997_v47 = vunpack.c.l.bf16 %v1996_v39  ;;  %v1998_v48 = vunpack.c.h.bf16 %v1996_v39  ;;  %vm377_vm10 = vsmask.f32 5392  ;;  %s262_s11 = scalar_lea.vmem %s2932_s6, %s1765_s7 }
  0x14   : > { %2109 = vmatprep.subr.bf16.mxu1 %v2364_v1  ;;  %v278_v17 = vrot.slane %v276_v15, 7  ;;  %vm362_vm1 = vcmp.ne.s32.totalorder %v348_v30, 0  ;;  %vm2512_vm6 = vcmp.ne.s32.totalorder %v348_v30, 3  ;;  %v2521_v45 = vsel %vm372_vm5, 65537, %v2366_v5  ;;  %v274_v46 = vld [vmem:[%s2928_s2] sm:$0x1]  ;;  %vm661_vm7 = vmpackc.low %vm2505_vm4, %vm2505_vm4 }
  0x15   : > { %2090 = vmatpush3.bf16.msra.mxu0 %v2280_v6  ;;  %vm373_vm2 = vmpackc.low %vm362_vm1, %vm362_vm1  ;;  %v380_v51 = vshrl.u32 %v2521_v45, 16  ;;  %v383_v52 = vshll.u32 %v2521_v45, 16  ;;  %v2539_v56 = vsel %vm661_vm7, 65537, %v2366_v5  ;;  %vm665_vm11 = vsmask.f32 2304 }
  0x16   : > { %2091 = vmatprep.subr.bf16.mxu0 %v2364_v1  ;;  %v280_v19 = vsub.f32 %v2461_v13, %v278_v17  ;;  %v2510_v38 = vsel %vm373_vm2, 65537, %v2366_v5  ;;  %vm662_vm8 = vmpackc.low %vm2512_vm6, %vm2512_vm6  ;;  %v669_v2 = vshrl.u32 %v2539_v56, 16  ;;  %v672_v3 = vshll.u32 %v2539_v56, 16  ;;  %v2571_v25 = vld [vmem:[#allocation2 + $0xc] sm:$0x3]  ;;  %v2319_v56 = vld [vmem:[%s2930_s4 + $0x160] sm:$0xff]  }
  0x17   : > { %2110 = vmatpush3.bf16.msra.mxu1 %v2283_v7  ;;  %v389_v44 = vshrl.u32 %v2510_v38, 16  ;;  %v392_v50 = vshll.u32 %v2510_v38, 16  ;;  %v382_v61 = vrot.slane %v380_v51, 6  ;;  %v385_v62 = vrot.slane %v383_v52, 7  ;;  %vm378_vm13 = vmor %vm376_vm9, %vm377_vm10 }
  0x18   : > { %2111 = vmatprep.subr.bf16.mxu1 %v2364_v1  ;;  %v281_v22 = vmax.f32 %v280_v19, 0.0  ;;  %v2544_v0 = vsel %vm662_vm8, 65537, %v2366_v5  ;;  %v671_v11 = vrot.slane %v669_v2, 5  ;;  %v674_v5 = vrot.slane %v672_v3, 6 }
  0x19   : > { %2092 = vmatpush3.bf16.msra.mxu0 %v2282_v8  ;;  %v391_v55 = vrot.slane %v389_v44, 6  ;;  %v394_v60 = vrot.slane %v392_v50, 7  ;;  %v2548_v8 = vor.u32 %v385_v62, %v382_v61  ;;  %vm666_vm12 = vsmask.f32 6416 }
  0x1a   : > { %2093 = vmatprep.subr.bf16.mxu0 %v2364_v1  ;;  %v282_v24 = vadd.f32 1e-05, %v281_v22  ;;  %v420_v22 = vld [vmem:[#allocation2] sm:$0xc]  ;;  %vm446_vm1 = vcmask 1045504   ;;  %vm667_vm4 = vmor %vm665_vm11, %vm666_vm12  ;;  %v2582_v31 = vrot.slane %v383_v52, 5 }
  0x1b   : > { %2112 = vmatpush3.bf16.msra.mxu1 %v2285_v9  ;;  %v395_v7 = vor.u32 %v394_v60, %v391_v55  ;;  %v387_v17 = vrot.slane %v2548_v8, 4  ;;  %vm398_vm14 = vcmp.ne.s16.totalorder %v2548_v8, 0  ;;  %v834_v32 = vrot.slane %v380_v51, 4  ;;  %v2300_v8 = vld [vmem:[%s2930_s4 + $0xa0] sm:$0xff]  }
  0x1c   : > { %2113 = vmatprep.subr.bf16.mxu1 %v2364_v1  ;;  %2354 = vrsqrt.f32 %v282_v24  ;;  %v837_v52 = vrot.slane %v392_v50, 5  ;;  %vm830_vm5 = vsmask.f32 3328  ;;  %v2297_v50 = vld [vmem:[%s2930_s4 + $0xf8] sm:$0xff]   ;;  %vm831_vm6 = vsmask.f32 7440 }
  0x1d   : > { %2094 = vmatpush3.bf16.msra.mxu0 %v2284_v10  ;;  %v835_v51 = vor.u32 %v834_v32, %v2582_v31  ;;  %vm548_vm8 = vsmask.f32 6400  ;;  %vm842_vm10 = vcmp.ne.s16.totalorder %v2582_v31, 0  ;;  %vm2627_vm11 = vmor %vm830_vm5, %vm831_vm6 }
  0x1e   : > { %2095 = vmatprep.subr.bf16.mxu0 %v2364_v1 }
  0x1f   : > { %2114 = vmatpush3.bf16.msra.mxu1 %v2287_v12  ;;  %v678_v12 = vshrl.u32 %v2544_v0, 16 }
  0x20   : > { %2115 = vmatprep.subr.bf16.mxu1 %v2364_v1 }
  0x21   : > { %2096 = vmatpush3.bf16.msra.mxu0 %v2286_v14  ;;  %v680_v19 = vrot.slane %v678_v12, 5 }
  0x22   : > { %2097 = vmatprep.subr.bf16.mxu0 %v2364_v1 }
  0x23   : > { %2116 = vmatpush3.bf16.msra.mxu1 %v2289_v16  ;;  %v397_v16 = vrot.slane %v395_v7, 4 }
  0x24   : > { %2117 = vmatprep.subr.bf16.mxu1 %v2364_v1 }
  0x25   : > { %2098 = vmatpush3.bf16.msra.mxu0 %v2288_v18  ;;  %v2558_v18 = vor.u32 %v674_v5, %v671_v11  ;;  %vm2567_vm15 = vcmp.ne.s16.totalorder %v397_v16, 0 }
  0x26   : > { %2099 = vmatprep.subr.bf16.mxu0 %v2364_v1  ;;  %v1248_v39 = vsel %vm2567_vm15, %v2571_v25, 0 }
  0x27   : > { %2118 = vmatpush3.bf16.msra.mxu1 %v2291_v21  ;;  %v365_v21 = vld [vmem:[#allocation2] sm:$0xe]  ;;  %v676_v26 = vrot.slane %v2558_v18, 4  ;;  %vm687_vm2 = vcmp.ne.s16.totalorder %v2558_v18, 0 }
  0x28   : > { %2119 = vmatprep.subr.bf16.mxu1 %v2364_v1  ;;  %v401_v28 = vsel %vm398_vm14, %v365_v21, 0 }
  0x29   : > { %2100 = vmatpush3.bf16.msra.mxu0 %v2290_v23  ;;  %v2355_v34 = vpop.eup %2354  ;;  %v2564_v23 = vsel %vm378_vm13, %v387_v17, %v395_v7  ;;  %v828_v7 = vld [vmem:[#allocation2] sm:$0x8] }
  0x2a   : > { %2125 = vmatprep.subr.bf16.mxu0 %v2364_v1  ;;  %v291_v35 = vrot.slane %v2355_v34, %v290_v33  ;;  %vm399_vm3 = vcmp.ne.s16.totalorder %v2564_v23, 0  ;;  %v2301_v23 = vld [vmem:[%s2930_s4 + $0xe8] sm:$0xff]  }
  0x2b   : > { %2120 = vmatpush3.bf16.msra.mxu1 %v2295_v27 }
  0x2c   : > { %2145 = vmatprep.subr.bf16.mxu1 %v2364_v1  ;;  %v292_v40 = vcombine.high %v291_v35, %v291_v35 }
  0x2e   : > { %v299_v43 = vrot.slane %v292_v40, %v290_v33  ;;  %v2294_v40 = vld [vmem:[%s2930_s4 + $0xb8] sm:$0xff]  }
  0x30   : > { %v301_v49 = vmul.f32 %v299_v43, %v273_v42 }
  0x32   : > { %v302_v53 = vmul.f32 %v301_v49, %v2461_v13  ;;  %v310_v54 = vrot.slane %v301_v49, %v309_v36  ;;  %v681_v13 = vshll.u32 %v2544_v0, 16 }
  0x34   : > { %v303_v57 = vsub.f32 %v274_v46, %v302_v53  ;;  %v312_v58 = vmul.f32 %v1997_v47, %v310_v54  ;;  %v313_v59 = vmul.f32 %v1998_v48, %v310_v54  ;;  %v683_v20 = vrot.slane %v681_v13, 6  ;;  %v2296_v54 = vld [vmem:[%s2930_s4 + $0xb0] sm:$0xff]  }
  0x36   : > { %v318_v63 = vrot.slane %v303_v57, %v309_v36  ;;  %v684_v27 = vor.u32 %v683_v20, %v680_v19  ;;  %v2589_v36 = vsel %vm687_vm2, %v420_v22, 0 }
  0x38   : > { %v320_v4 = vadd.f32 %v318_v63, %v312_v58  ;;  %v321_v6 = vadd.f32 %v318_v63, %v313_v59  ;;  %v686_v42 = vrot.slane %v684_v27, 4  ;;  %v2600_v46 = vsel %vm667_vm4, %v676_v26, %v684_v27 }
  0x39   : > { %v839_v58 = vrot.slane %v389_v44, 4  ;;  %v1924_v59 = vcombine.low %v1248_v39, %v1248_v39  ;;  %vm688_vm7 = vcmp.ne.s16.totalorder %v2600_v46, 0  ;;  %v2303_v46 = vld [vmem:[%s2930_s4 + $0xe0] sm:$0xff]   ;;  %v2306_v44 = vld [vmem:[%s2930_s4 + $0x88] sm:$0xff]  }
  0x3a   : > { %v322_v9 = vmax.f32 %v320_v4, 0.0  ;;  %v323_v10 = vmax.f32 %v321_v6, 0.0  ;;  %vm2618_vm9 = vcmp.ne.s16.totalorder %v686_v42, 0  ;;  %v2298_v6 = vld [vmem:[%s2930_s4 + $0xa8] sm:$0xff]  }
  0x3c   : > { %v1991_v14 = vpack.c.bf16 %v322_v9, %v322_v9  ;;  %v1992_v15 = vpack.c.bf16 %v323_v10, %v323_v10  ;;  %v836_v9 = vrot.slane %v835_v51, 4  ;;  %v840_v10 = vor.u32 %v839_v58, %v837_v52  ;;  %v1504_v58 = vld [vmem:[#allocation2 + $0xc] sm:$0x7] }
  0x3e   : > { %332 = vst [vmem:[#allocation2 + $0x4] sm:$0xf] %v1991_v14  ;;  %333 = vst [vmem:[#allocation2 + $0x8] sm:$0xf] %v1992_v15  ;;  %v1283_v14 = vshrl.u32 %v1924_v59, 16  ;;  %v1286_v15 = vshll.u32 %v1924_v59, 16  ;;  %v838_v24 = vsel %vm2627_vm11, %v836_v9, %v837_v52 }
  0x3f   : > { %v841_v26 = vrot.slane %v840_v10, 4  ;;  %vm2668_vm12 = vcmp.ne.s16.totalorder %v838_v24, 0  ;;  %v2307_v24 = vld [vmem:[%s2930_s4 + $0xd0] sm:$0xff]  }
  0x40   : > { %v1288_v32 = vrot.slane %v1286_v15, 2 }
  0x41   : > { %vm844_vm13 = vcmp.ne.s16.totalorder %v841_v26, 0 }
  0x45   : > { %v2578_v29 = vld [vmem:[#allocation2 + $0x4] sm:$0xf]  ;;  %v367_v30 = vld [vmem:[#allocation2 + $0x8] sm:$0x3] }
  0x46   : > { %v403_v33 = vsel %vm2567_vm15, %v367_v30, 0  ;;  %v1784_v34 = vcombine.low %v420_v22, %v2578_v29  ;;  %v1785_v35 = vcombine.low %v367_v30, %v367_v30  ;;  %v402_v41 = vsel %vm399_vm3, %v2578_v29, 0  ;;  %v1244_v5 = vld [vmem:[#allocation2 + $0x4] sm:$0xe]  ;;  %v656_v17 = vld [vmem:[#allocation2 + $0x8] sm:$0x7] }
  0x47   : > { %v1795_v37 = vcombine.low %v403_v33, %v403_v33  ;;  %v1794_v47 = vcombine.low %v401_v28, %v402_v41  ;;  %v691_v19 = vsel %vm688_vm7, %v2578_v29, 0  ;;  %v2636_v20 = vld [vmem:[#allocation2 + $0x8] sm:$0xf]  ;;  %v1246_v21 = vsel %vm398_vm14, %v1244_v5, 0  ;;  %v2656_v33 = vld [vmem:[#allocation2 + $0x4] sm:$0xc] }
  0x48   : > { %v447_v43 = vrot.slane %v1784_v34, 2  ;;  %v448_v45 = vrot.slane %v1785_v35, 2  ;;  %v2299_v22 = vld [vmem:[%s2930_s4 + $0xf0] sm:$0xff]   ;;  %v1247_v27 = vsel %vm399_vm3, %v2636_v20, 0  ;;  %v845_v28 = vsel %vm842_vm10, %v828_v7, 0  ;;  %v2305_v7 = vld [vmem:[%s2930_s4 + $0xd8] sm:$0xff]  }
  0x49   : > { %v558_v48 = vshrl.u32 %v1795_v37, 16  ;;  %v561_v49 = vshll.u32 %v1795_v37, 16  ;;  %v550_v55 = vshrl.u32 %v1794_v47, 16  ;;  %v553_v57 = vshll.u32 %v1794_v47, 16 }
  0x4a   : > { %v449_v53 = vsel %vm446_vm1, %v447_v43, %v448_v45  ;;  %v1285_v30 = vrot.slane %v1283_v14, 1  ;;  %v1820_v34 = vcombine.low %v2589_v36, %v691_v19  ;;  %v692_v35 = vsel %vm2618_vm9, %v656_v17, 0  ;;  %v2679_v45 = vld [vmem:[#allocation2 + $0x8] sm:$0xf] }
  0x4b   : > { %2102 = vmatmul.mubr.bf16.vlgmr.msra.gmra.mxu0 %v449_v53  ;;  %v560_v60 = vrot.slane %v558_v48, 1  ;;  %v563_v61 = vrot.slane %v561_v49, 2  ;;  %v552_v62 = vrot.slane %v550_v55, 1  ;;  %v555_v63 = vrot.slane %v553_v57, 2 }
  0x4c   : > { %2126 = vmatpush3.bf16.msra.mxu0 %v2294_v40  ;;  %2141 = vmatprep.mubr.msk.bf16.mxu0 %vm2365_vm0, %v2364_v1  ;;  %v1923_v37 = vcombine.low %v1246_v21, %v1247_v27  ;;  %v1505_v31 = vsel %vm687_vm2, %v2656_v33, 0  ;;  %v1506_v36 = vsel %vm688_vm7, %v2636_v20, 0  ;;  %v2302_v40 = vld [vmem:[%s2930_s4 + $0x98] sm:$0xff]   ;;  %v1821_v43 = vcombine.low %v692_v35, %v692_v35 }
  0x4d   : > { %2127 = vmatprep.subr.bf16.mxu0 %v2364_v1  ;;  %v564_v38 = vor.u32 %v563_v61, %v560_v60  ;;  %v556_v4 = vor.u32 %v555_v63, %v552_v62  ;;  %v1975_v18 = vcombine.low %v1505_v31, %v1506_v36  ;;  %v1289_v47 = vor.u32 %v1288_v32, %v1285_v30  ;;  %v2304_v60 = vld [vmem:[%s2930_s4 + $0x90] sm:$0xff]   ;;  %v2308_v32 = vld [vmem:[%s2930_s4 + $0x80] sm:$0xff]  }
  0x4e   : > { %v1275_v41 = vshrl.u32 %v1923_v37, 16  ;;  %v1278_v42 = vshll.u32 %v1923_v37, 16  ;;  %v720_v48 = vshrl.u32 %v1820_v34, 16  ;;  %v723_v49 = vshll.u32 %v1820_v34, 16  ;;  %v2309_v37 = vld [vmem:[%s2930_s4 + $0xc8] sm:$0xff]  }
  0x4f   : > { %v565_v16 = vsel %vm548_vm8, %v556_v4, %v564_v38  ;;  %v846_v53 = vsel %vm2668_vm12, %v2578_v29, 0  ;;  %v1534_v55 = vshrl.u32 %v1975_v18, 16  ;;  %v847_v57 = vsel %vm844_vm13, %v2679_v45, 0 }
  0x50   : > { %2128 = vmatpush3.bf16.msra.mxu0 %v2296_v54  ;;  %2122 = vmatmul.mubr.bf16.vlgmr.msra.gmra.mxu1 %v565_v16  ;;  %v1277_v51 = vrot.slane %v1275_v41, 1  ;;  %v1280_v52 = vrot.slane %v1278_v42, 2  ;;  %v1537_v59 = vshll.u32 %v1975_v18, 16  ;;  %v728_v61 = vshrl.u32 %v1821_v43, 16  ;;  %v2310_v42 = vld [vmem:[%s2930_s4 + $0x138] sm:$0xff]   ;;  %v2311_v18 = vld [vmem:[%s2930_s4 + $0xc0] sm:$0xff]  }
  0x51   : > { %2129 = vmatprep.subr.bf16.mxu0 %v2364_v1  ;;  %2146 = vmatpush3.bf16.msra.mxu1 %v2297_v50  ;;  %v731_v62 = vshll.u32 %v1821_v43, 16  ;;  %v1507_v50 = vsel %vm2618_vm9, %v1504_v58, 0  ;;  %v1536_v4 = vrot.slane %v1534_v55, 2  ;;  %v1846_v9 = vcombine.low %v845_v28, %v846_v53  ;;  %v2314_v53 = vld [vmem:[%s2930_s4 + $0x128] sm:$0xff]   ;;  %v2316_v55 = vld [vmem:[%s2930_s4 + $0x120] sm:$0xff]   ;;  %v2318_v58 = vld [vmem:[%s2930_s4 + $0x118] sm:$0xff]  }
  0x52   : > { %2161 = vmatprep.mubr.msk.bf16.mxu1 %vm2365_vm0, %v2364_v1  ;;  %2147 = vmatprep.subr.bf16.mxu1 %v2364_v1  ;;  %v1281_v54 = vor.u32 %v1280_v52, %v1277_v51  ;;  %v1976_v38 = vcombine.low %v1507_v50, %v1507_v50  ;;  %v1847_v10 = vcombine.low %v847_v57, %v847_v57  ;;  %v722_v14 = vrot.slane %v720_v48, 2  ;;  %v2313_v52 = vld [vmem:[%s2930_s4 + $0x178] sm:$0xff]   ;;  %v2317_v57 = vld [vmem:[%s2930_s4 + $0x168] sm:$0xff]   ;;  %v1097_v50 = vld [vmem:[#allocation2 + $0xc] sm:$0x1] }
  0x53   : > { %v725_v15 = vrot.slane %v723_v49, 3  ;;  %v730_v16 = vrot.slane %v728_v61, 2  ;;  %v733_v17 = vrot.slane %v731_v62, 3  ;;  %v875_v26 = vshrl.u32 %v1846_v9, 16  ;;  %v2320_v62 = vld [vmem:[%s2930_s4 + $0x110] sm:$0xff]  }
  0x54   : > { %2130 = vmatpush3.bf16.msra.mxu0 %v2298_v6  ;;  %v2695_v63 = vsel %vm548_vm8, %v1281_v54, %v1289_v47  ;;  %v1539_v6 = vrot.slane %v1537_v59, 3  ;;  %v1542_v11 = vshrl.u32 %v1976_v38, 16  ;;  %v1545_v5 = vshll.u32 %v1976_v38, 16  ;;  %v2315_v54 = vld [vmem:[%s2930_s4 + $0x170] sm:$0xff]   ;;  %v1095_v59 = vld [vmem:[#allocation2 + $0x4] sm:$0xf] }
  0x55   : > { %2131 = vmatprep.subr.bf16.mxu0 %v2364_v1  ;;  %2148 = vmatpush3.bf16.msra.mxu1 %v2299_v22  ;;  %v878_v27 = vshll.u32 %v1846_v9, 16  ;;  %v886_v28 = vshll.u32 %v1847_v10, 16  ;;  %vm718_vm14 = vsmask.f32 5376  ;;  %v726_v34 = vor.u32 %v725_v15, %v722_v14  ;;  %v2321_v38 = vld [vmem:[%s2930_s4 + $0x158] sm:$0xff]   ;;  %v2323_v9 = vld [vmem:[%s2930_s4 + $0x150] sm:$0xff]  }
  0x56   : > { %2149 = vmatprep.subr.bf16.mxu1 %v2364_v1  ;;  %v1540_v19 = vor.u32 %v1539_v6, %v1536_v4  ;;  %v1544_v21 = vrot.slane %v1542_v11, 2  ;;  %v1547_v22 = vrot.slane %v1545_v5, 3  ;;  %v877_v31 = vrot.slane %v875_v26, 3  ;;  %v2324_v5 = vld [vmem:[%s2930_s4 + $0x100] sm:$0xff]   ;;  %v2330_v26 = vld [vmem:[%s2930_s4 + $0x1f8] sm:$0xff]  }
  0x57   : > { %v880_v39 = vrot.slane %v878_v27, 4  ;;  %vm873_vm15 = vsmask.f32 4352  ;;  %v1101_v48 = vrot.slane %v669_v2, 7  ;;  %v1104_v49 = vrot.slane %v678_v12, 7  ;;  %v2331_v27 = vld [vmem:[%s2930_s4 + $0x1a8] sm:$0xff]  }
  0x58   : > { %2132 = vmatpush3.bf16.msra.mxu0 %v2300_v8  ;;  %v883_v8 = vshrl.u32 %v1847_v10, 16  ;;  %v1548_v30 = vor.u32 %v1547_v22, %v1544_v21  ;;  %vm1098_vm2 = vsmask.f32 256  ;;  %vm1099_vm3 = vsmask.f32 4368  ;;  %v2328_v21 = vld [vmem:[%s2930_s4 + $0x140] sm:$0xff]  }
  0x59   : > { %2133 = vmatprep.subr.bf16.mxu0 %v2364_v1  ;;  %2150 = vmatpush3.bf16.msra.mxu1 %v2301_v23  ;;  %v734_v23 = vor.u32 %v733_v17, %v730_v16  ;;  %v881_v43 = vor.u32 %v880_v39, %v877_v31  ;;  %v1103_v2 = vrot.slane %v1101_v48, 4  ;;  %v1105_v12 = vor.u32 %v1104_v49, %v681_v13  ;;  %vm1100_vm4 = vmor %vm1098_vm2, %vm1099_vm3  ;;  %v2339_v31 = vld [vmem:[%s2930_s4 + $0x188] sm:$0xff]   ;;  %v2340_v39 = vld [vmem:[%s2930_s4 + $0x1d0] sm:$0xff]  }
  0x5a   : > { %2151 = vmatprep.subr.bf16.mxu1 %v2364_v1  ;;  %v2716_v35 = vsel %vm718_vm14, %v1540_v19, %v1548_v30  ;;  %v885_v36 = vrot.slane %v883_v8, 3  ;;  %v1102_v0 = vor.u32 %v1101_v48, %v672_v3  ;;  %v1872_v17 = vcombine.low %v2578_v29, %v2679_v45  ;;  %v2327_v19 = vld [vmem:[%s2930_s4 + $0x1b8] sm:$0xff]   ;;  %v2329_v29 = vld [vmem:[%s2930_s4 + $0x1b0] sm:$0xff]   ;;  %v2334_v30 = vld [vmem:[%s2930_s4 + $0x1e8] sm:$0xff]  }
  0x5b   : > { %v735_v41 = vsel %vm718_vm14, %v726_v34, %v734_v23  ;;  %v1106_v13 = vsel %vm1100_vm4, %v1103_v2, %v1105_v12  ;;  %vm1139_vm8 = vsmask.f32 7424  ;;  %v2332_v8 = vld [vmem:[%s2930_s4 + $0x1f0] sm:$0xff]   ;;  %v2336_v34 = vld [vmem:[%s2930_s4 + $0x1e0] sm:$0xff]   ;;  %v2350_v48 = vld [vmem:[%s2930_s4 + $0x218] sm:$0xff]  }
  0x5c   : > { %2134 = vmatpush3.bf16.msra.mxu0 %v2302_v40  ;;  %v888_v40 = vrot.slane %v886_v28, 4  ;;  %vm1108_vm5 = vcmp.ne.s16.totalorder %v1102_v0, 0  ;;  %vm1109_vm6 = vcmp.ne.s16.totalorder %v1106_v13, 0  ;;  %v2333_v28 = vld [vmem:[%s2930_s4 + $0x1a0] sm:$0xff]   ;;  %v2337_v23 = vld [vmem:[%s2930_s4 + $0x190] sm:$0xff]  }
  0x5d   : > { %2135 = vmatprep.subr.bf16.mxu0 %v2364_v1  ;;  %2152 = vmatpush3.bf16.msra.mxu1 %v2303_v46  ;;  %v2312_v46 = vld [vmem:[%s2930_s4 + $0x130] sm:$0xff]   ;;  %v1111_v3 = vsel %vm1108_vm5, %v1095_v59, 0  ;;  %v1112_v61 = vsel %vm1109_vm6, %v2636_v20, 0 }
  0x5e   : > { %2153 = vmatprep.subr.bf16.mxu1 %v2364_v1  ;;  %v889_v47 = vor.u32 %v888_v40, %v885_v36  ;;  %v1897_v4 = vcombine.low %v1111_v3, %v1112_v61  ;;  %v2341_v36 = vld [vmem:[%s2930_s4 + $0x180] sm:$0xff]   ;;  %v2342_v40 = vld [vmem:[%s2930_s4 + $0x1c8] sm:$0xff]  }
  0x60   : > { %2136 = vmatpush3.bf16.msra.mxu0 %v2304_v60  ;;  %v890_v51 = vsel %vm873_vm15, %v881_v43, %v889_v47  ;;  %v1107_v60 = vrot.slane %v1104_v49, 4  ;;  %v1143_v11 = vshll.u32 %v1897_v4, 16  ;;  %v1141_v14 = vshrl.u32 %v1897_v4, 16  ;;  %v2344_v43 = vld [vmem:[%s2930_s4 + $0x1c0] sm:$0xff]   ;;  %v2351_v49 = vld [vmem:[%s2930_s4 + $0x210] sm:$0xff]  }
  0x61   : > { %2137 = vmatprep.subr.bf16.mxu0 %v2364_v1  ;;  %2154 = vmatpush3.bf16.msra.mxu1 %v2305_v7  ;;  %v2322_v7 = vld [vmem:[%s2930_s4 + $0x108] sm:$0xff]  }
  0x62   : > { %2155 = vmatprep.subr.bf16.mxu1 %v2364_v1  ;;  %vm1110_vm7 = vcmp.ne.s16.totalorder %v1107_v60, 0  ;;  %v1145_v15 = vrot.slane %v1143_v11, 1 }
  0x63   : > { %v1113_v6 = vsel %vm1110_vm7, %v1097_v50, 0 }
  0x64   : > { %2138 = vmatpush3.bf16.msra.mxu0 %v2306_v44  ;;  %v1898_v10 = vcombine.low %v1113_v6, %v1113_v6  ;;  %v2325_v44 = vld [vmem:[%s2930_s4 + $0x148] sm:$0xff]   ;;  %v1146_v22 = vor.u32 %v1145_v15, %v1141_v14 }
  0x65   : > { %2139 = vmatprep.subr.bf16.mxu0 %v2364_v1  ;;  %2156 = vmatpush3.bf16.msra.mxu1 %v2307_v24 }
  0x66   : > { %2157 = vmatprep.subr.bf16.mxu1 %v2364_v1  ;;  %v1148_v16 = vshll.u32 %v1898_v10, 16 }
  0x68   : > { %2140 = vmatpush3.bf16.msra.mxu0 %v2308_v32  ;;  %v1150_v24 = vrot.slane %v1148_v16, 1  ;;  %v2335_v32 = vld [vmem:[%s2930_s4 + $0x198] sm:$0xff]  }
  0x69   : > { %2165 = vmatprep.subr.bf16.mxu0 %v2364_v1  ;;  %2158 = vmatpush3.bf16.msra.mxu1 %v2309_v37  ;;  %v2338_v37 = vld [vmem:[%s2930_s4 + $0x1d8] sm:$0xff]  }
  0x6a   : > { %2159 = vmatprep.subr.bf16.mxu1 %v2364_v1  ;;  %v1151_v45 = vsel %vm1139_vm8, %v1146_v22, %v1150_v24 }
  0x6b   : > { %2142 = vmatmul.mubr.bf16.vlgmr.msra.gmra.mxu0 %v735_v41  ;;  %v1949_v41 = vcombine.low %v2656_v33, %v2636_v20  ;;  %v2348_v33 = vld [vmem:[%s2930_s4 + $0x228] sm:$0xff]  }
  0x6c   : > { %2166 = vmatpush3.bf16.msra.mxu0 %v2310_v42  ;;  %2181 = vmatprep.mubr.msk.bf16.mxu0 %vm2365_vm0, %v2364_v1  ;;  %v1950_v42 = vcombine.low %v2571_v25, %v2571_v25  ;;  %v2347_v25 = vld [vmem:[%s2930_s4 + $0x230] sm:$0xff]  }
  0x6d   : > { %2167 = vmatprep.subr.bf16.mxu0 %v2364_v1  ;;  %2160 = vmatpush3.bf16.msra.mxu1 %v2311_v18  ;;  %v2343_v18 = vld [vmem:[%s2930_s4 + $0x238] sm:$0xff]   ;;  %v1409_v47 = vrot.slane %v1949_v41, 2 }
  0x6e   : > { %2185 = vmatprep.subr.bf16.mxu1 %v2364_v1 }
  0x70   : > { %2168 = vmatpush3.bf16.msra.mxu0 %v2312_v46  ;;  %2162 = vmatmul.mubr.bf16.vlgmr.msra.gmra.mxu1 %v890_v51  ;;  %v1410_v46 = vrot.slane %v1950_v42, 2  ;;  %v2352_v51 = vld [vmem:[%s2930_s4 + $0x208] sm:$0xff]  }
  0x71   : > { %2169 = vmatprep.subr.bf16.mxu0 %v2364_v1  ;;  %2186 = vmatpush3.bf16.msra.mxu1 %v2313_v52  ;;  %v2353_v52 = vld [vmem:[%s2930_s4 + $0x200] sm:$0xff]  }
  0x72   : > { %2201 = vmatprep.mubr.msk.bf16.mxu1 %vm2365_vm0, %v2364_v1  ;;  %2187 = vmatprep.subr.bf16.mxu1 %v2364_v1  ;;  %v1411_v20 = vsel %vm446_vm1, %v1409_v47, %v1410_v46 }
  0x74   : > { %2170 = vmatpush3.bf16.msra.mxu0 %v2314_v53 }
  0x75   : > { %2171 = vmatprep.subr.bf16.mxu0 %v2364_v1  ;;  %2188 = vmatpush3.bf16.msra.mxu1 %v2315_v54 }
  0x76   : > { %2189 = vmatprep.subr.bf16.mxu1 %v2364_v1 }
  0x78   : > { %2172 = vmatpush3.bf16.msra.mxu0 %v2316_v55 }
  0x79   : > { %2173 = vmatprep.subr.bf16.mxu0 %v2364_v1  ;;  %2190 = vmatpush3.bf16.msra.mxu1 %v2317_v57 }
  0x7a   : > { %2191 = vmatprep.subr.bf16.mxu1 %v2364_v1 }
  0x7c   : > { %2174 = vmatpush3.bf16.msra.mxu0 %v2318_v58 }
  0x7d   : > { %2175 = vmatprep.subr.bf16.mxu0 %v2364_v1  ;;  %2192 = vmatpush3.bf16.msra.mxu1 %v2319_v56 }
  0x7e   : > { %2193 = vmatprep.subr.bf16.mxu1 %v2364_v1 }
  0x80   : > { %2176 = vmatpush3.bf16.msra.mxu0 %v2320_v62 }
  0x81   : > { %2177 = vmatprep.subr.bf16.mxu0 %v2364_v1  ;;  %2194 = vmatpush3.bf16.msra.mxu1 %v2321_v38 }
  0x82   : > { %2195 = vmatprep.subr.bf16.mxu1 %v2364_v1 }
  0x84   : > { %2178 = vmatpush3.bf16.msra.mxu0 %v2322_v7 }
  0x85   : > { %2179 = vmatprep.subr.bf16.mxu0 %v2364_v1  ;;  %2196 = vmatpush3.bf16.msra.mxu1 %v2323_v9 }
  0x86   : > { %2197 = vmatprep.subr.bf16.mxu1 %v2364_v1 }
  0x88   : > { %2180 = vmatpush3.bf16.msra.mxu0 %v2324_v5 }
  0x89   : > { %2205 = vmatprep.subr.bf16.mxu0 %v2364_v1  ;;  %2198 = vmatpush3.bf16.msra.mxu1 %v2325_v44 }
  0x8a   : > { %2199 = vmatprep.subr.bf16.mxu1 %v2364_v1 }
  0x8b   : > { %2182 = vmatmul.mubr.bf16.vlgmr.msra.gmra.mxu0 %v1872_v17 }
  0x8c   : > { %2206 = vmatpush3.bf16.msra.mxu0 %v2327_v19  ;;  %2221 = vmatprep.mubr.msk.bf16.mxu0 %vm2365_vm0, %v2364_v1 }
  0x8d   : > { %2207 = vmatprep.subr.bf16.mxu0 %v2364_v1  ;;  %2200 = vmatpush3.bf16.msra.mxu1 %v2328_v21 }
  0x8e   : > { %2225 = vmatprep.subr.bf16.mxu1 %v2364_v1 }
  0x90   : > { %2208 = vmatpush3.bf16.msra.mxu0 %v2329_v29  ;;  %2202 = vmatmul.mubr.bf16.vlgmr.msra.gmra.mxu1 %v1151_v45 }
  0x91   : > { %2209 = vmatprep.subr.bf16.mxu0 %v2364_v1  ;;  %2226 = vmatpush3.bf16.msra.mxu1 %v2330_v26 }
  0x92   : > { %2241 = vmatprep.mubr.msk.bf16.mxu1 %vm2365_vm0, %v2364_v1  ;;  %2227 = vmatprep.subr.bf16.mxu1 %v2364_v1 }
  0x94   : > { %2210 = vmatpush3.bf16.msra.mxu0 %v2331_v27 }
  0x95   : > { %2211 = vmatprep.subr.bf16.mxu0 %v2364_v1  ;;  %2228 = vmatpush3.bf16.msra.mxu1 %v2332_v8 }
  0x96   : > { %2229 = vmatprep.subr.bf16.mxu1 %v2364_v1 }
  0x98   : > { %2212 = vmatpush3.bf16.msra.mxu0 %v2333_v28 }
  0x99   : > { %2213 = vmatprep.subr.bf16.mxu0 %v2364_v1  ;;  %2230 = vmatpush3.bf16.msra.mxu1 %v2334_v30 }
  0x9a   : > { %2231 = vmatprep.subr.bf16.mxu1 %v2364_v1 }
  0x9c   : > { %2214 = vmatpush3.bf16.msra.mxu0 %v2335_v32 }
  0x9d   : > { %2215 = vmatprep.subr.bf16.mxu0 %v2364_v1  ;;  %2232 = vmatpush3.bf16.msra.mxu1 %v2336_v34 }
  0x9e   : > { %2233 = vmatprep.subr.bf16.mxu1 %v2364_v1 }
  0xa0   : > { %2216 = vmatpush3.bf16.msra.mxu0 %v2337_v23 }
  0xa1   : > { %2217 = vmatprep.subr.bf16.mxu0 %v2364_v1  ;;  %2234 = vmatpush3.bf16.msra.mxu1 %v2338_v37 }
  0xa2   : > { %2235 = vmatprep.subr.bf16.mxu1 %v2364_v1 }
  0xa4   : > { %2218 = vmatpush3.bf16.msra.mxu0 %v2339_v31 }
  0xa5   : > { %2219 = vmatprep.subr.bf16.mxu0 %v2364_v1  ;;  %2236 = vmatpush3.bf16.msra.mxu1 %v2340_v39 }
  0xa6   : > { %2237 = vmatprep.subr.bf16.mxu1 %v2364_v1 }
  0xa8   : > { %2220 = vmatpush3.bf16.msra.mxu0 %v2341_v36 }
  0xa9   : > { %2245 = vmatprep.subr.bf16.mxu0 %v2364_v1  ;;  %2238 = vmatpush3.bf16.msra.mxu1 %v2342_v40 }
  0xaa   : > { %2239 = vmatprep.subr.bf16.mxu1 %v2364_v1 }
  0xab   : > { %2222 = vmatmul.mubr.bf16.vlgmr.msra.gmra.mxu0 %v2695_v63  ;;  %v2349_v63 = vld [vmem:[%s2930_s4 + $0x220] sm:$0xff]  }
  0xac   : > { %2246 = vmatpush3.bf16.msra.mxu0 %v2343_v18  ;;  %2261 = vmatprep.mubr.msk.bf16.mxu0 %vm2365_vm0, %v2364_v1 }
  0xad   : > { %2247 = vmatprep.subr.bf16.mxu0 %v2364_v1  ;;  %2240 = vmatpush3.bf16.msra.mxu1 %v2344_v43 }
  0xb0   : > { %2248 = vmatpush3.bf16.msra.mxu0 %v2347_v25  ;;  %2242 = vmatmul.mubr.bf16.vlgmr.msra.gmra.mxu1 %v1411_v20 }
  0xb1   : > { %2249 = vmatprep.subr.bf16.mxu0 %v2364_v1 }
  0xb4   : > { %2250 = vmatpush3.bf16.msra.mxu0 %v2348_v33 }
  0xb5   : > { %2251 = vmatprep.subr.bf16.mxu0 %v2364_v1 }
  0xb8   : > { %2252 = vmatpush3.bf16.msra.mxu0 %v2349_v63 }
  0xb9   : > { %2253 = vmatprep.subr.bf16.mxu0 %v2364_v1 }
  0xbc   : > { %2254 = vmatpush3.bf16.msra.mxu0 %v2350_v48 }
  0xbd   : > { %2255 = vmatprep.subr.bf16.mxu0 %v2364_v1 }
  0xc0   : > { %2256 = vmatpush3.bf16.msra.mxu0 %v2351_v49 }
  0xc1   : > { %2257 = vmatprep.subr.bf16.mxu0 %v2364_v1 }
  0xc4   : > { %2258 = vmatpush3.bf16.msra.mxu0 %v2352_v51 }
  0xc5   : > { %2259 = vmatprep.subr.bf16.mxu0 %v2364_v1 }
  0xc8   : > { %2260 = vmatpush3.bf16.msra.mxu0 %v2353_v52 }
  0xcb   : > { %2262 = vmatmul.mubr.bf16.vlgmr.msra.gmra.mxu0 %v2716_v35 }
 0x10b   : > { %v533_v53 = vpop.f32.mrf.mxu0 }
 0x10d   : > { %v2103_v2 = vpop.f32.mrf.mxu0 }
 0x10f   : > { %v536_v12 = vpop.f32.mrf.mxu0 }
 0x110   : > { %v649_v54 = vpop.f32.mrf.mxu1 }
 0x111   : > { %v2104_v55 = vpop.f32.mrf.mxu0  ;;  %v650_v0 = vadd.f32 %v649_v54, %v533_v53 }
 0x112   : > { %v2123_v13 = vpop.f32.mrf.mxu1 }
 0x114   : > { %v652_v57 = vpop.f32.mrf.mxu1 }
 0x115   : > { %v653_v58 = vadd.f32 %v652_v57, %v536_v12 }
 0x116   : > { %v2124_v59 = vpop.f32.mrf.mxu1 }
 0x12b   : > { %v819_v60 = vpop.f32.mrf.mxu0 }
 0x12c   : > { %v826_v56 = vadd.f32 %v819_v60, %v650_v0 }
 0x12d   : > { %v2143_v3 = vpop.f32.mrf.mxu0 }
 0x12f   : > { %v822_v61 = vpop.f32.mrf.mxu0 }
 0x130   : > { %v827_v62 = vadd.f32 %v822_v61, %v653_v58  ;;  %v974_v50 = vpop.f32.mrf.mxu1 }
 0x131   : > { %v2144_v1 = vpop.f32.mrf.mxu0  ;;  %v981_v38 = vadd.f32 %v974_v50, %v826_v56 }
 0x132   : > { %v2163_v4 = vpop.f32.mrf.mxu1 }
 0x134   : > { %v977_v35 = vpop.f32.mrf.mxu1 }
 0x135   : > { %v982_v6 = vadd.f32 %v977_v35, %v827_v62 }
 0x136   : > { %v2164_v7 = vpop.f32.mrf.mxu1 }
 0x14b   : > { %v1086_v9 = vpop.f32.mrf.mxu0 }
 0x14c   : > { %v1093_v27 = vadd.f32 %v1086_v9, %v981_v38 }
 0x14d   : > { %v2183_v10 = vpop.f32.mrf.mxu0 }
 0x14f   : > { %v1089_v11 = vpop.f32.mrf.mxu0 }
 0x150   : > { %v1235_v5 = vpop.f32.mrf.mxu1  ;;  %v1094_v8 = vadd.f32 %v1089_v11, %v982_v6 }
 0x151   : > { %v2184_v44 = vpop.f32.mrf.mxu0  ;;  %v1242_v28 = vadd.f32 %v1235_v5, %v1093_v27 }
 0x152   : > { %v2203_v14 = vpop.f32.mrf.mxu1 }
 0x154   : > { %v1238_v15 = vpop.f32.mrf.mxu1 }
 0x155   : > { %v1243_v30 = vadd.f32 %v1238_v15, %v1094_v8 }
 0x156   : > { %v2204_v16 = vpop.f32.mrf.mxu1 }
 0x16b   : > { %v1374_v17 = vpop.f32.mrf.mxu0 }
 0x16c   : > { %v1381_v32 = vadd.f32 %v1374_v17, %v1242_v28 }
 0x16d   : > { %v2223_v19 = vpop.f32.mrf.mxu0 }
 0x16f   : > { %v1377_v21 = vpop.f32.mrf.mxu0 }
 0x170   : > { %v1495_v22 = vpop.f32.mrf.mxu1  ;;  %v1382_v23 = vadd.f32 %v1377_v21, %v1243_v30 }
 0x171   : > { %v2224_v24 = vpop.f32.mrf.mxu0  ;;  %v1502_v37 = vadd.f32 %v1495_v22, %v1381_v32 }
 0x172   : > { %v2243_v29 = vpop.f32.mrf.mxu1 }
 0x174   : > { %v1498_v45 = vpop.f32.mrf.mxu1 }
 0x175   : > { %v1503_v39 = vadd.f32 %v1498_v45, %v1382_v23 }
 0x176   : > { %v2244_v26 = vpop.f32.mrf.mxu1 }
 0x18b   : > { %v1633_v34 = vpop.f32.mrf.mxu0 }
 0x18c   : > { %v1640_v36 = vadd.f32 %v1633_v34, %v1502_v37 }
 0x18d   : > { %v2263_v31 = vpop.f32.mrf.mxu0 }
 0x18e   : > { %v1660_v18 = vmul.f32 %v1640_v36, %v1640_v36 }
 0x18f   : > { %v1636_v40 = vpop.f32.mrf.mxu0 }
 0x190   : > { %v1641_v41 = vadd.f32 %v1636_v40, %v1503_v39 }
 0x191   : > { %v2264_v42 = vpop.f32.mrf.mxu0 }
 0x192   : > { %v2002_v43 = vpack.c.bf16 %v1641_v41, %v1640_v36  ;;  %v1652_v47 = vadd.f32 %v1641_v41, %v1640_v36  ;;  %v1661_v46 = vmul.f32 %v1641_v41, %v1641_v41 }
 0x194   : > { %2003 = vst [vmem:[%s258_s30] sm:$0xff] %v2002_v43   ;;  %v1653_v25 = vrot.slane %v1652_v47, 4  ;;  %v1662_v20 = vadd.f32 %v1661_v46, %v1660_v18 }
 0x196   : > { %v1654_v33 = vadd.f32 %v1653_v25, %v1652_v47  ;;  %v1663_v63 = vrot.slane %v1662_v20, 4 }
 0x198   : > { %v1655_v48 = vrot.slane %v1654_v33, 2  ;;  %v1664_v49 = vadd.f32 %v1663_v63, %v1662_v20 }
 0x19a   : > { %v1656_v51 = vadd.f32 %v1655_v48, %v1654_v33  ;;  %v1665_v52 = vrot.slane %v1664_v49, 2 }
 0x19c   : > { %v1657_v53 = vrot.slane %v1656_v51, 1  ;;  %v1666_v2 = vadd.f32 %v1665_v52, %v1664_v49 }
 0x19e   : > { %v1658_v12 = vadd.f32 %v1657_v53, %v1656_v51  ;;  %v1667_v54 = vrot.slane %v1666_v2, 1 }
 0x1a0   : > { %1659 = vst [vmem:[%s262_s11] sm:$0x1] %v1658_v12  ;;  %v1668_v55 = vadd.f32 %v1667_v54, %v1666_v2 }
 0x1a2   : > { %1669 = vst [vmem:[%s262_s11 + $0x1] sm:$0x1] %v1668_v55 }
 0x1a3 PF: > { %s17_s21 = sadd.s32 1, %s2362_s21  }
 0x1a4   : > { %p14_p4 = scmp.ge.s32.totalorder %s17_s21, 4  }
 0x1a6   :  { %16 = sbr.rel (!%p14_p4) target bundleno = 1 (0x1), region = 90 }

// kernel: _lambda_.30
= control target key start
LH: loop header
LB: loop body
LE: loop exit
PB: predicated region body
PF: predicated region fallthrough
CT: control target
= control target key end

     0   :  { %s560_s27 = smov 0   ;;  %s603_s0 = inlined_call_operand.vmem [shape: bf16[2,4,128], index: 0, kind: input, shape index: {}]   ;;  %s604_s1 = inlined_call_operand.vmem [shape: f32[2,128], index: 1, kind: input, shape index: {}]   ;;  %s605_s2 = inlined_call_operand.vmem [shape: f32[1,128], index: 2, kind: input, shape index: {}, may-alias: {2,6}]   ;;  %s606_s3 = inlined_call_operand.vmem [shape: f32[1,128], index: 3, kind: input, shape index: {}, may-alias: {3,7}]   ;;  %s607_s4 = inlined_call_operand.vmem [shape: bf16[2,4,128], index: 4, kind: input, shape index: {}]   ;;  %s608_s5 = inlined_call_operand.vmem [shape: f32[2,128], index: 5, kind: input, shape index: {}]   ;;  %s609_s6 = inlined_call_operand.vmem [shape: f32[1,128], index: 6, kind: input, shape index: {}, may-alias: {2,6}]   ;;  %s610_s7 = inlined_call_operand.vmem [shape: f32[1,128], index: 7, kind: input, shape index: {}, may-alias: {3,7}]   ;;  %s611_s8 = inlined_call_operand.vmem [shape: bf16[2,4,128], index: 8, kind: output, shape index: {}]  }
   0x1 LB: > { %s483_s28 = sadd.s32 4294967295, %s512_s27   ;;  %p487_p0 = scmp.ge.s32.totalorder %s512_s27, 1  ;;  %s512_s27 = sphi %s560_s27, %s18_s27  }
   0x2   : > { %p270_p1 = scmp.lt.s32.totalorder %s512_s27, 3 }
   0x4   : > { %p271_p2 = pnand %p487_p0, %p270_p1 }
   0x5   : > { %p306_p3 = scmp.lt.s32.totalorder (!%p271_p2), %s483_s28, 1 }
   0x6   : > { %274 = sbr.rel (%p271_p2) target bundleno = 62 (0x3e), region = 52 }
   0xb   : > { %v320_v0 = vld [vmem:[%s604_s1] sm:$0x3]  ;;  %v514_v14 = vmov 1966171168   ;;  %v336_v16 = vlaneseq  ;;  %s613_s28 = smov (!%p306_p3, %s483_s28), 1 }
   0xc   : > { %v323_v1 = vmul.f32 0.125, %v320_v0  ;;  %v368_v2 = vld [vmem:[%s608_s5] sm:$0x3]  ;;  %v334_v15 = vunpack.c.l.s4 %v514_v14  ;;  %s574_s11 = sshll.u32 %s613_s28, 1 }
   0xd   : > { %v371_v4 = vmul.f32 0.125, %v368_v2  ;;  %v337_v18 = vshrl.u32 %v336_v16, 7  ;;  %s309_s14 = scalar_lea.vmem %s603_s0, %s574_s11  ;;  %s313_s17 = scalar_lea.vmem %s607_s4, %s574_s11  ;;  %v321_v26 = vld [vmem:[%s605_s2] sm:$0x1] }
   0xe   : > { %v324_v3 = vmul.f32 %v323_v1, %v323_v1  ;;  %v335_v17 = vunpack.c.0.s8 %v334_v15  ;;  %v318_v25 = vld [vmem:[%s309_s14] sm:$0x3]  ;;  %s317_s29 = scalar_lea.vmem %s611_s8, %s574_s11 }
   0xf   : > { %v372_v6 = vmul.f32 %v371_v4, %v371_v4  ;;  %v355_v28 = vsub.s32 0, %v337_v18  ;;  %v366_v30 = vld [vmem:[%s313_s17] sm:$0x3]  ;;  %v319_v32 = vunpack.c.l.bf16 %v318_v25 }
  0x10   : > { %v326_v5 = vrot.slane %v324_v3, 7  ;;  %v338_v19 = vsub.s32 %v335_v17, %v337_v18  ;;  %v369_v31 = vld [vmem:[%s609_s6] sm:$0x1]  ;;  %v367_v38 = vunpack.c.l.bf16 %v366_v30 }
  0x11   : > { %v374_v8 = vrot.slane %v372_v6, 7  ;;  %v322_v35 = vld [vmem:[%s606_s3] sm:$0x1] }
  0x12   : > { %v328_v7 = vsub.f32 %v323_v1, %v326_v5  ;;  %v370_v40 = vld [vmem:[%s610_s7] sm:$0x1] }
  0x13   : > { %v376_v10 = vsub.f32 %v371_v4, %v374_v8 }
  0x14   : > { %v329_v9 = vmax.f32 %v328_v7, 0.0 }
  0x15   : > { %v377_v12 = vmax.f32 %v376_v10, 0.0 }
  0x16   : > { %v330_v11 = vadd.f32 1e-05, %v329_v9 }
  0x17   : > { %v378_v13 = vadd.f32 1e-05, %v377_v12 }
  0x18   : > { %502 = vrsqrt.f32 %v330_v11 }
  0x19   : > { %504 = vrsqrt.f32 %v378_v13 }
  0x25   : > { %v503_v20 = vpop.eup %502 }
  0x26   : > { %v339_v21 = vrot.slane %v503_v20, %v338_v19  ;;  %v505_v22 = vpop.eup %504 }
  0x27   : > { %v387_v24 = vrot.slane %v505_v22, %v338_v19 }
  0x28   : > { %v340_v23 = vcombine.high %v339_v21, %v339_v21 }
  0x29   : > { %v388_v29 = vcombine.high %v387_v24, %v387_v24 }
  0x2a   : > { %v347_v27 = vrot.slane %v340_v23, %v338_v19 }
  0x2b   : > { %v395_v34 = vrot.slane %v388_v29, %v338_v19 }
  0x2c   : > { %v349_v33 = vmul.f32 %v347_v27, %v321_v26 }
  0x2d   : > { %v397_v39 = vmul.f32 %v395_v34, %v369_v31 }
  0x2e   : > { %v350_v36 = vmul.f32 %v349_v33, %v323_v1  ;;  %v356_v37 = vrot.slane %v349_v33, %v355_v28 }
  0x2f   : > { %v398_v43 = vmul.f32 %v397_v39, %v371_v4  ;;  %v404_v44 = vrot.slane %v397_v39, %v355_v28 }
  0x30   : > { %v351_v41 = vsub.f32 %v322_v35, %v350_v36  ;;  %v358_v42 = vmul.f32 %v356_v37, %v319_v32 }
  0x31   : > { %v399_v46 = vsub.f32 %v370_v40, %v398_v43  ;;  %v406_v47 = vmul.f32 %v404_v44, %v367_v38 }
  0x32   : > { %v363_v45 = vrot.slane %v351_v41, %v355_v28 }
  0x33   : > { %v411_v49 = vrot.slane %v399_v46, %v355_v28 }
  0x34   : > { %v365_v48 = vadd.f32 %v363_v45, %v358_v42 }
  0x35   : > { %v413_v50 = vadd.f32 %v411_v49, %v406_v47 }
  0x37   : > { %v414_v51 = vadd.f32 %v413_v50, %v365_v48 }
  0x39   : > { %v415_v52 = vmax.f32 %v414_v51, 0.0 }
  0x3b   : > { %v416_v53 = vpack.c.bf16 %v415_v52, %v415_v52 }
  0x3d   : > { %417 = vst [vmem:[%s317_s29] sm:$0x3] %v416_v53 }
  0x3e PF: > { %s18_s27 = sadd.s32 1, %s512_s27  }
  0x3f   : > { %p15_p4 = scmp.ge.s32.totalorder %s18_s27, 4  }
  0x41   :  { %17 = sbr.rel (!%p15_p4) target bundleno = 1 (0x1), region = 85 }

// kernel: _lambda_.29
= control target key start
LH: loop header
LB: loop body
LE: loop exit
PB: predicated region body
PF: predicated region fallthrough
CT: control target
= control target key end

     0   :  { %s2149_s21 = smov 0   ;;  %s2550_s0 = inlined_call_operand.vmem [shape: f32[2,128], index: 0, kind: input, shape index: {}]   ;;  %s2551_s1 = inlined_call_operand.vmem [shape: f32[1,128], index: 1, kind: input, shape index: {}]   ;;  %s2552_s2 = inlined_call_operand.vmem [shape: f32[1,128], index: 2, kind: input, shape index: {}]   ;;  %s2553_s3 = inlined_call_operand.vmem [shape: bf16[2,4,128], index: 3, kind: input, shape index: {}]   ;;  %s2554_s4 = inlined_call_operand.vmem [shape: bf16[9,128,128], index: 4, kind: input, shape index: {}]   ;;  %s2555_s5 = inlined_call_operand.vmem [shape: bf16[2,4,128], index: 5, kind: output, shape index: {0}]   ;;  %s2556_s6 = inlined_call_operand.vmem [shape: f32[2,2,128], index: 6, kind: output, shape index: {1}]  }
   0x1 LB: > { %s1535_s22 = sadd.s32 4294967295, %s2108_s21   ;;  %p1539_p0 = scmp.ge.s32.totalorder %s2108_s21, 1  ;;  %s2108_s21 = sphi %s2149_s21, %s17_s21  }
   0x2   : > { %p214_p1 = scmp.lt.s32.totalorder %s2108_s21, 3 }
   0x4   : > { %p215_p2 = pnand %p1539_p0, %p214_p1 }
   0x5   : > { %p246_p3 = scmp.lt.s32.totalorder (!%p215_p2), %s1535_s22, 1 }
   0x6   : > { %218 = sbr.rel (%p215_p2) target bundleno = 413 (0x19d), region = 40 }
   0xb   : > { %v2026_v0 = vld [vmem:[%s2554_s4 + $0x78] sm:$0xff]   ;;  %v2110_v1 = vmov 0.0   ;;  %v2027_v2 = vld [vmem:[%s2554_s4 + $0x70] sm:$0xff]   ;;  %vm2111_vm0 = vmmov 0   ;;  %v2112_v5 = vmov 0   ;;  %v2029_v6 = vld [vmem:[%s2554_s4 + $0x68] sm:$0xff]   ;;  %v280_v8 = vlaneseq }
   0xc   : > { %1834 = vmatprep.subr.bf16.mxu0 %v2110_v1  ;;  %1854 = vmatprep.subr.bf16.mxu1 %v2110_v1  ;;  %v2028_v3 = vld [vmem:[%s2554_s4 + $0x38] sm:$0xff]   ;;  %v2030_v4 = vld [vmem:[%s2554_s4 + $0x30] sm:$0xff]   ;;  %261 = vst [vmem:[#allocation2] sm:$0xf] %v2112_v5  ;;  %262 = vst [vmem:[#allocation2 + $0x4] sm:$0xf] %v2112_v5 }
   0xd   : > { %1835 = vmatpush3.bf16.msra.mxu0 %v2026_v0  ;;  %1850 = vmatprep.mubr.msk.bf16.mxu0 %vm2111_vm0, %v2110_v1  ;;  %v2032_v7 = vld [vmem:[%s2554_s4 + $0x28] sm:$0xff]   ;;  %v2031_v9 = vld [vmem:[%s2554_s4 + $0x60] sm:$0xff]   ;;  %v2194_v11 = vshrl.u32 %v280_v8, 7  ;;  %v2033_v12 = vld [vmem:[%s2554_s4 + $0x58] sm:$0xff]   ;;  %v2113_v32 = vmov 1966171168  }
   0xe   : > { %1836 = vmatprep.subr.bf16.mxu0 %v2110_v1  ;;  %1870 = vmatprep.mubr.msk.bf16.mxu1 %vm2111_vm0, %v2110_v1  ;;  %v2034_v10 = vld [vmem:[%s2554_s4 + $0x20] sm:$0xff]   ;;  %v2036_v15 = vld [vmem:[%s2554_s4 + $0x18] sm:$0xff]   ;;  %v2035_v17 = vld [vmem:[%s2554_s4 + $0x50] sm:$0xff]   ;;  %v278_v33 = vunpack.c.l.s4 %v2113_v32  ;;  %s2562_s22 = smov (!%p246_p3, %s1535_s22), 1  ;;  %vm1433_vm14 = vcmask 1043456  }
   0xf   : > { %1855 = vmatpush3.bf16.msra.mxu1 %v2028_v3  ;;  %v320_v13 = vand.u32 1, %v2194_v11  ;;  %v264_v14 = vld [vmem:[%s2550_s0] sm:$0x3]  ;;  %v2038_v19 = vld [vmem:[%s2554_s4 + $0x10] sm:$0xff]   ;;  %v2037_v21 = vld [vmem:[%s2554_s4 + $0x48] sm:$0xff]   ;;  %s2248_s11 = sshll.u32 %s2562_s22, 1 }
  0x10   : > { %1856 = vmatprep.subr.bf16.mxu1 %v2110_v1  ;;  %v267_v16 = vmul.f32 0.125, %v264_v14  ;;  %v2040_v23 = vld [vmem:[%s2554_s4 + $0x8] sm:$0xff]   ;;  %v2039_v26 = vld [vmem:[%s2554_s4 + $0x40] sm:$0xff]   ;;  %v279_v35 = vunpack.c.0.s8 %v278_v33  ;;  %s249_s14 = scalar_lea.vmem %s2553_s3, %s2248_s11  ;;  %v300_v43 = vsub.s32 0, %v2194_v11  ;;  %s253_s24 = scalar_lea.vmem %s2555_s5, %s2248_s11 }
  0x11   : > { %1837 = vmatpush3.bf16.msra.mxu0 %v2027_v2  ;;  %vm328_vm1 = vcmp.ne.s32.totalorder %v320_v13, 0  ;;  %v2043_v29 = vld [vmem:[%s2554_s4] sm:$0xff]   ;;  %vm329_vm3 = vcmp.ne.s32.totalorder %v320_v13, 1  ;;  %s257_s27 = scalar_lea.vmem %s2556_s6, %s2248_s11 }
  0x12   : > { %1838 = vmatprep.subr.bf16.mxu0 %v2110_v1  ;;  %v268_v18 = vmul.f32 %v267_v16, %v267_v16  ;;  %vm334_vm2 = vmpackc.low %vm328_vm1, %vm328_vm1  ;;  %v282_v36 = vsub.s32 %v279_v35, %v2194_v11  ;;  %v263_v39 = vld [vmem:[%s249_s14] sm:$0x3] }
  0x13   : > { %1857 = vmatpush3.bf16.msra.mxu1 %v2030_v4  ;;  %v335_v25 = vsel %vm334_vm2, 65537, %v2112_v5  ;;  %v265_v41 = vld [vmem:[%s2551_s1] sm:$0x1]  ;;  %v296_v45 = vunpack.c.l.bf16 %v263_v39  ;;  %vm583_vm4 = vmpackc.low %vm329_vm3, %vm329_vm3  ;;  %v330_v2 = vld [vmem:[#allocation2] sm:$0xc] }
  0x14   : > { %1858 = vmatprep.subr.bf16.mxu1 %v2110_v1  ;;  %v270_v20 = vrot.slane %v268_v18, 7  ;;  %v2230_v28 = vshrl.u32 %v335_v25, 16  ;;  %v2235_v30 = vshll.u32 %v335_v25, 16  ;;  %v266_v46 = vld [vmem:[%s2552_s2] sm:$0x1]  ;;  %v584_v52 = vsel %vm583_vm4, 65537, %v2112_v5 }
  0x15   : > { %1839 = vmatpush3.bf16.msra.mxu0 %v2029_v6  ;;  %v2265_v57 = vshrl.u32 %v584_v52, 16  ;;  %v2267_v58 = vshll.u32 %v584_v52, 16  ;;  %v2273_v3 = vld [vmem:[#allocation2] sm:$0x8]  ;;  %v2047_v25 = vld [vmem:[%s2554_s4 + $0xf0] sm:$0xff]  }
  0x16   : > { %1840 = vmatprep.subr.bf16.mxu0 %v2110_v1  ;;  %v272_v22 = vsub.f32 %v267_v16, %v270_v20  ;;  %v1074_v31 = vrot.slane %v2230_v28, 7  ;;  %v339_v54 = vrot.slane %v2230_v28, 5  ;;  %v342_v55 = vrot.slane %v2235_v30, 6  ;;  %v2052_v39 = vld [vmem:[%s2554_s4 + $0x90] sm:$0xff]  }
  0x17   : > { %1859 = vmatpush3.bf16.msra.mxu1 %v2032_v7  ;;  %v1308_v60 = vrot.slane %v2265_v57, 6  ;;  %v1309_v62 = vrot.slane %v2267_v58, 7  ;;  %v588_v11 = vrot.slane %v2267_v58, 5  ;;  %v718_v20 = vrot.slane %v2235_v30, 5 }
  0x18   : > { %1860 = vmatprep.subr.bf16.mxu1 %v2110_v1  ;;  %v273_v24 = vmax.f32 %v272_v22, 0.0  ;;  %v2243_v34 = vor.u32 %v1074_v31, %v2235_v30  ;;  %v343_v61 = vor.u32 %v342_v55, %v339_v54  ;;  %v344_v63 = vrot.slane %v339_v54, 4  ;;  %v2049_v31 = vld [vmem:[%s2554_s4 + $0xe8] sm:$0xff]   ;;  %v2058_v55 = vld [vmem:[%s2554_s4 + $0x138] sm:$0xff]  }
  0x19   : > { %1841 = vmatpush3.bf16.msra.mxu0 %v2031_v9  ;;  %v2271_v0 = vor.u32 %v1309_v62, %v1308_v60  ;;  %v2042_v9 = vld [vmem:[%s2554_s4 + $0xb8] sm:$0xff]   ;;  %vm2307_vm7 = vcmp.ne.s16.totalorder %v588_v11, 0  ;;  %vm722_vm9 = vcmp.ne.s16.totalorder %v718_v20, 0  ;;  %v2059_v60 = vld [vmem:[%s2554_s4 + $0xc0] sm:$0xff]   ;;  %v2060_v62 = vld [vmem:[%s2554_s4 + $0x130] sm:$0xff]  }
  0x1a   : > { %1842 = vmatprep.subr.bf16.mxu0 %v2110_v1  ;;  %v274_v27 = vadd.f32 1e-05, %v273_v24  ;;  %vm345_vm5 = vcmp.ne.s16.totalorder %v343_v61, 0  ;;  %vm346_vm6 = vcmp.ne.s16.totalorder %v344_v63, 0  ;;  %v596_v33 = vsel %vm2307_vm7, %v2273_v3, 0  ;;  %v2061_v63 = vld [vmem:[%s2554_s4 + $0x178] sm:$0xff]  }
  0x1b   : > { %1861 = vmatpush3.bf16.msra.mxu1 %v2034_v10  ;;  %v347_v4 = vsel %vm345_vm5, %v330_v2, 0  ;;  %v2062_v2 = vld [vmem:[%s2554_s4 + $0x128] sm:$0xff]   ;;  %vm1076_vm12 = vcmp.ne.s16.totalorder %v2243_v34, 0  ;;  %v2084_v34 = vld [vmem:[%s2554_s4 + $0x190] sm:$0xff]   ;;  %vm1311_vm13 = vcmp.ne.s16.totalorder %v2271_v0, 0 }
  0x1c   : > { %1862 = vmatprep.subr.bf16.mxu1 %v2110_v1  ;;  %2100 = vrsqrt.f32 %v274_v27  ;;  %v2048_v27 = vld [vmem:[%s2554_s4 + $0xa0] sm:$0xff]   ;;  %v2098_v0 = vld [vmem:[%s2554_s4 + $0x208] sm:$0xff]  }
  0x1d   : > { %1843 = vmatpush3.bf16.msra.mxu0 %v2033_v12  ;;  %v591_v12 = vrot.slane %v2265_v57, 4 }
  0x1e   : > { %1844 = vmatprep.subr.bf16.mxu0 %v2110_v1 }
  0x1f   : > { %1863 = vmatpush3.bf16.msra.mxu1 %v2036_v15  ;;  %v2044_v15 = vld [vmem:[%s2554_s4 + $0xb0] sm:$0xff]   ;;  %v592_v18 = vor.u32 %v591_v12, %v588_v11  ;;  %v2070_v12 = vld [vmem:[%s2554_s4 + $0x108] sm:$0xff]  }
  0x20   : > { %1864 = vmatprep.subr.bf16.mxu1 %v2110_v1 }
  0x21   : > { %1845 = vmatpush3.bf16.msra.mxu0 %v2035_v17  ;;  %v593_v24 = vrot.slane %v592_v18, 4  ;;  %v2074_v18 = vld [vmem:[%s2554_s4 + $0x1b8] sm:$0xff]  }
  0x22   : > { %1846 = vmatprep.subr.bf16.mxu0 %v2110_v1 }
  0x23   : > { %1865 = vmatpush3.bf16.msra.mxu1 %v2038_v19  ;;  %v2045_v19 = vld [vmem:[%s2554_s4 + $0xf8] sm:$0xff]   ;;  %vm2311_vm8 = vcmp.ne.s16.totalorder %v593_v24, 0 }
  0x24   : > { %1866 = vmatprep.subr.bf16.mxu1 %v2110_v1  ;;  %v2077_v24 = vld [vmem:[%s2554_s4 + $0x1f8] sm:$0xff]  }
  0x25   : > { %1847 = vmatpush3.bf16.msra.mxu0 %v2037_v21  ;;  %v719_v21 = vrot.slane %v2230_v28, 4 }
  0x26   : > { %1848 = vmatprep.subr.bf16.mxu0 %v2110_v1 }
  0x27   : > { %1867 = vmatpush3.bf16.msra.mxu1 %v2040_v23  ;;  %v2046_v23 = vld [vmem:[%s2554_s4 + $0xa8] sm:$0xff]  }
  0x28   : > { %1868 = vmatprep.subr.bf16.mxu1 %v2110_v1 }
  0x29   : > { %1849 = vmatpush3.bf16.msra.mxu0 %v2039_v26  ;;  %v2101_v37 = vpop.eup %2100  ;;  %v720_v26 = vor.u32 %v719_v21, %v718_v20  ;;  %v2075_v21 = vld [vmem:[%s2554_s4 + $0x140] sm:$0xff]  }
  0x2a   : > { %1874 = vmatprep.subr.bf16.mxu0 %v2110_v1  ;;  %v283_v38 = vrot.slane %v2101_v37, %v282_v36  ;;  %v2051_v37 = vld [vmem:[%s2554_s4 + $0xe0] sm:$0xff]  }
  0x2b   : > { %1869 = vmatpush3.bf16.msra.mxu1 %v2043_v29  ;;  %v721_v32 = vrot.slane %v720_v26, 4  ;;  %v2079_v26 = vld [vmem:[%s2554_s4 + $0x1f0] sm:$0xff]   ;;  %v2082_v29 = vld [vmem:[%s2554_s4 + $0x198] sm:$0xff]  }
  0x2c   : > { %1894 = vmatprep.subr.bf16.mxu1 %v2110_v1  ;;  %v284_v40 = vcombine.high %v283_v38, %v283_v38 }
  0x2d   : > { %vm723_vm10 = vcmp.ne.s16.totalorder %v721_v32, 0 }
  0x2e   : > { %v291_v42 = vrot.slane %v284_v40, %v282_v36  ;;  %v2050_v36 = vld [vmem:[%s2554_s4 + $0x98] sm:$0xff]   ;;  %v724_v40 = vsel %vm722_vm9, %v2273_v3, 0 }
  0x30   : > { %v293_v44 = vmul.f32 %v291_v42, %v265_v41  ;;  %v2053_v42 = vld [vmem:[%s2554_s4 + $0xd8] sm:$0xff]  }
  0x32   : > { %v294_v47 = vmul.f32 %v293_v44, %v267_v16  ;;  %v301_v48 = vrot.slane %v293_v44, %v300_v43 }
  0x34   : > { %v295_v49 = vsub.f32 %v266_v46, %v294_v47  ;;  %v303_v50 = vmul.f32 %v301_v48, %v296_v45  ;;  %v2054_v46 = vld [vmem:[%s2554_s4 + $0x88] sm:$0xff]   ;;  %v2055_v47 = vld [vmem:[%s2554_s4 + $0xd0] sm:$0xff]  }
  0x36   : > { %v308_v51 = vrot.slane %v295_v49, %v300_v43 }
  0x38   : > { %v310_v53 = vadd.f32 %v308_v51, %v303_v50  ;;  %v2056_v50 = vld [vmem:[%s2554_s4 + $0x80] sm:$0xff]  }
  0x3a   : > { %v311_v56 = vmax.f32 %v310_v53, 0.0  ;;  %v2057_v53 = vld [vmem:[%s2554_s4 + $0xc8] sm:$0xff]  }
  0x3c   : > { %v312_v59 = vpack.c.bf16 %v311_v56, %v311_v56 }
  0x3e   : > { %313 = vst [vmem:[#allocation2 + $0x4] sm:$0x3] %v312_v59 }
  0x45   : > { %v331_v5 = vld [vmem:[#allocation2 + $0x4] sm:$0x1] }
  0x46   : > { %v348_v6 = vsel %vm346_vm6, %v331_v5, 0  ;;  %v1559_v7 = vcombine.low %v2273_v3, %v331_v5  ;;  %v2305_v28 = vld [vmem:[#allocation2 + $0x4] sm:$0x3]  ;;  %v2063_v3 = vld [vmem:[%s2554_s4 + $0x170] sm:$0xff]   ;;  %v2064_v5 = vld [vmem:[%s2554_s4 + $0x120] sm:$0xff]  }
  0x47   : > { %v1568_v8 = vcombine.low %v347_v4, %v348_v6  ;;  %v597_v35 = vsel %vm2311_vm8, %v2305_v28, 0  ;;  %v725_v41 = vsel %vm723_vm10, %v2305_v28, 0  ;;  %v953_v4 = vrot.slane %v2265_v57, 7  ;;  %v2065_v6 = vld [vmem:[%s2554_s4 + $0x168] sm:$0xff]   ;;  %v2066_v57 = vld [vmem:[%s2554_s4 + $0x118] sm:$0xff]  }
  0x48   : > { %v388_v10 = vrot.slane %v1559_v7, 3  ;;  %v1593_v38 = vcombine.low %v596_v33, %v597_v35  ;;  %v1618_v45 = vcombine.low %v724_v40, %v725_v41  ;;  %v2085_v33 = vld [vmem:[%s2554_s4 + $0x1d8] sm:$0xff]   ;;  %v2088_v40 = vld [vmem:[%s2554_s4 + $0x180] sm:$0xff]   ;;  %v2089_v41 = vld [vmem:[%s2554_s4 + $0x1c8] sm:$0xff]  }
  0x49   : > { %v484_v13 = vshrl.u32 %v1568_v8, 16  ;;  %v487_v14 = vshll.u32 %v1568_v8, 16  ;;  %v954_v7 = vor.u32 %v953_v4, %v2267_v58  ;;  %v2067_v8 = vld [vmem:[%s2554_s4 + $0x160] sm:$0xff]   ;;  %v2068_v58 = vld [vmem:[%s2554_s4 + $0x110] sm:$0xff]  }
  0x4a   : > { %1851 = vmatmul.mubr.bf16.vlgmr.msra.gmra.mxu0 %v388_v10  ;;  %v621_v43 = vshrl.u32 %v1593_v38, 16  ;;  %v624_v44 = vshll.u32 %v1593_v38, 16  ;;  %v749_v51 = vshrl.u32 %v1618_v45, 16  ;;  %v752_v52 = vshll.u32 %v1618_v45, 16  ;;  %v2069_v10 = vld [vmem:[%s2554_s4 + $0x158] sm:$0xff]   ;;  %v2091_v45 = vld [vmem:[%s2554_s4 + $0x1c0] sm:$0xff]  }
  0x4b   : > { %1875 = vmatpush3.bf16.msra.mxu0 %v2042_v9  ;;  %v486_v16 = vrot.slane %v484_v13, 2  ;;  %v489_v17 = vrot.slane %v487_v14, 3  ;;  %1890 = vmatprep.mubr.msk.bf16.mxu0 %vm2111_vm0, %v2110_v1  ;;  %v952_v9 = vld [vmem:[#allocation2 + $0x4] sm:$0x7]  ;;  %vm955_vm11 = vcmp.ne.s16.totalorder %v954_v7, 0  ;;  %v2071_v14 = vld [vmem:[%s2554_s4 + $0x150] sm:$0xff]  }
  0x4c   : > { %1876 = vmatprep.subr.bf16.mxu0 %v2110_v1  ;;  %v623_v48 = vrot.slane %v621_v43, 3  ;;  %v626_v49 = vrot.slane %v624_v44, 4  ;;  %v751_v56 = vrot.slane %v749_v51, 3  ;;  %v754_v59 = vrot.slane %v752_v52, 4  ;;  %v2090_v43 = vld [vmem:[%s2554_s4 + $0x238] sm:$0xff]  }
  0x4d   : > { %v490_v22 = vor.u32 %v489_v17, %v486_v16  ;;  %v956_v11 = vsel %vm955_vm11, %v952_v9, 0  ;;  %v2073_v17 = vld [vmem:[%s2554_s4 + $0x148] sm:$0xff]   ;;  %v1077_v30 = vsel %vm1076_vm12, %v952_v9, 0  ;;  %v2096_v51 = vld [vmem:[%s2554_s4 + $0x218] sm:$0xff]  }
  0x4e   : > { %v627_v54 = vor.u32 %v626_v49, %v623_v48  ;;  %v755_v61 = vor.u32 %v754_v59, %v751_v56  ;;  %v1667_v13 = vcombine.low %v956_v11, %v956_v11  ;;  %v1692_v32 = vcombine.low %v1077_v30, %v1077_v30  ;;  %v2092_v44 = vld [vmem:[#allocation2 + $0x4] ss:$0 sps:$4 sm:$0x66]   ;;  %v2095_v49 = vld [vmem:[%s2554_s4 + $0x220] sm:$0xff]  }
  0x4f   : > { %1877 = vmatpush3.bf16.msra.mxu0 %v2044_v15  ;;  %1871 = vmatmul.mubr.bf16.vlgmr.msra.gmra.mxu1 %v490_v22  ;;  %v2072_v15 = vld [vmem:[%s2554_s4 + $0x100] sm:$0xff]   ;;  %v2094_v48 = vld [vmem:[%s2554_s4 + $0x228] sm:$0xff]  }
  0x50   : > { %1895 = vmatpush3.bf16.msra.mxu1 %v2045_v19  ;;  %1878 = vmatprep.subr.bf16.mxu0 %v2110_v1  ;;  %v980_v16 = vshll.u32 %v1667_v13, 16  ;;  %v978_v19 = vshrl.u32 %v1667_v13, 16  ;;  %v1101_v35 = vshll.u32 %v1692_v32, 16  ;;  %v1099_v38 = vshrl.u32 %v1692_v32, 16 }
  0x51   : > { %1896 = vmatprep.subr.bf16.mxu1 %v2110_v1  ;;  %1910 = vmatprep.mubr.msk.bf16.mxu1 %vm2111_vm0, %v2110_v1 }
  0x52   : > { %v982_v20 = vrot.slane %v980_v16, 1 }
  0x53   : > { %1879 = vmatpush3.bf16.msra.mxu0 %v2046_v23  ;;  %v2076_v23 = vld [vmem:[%s2554_s4 + $0x1b0] sm:$0xff]  }
  0x54   : > { %1897 = vmatpush3.bf16.msra.mxu1 %v2047_v25  ;;  %1880 = vmatprep.subr.bf16.mxu0 %v2110_v1  ;;  %v983_v22 = vor.u32 %v982_v20, %v978_v19  ;;  %v2078_v25 = vld [vmem:[%s2554_s4 + $0x1a8] sm:$0xff]  }
  0x55   : > { %1898 = vmatprep.subr.bf16.mxu1 %v2110_v1 }
  0x57   : > { %1881 = vmatpush3.bf16.msra.mxu0 %v2048_v27  ;;  %v2080_v27 = vld [vmem:[%s2554_s4 + $0x1a0] sm:$0xff]  }
  0x58   : > { %1899 = vmatpush3.bf16.msra.mxu1 %v2049_v31  ;;  %1882 = vmatprep.subr.bf16.mxu0 %v2110_v1  ;;  %v2083_v31 = vld [vmem:[%s2554_s4 + $0x1e0] sm:$0xff]  }
  0x59   : > { %1900 = vmatprep.subr.bf16.mxu1 %v2110_v1 }
  0x5b   : > { %1883 = vmatpush3.bf16.msra.mxu0 %v2050_v36  ;;  %v2086_v36 = vld [vmem:[%s2554_s4 + $0x188] sm:$0xff]  }
  0x5c   : > { %1901 = vmatpush3.bf16.msra.mxu1 %v2051_v37  ;;  %1884 = vmatprep.subr.bf16.mxu0 %v2110_v1  ;;  %v2087_v37 = vld [vmem:[%s2554_s4 + $0x1d0] sm:$0xff]  }
  0x5d   : > { %1902 = vmatprep.subr.bf16.mxu1 %v2110_v1 }
  0x5f   : > { %1885 = vmatpush3.bf16.msra.mxu0 %v2052_v39  ;;  %v1103_v39 = vrot.slane %v1101_v35, 1 }
  0x60   : > { %1903 = vmatpush3.bf16.msra.mxu1 %v2053_v42  ;;  %1886 = vmatprep.subr.bf16.mxu0 %v2110_v1 }
  0x61   : > { %1904 = vmatprep.subr.bf16.mxu1 %v2110_v1  ;;  %v1104_v42 = vor.u32 %v1103_v39, %v1099_v38 }
  0x63   : > { %1887 = vmatpush3.bf16.msra.mxu0 %v2054_v46  ;;  %v1216_v46 = vrot.slane %v2092_v44, 1 }
  0x64   : > { %1905 = vmatpush3.bf16.msra.mxu1 %v2055_v47  ;;  %1888 = vmatprep.subr.bf16.mxu0 %v2110_v1  ;;  %v2093_v47 = vld [vmem:[%s2554_s4 + $0x230] sm:$0xff]  }
  0x65   : > { %1906 = vmatprep.subr.bf16.mxu1 %v2110_v1 }
  0x67   : > { %1889 = vmatpush3.bf16.msra.mxu0 %v2056_v50  ;;  %v1307_v50 = vld [vmem:[#allocation2 + $0x4] sm:$0xe] }
  0x68   : > { %1907 = vmatpush3.bf16.msra.mxu1 %v2057_v53  ;;  %1914 = vmatprep.subr.bf16.mxu0 %v2110_v1  ;;  %v1312_v52 = vsel %vm1311_vm13, %v1307_v50, 0 }
  0x69   : > { %1908 = vmatprep.subr.bf16.mxu1 %v2110_v1  ;;  %v1742_v53 = vcombine.low %v1312_v52, %v1312_v52 }
  0x6a   : > { %1891 = vmatmul.mubr.bf16.vlgmr.msra.gmra.mxu0 %v627_v54  ;;  %v2097_v54 = vld [vmem:[%s2554_s4 + $0x210] sm:$0xff]  }
  0x6b   : > { %1915 = vmatpush3.bf16.msra.mxu0 %v2058_v55  ;;  %1930 = vmatprep.mubr.msk.bf16.mxu0 %vm2111_vm0, %v2110_v1  ;;  %v1334_v55 = vshrl.u32 %v1742_v53, 16  ;;  %v1337_v56 = vshll.u32 %v1742_v53, 16 }
  0x6c   : > { %1909 = vmatpush3.bf16.msra.mxu1 %v2059_v60  ;;  %1916 = vmatprep.subr.bf16.mxu0 %v2110_v1 }
  0x6d   : > { %1934 = vmatprep.subr.bf16.mxu1 %v2110_v1  ;;  %v1336_v59 = vrot.slane %v1334_v55, 1  ;;  %v1339_v60 = vrot.slane %v1337_v56, 2 }
  0x6f   : > { %1911 = vmatmul.mubr.bf16.vlgmr.msra.gmra.mxu1 %v755_v61  ;;  %1917 = vmatpush3.bf16.msra.mxu0 %v2060_v62  ;;  %v2099_v61 = vld [vmem:[%s2554_s4 + $0x200] sm:$0xff]   ;;  %v1340_v62 = vor.u32 %v1339_v60, %v1336_v59 }
  0x70   : > { %1935 = vmatpush3.bf16.msra.mxu1 %v2061_v63  ;;  %1918 = vmatprep.subr.bf16.mxu0 %v2110_v1 }
  0x71   : > { %1936 = vmatprep.subr.bf16.mxu1 %v2110_v1  ;;  %1950 = vmatprep.mubr.msk.bf16.mxu1 %vm2111_vm0, %v2110_v1 }
  0x73   : > { %1919 = vmatpush3.bf16.msra.mxu0 %v2062_v2 }
  0x74   : > { %1937 = vmatpush3.bf16.msra.mxu1 %v2063_v3  ;;  %1920 = vmatprep.subr.bf16.mxu0 %v2110_v1 }
  0x75   : > { %1938 = vmatprep.subr.bf16.mxu1 %v2110_v1 }
  0x77   : > { %1921 = vmatpush3.bf16.msra.mxu0 %v2064_v5 }
  0x78   : > { %1939 = vmatpush3.bf16.msra.mxu1 %v2065_v6  ;;  %1922 = vmatprep.subr.bf16.mxu0 %v2110_v1 }
  0x79   : > { %1940 = vmatprep.subr.bf16.mxu1 %v2110_v1 }
  0x7b   : > { %1923 = vmatpush3.bf16.msra.mxu0 %v2066_v57 }
  0x7c   : > { %1941 = vmatpush3.bf16.msra.mxu1 %v2067_v8  ;;  %1924 = vmatprep.subr.bf16.mxu0 %v2110_v1 }
  0x7d   : > { %1942 = vmatprep.subr.bf16.mxu1 %v2110_v1 }
  0x7f   : > { %1925 = vmatpush3.bf16.msra.mxu0 %v2068_v58 }
  0x80   : > { %1943 = vmatpush3.bf16.msra.mxu1 %v2069_v10  ;;  %1926 = vmatprep.subr.bf16.mxu0 %v2110_v1 }
  0x81   : > { %1944 = vmatprep.subr.bf16.mxu1 %v2110_v1 }
  0x83   : > { %1927 = vmatpush3.bf16.msra.mxu0 %v2070_v12 }
  0x84   : > { %1945 = vmatpush3.bf16.msra.mxu1 %v2071_v14  ;;  %1928 = vmatprep.subr.bf16.mxu0 %v2110_v1 }
  0x85   : > { %1946 = vmatprep.subr.bf16.mxu1 %v2110_v1 }
  0x87   : > { %1929 = vmatpush3.bf16.msra.mxu0 %v2072_v15 }
  0x88   : > { %1947 = vmatpush3.bf16.msra.mxu1 %v2073_v17  ;;  %1954 = vmatprep.subr.bf16.mxu0 %v2110_v1 }
  0x89   : > { %1948 = vmatprep.subr.bf16.mxu1 %v2110_v1 }
  0x8a   : > { %1931 = vmatmul.mubr.bf16.vlgmr.msra.gmra.mxu0 %v2305_v28  ;;  %v2081_v28 = vld [vmem:[%s2554_s4 + $0x1e8] sm:$0xff]  }
  0x8b   : > { %1955 = vmatpush3.bf16.msra.mxu0 %v2074_v18  ;;  %1970 = vmatprep.mubr.msk.bf16.mxu0 %vm2111_vm0, %v2110_v1 }
  0x8c   : > { %1949 = vmatpush3.bf16.msra.mxu1 %v2075_v21  ;;  %1956 = vmatprep.subr.bf16.mxu0 %v2110_v1 }
  0x8d   : > { %1974 = vmatprep.subr.bf16.mxu1 %v2110_v1 }
  0x8f   : > { %1951 = vmatmul.mubr.bf16.vlgmr.msra.gmra.mxu1 %v983_v22  ;;  %1957 = vmatpush3.bf16.msra.mxu0 %v2076_v23 }
  0x90   : > { %1975 = vmatpush3.bf16.msra.mxu1 %v2077_v24  ;;  %1958 = vmatprep.subr.bf16.mxu0 %v2110_v1 }
  0x91   : > { %1976 = vmatprep.subr.bf16.mxu1 %v2110_v1  ;;  %1990 = vmatprep.mubr.msk.bf16.mxu1 %vm2111_vm0, %v2110_v1 }
  0x93   : > { %1959 = vmatpush3.bf16.msra.mxu0 %v2078_v25 }
  0x94   : > { %1977 = vmatpush3.bf16.msra.mxu1 %v2079_v26  ;;  %1960 = vmatprep.subr.bf16.mxu0 %v2110_v1 }
  0x95   : > { %1978 = vmatprep.subr.bf16.mxu1 %v2110_v1 }
  0x97   : > { %1961 = vmatpush3.bf16.msra.mxu0 %v2080_v27 }
  0x98   : > { %1979 = vmatpush3.bf16.msra.mxu1 %v2081_v28  ;;  %1962 = vmatprep.subr.bf16.mxu0 %v2110_v1 }
  0x99   : > { %1980 = vmatprep.subr.bf16.mxu1 %v2110_v1 }
  0x9b   : > { %1963 = vmatpush3.bf16.msra.mxu0 %v2082_v29 }
  0x9c   : > { %1981 = vmatpush3.bf16.msra.mxu1 %v2083_v31  ;;  %1964 = vmatprep.subr.bf16.mxu0 %v2110_v1 }
  0x9d   : > { %1982 = vmatprep.subr.bf16.mxu1 %v2110_v1 }
  0x9f   : > { %1965 = vmatpush3.bf16.msra.mxu0 %v2084_v34 }
  0xa0   : > { %1983 = vmatpush3.bf16.msra.mxu1 %v2085_v33  ;;  %1966 = vmatprep.subr.bf16.mxu0 %v2110_v1 }
  0xa1   : > { %1984 = vmatprep.subr.bf16.mxu1 %v2110_v1 }
  0xa3   : > { %1967 = vmatpush3.bf16.msra.mxu0 %v2086_v36 }
  0xa4   : > { %1985 = vmatpush3.bf16.msra.mxu1 %v2087_v37  ;;  %1968 = vmatprep.subr.bf16.mxu0 %v2110_v1 }
  0xa5   : > { %1986 = vmatprep.subr.bf16.mxu1 %v2110_v1 }
  0xa7   : > { %1969 = vmatpush3.bf16.msra.mxu0 %v2088_v40 }
  0xa8   : > { %1987 = vmatpush3.bf16.msra.mxu1 %v2089_v41  ;;  %1994 = vmatprep.subr.bf16.mxu0 %v2110_v1 }
  0xa9   : > { %1988 = vmatprep.subr.bf16.mxu1 %v2110_v1 }
  0xaa   : > { %1971 = vmatmul.mubr.bf16.vlgmr.msra.gmra.mxu0 %v1104_v42 }
  0xab   : > { %1995 = vmatpush3.bf16.msra.mxu0 %v2090_v43  ;;  %2010 = vmatprep.mubr.msk.bf16.mxu0 %vm2111_vm0, %v2110_v1 }
  0xac   : > { %1989 = vmatpush3.bf16.msra.mxu1 %v2091_v45  ;;  %1996 = vmatprep.subr.bf16.mxu0 %v2110_v1 }
  0xaf   : > { %1991 = vmatmul.mubr.bf16.vlgmr.msra.gmra.mxu1 %v1216_v46  ;;  %1997 = vmatpush3.bf16.msra.mxu0 %v2093_v47 }
  0xb0   : > { %1998 = vmatprep.subr.bf16.mxu0 %v2110_v1 }
  0xb3   : > { %1999 = vmatpush3.bf16.msra.mxu0 %v2094_v48 }
  0xb4   : > { %2000 = vmatprep.subr.bf16.mxu0 %v2110_v1 }
  0xb7   : > { %2001 = vmatpush3.bf16.msra.mxu0 %v2095_v49 }
  0xb8   : > { %2002 = vmatprep.subr.bf16.mxu0 %v2110_v1 }
  0xbb   : > { %2003 = vmatpush3.bf16.msra.mxu0 %v2096_v51 }
  0xbc   : > { %2004 = vmatprep.subr.bf16.mxu0 %v2110_v1 }
  0xbf   : > { %2005 = vmatpush3.bf16.msra.mxu0 %v2097_v54 }
  0xc0   : > { %2006 = vmatprep.subr.bf16.mxu0 %v2110_v1 }
  0xc3   : > { %2007 = vmatpush3.bf16.msra.mxu0 %v2098_v0 }
  0xc4   : > { %2008 = vmatprep.subr.bf16.mxu0 %v2110_v1 }
  0xc7   : > { %2009 = vmatpush3.bf16.msra.mxu0 %v2099_v61 }
  0xca   : > { %2011 = vmatmul.mubr.bf16.vlgmr.msra.gmra.mxu0 %v1340_v62 }
 0x10a   : > { %v472_v63 = vpop.f32.mrf.mxu0 }
 0x10c   : > { %v1852_v2 = vpop.f32.mrf.mxu0 }
 0x10e   : > { %v475_v3 = vpop.f32.mrf.mxu0 }
 0x10f   : > { %v574_v4 = vpop.f32.mrf.mxu1 }
 0x110   : > { %v575_v5 = vadd.f32 %v574_v4, %v472_v63  ;;  %v1853_v6 = vpop.f32.mrf.mxu0 }
 0x111   : > { %v1872_v7 = vpop.f32.mrf.mxu1 }
 0x113   : > { %v577_v57 = vpop.f32.mrf.mxu1 }
 0x115   : > { %v1873_v8 = vpop.f32.mrf.mxu1 }
 0x12a   : > { %v711_v9 = vpop.f32.mrf.mxu0 }
 0x12b   : > { %v717_v58 = vadd.f32 %v711_v9, %v575_v5 }
 0x12c   : > { %v1892_v10 = vpop.f32.mrf.mxu0 }
 0x12e   : > { %v714_v11 = vpop.f32.mrf.mxu0 }
 0x12f   : > { %v839_v12 = vpop.f32.mrf.mxu1 }
 0x130   : > { %v845_v13 = vadd.f32 %v839_v12, %v717_v58  ;;  %v1893_v14 = vpop.f32.mrf.mxu0 }
 0x131   : > { %v1912_v1 = vpop.f32.mrf.mxu1 }
 0x133   : > { %v842_v15 = vpop.f32.mrf.mxu1 }
 0x135   : > { %v1913_v16 = vpop.f32.mrf.mxu1 }
 0x14a   : > { %v945_v17 = vpop.f32.mrf.mxu0 }
 0x14b   : > { %v951_v34 = vadd.f32 %v945_v17, %v845_v13 }
 0x14c   : > { %v1932_v18 = vpop.f32.mrf.mxu0 }
 0x14e   : > { %v948_v19 = vpop.f32.mrf.mxu0 }
 0x14f   : > { %v1067_v20 = vpop.f32.mrf.mxu1 }
 0x150   : > { %v1933_v21 = vpop.f32.mrf.mxu0  ;;  %v1073_v33 = vadd.f32 %v1067_v20, %v951_v34 }
 0x151   : > { %v1952_v22 = vpop.f32.mrf.mxu1 }
 0x153   : > { %v1070_v23 = vpop.f32.mrf.mxu1 }
 0x155   : > { %v1953_v24 = vpop.f32.mrf.mxu1 }
 0x16a   : > { %v1188_v25 = vpop.f32.mrf.mxu0 }
 0x16b   : > { %v1194_v35 = vadd.f32 %v1188_v25, %v1073_v33 }
 0x16c   : > { %v1972_v26 = vpop.f32.mrf.mxu0 }
 0x16e   : > { %v1191_v27 = vpop.f32.mrf.mxu0 }
 0x16f   : > { %v1300_v28 = vpop.f32.mrf.mxu1 }
 0x170   : > { %v1973_v29 = vpop.f32.mrf.mxu0  ;;  %v1306_v36 = vadd.f32 %v1300_v28, %v1194_v35 }
 0x171   : > { %v1992_v30 = vpop.f32.mrf.mxu1 }
 0x173   : > { %v1303_v31 = vpop.f32.mrf.mxu1 }
 0x175   : > { %v1993_v32 = vpop.f32.mrf.mxu1 }
 0x18a   : > { %v1424_v37 = vpop.f32.mrf.mxu0 }
 0x18b   : > { %v1430_v38 = vadd.f32 %v1424_v37, %v1306_v36 }
 0x18c   : > { %v2012_v39 = vpop.f32.mrf.mxu0 }
 0x18d   : > { %v1431_v40 = vpack.c.bf16 %v1430_v38, %v1430_v38  ;;  %v1434_v41 = vsel %vm1433_vm14, %v1430_v38, 0.0  ;;  %v1442_v42 = vmul.f32 %v1430_v38, %v1430_v38 }
 0x18e   : > { %v1435_v43 = vrot.slane %v1434_v41, 4  ;;  %v1427_v44 = vpop.f32.mrf.mxu0 }
 0x18f   : > { %1432 = vst [vmem:[%s253_s24] sm:$0x3] %v1431_v40  ;;  %v1443_v45 = vsel %vm1433_vm14, %v1442_v42, 0.0 }
 0x190   : > { %v1436_v46 = vadd.f32 %v1435_v43, %v1434_v41  ;;  %v1444_v47 = vrot.slane %v1443_v45, 4  ;;  %v2013_v48 = vpop.f32.mrf.mxu0 }
 0x192   : > { %v1437_v49 = vrot.slane %v1436_v46, 2  ;;  %v1445_v50 = vadd.f32 %v1444_v47, %v1443_v45 }
 0x194   : > { %v1438_v51 = vadd.f32 %v1437_v49, %v1436_v46  ;;  %v1446_v52 = vrot.slane %v1445_v50, 2 }
 0x196   : > { %v1439_v53 = vrot.slane %v1438_v51, 1  ;;  %v1447_v54 = vadd.f32 %v1446_v52, %v1445_v50 }
 0x198   : > { %v1440_v55 = vadd.f32 %v1439_v53, %v1438_v51  ;;  %v1448_v56 = vrot.slane %v1447_v54, 1 }
 0x19a   : > { %1441 = vst [vmem:[%s257_s27] sm:$0x1] %v1440_v55  ;;  %v1449_v0 = vadd.f32 %v1448_v56, %v1447_v54 }
 0x19c   : > { %1450 = vst [vmem:[%s257_s27 + $0x1] sm:$0x1] %v1449_v0 }
 0x19d PF: > { %s17_s21 = sadd.s32 1, %s2108_s21  }
 0x19e   : > { %p14_p4 = scmp.ge.s32.totalorder %s17_s21, 4  }
 0x1a0   :  { %16 = sbr.rel (!%p14_p4) target bundleno = 1 (0x1), region = 90 }

// kernel: _lambda_.28
= control target key start
LH: loop header
LB: loop body
LE: loop exit
PB: predicated region body
PF: predicated region fallthrough
CT: control target
= control target key end

     0   :  { %s2195_s21 = smov 0   ;;  %s2591_s0 = inlined_call_operand.vmem [shape: bf16[2,9,4,128], index: 0, kind: input, shape index: {}]   ;;  %s2592_s1 = inlined_call_operand.vmem [shape: bf16[9,128,128], index: 1, kind: input, shape index: {}]   ;;  %s2593_s2 = inlined_call_operand.vmem [shape: bf16[128,128], index: 2, kind: input, shape index: {}]   ;;  %s2594_s3 = inlined_call_operand.vmem [shape: bf16[2,4,128], index: 3, kind: output, shape index: {0}]   ;;  %s2595_s4 = inlined_call_operand.vmem [shape: f32[2,2,128], index: 4, kind: output, shape index: {1}]   ;;  %s2596_s5 = inlined_call_operand.vmem [shape: bf16[2,4,128], index: 5, kind: output, shape index: {2}]   ;;  %s2597_s6 = inlined_call_operand.vmem [shape: f32[2,2,128], index: 6, kind: output, shape index: {3}]  }
   0x1 LB: > { %s1540_s22 = sadd.s32 4294967295, %s2156_s21   ;;  %p1544_p0 = scmp.ge.s32.totalorder %s2156_s21, 1  ;;  %s2156_s21 = sphi %s2195_s21, %s17_s21  }
   0x2   : > { %p219_p1 = scmp.lt.s32.totalorder %s2156_s21, 3 }
   0x4   : > { %p220_p2 = pnand %p1544_p0, %p219_p1 }
   0x5   : > { %p260_p3 = scmp.lt.s32.totalorder (!%p220_p2), %s1540_s22, 1 }
   0x6   : > { %223 = sbr.rel (%p220_p2) target bundleno = 383 (0x17f), region = 32 }
   0xb   : > { %v2070_v0 = vld [vmem:[%s2592_s1 + $0x78] sm:$0xff]   ;;  %v2158_v1 = vmov 0.0   ;;  %v2072_v3 = vld [vmem:[%s2592_s1 + $0x70] sm:$0xff]   ;;  %vm2159_vm0 = vmmov 0   ;;  %v2074_v5 = vld [vmem:[%s2592_s1 + $0x68] sm:$0xff]   ;;  %s2599_s22 = smov (!%p260_p3, %s1540_s22), 1 }
   0xc   : > { %1859 = vmatprep.subr.bf16.mxu0 %v2158_v1  ;;  %1879 = vmatprep.subr.bf16.mxu1 %v2158_v1  ;;  %v2071_v2 = vld [vmem:[%s2592_s1 + $0x38] sm:$0xff]   ;;  %v2073_v4 = vld [vmem:[%s2592_s1 + $0x30] sm:$0xff]   ;;  %v2075_v6 = vld [vmem:[%s2592_s1 + $0x28] sm:$0xff]   ;;  %s2059_s25 = smul.u32 18, %s2599_s22  ;;  %vm1252_vm1 = vcmask 1043456  }
   0xd   : > { %1860 = vmatpush3.bf16.msra.mxu0 %v2070_v0  ;;  %1875 = vmatprep.mubr.msk.bf16.mxu0 %vm2159_vm0, %v2158_v1  ;;  %v2076_v7 = vld [vmem:[%s2592_s1 + $0x60] sm:$0xff]   ;;  %v2078_v9 = vld [vmem:[%s2592_s1 + $0x58] sm:$0xff]   ;;  %v2080_v11 = vld [vmem:[%s2592_s1 + $0x50] sm:$0xff]  }
   0xe   : > { %1880 = vmatpush3.bf16.msra.mxu1 %v2071_v2  ;;  %1861 = vmatprep.subr.bf16.mxu0 %v2158_v1  ;;  %v2077_v8 = vld [vmem:[%s2592_s1 + $0x20] sm:$0xff]   ;;  %v2079_v10 = vld [vmem:[%s2592_s1 + $0x18] sm:$0xff]   ;;  %v2081_v12 = vld [vmem:[%s2592_s1 + $0x10] sm:$0xff]   ;;  %s2273_s8 = scalar_lea.vmem %s2591_s0, %s2059_s25 }
   0xf   : > { %1881 = vmatprep.subr.bf16.mxu1 %v2158_v1  ;;  %1895 = vmatprep.mubr.msk.bf16.mxu1 %vm2159_vm0, %v2158_v1  ;;  %v2082_v13 = vld [vmem:[%s2592_s1 + $0x48] sm:$0xff]   ;;  %v2084_v15 = vld [vmem:[%s2592_s1 + $0x40] sm:$0xff]   ;;  %v2086_v19 = vld [vmem:[%s2592_s1 + $0xb8] sm:$0xff]  }
  0x10   : > { %v2083_v14 = vld [vmem:[%s2592_s1 + $0x8] sm:$0xff]   ;;  %v2085_v16 = vld [vmem:[%s2592_s1] sm:$0xff]   ;;  %v2087_v20 = vld [vmem:[%s2592_s1 + $0xf8] sm:$0xff]  }
  0x11   : > { %1862 = vmatpush3.bf16.msra.mxu0 %v2072_v3  ;;  %v1550_v17 = vld [vmem:[%s2273_s8 + $0x2] sm:$0x3]  ;;  %v282_v18 = vld [vmem:[%s2273_s8] sm:$0x3]  ;;  %v2088_v21 = vld [vmem:[%s2592_s1 + $0xb0] sm:$0xff]  }
  0x12   : > { %1882 = vmatpush3.bf16.msra.mxu1 %v2073_v4  ;;  %1863 = vmatprep.subr.bf16.mxu0 %v2158_v1  ;;  %v2089_v22 = vld [vmem:[%s2592_s1 + $0xf0] sm:$0xff]   ;;  %v2090_v23 = vld [vmem:[%s2592_s1 + $0xa8] sm:$0xff]   ;;  %v2092_v25 = vld [vmem:[%s2592_s1 + $0xa0] sm:$0xff]  }
  0x13   : > { %1883 = vmatprep.subr.bf16.mxu1 %v2158_v1  ;;  %v2091_v24 = vld [vmem:[%s2592_s1 + $0xe8] sm:$0xff]   ;;  %v2093_v26 = vld [vmem:[%s2592_s1 + $0xe0] sm:$0xff]   ;;  %v2094_v27 = vld [vmem:[%s2592_s1 + $0x98] sm:$0xff]  }
  0x14   : > { %v2095_v28 = vld [vmem:[%s2592_s1 + $0xd8] sm:$0xff]   ;;  %v2096_v29 = vld [vmem:[%s2592_s1 + $0x90] sm:$0xff]   ;;  %v2098_v31 = vld [vmem:[%s2592_s1 + $0x88] sm:$0xff]  }
  0x15   : > { %1864 = vmatpush3.bf16.msra.mxu0 %v2074_v5  ;;  %v2097_v30 = vld [vmem:[%s2592_s1 + $0xd0] sm:$0xff]   ;;  %v2099_v32 = vld [vmem:[%s2592_s1 + $0xc8] sm:$0xff]   ;;  %v2100_v33 = vld [vmem:[%s2592_s1 + $0x80] sm:$0xff]  }
  0x16   : > { %1884 = vmatpush3.bf16.msra.mxu1 %v2075_v6  ;;  %1865 = vmatprep.subr.bf16.mxu0 %v2158_v1  ;;  %v2101_v34 = vld [vmem:[%s2592_s1 + $0xc0] sm:$0xff]   ;;  %v2102_v37 = vld [vmem:[%s2592_s1 + $0x138] sm:$0xff]   ;;  %v2104_v39 = vld [vmem:[%s2592_s1 + $0x130] sm:$0xff]  }
  0x17   : > { %1885 = vmatprep.subr.bf16.mxu1 %v2158_v1  ;;  %v1583_v35 = vld [vmem:[%s2273_s8 + $0x4] sm:$0x3]  ;;  %v1608_v36 = vld [vmem:[%s2273_s8 + $0x6] sm:$0x3]  ;;  %v2103_v38 = vld [vmem:[%s2592_s1 + $0x178] sm:$0xff]  }
  0x18   : > { %v2105_v40 = vld [vmem:[%s2592_s1 + $0x170] sm:$0xff]   ;;  %v2106_v41 = vld [vmem:[%s2592_s1 + $0x128] sm:$0xff]   ;;  %v2108_v43 = vld [vmem:[%s2592_s1 + $0x120] sm:$0xff]  }
  0x19   : > { %1866 = vmatpush3.bf16.msra.mxu0 %v2076_v7  ;;  %v2107_v42 = vld [vmem:[%s2592_s1 + $0x168] sm:$0xff]   ;;  %v2109_v44 = vld [vmem:[%s2592_s1 + $0x160] sm:$0xff]   ;;  %v2110_v45 = vld [vmem:[%s2592_s1 + $0x118] sm:$0xff]  }
  0x1a   : > { %1886 = vmatpush3.bf16.msra.mxu1 %v2077_v8  ;;  %1867 = vmatprep.subr.bf16.mxu0 %v2158_v1  ;;  %v2111_v46 = vld [vmem:[%s2592_s1 + $0x158] sm:$0xff]   ;;  %v2112_v47 = vld [vmem:[%s2592_s1 + $0x110] sm:$0xff]   ;;  %v2114_v49 = vld [vmem:[%s2592_s1 + $0x108] sm:$0xff]  }
  0x1b   : > { %1887 = vmatprep.subr.bf16.mxu1 %v2158_v1  ;;  %v2113_v48 = vld [vmem:[%s2592_s1 + $0x150] sm:$0xff]   ;;  %v2115_v50 = vld [vmem:[%s2592_s1 + $0x148] sm:$0xff]   ;;  %v2116_v51 = vld [vmem:[%s2592_s1 + $0x100] sm:$0xff]  }
  0x1c   : > { %v2117_v52 = vld [vmem:[%s2592_s1 + $0x140] sm:$0xff]   ;;  %v1633_v53 = vld [vmem:[%s2273_s8 + $0x8] sm:$0x3]  ;;  %v2118_v54 = vld [vmem:[%s2592_s1 + $0x1b8] sm:$0xff]  }
  0x1d   : > { %1868 = vmatpush3.bf16.msra.mxu0 %v2078_v9  ;;  %v1658_v55 = vld [vmem:[%s2273_s8 + $0xa] sm:$0x3]  ;;  %v2119_v56 = vld [vmem:[%s2592_s1 + $0x1f8] sm:$0xff]   ;;  %v2120_v57 = vld [vmem:[%s2592_s1 + $0x1b0] sm:$0xff]  }
  0x1e   : > { %1888 = vmatpush3.bf16.msra.mxu1 %v2079_v10  ;;  %1869 = vmatprep.subr.bf16.mxu0 %v2158_v1  ;;  %v2121_v58 = vld [vmem:[%s2592_s1 + $0x1f0] sm:$0xff]   ;;  %v2122_v59 = vld [vmem:[%s2592_s1 + $0x1a8] sm:$0xff]   ;;  %v2124_v61 = vld [vmem:[%s2592_s1 + $0x1a0] sm:$0xff]  }
  0x1f   : > { %1889 = vmatprep.subr.bf16.mxu1 %v2158_v1  ;;  %v2123_v60 = vld [vmem:[%s2592_s1 + $0x1e8] sm:$0xff]   ;;  %v2125_v62 = vld [vmem:[%s2592_s1 + $0x1e0] sm:$0xff]   ;;  %v2126_v63 = vld [vmem:[%s2592_s1 + $0x198] sm:$0xff]  }
  0x20   : > { %v2127_v0 = vld [vmem:[%s2592_s1 + $0x1d8] sm:$0xff]   ;;  %v2128_v2 = vld [vmem:[%s2592_s1 + $0x190] sm:$0xff]   ;;  %v2130_v4 = vld [vmem:[%s2592_s1 + $0x188] sm:$0xff]  }
  0x21   : > { %1870 = vmatpush3.bf16.msra.mxu0 %v2080_v11  ;;  %v2129_v3 = vld [vmem:[%s2592_s1 + $0x1d0] sm:$0xff]   ;;  %v2131_v5 = vld [vmem:[%s2592_s1 + $0x1c8] sm:$0xff]   ;;  %v2132_v6 = vld [vmem:[%s2592_s1 + $0x180] sm:$0xff]  }
  0x22   : > { %1890 = vmatpush3.bf16.msra.mxu1 %v2081_v12  ;;  %1871 = vmatprep.subr.bf16.mxu0 %v2158_v1  ;;  %v2133_v7 = vld [vmem:[%s2592_s1 + $0x1c0] sm:$0xff]   ;;  %v1683_v8 = vld [vmem:[%s2273_s8 + $0xc] sm:$0x3]  ;;  %v2134_v9 = vld [vmem:[%s2592_s1 + $0x238] sm:$0xff]  }
  0x23   : > { %1891 = vmatprep.subr.bf16.mxu1 %v2158_v1  ;;  %v1708_v10 = vld [vmem:[%s2273_s8 + $0xe] sm:$0x3]  ;;  %v2135_v11 = vld [vmem:[%s2593_s2 + $0x38] sm:$0xff]   ;;  %v2136_v12 = vld [vmem:[%s2592_s1 + $0x230] sm:$0xff]  }
  0x25   : > { %1872 = vmatpush3.bf16.msra.mxu0 %v2082_v13  ;;  %v2137_v13 = vld [vmem:[%s2593_s2 + $0x30] sm:$0xff]  }
  0x26   : > { %1892 = vmatpush3.bf16.msra.mxu1 %v2083_v14  ;;  %1873 = vmatprep.subr.bf16.mxu0 %v2158_v1  ;;  %v2138_v14 = vld [vmem:[%s2592_s1 + $0x228] sm:$0xff]  }
  0x27   : > { %1893 = vmatprep.subr.bf16.mxu1 %v2158_v1 }
  0x29   : > { %1874 = vmatpush3.bf16.msra.mxu0 %v2084_v15  ;;  %v2139_v15 = vld [vmem:[%s2593_s2 + $0x28] sm:$0xff]  }
  0x2a   : > { %1894 = vmatpush3.bf16.msra.mxu1 %v2085_v16  ;;  %1899 = vmatprep.subr.bf16.mxu0 %v2158_v1  ;;  %v2140_v16 = vld [vmem:[%s2592_s1 + $0x220] sm:$0xff]  }
  0x2b   : > { %1919 = vmatprep.subr.bf16.mxu1 %v2158_v1 }
  0x2c   : > { %1876 = vmatmul.mubr.bf16.vlgmr.msra.gmra.mxu0 %v1550_v17  ;;  %v2141_v17 = vld [vmem:[%s2593_s2 + $0x20] sm:$0xff]  }
  0x2d   : > { %1896 = vmatmul.mubr.bf16.vlgmr.msra.gmra.mxu1 %v282_v18  ;;  %1900 = vmatpush3.bf16.msra.mxu0 %v2086_v19  ;;  %v2142_v18 = vld [vmem:[%s2592_s1 + $0x218] sm:$0xff]  }
  0x2e   : > { %1920 = vmatpush3.bf16.msra.mxu1 %v2087_v20  ;;  %1901 = vmatprep.subr.bf16.mxu0 %v2158_v1  ;;  %v2143_v19 = vld [vmem:[%s2593_s2 + $0x18] sm:$0xff]   ;;  %v2144_v20 = vld [vmem:[%s2592_s1 + $0x210] sm:$0xff]  }
  0x2f   : > { %1921 = vmatprep.subr.bf16.mxu1 %v2158_v1  ;;  %1915 = vmatprep.mubr.msk.bf16.mxu0 %vm2159_vm0, %v2158_v1 }
  0x30   : > { %1935 = vmatprep.mubr.msk.bf16.mxu1 %vm2159_vm0, %v2158_v1 }
  0x31   : > { %1902 = vmatpush3.bf16.msra.mxu0 %v2088_v21  ;;  %v2145_v21 = vld [vmem:[%s2593_s2 + $0x10] sm:$0xff]  }
  0x32   : > { %1922 = vmatpush3.bf16.msra.mxu1 %v2089_v22  ;;  %1903 = vmatprep.subr.bf16.mxu0 %v2158_v1  ;;  %v2146_v22 = vld [vmem:[%s2592_s1 + $0x208] sm:$0xff]  }
  0x33   : > { %1923 = vmatprep.subr.bf16.mxu1 %v2158_v1 }
  0x35   : > { %1904 = vmatpush3.bf16.msra.mxu0 %v2090_v23  ;;  %v2147_v23 = vld [vmem:[%s2593_s2 + $0x8] sm:$0xff]  }
  0x36   : > { %1924 = vmatpush3.bf16.msra.mxu1 %v2091_v24  ;;  %1905 = vmatprep.subr.bf16.mxu0 %v2158_v1  ;;  %v2148_v24 = vld [vmem:[%s2592_s1 + $0x200] sm:$0xff]  }
  0x37   : > { %1925 = vmatprep.subr.bf16.mxu1 %v2158_v1 }
  0x39   : > { %1906 = vmatpush3.bf16.msra.mxu0 %v2092_v25  ;;  %v2149_v25 = vld [vmem:[%s2593_s2] sm:$0xff]  }
  0x3a   : > { %1926 = vmatpush3.bf16.msra.mxu1 %v2093_v26  ;;  %1907 = vmatprep.subr.bf16.mxu0 %v2158_v1  ;;  %v1733_v26 = vld [vmem:[%s2273_s8 + $0x10] sm:$0x3] }
  0x3b   : > { %1927 = vmatprep.subr.bf16.mxu1 %v2158_v1 }
  0x3d   : > { %1908 = vmatpush3.bf16.msra.mxu0 %v2094_v27  ;;  %v1758_v27 = vld [vmem:[%s2273_s8 + $0x8] sm:$0x3]  ;;  %s2566_s8 = sshll.u32 %s2599_s22, 1 }
  0x3e   : > { %1928 = vmatpush3.bf16.msra.mxu1 %v2095_v28  ;;  %1909 = vmatprep.subr.bf16.mxu0 %v2158_v1  ;;  %s276_s17 = scalar_lea.vmem %s2596_s5, %s2566_s8  ;;  %s268_s20 = scalar_lea.vmem %s2594_s3, %s2566_s8 }
  0x3f   : > { %1929 = vmatprep.subr.bf16.mxu1 %v2158_v1  ;;  %s280_s24 = scalar_lea.vmem %s2597_s6, %s2566_s8  ;;  %s272_s27 = scalar_lea.vmem %s2595_s4, %s2566_s8 }
  0x41   : > { %1910 = vmatpush3.bf16.msra.mxu0 %v2096_v29 }
  0x42   : > { %1930 = vmatpush3.bf16.msra.mxu1 %v2097_v30  ;;  %1911 = vmatprep.subr.bf16.mxu0 %v2158_v1 }
  0x43   : > { %1931 = vmatprep.subr.bf16.mxu1 %v2158_v1 }
  0x45   : > { %1912 = vmatpush3.bf16.msra.mxu0 %v2098_v31 }
  0x46   : > { %1932 = vmatpush3.bf16.msra.mxu1 %v2099_v32  ;;  %1913 = vmatprep.subr.bf16.mxu0 %v2158_v1 }
  0x47   : > { %1933 = vmatprep.subr.bf16.mxu1 %v2158_v1 }
  0x49   : > { %1914 = vmatpush3.bf16.msra.mxu0 %v2100_v33 }
  0x4a   : > { %1934 = vmatpush3.bf16.msra.mxu1 %v2101_v34  ;;  %1939 = vmatprep.subr.bf16.mxu0 %v2158_v1 }
  0x4b   : > { %1959 = vmatprep.subr.bf16.mxu1 %v2158_v1 }
  0x4c   : > { %1916 = vmatmul.mubr.bf16.vlgmr.msra.gmra.mxu0 %v1583_v35 }
  0x4d   : > { %1936 = vmatmul.mubr.bf16.vlgmr.msra.gmra.mxu1 %v1608_v36  ;;  %1940 = vmatpush3.bf16.msra.mxu0 %v2102_v37 }
  0x4e   : > { %1960 = vmatpush3.bf16.msra.mxu1 %v2103_v38  ;;  %1941 = vmatprep.subr.bf16.mxu0 %v2158_v1 }
  0x4f   : > { %1961 = vmatprep.subr.bf16.mxu1 %v2158_v1  ;;  %1955 = vmatprep.mubr.msk.bf16.mxu0 %vm2159_vm0, %v2158_v1 }
  0x50   : > { %1975 = vmatprep.mubr.msk.bf16.mxu1 %vm2159_vm0, %v2158_v1 }
  0x51   : > { %1942 = vmatpush3.bf16.msra.mxu0 %v2104_v39 }
  0x52   : > { %1962 = vmatpush3.bf16.msra.mxu1 %v2105_v40  ;;  %1943 = vmatprep.subr.bf16.mxu0 %v2158_v1 }
  0x53   : > { %1963 = vmatprep.subr.bf16.mxu1 %v2158_v1 }
  0x55   : > { %1944 = vmatpush3.bf16.msra.mxu0 %v2106_v41 }
  0x56   : > { %1964 = vmatpush3.bf16.msra.mxu1 %v2107_v42  ;;  %1945 = vmatprep.subr.bf16.mxu0 %v2158_v1 }
  0x57   : > { %1965 = vmatprep.subr.bf16.mxu1 %v2158_v1 }
  0x59   : > { %1946 = vmatpush3.bf16.msra.mxu0 %v2108_v43 }
  0x5a   : > { %1966 = vmatpush3.bf16.msra.mxu1 %v2109_v44  ;;  %1947 = vmatprep.subr.bf16.mxu0 %v2158_v1 }
  0x5b   : > { %1967 = vmatprep.subr.bf16.mxu1 %v2158_v1 }
  0x5d   : > { %1948 = vmatpush3.bf16.msra.mxu0 %v2110_v45 }
  0x5e   : > { %1968 = vmatpush3.bf16.msra.mxu1 %v2111_v46  ;;  %1949 = vmatprep.subr.bf16.mxu0 %v2158_v1 }
  0x5f   : > { %1969 = vmatprep.subr.bf16.mxu1 %v2158_v1 }
  0x61   : > { %1950 = vmatpush3.bf16.msra.mxu0 %v2112_v47 }
  0x62   : > { %1970 = vmatpush3.bf16.msra.mxu1 %v2113_v48  ;;  %1951 = vmatprep.subr.bf16.mxu0 %v2158_v1 }
  0x63   : > { %1971 = vmatprep.subr.bf16.mxu1 %v2158_v1 }
  0x65   : > { %1952 = vmatpush3.bf16.msra.mxu0 %v2114_v49 }
  0x66   : > { %1972 = vmatpush3.bf16.msra.mxu1 %v2115_v50  ;;  %1953 = vmatprep.subr.bf16.mxu0 %v2158_v1 }
  0x67   : > { %1973 = vmatprep.subr.bf16.mxu1 %v2158_v1 }
  0x69   : > { %1954 = vmatpush3.bf16.msra.mxu0 %v2116_v51 }
  0x6a   : > { %1974 = vmatpush3.bf16.msra.mxu1 %v2117_v52  ;;  %1979 = vmatprep.subr.bf16.mxu0 %v2158_v1 }
  0x6b   : > { %1999 = vmatprep.subr.bf16.mxu1 %v2158_v1 }
  0x6c   : > { %1956 = vmatmul.mubr.bf16.vlgmr.msra.gmra.mxu0 %v1633_v53 }
  0x6d   : > { %1976 = vmatmul.mubr.bf16.vlgmr.msra.gmra.mxu1 %v1658_v55  ;;  %1980 = vmatpush3.bf16.msra.mxu0 %v2118_v54 }
  0x6e   : > { %2000 = vmatpush3.bf16.msra.mxu1 %v2119_v56  ;;  %1981 = vmatprep.subr.bf16.mxu0 %v2158_v1 }
  0x6f   : > { %2001 = vmatprep.subr.bf16.mxu1 %v2158_v1  ;;  %1995 = vmatprep.mubr.msk.bf16.mxu0 %vm2159_vm0, %v2158_v1 }
  0x70   : > { %2015 = vmatprep.mubr.msk.bf16.mxu1 %vm2159_vm0, %v2158_v1 }
  0x71   : > { %1982 = vmatpush3.bf16.msra.mxu0 %v2120_v57 }
  0x72   : > { %2002 = vmatpush3.bf16.msra.mxu1 %v2121_v58  ;;  %1983 = vmatprep.subr.bf16.mxu0 %v2158_v1 }
  0x73   : > { %2003 = vmatprep.subr.bf16.mxu1 %v2158_v1 }
  0x75   : > { %1984 = vmatpush3.bf16.msra.mxu0 %v2122_v59 }
  0x76   : > { %2004 = vmatpush3.bf16.msra.mxu1 %v2123_v60  ;;  %1985 = vmatprep.subr.bf16.mxu0 %v2158_v1 }
  0x77   : > { %2005 = vmatprep.subr.bf16.mxu1 %v2158_v1 }
  0x79   : > { %1986 = vmatpush3.bf16.msra.mxu0 %v2124_v61 }
  0x7a   : > { %2006 = vmatpush3.bf16.msra.mxu1 %v2125_v62  ;;  %1987 = vmatprep.subr.bf16.mxu0 %v2158_v1 }
  0x7b   : > { %2007 = vmatprep.subr.bf16.mxu1 %v2158_v1 }
  0x7d   : > { %1988 = vmatpush3.bf16.msra.mxu0 %v2126_v63 }
  0x7e   : > { %2008 = vmatpush3.bf16.msra.mxu1 %v2127_v0  ;;  %1989 = vmatprep.subr.bf16.mxu0 %v2158_v1 }
  0x7f   : > { %2009 = vmatprep.subr.bf16.mxu1 %v2158_v1 }
  0x81   : > { %1990 = vmatpush3.bf16.msra.mxu0 %v2128_v2 }
  0x82   : > { %2010 = vmatpush3.bf16.msra.mxu1 %v2129_v3  ;;  %1991 = vmatprep.subr.bf16.mxu0 %v2158_v1 }
  0x83   : > { %2011 = vmatprep.subr.bf16.mxu1 %v2158_v1 }
  0x85   : > { %1992 = vmatpush3.bf16.msra.mxu0 %v2130_v4 }
  0x86   : > { %2012 = vmatpush3.bf16.msra.mxu1 %v2131_v5  ;;  %1993 = vmatprep.subr.bf16.mxu0 %v2158_v1 }
  0x87   : > { %2013 = vmatprep.subr.bf16.mxu1 %v2158_v1 }
  0x89   : > { %1994 = vmatpush3.bf16.msra.mxu0 %v2132_v6 }
  0x8a   : > { %2014 = vmatpush3.bf16.msra.mxu1 %v2133_v7  ;;  %2019 = vmatprep.subr.bf16.mxu0 %v2158_v1 }
  0x8b   : > { %2039 = vmatprep.subr.bf16.mxu1 %v2158_v1 }
  0x8c   : > { %1996 = vmatmul.mubr.bf16.vlgmr.msra.gmra.mxu0 %v1683_v8 }
  0x8d   : > { %2016 = vmatmul.mubr.bf16.vlgmr.msra.gmra.mxu1 %v1708_v10  ;;  %2020 = vmatpush3.bf16.msra.mxu0 %v2134_v9 }
  0x8e   : > { %2040 = vmatpush3.bf16.msra.mxu1 %v2135_v11  ;;  %2021 = vmatprep.subr.bf16.mxu0 %v2158_v1 }
  0x8f   : > { %2041 = vmatprep.subr.bf16.mxu1 %v2158_v1  ;;  %2035 = vmatprep.mubr.msk.bf16.mxu0 %vm2159_vm0, %v2158_v1 }
  0x90   : > { %2055 = vmatprep.mubr.msk.bf16.mxu1 %vm2159_vm0, %v2158_v1 }
  0x91   : > { %2022 = vmatpush3.bf16.msra.mxu0 %v2136_v12 }
  0x92   : > { %2042 = vmatpush3.bf16.msra.mxu1 %v2137_v13  ;;  %2023 = vmatprep.subr.bf16.mxu0 %v2158_v1 }
  0x93   : > { %2043 = vmatprep.subr.bf16.mxu1 %v2158_v1 }
  0x95   : > { %2024 = vmatpush3.bf16.msra.mxu0 %v2138_v14 }
  0x96   : > { %2044 = vmatpush3.bf16.msra.mxu1 %v2139_v15  ;;  %2025 = vmatprep.subr.bf16.mxu0 %v2158_v1 }
  0x97   : > { %2045 = vmatprep.subr.bf16.mxu1 %v2158_v1 }
  0x99   : > { %2026 = vmatpush3.bf16.msra.mxu0 %v2140_v16 }
  0x9a   : > { %2046 = vmatpush3.bf16.msra.mxu1 %v2141_v17  ;;  %2027 = vmatprep.subr.bf16.mxu0 %v2158_v1 }
  0x9b   : > { %2047 = vmatprep.subr.bf16.mxu1 %v2158_v1 }
  0x9d   : > { %2028 = vmatpush3.bf16.msra.mxu0 %v2142_v18 }
  0x9e   : > { %2048 = vmatpush3.bf16.msra.mxu1 %v2143_v19  ;;  %2029 = vmatprep.subr.bf16.mxu0 %v2158_v1 }
  0x9f   : > { %2049 = vmatprep.subr.bf16.mxu1 %v2158_v1 }
  0xa1   : > { %2030 = vmatpush3.bf16.msra.mxu0 %v2144_v20 }
  0xa2   : > { %2050 = vmatpush3.bf16.msra.mxu1 %v2145_v21  ;;  %2031 = vmatprep.subr.bf16.mxu0 %v2158_v1 }
  0xa3   : > { %2051 = vmatprep.subr.bf16.mxu1 %v2158_v1 }
  0xa5   : > { %2032 = vmatpush3.bf16.msra.mxu0 %v2146_v22 }
  0xa6   : > { %2052 = vmatpush3.bf16.msra.mxu1 %v2147_v23  ;;  %2033 = vmatprep.subr.bf16.mxu0 %v2158_v1 }
  0xa7   : > { %2053 = vmatprep.subr.bf16.mxu1 %v2158_v1 }
  0xa9   : > { %2034 = vmatpush3.bf16.msra.mxu0 %v2148_v24 }
  0xaa   : > { %2054 = vmatpush3.bf16.msra.mxu1 %v2149_v25 }
  0xac   : > { %2036 = vmatmul.mubr.bf16.vlgmr.msra.gmra.mxu0 %v1733_v26 }
  0xad   : > { %2056 = vmatmul.mubr.bf16.vlgmr.msra.gmra.mxu1 %v1758_v27 }
  0xec   : > { %v400_v28 = vpop.f32.mrf.mxu0 }
  0xed   : > { %v488_v29 = vpop.f32.mrf.mxu1 }
  0xee   : > { %v489_v30 = vadd.f32 %v488_v29, %v400_v28  ;;  %v1877_v31 = vpop.f32.mrf.mxu0 }
  0xef   : > { %v1897_v32 = vpop.f32.mrf.mxu1 }
  0xf0   : > { %v403_v33 = vpop.f32.mrf.mxu0 }
  0xf1   : > { %v491_v34 = vpop.f32.mrf.mxu1 }
  0xf2   : > { %v1878_v35 = vpop.f32.mrf.mxu0 }
  0xf3   : > { %v1898_v36 = vpop.f32.mrf.mxu1 }
 0x10c   : > { %v595_v37 = vpop.f32.mrf.mxu0 }
 0x10d   : > { %v601_v38 = vadd.f32 %v595_v37, %v489_v30  ;;  %v703_v39 = vpop.f32.mrf.mxu1 }
 0x10e   : > { %v1917_v40 = vpop.f32.mrf.mxu0 }
 0x10f   : > { %v709_v1 = vadd.f32 %v703_v39, %v601_v38  ;;  %v1937_v41 = vpop.f32.mrf.mxu1 }
 0x110   : > { %v598_v42 = vpop.f32.mrf.mxu0 }
 0x111   : > { %v706_v43 = vpop.f32.mrf.mxu1 }
 0x112   : > { %v1918_v44 = vpop.f32.mrf.mxu0 }
 0x113   : > { %v1938_v45 = vpop.f32.mrf.mxu1 }
 0x12c   : > { %v811_v46 = vpop.f32.mrf.mxu0 }
 0x12d   : > { %v919_v47 = vpop.f32.mrf.mxu1  ;;  %v817_v62 = vadd.f32 %v811_v46, %v709_v1 }
 0x12e   : > { %v1957_v48 = vpop.f32.mrf.mxu0 }
 0x12f   : > { %v1977_v49 = vpop.f32.mrf.mxu1  ;;  %v925_v63 = vadd.f32 %v919_v47, %v817_v62 }
 0x130   : > { %v814_v50 = vpop.f32.mrf.mxu0 }
 0x131   : > { %v922_v51 = vpop.f32.mrf.mxu1 }
 0x132   : > { %v1958_v52 = vpop.f32.mrf.mxu0 }
 0x133   : > { %v1978_v53 = vpop.f32.mrf.mxu1 }
 0x14c   : > { %v1027_v54 = vpop.f32.mrf.mxu0 }
 0x14d   : > { %v1135_v55 = vpop.f32.mrf.mxu1  ;;  %v1033_v0 = vadd.f32 %v1027_v54, %v925_v63 }
 0x14e   : > { %v1997_v56 = vpop.f32.mrf.mxu0 }
 0x14f   : > { %v2017_v57 = vpop.f32.mrf.mxu1  ;;  %v1141_v2 = vadd.f32 %v1135_v55, %v1033_v0 }
 0x150   : > { %v1030_v58 = vpop.f32.mrf.mxu0 }
 0x151   : > { %v1138_v59 = vpop.f32.mrf.mxu1 }
 0x152   : > { %v1998_v60 = vpop.f32.mrf.mxu0 }
 0x153   : > { %v2018_v61 = vpop.f32.mrf.mxu1 }
 0x16c   : > { %v1243_v3 = vpop.f32.mrf.mxu0 }
 0x16d   : > { %v1249_v4 = vadd.f32 %v1243_v3, %v1141_v2  ;;  %v1369_v5 = vpop.f32.mrf.mxu1 }
 0x16e   : > { %v1375_v6 = vpack.c.bf16 %v1369_v5, %v1369_v5  ;;  %v1377_v7 = vsel %vm1252_vm1, %v1369_v5, 0.0  ;;  %v1385_v8 = vmul.f32 %v1369_v5, %v1369_v5  ;;  %v2037_v9 = vpop.f32.mrf.mxu0 }
 0x16f   : > { %v1250_v10 = vpack.c.bf16 %v1249_v4, %v1249_v4  ;;  %v1253_v11 = vsel %vm1252_vm1, %v1249_v4, 0.0  ;;  %v1261_v12 = vmul.f32 %v1249_v4, %v1249_v4  ;;  %v1378_v13 = vrot.slane %v1377_v7, 4  ;;  %v2057_v14 = vpop.f32.mrf.mxu1 }
 0x170   : > { %v1254_v15 = vrot.slane %v1253_v11, 4  ;;  %1376 = vst [vmem:[%s276_s17] sm:$0x3] %v1375_v6  ;;  %v1386_v16 = vsel %vm1252_vm1, %v1385_v8, 0.0  ;;  %v1246_v17 = vpop.f32.mrf.mxu0 }
 0x171   : > { %1251 = vst [vmem:[%s268_s20] sm:$0x3] %v1250_v10  ;;  %v1262_v18 = vsel %vm1252_vm1, %v1261_v12, 0.0  ;;  %v1379_v19 = vadd.f32 %v1378_v13, %v1377_v7  ;;  %v1387_v20 = vrot.slane %v1386_v16, 4  ;;  %v1372_v21 = vpop.f32.mrf.mxu1 }
 0x172   : > { %v1255_v22 = vadd.f32 %v1254_v15, %v1253_v11  ;;  %v1263_v23 = vrot.slane %v1262_v18, 4  ;;  %v2038_v24 = vpop.f32.mrf.mxu0 }
 0x173   : > { %v1380_v25 = vrot.slane %v1379_v19, 2  ;;  %v1388_v26 = vadd.f32 %v1387_v20, %v1386_v16  ;;  %v2058_v27 = vpop.f32.mrf.mxu1 }
 0x174   : > { %v1256_v28 = vrot.slane %v1255_v22, 2  ;;  %v1264_v29 = vadd.f32 %v1263_v23, %v1262_v18 }
 0x175   : > { %v1381_v30 = vadd.f32 %v1380_v25, %v1379_v19  ;;  %v1389_v31 = vrot.slane %v1388_v26, 2 }
 0x176   : > { %v1257_v32 = vadd.f32 %v1256_v28, %v1255_v22  ;;  %v1265_v33 = vrot.slane %v1264_v29, 2 }
 0x177   : > { %v1382_v34 = vrot.slane %v1381_v30, 1  ;;  %v1390_v35 = vadd.f32 %v1389_v31, %v1388_v26 }
 0x178   : > { %v1258_v36 = vrot.slane %v1257_v32, 1  ;;  %v1266_v37 = vadd.f32 %v1265_v33, %v1264_v29 }
 0x179   : > { %v1383_v38 = vadd.f32 %v1382_v34, %v1381_v30  ;;  %v1391_v39 = vrot.slane %v1390_v35, 1 }
 0x17a   : > { %v1259_v40 = vadd.f32 %v1258_v36, %v1257_v32  ;;  %v1267_v1 = vrot.slane %v1266_v37, 1 }
 0x17b   : > { %1384 = vst [vmem:[%s280_s24] sm:$0x1] %v1383_v38  ;;  %v1392_v41 = vadd.f32 %v1391_v39, %v1390_v35 }
 0x17c   : > { %1260 = vst [vmem:[%s272_s27] sm:$0x1] %v1259_v40  ;;  %v1268_v42 = vadd.f32 %v1267_v1, %v1266_v37 }
 0x17d   : > { %1393 = vst [vmem:[%s280_s24 + $0x1] sm:$0x1] %v1392_v41 }
 0x17e   : > { %1269 = vst [vmem:[%s272_s27 + $0x1] sm:$0x1] %v1268_v42 }
 0x17f PF: > { %s17_s21 = sadd.s32 1, %s2156_s21  }
 0x180   : > { %p14_p4 = scmp.ge.s32.totalorder %s17_s21, 4  }
 0x182   :  { %16 = sbr.rel (!%p14_p4) target bundleno = 1 (0x1), region = 114 }

// kernel: _lambda_.35
= control target key start
LH: loop header
LB: loop body
LE: loop exit
PB: predicated region body
PF: predicated region fallthrough
CT: control target
= control target key end

     0   :  { %s620_s21 = smov 0   ;;  %s690_s0 = inlined_call_operand.vmem [shape: f32[2,128], index: 0, kind: input, shape index: {}]   ;;  %s691_s1 = inlined_call_operand.vmem [shape: f32[1,128], index: 1, kind: input, shape index: {}]   ;;  %s692_s2 = inlined_call_operand.vmem [shape: f32[1,128], index: 2, kind: input, shape index: {}]   ;;  %s693_s3 = inlined_call_operand.vmem [shape: bf16[2,1,128], index: 3, kind: input, shape index: {}]   ;;  %s694_s4 = inlined_call_operand.vmem [shape: bf16[9,128,128], index: 4, kind: input, shape index: {}]   ;;  %s695_s5 = inlined_call_operand.vmem [shape: bf16[2,1,128], index: 5, kind: output, shape index: {0}]   ;;  %s696_s6 = inlined_call_operand.vmem [shape: f32[2,2,128], index: 6, kind: output, shape index: {1}]  }
   0x1 LB: > { %s490_s22 = sadd.s32 4294967295, %s579_s21   ;;  %p494_p0 = scmp.ge.s32.totalorder %s579_s21, 1  ;;  %s579_s21 = sphi %s620_s21, %s17_s21  }
   0x2   : > { %p213_p1 = scmp.lt.s32.totalorder %s579_s21, 3 }
   0x4   : > { %p214_p2 = pnand %p494_p0, %p213_p1 }
   0x5   : > { %p243_p3 = scmp.lt.s32.totalorder (!%p214_p2), %s490_s22, 1 }
   0x6   : > { %217 = sbr.rel (%p214_p2) target bundleno = 265 (0x109), region = 40 }
   0xb   : > { %v563_v0 = vld [vmem:[%s694_s4 + $0x138] sm:$0xff]   ;;  %v581_v1 = vmov 0.0   ;;  %v564_v2 = vld [vmem:[%s694_s4 + $0x130] sm:$0xff]   ;;  %vm582_vm0 = vmmov 0   ;;  %v583_v3 = vmov 0   ;;  %v565_v4 = vld [vmem:[%s694_s4 + $0x128] sm:$0xff]   ;;  %v273_v18 = vlaneseq }
   0xc   : > { %531 = vmatprep.subr.bf16.mxu0 %v581_v1  ;;  %547 = vmatprep.mubr.msk.bf16.mxu0 %vm582_vm0, %v581_v1  ;;  %255 = vst [vmem:[#allocation2 + $0x4] sm:$0xf] %v583_v3  ;;  %v257_v5 = vld [vmem:[%s690_s0] sm:$0x3]  ;;  %v567_v10 = vld [vmem:[%s694_s4 + $0x118] sm:$0xff]   ;;  %v568_v13 = vld [vmem:[%s694_s4 + $0x110] sm:$0xff]  }
   0xd   : > { %532 = vmatpush3.bf16.msra.mxu0 %v563_v0  ;;  %v260_v6 = vmul.f32 0.5, %v257_v5  ;;  %v566_v7 = vld [vmem:[%s694_s4 + $0x120] sm:$0xff]   ;;  %v569_v15 = vld [vmem:[%s694_s4 + $0x108] sm:$0xff]   ;;  %v584_v16 = vmov 1966171168   ;;  %v274_v21 = vshrl.u32 %v273_v18, 7 }
   0xe   : > { %533 = vmatprep.subr.bf16.mxu0 %v581_v1  ;;  %v271_v17 = vunpack.c.l.s4 %v584_v16  ;;  %v570_v19 = vld [vmem:[%s694_s4 + $0x100] sm:$0xff]   ;;  %s700_s22 = smov (!%p243_p3, %s490_s22), 1  ;;  %vm294_vm1 = vcmask 1040384   ;;  %vm295_vm2 = vsmask.f32 256 }
   0xf   : > { %v261_v8 = vmul.f32 %v260_v6, %v260_v6  ;;  %s245_s19 = scalar_lea.vmem %s693_s3, %s700_s22  ;;  %v258_v27 = vld [vmem:[%s691_s1] sm:$0x1]  ;;  %vm671_vm3 = vmand %vm294_vm1, %vm295_vm2  ;;  %s495_s26 = sshll.u32 %s700_s22, 1 }
  0x10   : > { %v272_v20 = vunpack.c.0.s8 %v271_v17  ;;  %v256_v25 = vld [vmem:[%s245_s19] sm:$0x1]  ;;  %s248_s29 = scalar_lea.vmem %s695_s5, %s700_s22  ;;  %s252_s8 = scalar_lea.vmem %s696_s6, %s495_s26 }
  0x11   : > { %534 = vmatpush3.bf16.msra.mxu0 %v564_v2  ;;  %v263_v9 = vrot.slane %v261_v8, 7  ;;  %v289_v29 = vunpack.c.l.bf16 %v256_v25  ;;  %v259_v31 = vld [vmem:[%s692_s2] sm:$0x1] }
  0x12   : > { %535 = vmatprep.subr.bf16.mxu0 %v581_v1  ;;  %v275_v22 = vsub.s32 %v272_v20, %v274_v21  ;;  %v407_v43 = vld [vmem:[%s248_s29] sm:$0x1] }
  0x13   : > { %v265_v11 = vsub.f32 %v260_v6, %v263_v9  ;;  %v297_v38 = vld [vmem:[#allocation2 + $0x4] sm:$0x1] }
  0x15   : > { %536 = vmatpush3.bf16.msra.mxu0 %v565_v4  ;;  %v266_v12 = vmax.f32 %v265_v11, 0.0 }
  0x16   : > { %537 = vmatprep.subr.bf16.mxu0 %v581_v1 }
  0x17   : > { %v267_v14 = vadd.f32 1e-05, %v266_v12 }
  0x19   : > { %538 = vmatpush3.bf16.msra.mxu0 %v566_v7  ;;  %571 = vrsqrt.f32 %v267_v14 }
  0x1a   : > { %539 = vmatprep.subr.bf16.mxu0 %v581_v1 }
  0x1d   : > { %540 = vmatpush3.bf16.msra.mxu0 %v567_v10 }
  0x1e   : > { %541 = vmatprep.subr.bf16.mxu0 %v581_v1 }
  0x21   : > { %542 = vmatpush3.bf16.msra.mxu0 %v568_v13 }
  0x22   : > { %543 = vmatprep.subr.bf16.mxu0 %v581_v1 }
  0x25   : > { %544 = vmatpush3.bf16.msra.mxu0 %v569_v15 }
  0x26   : > { %545 = vmatprep.subr.bf16.mxu0 %v581_v1  ;;  %v572_v23 = vpop.eup %571 }
  0x27   : > { %v276_v24 = vrot.slane %v572_v23, %v275_v22 }
  0x29   : > { %546 = vmatpush3.bf16.msra.mxu0 %v570_v19  ;;  %v277_v26 = vcombine.high %v276_v24, %v276_v24 }
  0x2b   : > { %v284_v28 = vrot.slane %v277_v26, %v275_v22 }
  0x2d   : > { %v286_v30 = vmul.f32 %v284_v28, %v258_v27 }
  0x2f   : > { %v287_v32 = vmul.f32 %v286_v30, %v260_v6  ;;  %v290_v33 = vmul.f32 %v289_v29, %v286_v30 }
  0x31   : > { %v288_v34 = vsub.f32 %v259_v31, %v287_v32 }
  0x33   : > { %v291_v35 = vadd.f32 %v290_v33, %v288_v34 }
  0x35   : > { %v292_v36 = vmax.f32 %v291_v35, 0.0 }
  0x37   : > { %v293_v39 = vpack.c.bf16 %v292_v36, %v292_v36 }
  0x39   : > { %v298_v40 = vsel %vm671_vm3, %v293_v39, %v297_v38 }
  0x3a   : > { %299 = vst [vmem:[#allocation2 + $0x4] sm:$0x1] %v298_v40 }
  0x41   : > { %v300_v41 = vld [vmem:[#allocation2 + $0x4] sm:$0x1] }
  0x42   : > { %548 = vmatmul.mubr.bf16.vlgmr.msra.gmra.mxu0 %v300_v41 }
 0x102   : > { %v400_v42 = vpop.f32.mrf.mxu0 }
 0x103   : > { %v406_v44 = vpack.c.bf16 %v400_v42, %v400_v42  ;;  %411 = vst [vmem:[%s252_s8] sm:$0x1] %v400_v42  ;;  %v412_v45 = vmul.f32 %v400_v42, %v400_v42 }
 0x104   : > { %v549_v46 = vpop.f32.mrf.mxu0 }
 0x105   : > { %v408_v47 = vsel %vm671_vm3, %v406_v44, %v407_v43  ;;  %414 = vst [vmem:[%s252_s8 + $0x1] sm:$0x1] %v412_v45 }
 0x106   : > { %409 = vst [vmem:[%s248_s29] sm:$0x1] %v408_v47  ;;  %v403_v48 = vpop.f32.mrf.mxu0 }
 0x108   : > { %v550_v49 = vpop.f32.mrf.mxu0 }
 0x109 PF: > { %s17_s21 = sadd.s32 1, %s579_s21  }
 0x10a   : > { %p14_p4 = scmp.ge.s32.totalorder %s17_s21, 4  }
 0x10c   :  { %16 = sbr.rel (!%p14_p4) target bundleno = 1 (0x1), region = 83 }

// kernel: _lambda_.36
= control target key start
LH: loop header
LB: loop body
LE: loop exit
PB: predicated region body
PF: predicated region fallthrough
CT: control target
= control target key end

     0   :  { %s518_s27 = smov 0   ;;  %s561_s0 = inlined_call_operand.vmem [shape: bf16[2,1,128], index: 0, kind: input, shape index: {}]   ;;  %s562_s1 = inlined_call_operand.vmem [shape: f32[2,128], index: 1, kind: input, shape index: {}]   ;;  %s563_s2 = inlined_call_operand.vmem [shape: f32[1,128], index: 2, kind: input, shape index: {}, may-alias: {2,6}]   ;;  %s564_s3 = inlined_call_operand.vmem [shape: f32[1,128], index: 3, kind: input, shape index: {}, may-alias: {3,7}]   ;;  %s565_s4 = inlined_call_operand.vmem [shape: bf16[2,1,128], index: 4, kind: input, shape index: {}]   ;;  %s566_s5 = inlined_call_operand.vmem [shape: f32[2,128], index: 5, kind: input, shape index: {}]   ;;  %s567_s6 = inlined_call_operand.vmem [shape: f32[1,128], index: 6, kind: input, shape index: {}, may-alias: {2,6}]   ;;  %s568_s7 = inlined_call_operand.vmem [shape: f32[1,128], index: 7, kind: input, shape index: {}, may-alias: {3,7}]   ;;  %s569_s8 = inlined_call_operand.vmem [shape: bf16[2,1,128], index: 8, kind: output, shape index: {}]  }
   0x1 LB: > { %s444_s28 = sadd.s32 4294967295, %s470_s27   ;;  %p448_p0 = scmp.ge.s32.totalorder %s470_s27, 1  ;;  %s470_s27 = sphi %s518_s27, %s18_s27  }
   0x2   : > { %p268_p1 = scmp.lt.s32.totalorder %s470_s27, 3 }
   0x4   : > { %p269_p2 = pnand %p448_p0, %p268_p1 }
   0x5   : > { %p301_p3 = scmp.lt.s32.totalorder (!%p269_p2), %s444_s28, 1 }
   0x6   : > { %272 = sbr.rel (%p269_p2) target bundleno = 61 (0x3d), region = 52 }
   0xb   : > { %v312_v0 = vld [vmem:[%s562_s1] sm:$0x3]  ;;  %v472_v14 = vmov 1966171168   ;;  %v328_v16 = vlaneseq  ;;  %s571_s28 = smov (!%p301_p3, %s444_s28), 1  ;;  %vm385_vm0 = vcmask 1040384  }
   0xc   : > { %v315_v1 = vmul.f32 0.5, %v312_v0  ;;  %v348_v2 = vld [vmem:[%s566_s5] sm:$0x3]  ;;  %v326_v15 = vunpack.c.l.s4 %v472_v14  ;;  %s303_s13 = scalar_lea.vmem %s561_s0, %s571_s28  ;;  %s306_s16 = scalar_lea.vmem %s565_s4, %s571_s28  ;;  %vm386_vm1 = vsmask.f32 256 }
   0xd   : > { %v351_v4 = vmul.f32 0.5, %v348_v2  ;;  %v329_v18 = vshrl.u32 %v328_v16, 7  ;;  %v310_v23 = vld [vmem:[%s303_s13] sm:$0x1]  ;;  %s309_s29 = scalar_lea.vmem %s569_s8, %s571_s28  ;;  %vm387_vm2 = vmand %vm385_vm0, %vm386_vm1 }
   0xe   : > { %v316_v3 = vmul.f32 %v315_v1, %v315_v1  ;;  %v327_v17 = vunpack.c.0.s8 %v326_v15  ;;  %v313_v26 = vld [vmem:[%s563_s2] sm:$0x1]  ;;  %v311_v28 = vunpack.c.l.bf16 %v310_v23 }
   0xf   : > { %v352_v6 = vmul.f32 %v351_v4, %v351_v4  ;;  %v346_v27 = vld [vmem:[%s306_s16] sm:$0x1] }
  0x10   : > { %v318_v5 = vrot.slane %v316_v3, 7  ;;  %v330_v19 = vsub.s32 %v327_v17, %v329_v18  ;;  %v349_v31 = vld [vmem:[%s567_s6] sm:$0x1]  ;;  %v347_v33 = vunpack.c.l.bf16 %v346_v27 }
  0x11   : > { %v354_v8 = vrot.slane %v352_v6, 7  ;;  %v314_v35 = vld [vmem:[%s564_s3] sm:$0x1] }
  0x12   : > { %v320_v7 = vsub.f32 %v315_v1, %v318_v5  ;;  %v350_v39 = vld [vmem:[%s568_s7] sm:$0x1] }
  0x13   : > { %v356_v10 = vsub.f32 %v351_v4, %v354_v8  ;;  %v388_v48 = vld [vmem:[%s309_s29] sm:$0x1] }
  0x14   : > { %v321_v9 = vmax.f32 %v320_v7, 0.0 }
  0x15   : > { %v357_v12 = vmax.f32 %v356_v10, 0.0 }
  0x16   : > { %v322_v11 = vadd.f32 1e-05, %v321_v9 }
  0x17   : > { %v358_v13 = vadd.f32 1e-05, %v357_v12 }
  0x18   : > { %460 = vrsqrt.f32 %v322_v11 }
  0x19   : > { %462 = vrsqrt.f32 %v358_v13 }
  0x25   : > { %v461_v20 = vpop.eup %460 }
  0x26   : > { %v331_v21 = vrot.slane %v461_v20, %v330_v19  ;;  %v463_v22 = vpop.eup %462 }
  0x27   : > { %v367_v25 = vrot.slane %v463_v22, %v330_v19 }
  0x28   : > { %v332_v24 = vcombine.high %v331_v21, %v331_v21 }
  0x29   : > { %v368_v30 = vcombine.high %v367_v25, %v367_v25 }
  0x2a   : > { %v339_v29 = vrot.slane %v332_v24, %v330_v19 }
  0x2b   : > { %v375_v34 = vrot.slane %v368_v30, %v330_v19 }
  0x2c   : > { %v341_v32 = vmul.f32 %v339_v29, %v313_v26 }
  0x2d   : > { %v377_v38 = vmul.f32 %v375_v34, %v349_v31 }
  0x2e   : > { %v342_v36 = vmul.f32 %v341_v32, %v315_v1  ;;  %v344_v37 = vmul.f32 %v341_v32, %v311_v28 }
  0x2f   : > { %v378_v41 = vmul.f32 %v377_v38, %v351_v4  ;;  %v380_v42 = vmul.f32 %v377_v38, %v347_v33 }
  0x30   : > { %v343_v40 = vsub.f32 %v314_v35, %v342_v36 }
  0x31   : > { %v379_v44 = vsub.f32 %v350_v39, %v378_v41 }
  0x32   : > { %v345_v43 = vadd.f32 %v344_v37, %v343_v40 }
  0x33   : > { %v381_v45 = vadd.f32 %v380_v42, %v379_v44 }
  0x35   : > { %v382_v46 = vadd.f32 %v381_v45, %v345_v43 }
  0x37   : > { %v383_v47 = vmax.f32 %v382_v46, 0.0 }
  0x39   : > { %v384_v49 = vpack.c.bf16 %v383_v47, %v383_v47 }
  0x3b   : > { %v389_v50 = vsel %vm387_vm2, %v384_v49, %v388_v48 }
  0x3c   : > { %390 = vst [vmem:[%s309_s29] sm:$0x1] %v389_v50 }
  0x3d PF: > { %s18_s27 = sadd.s32 1, %s470_s27  }
  0x3e   : > { %p15_p4 = scmp.ge.s32.totalorder %s18_s27, 4  }
  0x40   :  { %17 = sbr.rel (!%p15_p4) target bundleno = 1 (0x1), region = 85 }

// kernel: _lambda_.31
= control target key start
LH: loop header
LB: loop body
LE: loop exit
PB: predicated region body
PF: predicated region fallthrough
CT: control target
= control target key end

     0   :  { %s2349_s21 = smov 0   ;;  %s2787_s0 = inlined_call_operand.vmem [shape: bf16[2,4,128], index: 0, kind: input, shape index: {}]   ;;  %s2788_s1 = inlined_call_operand.vmem [shape: bf16[9,128,128], index: 1, kind: input, shape index: {}]   ;;  %s2789_s2 = inlined_call_operand.vmem [shape: bf16[128,128], index: 2, kind: input, shape index: {}]   ;;  %s2790_s3 = inlined_call_operand.vmem [shape: bf16[2,4,128], index: 3, kind: output, shape index: {0}]   ;;  %s2791_s4 = inlined_call_operand.vmem [shape: f32[2,2,128], index: 4, kind: output, shape index: {1}]   ;;  %s2792_s5 = inlined_call_operand.vmem [shape: bf16[2,4,128], index: 5, kind: output, shape index: {2}]   ;;  %s2793_s6 = inlined_call_operand.vmem [shape: f32[2,2,128], index: 6, kind: output, shape index: {3}]  }
   0x1 LB: > { %s1692_s22 = sadd.s32 4294967295, %s2309_s21   ;;  %p1696_p0 = scmp.ge.s32.totalorder %s2309_s21, 1  ;;  %s2309_s21 = sphi %s2349_s21, %s17_s21  }
   0x2   : > { %p218_p1 = scmp.lt.s32.totalorder %s2309_s21, 3 }
   0x4   : > { %p219_p2 = pnand %p1696_p0, %p218_p1 }
   0x5   : > { %p258_p3 = scmp.lt.s32.totalorder (!%p219_p2), %s1692_s22, 1 }
   0x6   : > { %222 = sbr.rel (%p219_p2) target bundleno = 383 (0x17f), region = 32 }
   0xb   : > { %v2221_v0 = vld [vmem:[%s2788_s1 + $0x78] sm:$0xff]   ;;  %v2311_v1 = vmov 0.0   ;;  %v285_v3 = vlaneseq  ;;  %v2223_v4 = vld [vmem:[%s2788_s1 + $0x70] sm:$0xff]   ;;  %vm2312_vm0 = vmmov 0   ;;  %v2313_v6 = vmov 0   ;;  %v2225_v8 = vld [vmem:[%s2788_s1 + $0x68] sm:$0xff]  }
   0xc   : > { %2010 = vmatprep.subr.bf16.mxu0 %v2311_v1  ;;  %2030 = vmatprep.subr.bf16.mxu1 %v2311_v1  ;;  %v2222_v2 = vld [vmem:[%s2788_s1 + $0x38] sm:$0xff]   ;;  %v2224_v5 = vld [vmem:[%s2788_s1 + $0x30] sm:$0xff]   ;;  %281 = vst [vmem:[#allocation2] sm:$0xf] %v2313_v6  ;;  %282 = vst [vmem:[#allocation2 + $0x4] sm:$0xf] %v2313_v6 }
   0xd   : > { %2011 = vmatpush3.bf16.msra.mxu0 %v2221_v0  ;;  %2026 = vmatprep.mubr.msk.bf16.mxu0 %vm2312_vm0, %v2311_v1  ;;  %v286_v7 = vshrl.u32 %v285_v3, 7  ;;  %s2803_s22 = smov (!%p258_p3, %s1692_s22), 1  ;;  %v2226_v9 = vld [vmem:[%s2788_s1 + $0x28] sm:$0xff]   ;;  %v2227_v11 = vld [vmem:[%s2788_s1 + $0x60] sm:$0xff]   ;;  %v2229_v13 = vld [vmem:[%s2788_s1 + $0x58] sm:$0xff]   ;;  %vm1404_vm14 = vcmask 1043456  }
   0xe   : > { %2031 = vmatpush3.bf16.msra.mxu1 %v2222_v2  ;;  %2012 = vmatprep.subr.bf16.mxu0 %v2311_v1  ;;  %s2388_s13 = sshll.u32 %s2803_s22, 1  ;;  %v2228_v12 = vld [vmem:[%s2788_s1 + $0x20] sm:$0xff]   ;;  %v2230_v14 = vld [vmem:[%s2788_s1 + $0x18] sm:$0xff]   ;;  %v2231_v18 = vld [vmem:[%s2788_s1 + $0x50] sm:$0xff]  }
   0xf   : > { %2032 = vmatprep.subr.bf16.mxu1 %v2311_v1  ;;  %2046 = vmatprep.mubr.msk.bf16.mxu1 %vm2312_vm0, %v2311_v1  ;;  %v291_v10 = vand.u32 1, %v286_v7  ;;  %s261_s18 = scalar_lea.vmem %s2787_s0, %s2388_s13  ;;  %v2232_v21 = vld [vmem:[%s2788_s1 + $0x10] sm:$0xff]   ;;  %v2233_v27 = vld [vmem:[%s2788_s1 + $0x48] sm:$0xff]   ;;  %v2235_v37 = vld [vmem:[%s2788_s1 + $0x40] sm:$0xff]   ;;  %s273_s10 = scalar_lea.vmem %s2792_s5, %s2388_s13 }
  0x10   : > { %v283_v16 = vld [vmem:[%s261_s18] sm:$0x3]  ;;  %v2234_v30 = vld [vmem:[%s2788_s1 + $0x8] sm:$0xff]   ;;  %v2238_v43 = vld [vmem:[%s2788_s1 + $0xb8] sm:$0xff]   ;;  %s265_s14 = scalar_lea.vmem %s2790_s3, %s2388_s13  ;;  %s277_s17 = scalar_lea.vmem %s2793_s6, %s2388_s13 }
  0x11   : > { %2013 = vmatpush3.bf16.msra.mxu0 %v2223_v4  ;;  %vm299_vm1 = vcmp.ne.s32.totalorder %v291_v10, 0  ;;  %vm2406_vm2 = vcmp.ne.s32.totalorder %v291_v10, 1  ;;  %284 = vst [vmem:[#allocation2 + $0x4] sm:$0x3] %v283_v16  ;;  %v2236_v39 = vld [vmem:[%s2788_s1] sm:$0xff]   ;;  %v2239_v48 = vld [vmem:[%s2788_s1 + $0xf8] sm:$0xff]   ;;  %s269_s20 = scalar_lea.vmem %s2791_s4, %s2388_s13 }
  0x12   : > { %2033 = vmatpush3.bf16.msra.mxu1 %v2224_v5  ;;  %2014 = vmatprep.subr.bf16.mxu0 %v2311_v1  ;;  %vm305_vm3 = vmpackc.low %vm299_vm1, %vm299_vm1  ;;  %v2240_v53 = vld [vmem:[%s2788_s1 + $0xb0] sm:$0xff]   ;;  %v2242_v57 = vld [vmem:[%s2788_s1 + $0xa8] sm:$0xff]  }
  0x13   : > { %2034 = vmatprep.subr.bf16.mxu1 %v2311_v1  ;;  %v306_v17 = vsel %vm305_vm3, 65537, %v2313_v6  ;;  %vm554_vm4 = vmpackc.low %vm2406_vm2, %vm2406_vm2  ;;  %v301_v22 = vld [vmem:[#allocation2] sm:$0xc]  ;;  %v2241_v54 = vld [vmem:[%s2788_s1 + $0xf0] sm:$0xff]  }
  0x14   : > { %v2414_v19 = vshrl.u32 %v306_v17, 16  ;;  %v2416_v20 = vshll.u32 %v306_v17, 16  ;;  %v2428_v25 = vld [vmem:[#allocation2] sm:$0x8]  ;;  %v555_v26 = vsel %vm554_vm4, 65537, %v2313_v6  ;;  %v2244_v2 = vld [vmem:[%s2788_s1 + $0xa0] sm:$0xff]  }
  0x15   : > { %2015 = vmatpush3.bf16.msra.mxu0 %v2225_v8  ;;  %v2438_v32 = vshll.u32 %v555_v26, 16  ;;  %v2441_v36 = vshrl.u32 %v555_v26, 16  ;;  %v2243_v59 = vld [vmem:[%s2788_s1 + $0xe8] sm:$0xff]   ;;  %v2245_v6 = vld [vmem:[%s2788_s1 + $0xe0] sm:$0xff]   ;;  %v2248_v16 = vld [vmem:[%s2788_s1 + $0x90] sm:$0xff]  }
  0x16   : > { %2035 = vmatpush3.bf16.msra.mxu1 %v2226_v9  ;;  %2016 = vmatprep.subr.bf16.mxu0 %v2311_v1  ;;  %v310_v23 = vrot.slane %v2414_v19, 5  ;;  %v313_v24 = vrot.slane %v2416_v20, 6  ;;  %v689_v49 = vrot.slane %v2416_v20, 5  ;;  %v690_v50 = vrot.slane %v2414_v19, 4  ;;  %v2249_v17 = vld [vmem:[%s2788_s1 + $0xd0] sm:$0xff]   ;;  %v2252_v26 = vld [vmem:[%s2788_s1 + $0x80] sm:$0xff]  }
  0x17   : > { %2036 = vmatprep.subr.bf16.mxu1 %v2311_v1  ;;  %v559_v40 = vrot.slane %v2438_v32, 5  ;;  %v562_v45 = vrot.slane %v2441_v36, 4  ;;  %v1045_v62 = vrot.slane %v2414_v19, 7  ;;  %v1279_v0 = vrot.slane %v2441_v36, 6  ;;  %v2250_v19 = vld [vmem:[%s2788_s1 + $0x88] sm:$0xff]   ;;  %v2271_v58 = vld [vmem:[%s2788_s1 + $0x1f8] sm:$0xff]  }
  0x18   : > { %v314_v28 = vor.u32 %v313_v24, %v310_v23  ;;  %v315_v29 = vrot.slane %v310_v23, 4  ;;  %v302_v31 = vld [vmem:[#allocation2 + $0x4] sm:$0x1]  ;;  %v691_v55 = vor.u32 %v690_v50, %v689_v49  ;;  %v1280_v4 = vrot.slane %v2438_v32, 7  ;;  %v2276_v63 = vld [vmem:[%s2788_s1 + $0x1a0] sm:$0xff]   ;;  %v2279_v5 = vld [vmem:[%s2788_s1 + $0x1d8] sm:$0xff]  }
  0x19   : > { %2017 = vmatpush3.bf16.msra.mxu0 %v2227_v11  ;;  %v1718_v35 = vcombine.low %v2428_v25, %v302_v31  ;;  %v563_v52 = vor.u32 %v562_v45, %v559_v40  ;;  %vm2478_vm7 = vcmp.ne.s16.totalorder %v559_v40, 0  ;;  %v2486_v60 = vld [vmem:[#allocation2 + $0x4] sm:$0x3]  ;;  %v2499_v3 = vor.u32 %v1045_v62, %v2416_v20  ;;  %v2246_v11 = vld [vmem:[%s2788_s1 + $0x98] sm:$0xff]  }
  0x1a   : > { %2037 = vmatpush3.bf16.msra.mxu1 %v2228_v12  ;;  %2018 = vmatprep.subr.bf16.mxu0 %v2311_v1  ;;  %vm316_vm5 = vcmp.ne.s16.totalorder %v314_v28, 0  ;;  %vm317_vm6 = vcmp.ne.s16.totalorder %v315_v29, 0  ;;  %v692_v61 = vrot.slane %v691_v55, 4  ;;  %vm2502_vm9 = vcmp.ne.s16.totalorder %v689_v49, 0  ;;  %v2251_v23 = vld [vmem:[%s2788_s1 + $0xc8] sm:$0xff]   ;;  %v2269_v55 = vld [vmem:[%s2788_s1 + $0x140] sm:$0xff]  }
  0x1b   : > { %2038 = vmatprep.subr.bf16.mxu1 %v2311_v1  ;;  %v318_v33 = vsel %vm316_vm5, %v301_v22, 0  ;;  %v319_v34 = vsel %vm317_vm6, %v302_v31, 0  ;;  %v359_v44 = vrot.slane %v1718_v35, 3  ;;  %v564_v56 = vrot.slane %v563_v52, 4  ;;  %v2256_v35 = vld [vmem:[%s2788_s1 + $0x130] sm:$0xff]   ;;  %v2266_v49 = vld [vmem:[%s2788_s1 + $0x108] sm:$0xff]  }
  0x1c   : > { %v1727_v38 = vcombine.low %v318_v33, %v319_v34  ;;  %vm694_vm10 = vcmp.ne.s16.totalorder %v692_v61, 0  ;;  %v2511_v7 = vor.u32 %v1280_v4, %v1279_v0  ;;  %v567_v8 = vsel %vm2478_vm7, %v2428_v25, 0  ;;  %v2254_v33 = vld [vmem:[%s2788_s1 + $0x138] sm:$0xff]   ;;  %v2268_v52 = vld [vmem:[%s2788_s1 + $0x100] sm:$0xff]   ;;  %v2273_v61 = vld [vmem:[%s2788_s1 + $0x1f0] sm:$0xff]  }
  0x1d   : > { %2019 = vmatpush3.bf16.msra.mxu0 %v2229_v13  ;;  %vm2490_vm8 = vcmp.ne.s16.totalorder %v564_v56, 0  ;;  %v695_v10 = vsel %vm2502_vm9, %v2428_v25, 0  ;;  %v696_v12 = vsel %vm694_vm10, %v2486_v60, 0  ;;  %v2247_v13 = vld [vmem:[%s2788_s1 + $0xd8] sm:$0xff]   ;;  %v2275_v62 = vld [vmem:[%s2788_s1 + $0x1e8] sm:$0xff]   ;;  %v2277_v0 = vld [vmem:[%s2788_s1 + $0x1e0] sm:$0xff]  }
  0x1e   : > { %2039 = vmatpush3.bf16.msra.mxu1 %v2230_v14  ;;  %2020 = vmatprep.subr.bf16.mxu0 %v2311_v1  ;;  %v455_v41 = vshrl.u32 %v1727_v38, 16  ;;  %v458_v42 = vshll.u32 %v1727_v38, 16  ;;  %v568_v9 = vsel %vm2490_vm8, %v2486_v60, 0  ;;  %v1777_v15 = vcombine.low %v695_v10, %v696_v12  ;;  %v2255_v34 = vld [vmem:[%s2788_s1 + $0x178] sm:$0xff]   ;;  %v2282_v10 = vld [vmem:[%s2788_s1 + $0x188] sm:$0xff]  }
  0x1f   : > { %2040 = vmatprep.subr.bf16.mxu1 %v2311_v1  ;;  %v1752_v14 = vcombine.low %v567_v8, %v568_v9  ;;  %v924_v38 = vrot.slane %v2441_v36, 7  ;;  %v2259_v36 = vld [vmem:[%s2788_s1 + $0x168] sm:$0xff]   ;;  %vm1047_vm12 = vcmp.ne.s16.totalorder %v2499_v3, 0  ;;  %v2280_v3 = vld [vmem:[%s2788_s1 + $0x190] sm:$0xff]   ;;  %vm1282_vm13 = vcmp.ne.s16.totalorder %v2511_v7, 0 }
  0x20   : > { %v457_v46 = vrot.slane %v455_v41, 2  ;;  %v460_v47 = vrot.slane %v458_v42, 3  ;;  %v723_v22 = vshll.u32 %v1777_v15, 16  ;;  %v2260_v41 = vld [vmem:[%s2788_s1 + $0x120] sm:$0xff]   ;;  %v2281_v8 = vld [vmem:[%s2788_s1 + $0x1d0] sm:$0xff]  }
  0x21   : > { %2021 = vmatpush3.bf16.msra.mxu0 %v2231_v18  ;;  %v592_v18 = vshrl.u32 %v1752_v14, 16  ;;  %v595_v20 = vshll.u32 %v1752_v14, 16  ;;  %v925_v40 = vor.u32 %v924_v38, %v2438_v32  ;;  %v2261_v42 = vld [vmem:[%s2788_s1 + $0x160] sm:$0xff]   ;;  %v2262_v32 = vld [vmem:[%s2788_s1 + $0x118] sm:$0xff]   ;;  %v2297_v7 = vld [vmem:[%s2788_s1 + $0x210] sm:$0xff]  }
  0x22   : > { %2041 = vmatpush3.bf16.msra.mxu1 %v2232_v21  ;;  %2022 = vmatprep.subr.bf16.mxu0 %v2311_v1  ;;  %v461_v51 = vor.u32 %v460_v47, %v457_v46  ;;  %v720_v21 = vshrl.u32 %v1777_v15, 16  ;;  %v725_v29 = vrot.slane %v723_v22, 4  ;;  %v2264_v46 = vld [vmem:[%s2788_s1 + $0x110] sm:$0xff]   ;;  %v2284_v14 = vld [vmem:[%s2788_s1 + $0x180] sm:$0xff]   ;;  %v2300_v38 = vld [vmem:[%s2789_s2 + $0x8] sm:$0xff]  }
  0x23   : > { %2042 = vmatprep.subr.bf16.mxu1 %v2311_v1  ;;  %v594_v24 = vrot.slane %v592_v18, 3  ;;  %v597_v25 = vrot.slane %v595_v20, 4  ;;  %vm926_vm11 = vcmp.ne.s16.totalorder %v925_v40, 0  ;;  %v2286_v15 = vld [vmem:[#allocation2 + $0x4] ss:$0 sps:$4 sm:$0x66]  }
  0x24   : > { %v722_v28 = vrot.slane %v720_v21, 3  ;;  %v1187_v18 = vrot.slane %v2286_v15, 1  ;;  %v2288_v20 = vld [vmem:[%s2789_s2 + $0x38] sm:$0xff]   ;;  %v2289_v21 = vld [vmem:[%s2788_s1 + $0x230] sm:$0xff]   ;;  %v2301_v40 = vld [vmem:[%s2788_s1 + $0x200] sm:$0xff]  }
  0x25   : > { %2023 = vmatpush3.bf16.msra.mxu0 %v2233_v27  ;;  %v2253_v27 = vld [vmem:[%s2788_s1 + $0xc0] sm:$0xff]   ;;  %v2290_v22 = vld [vmem:[%s2789_s2 + $0x30] sm:$0xff]  }
  0x26   : > { %2043 = vmatpush3.bf16.msra.mxu1 %v2234_v30  ;;  %2024 = vmatprep.subr.bf16.mxu0 %v2311_v1  ;;  %v598_v30 = vor.u32 %v597_v25, %v594_v24  ;;  %v726_v31 = vor.u32 %v725_v29, %v722_v28  ;;  %v2292_v24 = vld [vmem:[%s2789_s2 + $0x28] sm:$0xff]   ;;  %v2293_v25 = vld [vmem:[%s2788_s1 + $0x220] sm:$0xff]   ;;  %v2295_v28 = vld [vmem:[%s2788_s1 + $0x218] sm:$0xff]  }
  0x27   : > { %2044 = vmatprep.subr.bf16.mxu1 %v2311_v1 }
  0x29   : > { %2025 = vmatpush3.bf16.msra.mxu0 %v2235_v37  ;;  %v2257_v37 = vld [vmem:[%s2788_s1 + $0x170] sm:$0xff]  }
  0x2a   : > { %2045 = vmatpush3.bf16.msra.mxu1 %v2236_v39  ;;  %2050 = vmatprep.subr.bf16.mxu0 %v2311_v1  ;;  %v2258_v39 = vld [vmem:[%s2788_s1 + $0x128] sm:$0xff]  }
  0x2b   : > { %2070 = vmatprep.subr.bf16.mxu1 %v2311_v1 }
  0x2c   : > { %2027 = vmatmul.mubr.bf16.vlgmr.msra.gmra.mxu0 %v359_v44  ;;  %v2263_v44 = vld [vmem:[%s2788_s1 + $0x158] sm:$0xff]  }
  0x2d   : > { %2047 = vmatmul.mubr.bf16.vlgmr.msra.gmra.mxu1 %v461_v51  ;;  %2051 = vmatpush3.bf16.msra.mxu0 %v2238_v43  ;;  %v923_v43 = vld [vmem:[#allocation2 + $0x4] sm:$0x7] }
  0x2e   : > { %2071 = vmatpush3.bf16.msra.mxu1 %v2239_v48  ;;  %2052 = vmatprep.subr.bf16.mxu0 %v2311_v1  ;;  %v927_v45 = vsel %vm926_vm11, %v923_v43, 0  ;;  %v2265_v48 = vld [vmem:[%s2788_s1 + $0x150] sm:$0xff]   ;;  %v2267_v51 = vld [vmem:[%s2788_s1 + $0x148] sm:$0xff]   ;;  %v1048_v4 = vsel %vm1047_vm12, %v923_v43, 0 }
  0x2f   : > { %2072 = vmatprep.subr.bf16.mxu1 %v2311_v1  ;;  %2066 = vmatprep.mubr.msk.bf16.mxu0 %vm2312_vm0, %v2311_v1  ;;  %v1826_v47 = vcombine.low %v927_v45, %v927_v45  ;;  %v1422_v43 = vld [vmem:[#allocation2 + $0x4] sm:$0x3] }
  0x30   : > { %2086 = vmatprep.mubr.msk.bf16.mxu1 %vm2312_vm0, %v2311_v1 }
  0x31   : > { %2053 = vmatpush3.bf16.msra.mxu0 %v2240_v53  ;;  %v951_v50 = vshll.u32 %v1826_v47, 16  ;;  %v949_v53 = vshrl.u32 %v1826_v47, 16 }
  0x32   : > { %2073 = vmatpush3.bf16.msra.mxu1 %v2241_v54  ;;  %2054 = vmatprep.subr.bf16.mxu0 %v2311_v1 }
  0x33   : > { %2074 = vmatprep.subr.bf16.mxu1 %v2311_v1  ;;  %v953_v54 = vrot.slane %v951_v50, 1 }
  0x35   : > { %2055 = vmatpush3.bf16.msra.mxu0 %v2242_v57  ;;  %v954_v56 = vor.u32 %v953_v54, %v949_v53  ;;  %v2270_v57 = vld [vmem:[%s2788_s1 + $0x1b8] sm:$0xff]  }
  0x36   : > { %2075 = vmatpush3.bf16.msra.mxu1 %v2243_v59  ;;  %2056 = vmatprep.subr.bf16.mxu0 %v2311_v1  ;;  %v2272_v59 = vld [vmem:[%s2788_s1 + $0x1b0] sm:$0xff]  }
  0x37   : > { %2076 = vmatprep.subr.bf16.mxu1 %v2311_v1 }
  0x39   : > { %2057 = vmatpush3.bf16.msra.mxu0 %v2244_v2  ;;  %v2278_v2 = vld [vmem:[%s2788_s1 + $0x198] sm:$0xff]  }
  0x3a   : > { %2077 = vmatpush3.bf16.msra.mxu1 %v2245_v6  ;;  %2058 = vmatprep.subr.bf16.mxu0 %v2311_v1  ;;  %v1851_v6 = vcombine.low %v1048_v4, %v1048_v4 }
  0x3b   : > { %2078 = vmatprep.subr.bf16.mxu1 %v2311_v1 }
  0x3c   : > { %v1072_v9 = vshll.u32 %v1851_v6, 16  ;;  %v1070_v12 = vshrl.u32 %v1851_v6, 16 }
  0x3d   : > { %2059 = vmatpush3.bf16.msra.mxu0 %v2246_v11  ;;  %v2283_v11 = vld [vmem:[%s2788_s1 + $0x1c8] sm:$0xff]  }
  0x3e   : > { %2079 = vmatpush3.bf16.msra.mxu1 %v2247_v13  ;;  %2060 = vmatprep.subr.bf16.mxu0 %v2311_v1  ;;  %v1074_v13 = vrot.slane %v1072_v9, 1 }
  0x3f   : > { %2080 = vmatprep.subr.bf16.mxu1 %v2311_v1 }
  0x41   : > { %2061 = vmatpush3.bf16.msra.mxu0 %v2248_v16  ;;  %v2285_v16 = vld [vmem:[%s2788_s1 + $0x1c0] sm:$0xff]  }
  0x42   : > { %2081 = vmatpush3.bf16.msra.mxu1 %v2249_v17  ;;  %2062 = vmatprep.subr.bf16.mxu0 %v2311_v1  ;;  %v1075_v17 = vor.u32 %v1074_v13, %v1070_v12 }
  0x43   : > { %2082 = vmatprep.subr.bf16.mxu1 %v2311_v1 }
  0x45   : > { %2063 = vmatpush3.bf16.msra.mxu0 %v2250_v19  ;;  %v2287_v19 = vld [vmem:[%s2788_s1 + $0x238] sm:$0xff]  }
  0x46   : > { %2083 = vmatpush3.bf16.msra.mxu1 %v2251_v23  ;;  %2064 = vmatprep.subr.bf16.mxu0 %v2311_v1  ;;  %v2291_v23 = vld [vmem:[%s2788_s1 + $0x228] sm:$0xff]  }
  0x47   : > { %2084 = vmatprep.subr.bf16.mxu1 %v2311_v1 }
  0x49   : > { %2065 = vmatpush3.bf16.msra.mxu0 %v2252_v26  ;;  %v2294_v26 = vld [vmem:[%s2789_s2 + $0x20] sm:$0xff]  }
  0x4a   : > { %2085 = vmatpush3.bf16.msra.mxu1 %v2253_v27  ;;  %2090 = vmatprep.subr.bf16.mxu0 %v2311_v1  ;;  %v1278_v27 = vld [vmem:[#allocation2 + $0x4] sm:$0xe] }
  0x4b   : > { %2110 = vmatprep.subr.bf16.mxu1 %v2311_v1  ;;  %v1283_v29 = vsel %vm1282_vm13, %v1278_v27, 0 }
  0x4c   : > { %2067 = vmatmul.mubr.bf16.vlgmr.msra.gmra.mxu0 %v598_v30  ;;  %v2296_v30 = vld [vmem:[%s2789_s2 + $0x18] sm:$0xff]  }
  0x4d   : > { %2087 = vmatmul.mubr.bf16.vlgmr.msra.gmra.mxu1 %v726_v31  ;;  %2091 = vmatpush3.bf16.msra.mxu0 %v2254_v33  ;;  %v1901_v31 = vcombine.low %v1283_v29, %v1283_v29  ;;  %v2298_v33 = vld [vmem:[%s2789_s2 + $0x10] sm:$0xff]  }
  0x4e   : > { %2111 = vmatpush3.bf16.msra.mxu1 %v2255_v34  ;;  %2092 = vmatprep.subr.bf16.mxu0 %v2311_v1 }
  0x4f   : > { %2112 = vmatprep.subr.bf16.mxu1 %v2311_v1  ;;  %2106 = vmatprep.mubr.msk.bf16.mxu0 %vm2312_vm0, %v2311_v1  ;;  %v1305_v34 = vshrl.u32 %v1901_v31, 16 }
  0x50   : > { %2126 = vmatprep.mubr.msk.bf16.mxu1 %vm2312_vm0, %v2311_v1 }
  0x51   : > { %2093 = vmatpush3.bf16.msra.mxu0 %v2256_v35  ;;  %v1308_v35 = vshll.u32 %v1901_v31, 16 }
  0x52   : > { %2113 = vmatpush3.bf16.msra.mxu1 %v2257_v37  ;;  %2094 = vmatprep.subr.bf16.mxu0 %v2311_v1  ;;  %v2299_v37 = vld [vmem:[%s2788_s1 + $0x208] sm:$0xff]  }
  0x53   : > { %2114 = vmatprep.subr.bf16.mxu1 %v2311_v1 }
  0x55   : > { %2095 = vmatpush3.bf16.msra.mxu0 %v2258_v39  ;;  %v1307_v39 = vrot.slane %v1305_v34, 1 }
  0x56   : > { %2115 = vmatpush3.bf16.msra.mxu1 %v2259_v36  ;;  %2096 = vmatprep.subr.bf16.mxu0 %v2311_v1  ;;  %v1310_v36 = vrot.slane %v1308_v35, 2 }
  0x57   : > { %2116 = vmatprep.subr.bf16.mxu1 %v2311_v1 }
  0x59   : > { %2097 = vmatpush3.bf16.msra.mxu0 %v2260_v41  ;;  %v2302_v41 = vld [vmem:[%s2789_s2] sm:$0xff]  }
  0x5a   : > { %2117 = vmatpush3.bf16.msra.mxu1 %v2261_v42  ;;  %2098 = vmatprep.subr.bf16.mxu0 %v2311_v1  ;;  %v1311_v42 = vor.u32 %v1310_v36, %v1307_v39 }
  0x5b   : > { %2118 = vmatprep.subr.bf16.mxu1 %v2311_v1 }
  0x5d   : > { %2099 = vmatpush3.bf16.msra.mxu0 %v2262_v32 }
  0x5e   : > { %2119 = vmatpush3.bf16.msra.mxu1 %v2263_v44  ;;  %2100 = vmatprep.subr.bf16.mxu0 %v2311_v1 }
  0x5f   : > { %2120 = vmatprep.subr.bf16.mxu1 %v2311_v1 }
  0x61   : > { %2101 = vmatpush3.bf16.msra.mxu0 %v2264_v46 }
  0x62   : > { %2121 = vmatpush3.bf16.msra.mxu1 %v2265_v48  ;;  %2102 = vmatprep.subr.bf16.mxu0 %v2311_v1 }
  0x63   : > { %2122 = vmatprep.subr.bf16.mxu1 %v2311_v1 }
  0x65   : > { %2103 = vmatpush3.bf16.msra.mxu0 %v2266_v49 }
  0x66   : > { %2123 = vmatpush3.bf16.msra.mxu1 %v2267_v51  ;;  %2104 = vmatprep.subr.bf16.mxu0 %v2311_v1 }
  0x67   : > { %2124 = vmatprep.subr.bf16.mxu1 %v2311_v1 }
  0x69   : > { %2105 = vmatpush3.bf16.msra.mxu0 %v2268_v52 }
  0x6a   : > { %2125 = vmatpush3.bf16.msra.mxu1 %v2269_v55  ;;  %2130 = vmatprep.subr.bf16.mxu0 %v2311_v1 }
  0x6b   : > { %2150 = vmatprep.subr.bf16.mxu1 %v2311_v1 }
  0x6c   : > { %2107 = vmatmul.mubr.bf16.vlgmr.msra.gmra.mxu0 %v2486_v60  ;;  %v2274_v60 = vld [vmem:[%s2788_s1 + $0x1a8] sm:$0xff]  }
  0x6d   : > { %2127 = vmatmul.mubr.bf16.vlgmr.msra.gmra.mxu1 %v954_v56  ;;  %2131 = vmatpush3.bf16.msra.mxu0 %v2270_v57 }
  0x6e   : > { %2151 = vmatpush3.bf16.msra.mxu1 %v2271_v58  ;;  %2132 = vmatprep.subr.bf16.mxu0 %v2311_v1 }
  0x6f   : > { %2152 = vmatprep.subr.bf16.mxu1 %v2311_v1  ;;  %2146 = vmatprep.mubr.msk.bf16.mxu0 %vm2312_vm0, %v2311_v1 }
  0x70   : > { %2166 = vmatprep.mubr.msk.bf16.mxu1 %vm2312_vm0, %v2311_v1 }
  0x71   : > { %2133 = vmatpush3.bf16.msra.mxu0 %v2272_v59 }
  0x72   : > { %2153 = vmatpush3.bf16.msra.mxu1 %v2273_v61  ;;  %2134 = vmatprep.subr.bf16.mxu0 %v2311_v1 }
  0x73   : > { %2154 = vmatprep.subr.bf16.mxu1 %v2311_v1 }
  0x75   : > { %2135 = vmatpush3.bf16.msra.mxu0 %v2274_v60 }
  0x76   : > { %2155 = vmatpush3.bf16.msra.mxu1 %v2275_v62  ;;  %2136 = vmatprep.subr.bf16.mxu0 %v2311_v1 }
  0x77   : > { %2156 = vmatprep.subr.bf16.mxu1 %v2311_v1 }
  0x79   : > { %2137 = vmatpush3.bf16.msra.mxu0 %v2276_v63 }
  0x7a   : > { %2157 = vmatpush3.bf16.msra.mxu1 %v2277_v0  ;;  %2138 = vmatprep.subr.bf16.mxu0 %v2311_v1 }
  0x7b   : > { %2158 = vmatprep.subr.bf16.mxu1 %v2311_v1 }
  0x7d   : > { %2139 = vmatpush3.bf16.msra.mxu0 %v2278_v2 }
  0x7e   : > { %2159 = vmatpush3.bf16.msra.mxu1 %v2279_v5  ;;  %2140 = vmatprep.subr.bf16.mxu0 %v2311_v1 }
  0x7f   : > { %2160 = vmatprep.subr.bf16.mxu1 %v2311_v1 }
  0x81   : > { %2141 = vmatpush3.bf16.msra.mxu0 %v2280_v3 }
  0x82   : > { %2161 = vmatpush3.bf16.msra.mxu1 %v2281_v8  ;;  %2142 = vmatprep.subr.bf16.mxu0 %v2311_v1 }
  0x83   : > { %2162 = vmatprep.subr.bf16.mxu1 %v2311_v1 }
  0x85   : > { %2143 = vmatpush3.bf16.msra.mxu0 %v2282_v10 }
  0x86   : > { %2163 = vmatpush3.bf16.msra.mxu1 %v2283_v11  ;;  %2144 = vmatprep.subr.bf16.mxu0 %v2311_v1 }
  0x87   : > { %2164 = vmatprep.subr.bf16.mxu1 %v2311_v1 }
  0x89   : > { %2145 = vmatpush3.bf16.msra.mxu0 %v2284_v14 }
  0x8a   : > { %2165 = vmatpush3.bf16.msra.mxu1 %v2285_v16  ;;  %2170 = vmatprep.subr.bf16.mxu0 %v2311_v1 }
  0x8b   : > { %2190 = vmatprep.subr.bf16.mxu1 %v2311_v1 }
  0x8c   : > { %2147 = vmatmul.mubr.bf16.vlgmr.msra.gmra.mxu0 %v1075_v17 }
  0x8d   : > { %2167 = vmatmul.mubr.bf16.vlgmr.msra.gmra.mxu1 %v1187_v18  ;;  %2171 = vmatpush3.bf16.msra.mxu0 %v2287_v19 }
  0x8e   : > { %2191 = vmatpush3.bf16.msra.mxu1 %v2288_v20  ;;  %2172 = vmatprep.subr.bf16.mxu0 %v2311_v1 }
  0x8f   : > { %2192 = vmatprep.subr.bf16.mxu1 %v2311_v1  ;;  %2186 = vmatprep.mubr.msk.bf16.mxu0 %vm2312_vm0, %v2311_v1 }
  0x90   : > { %2206 = vmatprep.mubr.msk.bf16.mxu1 %vm2312_vm0, %v2311_v1 }
  0x91   : > { %2173 = vmatpush3.bf16.msra.mxu0 %v2289_v21 }
  0x92   : > { %2193 = vmatpush3.bf16.msra.mxu1 %v2290_v22  ;;  %2174 = vmatprep.subr.bf16.mxu0 %v2311_v1 }
  0x93   : > { %2194 = vmatprep.subr.bf16.mxu1 %v2311_v1 }
  0x95   : > { %2175 = vmatpush3.bf16.msra.mxu0 %v2291_v23 }
  0x96   : > { %2195 = vmatpush3.bf16.msra.mxu1 %v2292_v24  ;;  %2176 = vmatprep.subr.bf16.mxu0 %v2311_v1 }
  0x97   : > { %2196 = vmatprep.subr.bf16.mxu1 %v2311_v1 }
  0x99   : > { %2177 = vmatpush3.bf16.msra.mxu0 %v2293_v25 }
  0x9a   : > { %2197 = vmatpush3.bf16.msra.mxu1 %v2294_v26  ;;  %2178 = vmatprep.subr.bf16.mxu0 %v2311_v1 }
  0x9b   : > { %2198 = vmatprep.subr.bf16.mxu1 %v2311_v1 }
  0x9d   : > { %2179 = vmatpush3.bf16.msra.mxu0 %v2295_v28 }
  0x9e   : > { %2199 = vmatpush3.bf16.msra.mxu1 %v2296_v30  ;;  %2180 = vmatprep.subr.bf16.mxu0 %v2311_v1 }
  0x9f   : > { %2200 = vmatprep.subr.bf16.mxu1 %v2311_v1 }
  0xa1   : > { %2181 = vmatpush3.bf16.msra.mxu0 %v2297_v7 }
  0xa2   : > { %2201 = vmatpush3.bf16.msra.mxu1 %v2298_v33  ;;  %2182 = vmatprep.subr.bf16.mxu0 %v2311_v1 }
  0xa3   : > { %2202 = vmatprep.subr.bf16.mxu1 %v2311_v1 }
  0xa5   : > { %2183 = vmatpush3.bf16.msra.mxu0 %v2299_v37 }
  0xa6   : > { %2203 = vmatpush3.bf16.msra.mxu1 %v2300_v38  ;;  %2184 = vmatprep.subr.bf16.mxu0 %v2311_v1 }
  0xa7   : > { %2204 = vmatprep.subr.bf16.mxu1 %v2311_v1 }
  0xa9   : > { %2185 = vmatpush3.bf16.msra.mxu0 %v2301_v40 }
  0xaa   : > { %2205 = vmatpush3.bf16.msra.mxu1 %v2302_v41 }
  0xac   : > { %2187 = vmatmul.mubr.bf16.vlgmr.msra.gmra.mxu0 %v1311_v42 }
  0xad   : > { %2207 = vmatmul.mubr.bf16.vlgmr.msra.gmra.mxu1 %v1422_v43 }
  0xec   : > { %v443_v32 = vpop.f32.mrf.mxu0 }
  0xed   : > { %v545_v44 = vpop.f32.mrf.mxu1 }
  0xee   : > { %v546_v45 = vadd.f32 %v545_v44, %v443_v32  ;;  %v2028_v46 = vpop.f32.mrf.mxu0 }
  0xef   : > { %v2048_v47 = vpop.f32.mrf.mxu1 }
  0xf0   : > { %v446_v48 = vpop.f32.mrf.mxu0 }
  0xf1   : > { %v548_v49 = vpop.f32.mrf.mxu1 }
  0xf2   : > { %v2029_v50 = vpop.f32.mrf.mxu0 }
  0xf3   : > { %v2049_v51 = vpop.f32.mrf.mxu1 }
 0x10c   : > { %v682_v52 = vpop.f32.mrf.mxu0 }
 0x10d   : > { %v688_v53 = vadd.f32 %v682_v52, %v546_v45  ;;  %v810_v54 = vpop.f32.mrf.mxu1 }
 0x10e   : > { %v2068_v55 = vpop.f32.mrf.mxu0 }
 0x10f   : > { %v816_v1 = vadd.f32 %v810_v54, %v688_v53  ;;  %v2088_v56 = vpop.f32.mrf.mxu1 }
 0x110   : > { %v685_v57 = vpop.f32.mrf.mxu0 }
 0x111   : > { %v813_v58 = vpop.f32.mrf.mxu1 }
 0x112   : > { %v2069_v59 = vpop.f32.mrf.mxu0 }
 0x113   : > { %v2089_v61 = vpop.f32.mrf.mxu1 }
 0x12c   : > { %v916_v60 = vpop.f32.mrf.mxu0 }
 0x12d   : > { %v1038_v62 = vpop.f32.mrf.mxu1  ;;  %v922_v15 = vadd.f32 %v916_v60, %v816_v1 }
 0x12e   : > { %v2108_v63 = vpop.f32.mrf.mxu0 }
 0x12f   : > { %v2128_v0 = vpop.f32.mrf.mxu1  ;;  %v1044_v16 = vadd.f32 %v1038_v62, %v922_v15 }
 0x130   : > { %v919_v2 = vpop.f32.mrf.mxu0 }
 0x131   : > { %v1041_v4 = vpop.f32.mrf.mxu1 }
 0x132   : > { %v2109_v5 = vpop.f32.mrf.mxu0 }
 0x133   : > { %v2129_v6 = vpop.f32.mrf.mxu1 }
 0x14c   : > { %v1159_v3 = vpop.f32.mrf.mxu0 }
 0x14d   : > { %v1271_v8 = vpop.f32.mrf.mxu1  ;;  %v1165_v17 = vadd.f32 %v1159_v3, %v1044_v16 }
 0x14e   : > { %v2148_v9 = vpop.f32.mrf.mxu0 }
 0x14f   : > { %v2168_v10 = vpop.f32.mrf.mxu1  ;;  %v1277_v18 = vadd.f32 %v1271_v8, %v1165_v17 }
 0x150   : > { %v1162_v11 = vpop.f32.mrf.mxu0 }
 0x151   : > { %v1274_v12 = vpop.f32.mrf.mxu1 }
 0x152   : > { %v2149_v13 = vpop.f32.mrf.mxu0 }
 0x153   : > { %v2169_v14 = vpop.f32.mrf.mxu1 }
 0x16c   : > { %v1395_v19 = vpop.f32.mrf.mxu0 }
 0x16d   : > { %v1401_v20 = vadd.f32 %v1395_v19, %v1277_v18  ;;  %v1521_v21 = vpop.f32.mrf.mxu1 }
 0x16e   : > { %v1527_v22 = vpack.c.bf16 %v1521_v21, %v1521_v21  ;;  %v1529_v23 = vsel %vm1404_vm14, %v1521_v21, 0.0  ;;  %v1537_v24 = vmul.f32 %v1521_v21, %v1521_v21  ;;  %v2188_v25 = vpop.f32.mrf.mxu0 }
 0x16f   : > { %v1402_v26 = vpack.c.bf16 %v1401_v20, %v1401_v20  ;;  %v1405_v27 = vsel %vm1404_vm14, %v1401_v20, 0.0  ;;  %v1413_v28 = vmul.f32 %v1401_v20, %v1401_v20  ;;  %v1530_v29 = vrot.slane %v1529_v23, 4  ;;  %v2208_v30 = vpop.f32.mrf.mxu1 }
 0x170   : > { %v1406_v31 = vrot.slane %v1405_v27, 4  ;;  %1528 = vst [vmem:[%s273_s10] sm:$0x3] %v1527_v22  ;;  %v1538_v7 = vsel %vm1404_vm14, %v1537_v24, 0.0  ;;  %v1398_v33 = vpop.f32.mrf.mxu0 }
 0x171   : > { %1403 = vst [vmem:[%s265_s14] sm:$0x3] %v1402_v26  ;;  %v1414_v34 = vsel %vm1404_vm14, %v1413_v28, 0.0  ;;  %v1531_v35 = vadd.f32 %v1530_v29, %v1529_v23  ;;  %v1539_v37 = vrot.slane %v1538_v7, 4  ;;  %v1524_v38 = vpop.f32.mrf.mxu1 }
 0x172   : > { %v1407_v39 = vadd.f32 %v1406_v31, %v1405_v27  ;;  %v1415_v36 = vrot.slane %v1414_v34, 4  ;;  %v2189_v40 = vpop.f32.mrf.mxu0 }
 0x173   : > { %v1532_v41 = vrot.slane %v1531_v35, 2  ;;  %v1540_v42 = vadd.f32 %v1539_v37, %v1538_v7  ;;  %v2209_v43 = vpop.f32.mrf.mxu1 }
 0x174   : > { %v1408_v32 = vrot.slane %v1407_v39, 2  ;;  %v1416_v44 = vadd.f32 %v1415_v36, %v1414_v34 }
 0x175   : > { %v1533_v45 = vadd.f32 %v1532_v41, %v1531_v35  ;;  %v1541_v46 = vrot.slane %v1540_v42, 2 }
 0x176   : > { %v1409_v47 = vadd.f32 %v1408_v32, %v1407_v39  ;;  %v1417_v48 = vrot.slane %v1416_v44, 2 }
 0x177   : > { %v1534_v49 = vrot.slane %v1533_v45, 1  ;;  %v1542_v50 = vadd.f32 %v1541_v46, %v1540_v42 }
 0x178   : > { %v1410_v51 = vrot.slane %v1409_v47, 1  ;;  %v1418_v52 = vadd.f32 %v1417_v48, %v1416_v44 }
 0x179   : > { %v1535_v53 = vadd.f32 %v1534_v49, %v1533_v45  ;;  %v1543_v54 = vrot.slane %v1542_v50, 1 }
 0x17a   : > { %v1411_v55 = vadd.f32 %v1410_v51, %v1409_v47  ;;  %v1419_v1 = vrot.slane %v1418_v52, 1 }
 0x17b   : > { %1536 = vst [vmem:[%s277_s17] sm:$0x1] %v1535_v53  ;;  %v1544_v56 = vadd.f32 %v1543_v54, %v1542_v50 }
 0x17c   : > { %1412 = vst [vmem:[%s269_s20] sm:$0x1] %v1411_v55  ;;  %v1420_v57 = vadd.f32 %v1419_v1, %v1418_v52 }
 0x17d   : > { %1545 = vst [vmem:[%s277_s17 + $0x1] sm:$0x1] %v1544_v56 }
 0x17e   : > { %1421 = vst [vmem:[%s269_s20 + $0x1] sm:$0x1] %v1420_v57 }
 0x17f PF: > { %s17_s21 = sadd.s32 1, %s2309_s21  }
 0x180   : > { %p14_p4 = scmp.ge.s32.totalorder %s17_s21, 4  }
 0x182   :  { %16 = sbr.rel (!%p14_p4) target bundleno = 1 (0x1), region = 106 }

// kernel: _lambda_.34
= control target key start
LH: loop header
LB: loop body
LE: loop exit
PB: predicated region body
PF: predicated region fallthrough
CT: control target
= control target key end

     0   :  { %s2155_s21 = smov 0   ;;  %s2543_s0 = inlined_call_operand.vmem [shape: bf16[2,9,1,128], index: 0, kind: input, shape index: {}]   ;;  %s2544_s1 = inlined_call_operand.vmem [shape: bf16[9,128,128], index: 1, kind: input, shape index: {}]   ;;  %s2545_s2 = inlined_call_operand.vmem [shape: bf16[128,128], index: 2, kind: input, shape index: {}]   ;;  %s2546_s3 = inlined_call_operand.vmem [shape: bf16[2,1,128], index: 3, kind: output, shape index: {0}]   ;;  %s2547_s4 = inlined_call_operand.vmem [shape: f32[2,2,128], index: 4, kind: output, shape index: {1}]   ;;  %s2548_s5 = inlined_call_operand.vmem [shape: bf16[2,1,128], index: 5, kind: output, shape index: {2}]   ;;  %s2549_s6 = inlined_call_operand.vmem [shape: f32[2,2,128], index: 6, kind: output, shape index: {3}]  }
   0x1 LB: > { %s1503_s22 = sadd.s32 4294967295, %s2116_s21   ;;  %p1507_p0 = scmp.ge.s32.totalorder %s2116_s21, 1  ;;  %s2116_s21 = sphi %s2155_s21, %s17_s21  }
   0x2   : > { %p218_p1 = scmp.lt.s32.totalorder %s2116_s21, 3 }
   0x4   : > { %p219_p2 = pnand %p1507_p0, %p218_p1 }
   0x5   : > { %p256_p3 = scmp.lt.s32.totalorder (!%p219_p2), %s1503_s22, 1 }
   0x6   : > { %222 = sbr.rel (%p219_p2) target bundleno = 372 (0x174), region = 32 }
   0xb   : > { %v2030_v0 = vld [vmem:[%s2544_s1 + $0x78] sm:$0xff]   ;;  %v2118_v1 = vmov 0.0   ;;  %v2032_v3 = vld [vmem:[%s2544_s1 + $0x70] sm:$0xff]   ;;  %vm2119_vm0 = vmmov 0   ;;  %v2034_v5 = vld [vmem:[%s2544_s1 + $0x68] sm:$0xff]   ;;  %s2551_s22 = smov (!%p256_p3, %s1503_s22), 1 }
   0xc   : > { %1819 = vmatprep.subr.bf16.mxu0 %v2118_v1  ;;  %1839 = vmatprep.subr.bf16.mxu1 %v2118_v1  ;;  %v2031_v2 = vld [vmem:[%s2544_s1 + $0x38] sm:$0xff]   ;;  %v2033_v4 = vld [vmem:[%s2544_s1 + $0x30] sm:$0xff]   ;;  %v2035_v6 = vld [vmem:[%s2544_s1 + $0x28] sm:$0xff]   ;;  %s2019_s25 = smul.u32 9, %s2551_s22  ;;  %vm1244_vm1 = vcmask 1040384   ;;  %s269_s17 = scalar_lea.vmem %s2548_s5, %s2551_s22 }
   0xd   : > { %1820 = vmatpush3.bf16.msra.mxu0 %v2030_v0  ;;  %1835 = vmatprep.mubr.msk.bf16.mxu0 %vm2119_vm0, %v2118_v1  ;;  %v2036_v7 = vld [vmem:[%s2544_s1 + $0x60] sm:$0xff]   ;;  %v2038_v9 = vld [vmem:[%s2544_s1 + $0x58] sm:$0xff]   ;;  %v2040_v11 = vld [vmem:[%s2544_s1 + $0x50] sm:$0xff]   ;;  %vm1245_vm2 = vsmask.f32 256  ;;  %s262_s20 = scalar_lea.vmem %s2546_s3, %s2551_s22 }
   0xe   : > { %1840 = vmatpush3.bf16.msra.mxu1 %v2031_v2  ;;  %1821 = vmatprep.subr.bf16.mxu0 %v2118_v1  ;;  %v2037_v8 = vld [vmem:[%s2544_s1 + $0x20] sm:$0xff]   ;;  %v2039_v10 = vld [vmem:[%s2544_s1 + $0x18] sm:$0xff]   ;;  %v2041_v12 = vld [vmem:[%s2544_s1 + $0x10] sm:$0xff]   ;;  %s2233_s8 = scalar_lea.vmem %s2543_s0, %s2019_s25 }
   0xf   : > { %1841 = vmatprep.subr.bf16.mxu1 %v2118_v1  ;;  %1855 = vmatprep.mubr.msk.bf16.mxu1 %vm2119_vm0, %v2118_v1  ;;  %v2042_v13 = vld [vmem:[%s2544_s1 + $0x48] sm:$0xff]   ;;  %v2044_v15 = vld [vmem:[%s2544_s1 + $0x40] sm:$0xff]   ;;  %v2046_v19 = vld [vmem:[%s2544_s1 + $0xb8] sm:$0xff]  }
  0x10   : > { %v2043_v14 = vld [vmem:[%s2544_s1 + $0x8] sm:$0xff]   ;;  %v2045_v16 = vld [vmem:[%s2544_s1] sm:$0xff]   ;;  %v2047_v20 = vld [vmem:[%s2544_s1 + $0xf8] sm:$0xff]  }
  0x11   : > { %1822 = vmatpush3.bf16.msra.mxu0 %v2032_v3  ;;  %v1510_v17 = vld [vmem:[%s2233_s8 + $0x1] sm:$0x1]  ;;  %v275_v18 = vld [vmem:[%s2233_s8] sm:$0x1]  ;;  %v2048_v21 = vld [vmem:[%s2544_s1 + $0xb0] sm:$0xff]  }
  0x12   : > { %1842 = vmatpush3.bf16.msra.mxu1 %v2033_v4  ;;  %1823 = vmatprep.subr.bf16.mxu0 %v2118_v1  ;;  %v2049_v22 = vld [vmem:[%s2544_s1 + $0xf0] sm:$0xff]   ;;  %v2050_v23 = vld [vmem:[%s2544_s1 + $0xa8] sm:$0xff]   ;;  %v2052_v25 = vld [vmem:[%s2544_s1 + $0xa0] sm:$0xff]  }
  0x13   : > { %1843 = vmatprep.subr.bf16.mxu1 %v2118_v1  ;;  %v2051_v24 = vld [vmem:[%s2544_s1 + $0xe8] sm:$0xff]   ;;  %v2053_v26 = vld [vmem:[%s2544_s1 + $0xe0] sm:$0xff]   ;;  %v2054_v27 = vld [vmem:[%s2544_s1 + $0x98] sm:$0xff]  }
  0x14   : > { %v2055_v28 = vld [vmem:[%s2544_s1 + $0xd8] sm:$0xff]   ;;  %v2056_v29 = vld [vmem:[%s2544_s1 + $0x90] sm:$0xff]   ;;  %v2058_v31 = vld [vmem:[%s2544_s1 + $0x88] sm:$0xff]  }
  0x15   : > { %1824 = vmatpush3.bf16.msra.mxu0 %v2034_v5  ;;  %v2057_v30 = vld [vmem:[%s2544_s1 + $0xd0] sm:$0xff]   ;;  %v2059_v32 = vld [vmem:[%s2544_s1 + $0xc8] sm:$0xff]   ;;  %v2060_v33 = vld [vmem:[%s2544_s1 + $0x80] sm:$0xff]  }
  0x16   : > { %1844 = vmatpush3.bf16.msra.mxu1 %v2035_v6  ;;  %1825 = vmatprep.subr.bf16.mxu0 %v2118_v1  ;;  %v2061_v34 = vld [vmem:[%s2544_s1 + $0xc0] sm:$0xff]   ;;  %v2062_v37 = vld [vmem:[%s2544_s1 + $0x138] sm:$0xff]   ;;  %v2064_v39 = vld [vmem:[%s2544_s1 + $0x130] sm:$0xff]  }
  0x17   : > { %1845 = vmatprep.subr.bf16.mxu1 %v2118_v1  ;;  %v1543_v35 = vld [vmem:[%s2233_s8 + $0x2] sm:$0x1]  ;;  %v1568_v36 = vld [vmem:[%s2233_s8 + $0x3] sm:$0x1]  ;;  %v2063_v38 = vld [vmem:[%s2544_s1 + $0x178] sm:$0xff]  }
  0x18   : > { %v2065_v40 = vld [vmem:[%s2544_s1 + $0x170] sm:$0xff]   ;;  %v2066_v41 = vld [vmem:[%s2544_s1 + $0x128] sm:$0xff]   ;;  %v2068_v43 = vld [vmem:[%s2544_s1 + $0x120] sm:$0xff]  }
  0x19   : > { %1826 = vmatpush3.bf16.msra.mxu0 %v2036_v7  ;;  %v2067_v42 = vld [vmem:[%s2544_s1 + $0x168] sm:$0xff]   ;;  %v2069_v44 = vld [vmem:[%s2544_s1 + $0x160] sm:$0xff]   ;;  %v2070_v45 = vld [vmem:[%s2544_s1 + $0x118] sm:$0xff]  }
  0x1a   : > { %1846 = vmatpush3.bf16.msra.mxu1 %v2037_v8  ;;  %1827 = vmatprep.subr.bf16.mxu0 %v2118_v1  ;;  %v2071_v46 = vld [vmem:[%s2544_s1 + $0x158] sm:$0xff]   ;;  %v2072_v47 = vld [vmem:[%s2544_s1 + $0x110] sm:$0xff]   ;;  %v2074_v49 = vld [vmem:[%s2544_s1 + $0x108] sm:$0xff]  }
  0x1b   : > { %1847 = vmatprep.subr.bf16.mxu1 %v2118_v1  ;;  %v2073_v48 = vld [vmem:[%s2544_s1 + $0x150] sm:$0xff]   ;;  %v2075_v50 = vld [vmem:[%s2544_s1 + $0x148] sm:$0xff]   ;;  %v2076_v51 = vld [vmem:[%s2544_s1 + $0x100] sm:$0xff]  }
  0x1c   : > { %v2077_v52 = vld [vmem:[%s2544_s1 + $0x140] sm:$0xff]   ;;  %v2078_v54 = vld [vmem:[%s2544_s1 + $0x1b8] sm:$0xff]   ;;  %v2080_v57 = vld [vmem:[%s2544_s1 + $0x1b0] sm:$0xff]  }
  0x1d   : > { %1828 = vmatpush3.bf16.msra.mxu0 %v2038_v9  ;;  %v1593_v53 = vld [vmem:[%s2233_s8 + $0x4] sm:$0x1]  ;;  %v1618_v55 = vld [vmem:[%s2233_s8 + $0x5] sm:$0x1]  ;;  %v2079_v56 = vld [vmem:[%s2544_s1 + $0x1f8] sm:$0xff]  }
  0x1e   : > { %1848 = vmatpush3.bf16.msra.mxu1 %v2039_v10  ;;  %1829 = vmatprep.subr.bf16.mxu0 %v2118_v1  ;;  %v2081_v58 = vld [vmem:[%s2544_s1 + $0x1f0] sm:$0xff]   ;;  %v2082_v59 = vld [vmem:[%s2544_s1 + $0x1a8] sm:$0xff]   ;;  %v2084_v61 = vld [vmem:[%s2544_s1 + $0x1a0] sm:$0xff]  }
  0x1f   : > { %1849 = vmatprep.subr.bf16.mxu1 %v2118_v1  ;;  %v2083_v60 = vld [vmem:[%s2544_s1 + $0x1e8] sm:$0xff]   ;;  %v2085_v62 = vld [vmem:[%s2544_s1 + $0x1e0] sm:$0xff]   ;;  %v2086_v63 = vld [vmem:[%s2544_s1 + $0x198] sm:$0xff]  }
  0x20   : > { %v2087_v0 = vld [vmem:[%s2544_s1 + $0x1d8] sm:$0xff]   ;;  %v2088_v2 = vld [vmem:[%s2544_s1 + $0x190] sm:$0xff]   ;;  %v2090_v4 = vld [vmem:[%s2544_s1 + $0x188] sm:$0xff]  }
  0x21   : > { %1830 = vmatpush3.bf16.msra.mxu0 %v2040_v11  ;;  %v2089_v3 = vld [vmem:[%s2544_s1 + $0x1d0] sm:$0xff]   ;;  %v2091_v5 = vld [vmem:[%s2544_s1 + $0x1c8] sm:$0xff]   ;;  %v2092_v6 = vld [vmem:[%s2544_s1 + $0x180] sm:$0xff]  }
  0x22   : > { %1850 = vmatpush3.bf16.msra.mxu1 %v2041_v12  ;;  %1831 = vmatprep.subr.bf16.mxu0 %v2118_v1  ;;  %v2093_v7 = vld [vmem:[%s2544_s1 + $0x1c0] sm:$0xff]   ;;  %v2094_v9 = vld [vmem:[%s2544_s1 + $0x238] sm:$0xff]   ;;  %v2096_v12 = vld [vmem:[%s2544_s1 + $0x230] sm:$0xff]  }
  0x23   : > { %1851 = vmatprep.subr.bf16.mxu1 %v2118_v1  ;;  %v1643_v8 = vld [vmem:[%s2233_s8 + $0x6] sm:$0x1]  ;;  %v1668_v10 = vld [vmem:[%s2233_s8 + $0x7] sm:$0x1]  ;;  %v2095_v11 = vld [vmem:[%s2545_s2 + $0x38] sm:$0xff]  }
  0x24   : > { %vm1246_vm3 = vmand %vm1244_vm1, %vm1245_vm2 }
  0x25   : > { %1832 = vmatpush3.bf16.msra.mxu0 %v2042_v13  ;;  %v2097_v13 = vld [vmem:[%s2545_s2 + $0x30] sm:$0xff]  }
  0x26   : > { %1852 = vmatpush3.bf16.msra.mxu1 %v2043_v14  ;;  %1833 = vmatprep.subr.bf16.mxu0 %v2118_v1  ;;  %v2098_v14 = vld [vmem:[%s2544_s1 + $0x228] sm:$0xff]  }
  0x27   : > { %1853 = vmatprep.subr.bf16.mxu1 %v2118_v1 }
  0x29   : > { %1834 = vmatpush3.bf16.msra.mxu0 %v2044_v15  ;;  %v2099_v15 = vld [vmem:[%s2545_s2 + $0x28] sm:$0xff]  }
  0x2a   : > { %1854 = vmatpush3.bf16.msra.mxu1 %v2045_v16  ;;  %1859 = vmatprep.subr.bf16.mxu0 %v2118_v1  ;;  %v2100_v16 = vld [vmem:[%s2544_s1 + $0x220] sm:$0xff]  }
  0x2b   : > { %1879 = vmatprep.subr.bf16.mxu1 %v2118_v1 }
  0x2c   : > { %1836 = vmatmul.mubr.bf16.vlgmr.msra.gmra.mxu0 %v1510_v17  ;;  %v2101_v17 = vld [vmem:[%s2545_s2 + $0x20] sm:$0xff]  }
  0x2d   : > { %1856 = vmatmul.mubr.bf16.vlgmr.msra.gmra.mxu1 %v275_v18  ;;  %1860 = vmatpush3.bf16.msra.mxu0 %v2046_v19  ;;  %v2102_v18 = vld [vmem:[%s2544_s1 + $0x218] sm:$0xff]  }
  0x2e   : > { %1880 = vmatpush3.bf16.msra.mxu1 %v2047_v20  ;;  %1861 = vmatprep.subr.bf16.mxu0 %v2118_v1  ;;  %v2103_v19 = vld [vmem:[%s2545_s2 + $0x18] sm:$0xff]   ;;  %v2104_v20 = vld [vmem:[%s2544_s1 + $0x210] sm:$0xff]  }
  0x2f   : > { %1881 = vmatprep.subr.bf16.mxu1 %v2118_v1  ;;  %1875 = vmatprep.mubr.msk.bf16.mxu0 %vm2119_vm0, %v2118_v1 }
  0x30   : > { %1895 = vmatprep.mubr.msk.bf16.mxu1 %vm2119_vm0, %v2118_v1 }
  0x31   : > { %1862 = vmatpush3.bf16.msra.mxu0 %v2048_v21  ;;  %v2105_v21 = vld [vmem:[%s2545_s2 + $0x10] sm:$0xff]  }
  0x32   : > { %1882 = vmatpush3.bf16.msra.mxu1 %v2049_v22  ;;  %1863 = vmatprep.subr.bf16.mxu0 %v2118_v1  ;;  %v2106_v22 = vld [vmem:[%s2544_s1 + $0x208] sm:$0xff]  }
  0x33   : > { %1883 = vmatprep.subr.bf16.mxu1 %v2118_v1 }
  0x35   : > { %1864 = vmatpush3.bf16.msra.mxu0 %v2050_v23  ;;  %v2107_v23 = vld [vmem:[%s2545_s2 + $0x8] sm:$0xff]  }
  0x36   : > { %1884 = vmatpush3.bf16.msra.mxu1 %v2051_v24  ;;  %1865 = vmatprep.subr.bf16.mxu0 %v2118_v1  ;;  %v2108_v24 = vld [vmem:[%s2544_s1 + $0x200] sm:$0xff]  }
  0x37   : > { %1885 = vmatprep.subr.bf16.mxu1 %v2118_v1 }
  0x39   : > { %1866 = vmatpush3.bf16.msra.mxu0 %v2052_v25  ;;  %v2109_v25 = vld [vmem:[%s2545_s2] sm:$0xff]  }
  0x3a   : > { %1886 = vmatpush3.bf16.msra.mxu1 %v2053_v26  ;;  %1867 = vmatprep.subr.bf16.mxu0 %v2118_v1  ;;  %v1693_v26 = vld [vmem:[%s2233_s8 + $0x8] sm:$0x1] }
  0x3b   : > { %1887 = vmatprep.subr.bf16.mxu1 %v2118_v1 }
  0x3d   : > { %1868 = vmatpush3.bf16.msra.mxu0 %v2054_v27  ;;  %v1718_v27 = vld [vmem:[%s2233_s8 + $0x4] sm:$0x1]  ;;  %s1508_s8 = sshll.u32 %s2551_s22, 1 }
  0x3e   : > { %1888 = vmatpush3.bf16.msra.mxu1 %v2055_v28  ;;  %1869 = vmatprep.subr.bf16.mxu0 %v2118_v1  ;;  %s273_s25 = scalar_lea.vmem %s2549_s6, %s1508_s8  ;;  %s266_s28 = scalar_lea.vmem %s2547_s4, %s1508_s8 }
  0x3f   : > { %1889 = vmatprep.subr.bf16.mxu1 %v2118_v1 }
  0x41   : > { %1870 = vmatpush3.bf16.msra.mxu0 %v2056_v29 }
  0x42   : > { %1890 = vmatpush3.bf16.msra.mxu1 %v2057_v30  ;;  %1871 = vmatprep.subr.bf16.mxu0 %v2118_v1 }
  0x43   : > { %1891 = vmatprep.subr.bf16.mxu1 %v2118_v1 }
  0x45   : > { %1872 = vmatpush3.bf16.msra.mxu0 %v2058_v31 }
  0x46   : > { %1892 = vmatpush3.bf16.msra.mxu1 %v2059_v32  ;;  %1873 = vmatprep.subr.bf16.mxu0 %v2118_v1 }
  0x47   : > { %1893 = vmatprep.subr.bf16.mxu1 %v2118_v1 }
  0x49   : > { %1874 = vmatpush3.bf16.msra.mxu0 %v2060_v33 }
  0x4a   : > { %1894 = vmatpush3.bf16.msra.mxu1 %v2061_v34  ;;  %1899 = vmatprep.subr.bf16.mxu0 %v2118_v1 }
  0x4b   : > { %1919 = vmatprep.subr.bf16.mxu1 %v2118_v1 }
  0x4c   : > { %1876 = vmatmul.mubr.bf16.vlgmr.msra.gmra.mxu0 %v1543_v35 }
  0x4d   : > { %1896 = vmatmul.mubr.bf16.vlgmr.msra.gmra.mxu1 %v1568_v36  ;;  %1900 = vmatpush3.bf16.msra.mxu0 %v2062_v37 }
  0x4e   : > { %1920 = vmatpush3.bf16.msra.mxu1 %v2063_v38  ;;  %1901 = vmatprep.subr.bf16.mxu0 %v2118_v1 }
  0x4f   : > { %1921 = vmatprep.subr.bf16.mxu1 %v2118_v1  ;;  %1915 = vmatprep.mubr.msk.bf16.mxu0 %vm2119_vm0, %v2118_v1 }
  0x50   : > { %1935 = vmatprep.mubr.msk.bf16.mxu1 %vm2119_vm0, %v2118_v1 }
  0x51   : > { %1902 = vmatpush3.bf16.msra.mxu0 %v2064_v39 }
  0x52   : > { %1922 = vmatpush3.bf16.msra.mxu1 %v2065_v40  ;;  %1903 = vmatprep.subr.bf16.mxu0 %v2118_v1 }
  0x53   : > { %1923 = vmatprep.subr.bf16.mxu1 %v2118_v1 }
  0x55   : > { %1904 = vmatpush3.bf16.msra.mxu0 %v2066_v41 }
  0x56   : > { %1924 = vmatpush3.bf16.msra.mxu1 %v2067_v42  ;;  %1905 = vmatprep.subr.bf16.mxu0 %v2118_v1 }
  0x57   : > { %1925 = vmatprep.subr.bf16.mxu1 %v2118_v1 }
  0x59   : > { %1906 = vmatpush3.bf16.msra.mxu0 %v2068_v43 }
  0x5a   : > { %1926 = vmatpush3.bf16.msra.mxu1 %v2069_v44  ;;  %1907 = vmatprep.subr.bf16.mxu0 %v2118_v1 }
  0x5b   : > { %1927 = vmatprep.subr.bf16.mxu1 %v2118_v1 }
  0x5d   : > { %1908 = vmatpush3.bf16.msra.mxu0 %v2070_v45 }
  0x5e   : > { %1928 = vmatpush3.bf16.msra.mxu1 %v2071_v46  ;;  %1909 = vmatprep.subr.bf16.mxu0 %v2118_v1 }
  0x5f   : > { %1929 = vmatprep.subr.bf16.mxu1 %v2118_v1 }
  0x61   : > { %1910 = vmatpush3.bf16.msra.mxu0 %v2072_v47 }
  0x62   : > { %1930 = vmatpush3.bf16.msra.mxu1 %v2073_v48  ;;  %1911 = vmatprep.subr.bf16.mxu0 %v2118_v1 }
  0x63   : > { %1931 = vmatprep.subr.bf16.mxu1 %v2118_v1 }
  0x65   : > { %1912 = vmatpush3.bf16.msra.mxu0 %v2074_v49 }
  0x66   : > { %1932 = vmatpush3.bf16.msra.mxu1 %v2075_v50  ;;  %1913 = vmatprep.subr.bf16.mxu0 %v2118_v1 }
  0x67   : > { %1933 = vmatprep.subr.bf16.mxu1 %v2118_v1 }
  0x69   : > { %1914 = vmatpush3.bf16.msra.mxu0 %v2076_v51 }
  0x6a   : > { %1934 = vmatpush3.bf16.msra.mxu1 %v2077_v52  ;;  %1939 = vmatprep.subr.bf16.mxu0 %v2118_v1 }
  0x6b   : > { %1959 = vmatprep.subr.bf16.mxu1 %v2118_v1 }
  0x6c   : > { %1916 = vmatmul.mubr.bf16.vlgmr.msra.gmra.mxu0 %v1593_v53 }
  0x6d   : > { %1936 = vmatmul.mubr.bf16.vlgmr.msra.gmra.mxu1 %v1618_v55  ;;  %1940 = vmatpush3.bf16.msra.mxu0 %v2078_v54 }
  0x6e   : > { %1960 = vmatpush3.bf16.msra.mxu1 %v2079_v56  ;;  %1941 = vmatprep.subr.bf16.mxu0 %v2118_v1 }
  0x6f   : > { %1961 = vmatprep.subr.bf16.mxu1 %v2118_v1  ;;  %1955 = vmatprep.mubr.msk.bf16.mxu0 %vm2119_vm0, %v2118_v1 }
  0x70   : > { %1975 = vmatprep.mubr.msk.bf16.mxu1 %vm2119_vm0, %v2118_v1 }
  0x71   : > { %1942 = vmatpush3.bf16.msra.mxu0 %v2080_v57 }
  0x72   : > { %1962 = vmatpush3.bf16.msra.mxu1 %v2081_v58  ;;  %1943 = vmatprep.subr.bf16.mxu0 %v2118_v1 }
  0x73   : > { %1963 = vmatprep.subr.bf16.mxu1 %v2118_v1 }
  0x75   : > { %1944 = vmatpush3.bf16.msra.mxu0 %v2082_v59 }
  0x76   : > { %1964 = vmatpush3.bf16.msra.mxu1 %v2083_v60  ;;  %1945 = vmatprep.subr.bf16.mxu0 %v2118_v1 }
  0x77   : > { %1965 = vmatprep.subr.bf16.mxu1 %v2118_v1 }
  0x79   : > { %1946 = vmatpush3.bf16.msra.mxu0 %v2084_v61 }
  0x7a   : > { %1966 = vmatpush3.bf16.msra.mxu1 %v2085_v62  ;;  %1947 = vmatprep.subr.bf16.mxu0 %v2118_v1 }
  0x7b   : > { %1967 = vmatprep.subr.bf16.mxu1 %v2118_v1 }
  0x7d   : > { %1948 = vmatpush3.bf16.msra.mxu0 %v2086_v63 }
  0x7e   : > { %1968 = vmatpush3.bf16.msra.mxu1 %v2087_v0  ;;  %1949 = vmatprep.subr.bf16.mxu0 %v2118_v1 }
  0x7f   : > { %1969 = vmatprep.subr.bf16.mxu1 %v2118_v1 }
  0x81   : > { %1950 = vmatpush3.bf16.msra.mxu0 %v2088_v2 }
  0x82   : > { %1970 = vmatpush3.bf16.msra.mxu1 %v2089_v3  ;;  %1951 = vmatprep.subr.bf16.mxu0 %v2118_v1 }
  0x83   : > { %1971 = vmatprep.subr.bf16.mxu1 %v2118_v1 }
  0x85   : > { %1952 = vmatpush3.bf16.msra.mxu0 %v2090_v4 }
  0x86   : > { %1972 = vmatpush3.bf16.msra.mxu1 %v2091_v5  ;;  %1953 = vmatprep.subr.bf16.mxu0 %v2118_v1 }
  0x87   : > { %1973 = vmatprep.subr.bf16.mxu1 %v2118_v1 }
  0x89   : > { %1954 = vmatpush3.bf16.msra.mxu0 %v2092_v6  ;;  %v1361_v6 = vld [vmem:[%s269_s17] sm:$0x1] }
  0x8a   : > { %1974 = vmatpush3.bf16.msra.mxu1 %v2093_v7  ;;  %1979 = vmatprep.subr.bf16.mxu0 %v2118_v1  ;;  %v1247_v7 = vld [vmem:[%s262_s20] sm:$0x1] }
  0x8b   : > { %1999 = vmatprep.subr.bf16.mxu1 %v2118_v1 }
  0x8c   : > { %1956 = vmatmul.mubr.bf16.vlgmr.msra.gmra.mxu0 %v1643_v8 }
  0x8d   : > { %1976 = vmatmul.mubr.bf16.vlgmr.msra.gmra.mxu1 %v1668_v10  ;;  %1980 = vmatpush3.bf16.msra.mxu0 %v2094_v9 }
  0x8e   : > { %2000 = vmatpush3.bf16.msra.mxu1 %v2095_v11  ;;  %1981 = vmatprep.subr.bf16.mxu0 %v2118_v1 }
  0x8f   : > { %2001 = vmatprep.subr.bf16.mxu1 %v2118_v1  ;;  %1995 = vmatprep.mubr.msk.bf16.mxu0 %vm2119_vm0, %v2118_v1 }
  0x90   : > { %2015 = vmatprep.mubr.msk.bf16.mxu1 %vm2119_vm0, %v2118_v1 }
  0x91   : > { %1982 = vmatpush3.bf16.msra.mxu0 %v2096_v12 }
  0x92   : > { %2002 = vmatpush3.bf16.msra.mxu1 %v2097_v13  ;;  %1983 = vmatprep.subr.bf16.mxu0 %v2118_v1 }
  0x93   : > { %2003 = vmatprep.subr.bf16.mxu1 %v2118_v1 }
  0x95   : > { %1984 = vmatpush3.bf16.msra.mxu0 %v2098_v14 }
  0x96   : > { %2004 = vmatpush3.bf16.msra.mxu1 %v2099_v15  ;;  %1985 = vmatprep.subr.bf16.mxu0 %v2118_v1 }
  0x97   : > { %2005 = vmatprep.subr.bf16.mxu1 %v2118_v1 }
  0x99   : > { %1986 = vmatpush3.bf16.msra.mxu0 %v2100_v16 }
  0x9a   : > { %2006 = vmatpush3.bf16.msra.mxu1 %v2101_v17  ;;  %1987 = vmatprep.subr.bf16.mxu0 %v2118_v1 }
  0x9b   : > { %2007 = vmatprep.subr.bf16.mxu1 %v2118_v1 }
  0x9d   : > { %1988 = vmatpush3.bf16.msra.mxu0 %v2102_v18 }
  0x9e   : > { %2008 = vmatpush3.bf16.msra.mxu1 %v2103_v19  ;;  %1989 = vmatprep.subr.bf16.mxu0 %v2118_v1 }
  0x9f   : > { %2009 = vmatprep.subr.bf16.mxu1 %v2118_v1 }
  0xa1   : > { %1990 = vmatpush3.bf16.msra.mxu0 %v2104_v20 }
  0xa2   : > { %2010 = vmatpush3.bf16.msra.mxu1 %v2105_v21  ;;  %1991 = vmatprep.subr.bf16.mxu0 %v2118_v1 }
  0xa3   : > { %2011 = vmatprep.subr.bf16.mxu1 %v2118_v1 }
  0xa5   : > { %1992 = vmatpush3.bf16.msra.mxu0 %v2106_v22 }
  0xa6   : > { %2012 = vmatpush3.bf16.msra.mxu1 %v2107_v23  ;;  %1993 = vmatprep.subr.bf16.mxu0 %v2118_v1 }
  0xa7   : > { %2013 = vmatprep.subr.bf16.mxu1 %v2118_v1 }
  0xa9   : > { %1994 = vmatpush3.bf16.msra.mxu0 %v2108_v24 }
  0xaa   : > { %2014 = vmatpush3.bf16.msra.mxu1 %v2109_v25 }
  0xac   : > { %1996 = vmatmul.mubr.bf16.vlgmr.msra.gmra.mxu0 %v1693_v26 }
  0xad   : > { %2016 = vmatmul.mubr.bf16.vlgmr.msra.gmra.mxu1 %v1718_v27 }
  0xec   : > { %v393_v28 = vpop.f32.mrf.mxu0 }
  0xed   : > { %v481_v29 = vpop.f32.mrf.mxu1 }
  0xee   : > { %v482_v30 = vadd.f32 %v481_v29, %v393_v28  ;;  %v1837_v31 = vpop.f32.mrf.mxu0 }
  0xef   : > { %v1857_v32 = vpop.f32.mrf.mxu1 }
  0xf0   : > { %v396_v33 = vpop.f32.mrf.mxu0 }
  0xf1   : > { %v484_v34 = vpop.f32.mrf.mxu1 }
  0xf2   : > { %v1838_v35 = vpop.f32.mrf.mxu0 }
  0xf3   : > { %v1858_v36 = vpop.f32.mrf.mxu1 }
 0x10c   : > { %v588_v37 = vpop.f32.mrf.mxu0 }
 0x10d   : > { %v594_v38 = vadd.f32 %v588_v37, %v482_v30  ;;  %v696_v39 = vpop.f32.mrf.mxu1 }
 0x10e   : > { %v1877_v40 = vpop.f32.mrf.mxu0 }
 0x10f   : > { %v702_v1 = vadd.f32 %v696_v39, %v594_v38  ;;  %v1897_v41 = vpop.f32.mrf.mxu1 }
 0x110   : > { %v591_v42 = vpop.f32.mrf.mxu0 }
 0x111   : > { %v699_v43 = vpop.f32.mrf.mxu1 }
 0x112   : > { %v1878_v44 = vpop.f32.mrf.mxu0 }
 0x113   : > { %v1898_v45 = vpop.f32.mrf.mxu1 }
 0x12c   : > { %v804_v46 = vpop.f32.mrf.mxu0 }
 0x12d   : > { %v912_v47 = vpop.f32.mrf.mxu1  ;;  %v810_v62 = vadd.f32 %v804_v46, %v702_v1 }
 0x12e   : > { %v1917_v48 = vpop.f32.mrf.mxu0 }
 0x12f   : > { %v1937_v49 = vpop.f32.mrf.mxu1  ;;  %v918_v63 = vadd.f32 %v912_v47, %v810_v62 }
 0x130   : > { %v807_v50 = vpop.f32.mrf.mxu0 }
 0x131   : > { %v915_v51 = vpop.f32.mrf.mxu1 }
 0x132   : > { %v1918_v52 = vpop.f32.mrf.mxu0 }
 0x133   : > { %v1938_v53 = vpop.f32.mrf.mxu1 }
 0x14c   : > { %v1020_v54 = vpop.f32.mrf.mxu0 }
 0x14d   : > { %v1128_v55 = vpop.f32.mrf.mxu1  ;;  %v1026_v0 = vadd.f32 %v1020_v54, %v918_v63 }
 0x14e   : > { %v1957_v56 = vpop.f32.mrf.mxu0 }
 0x14f   : > { %v1977_v57 = vpop.f32.mrf.mxu1  ;;  %v1134_v2 = vadd.f32 %v1128_v55, %v1026_v0 }
 0x150   : > { %v1023_v58 = vpop.f32.mrf.mxu0 }
 0x151   : > { %v1131_v59 = vpop.f32.mrf.mxu1 }
 0x152   : > { %v1958_v60 = vpop.f32.mrf.mxu0 }
 0x153   : > { %v1978_v61 = vpop.f32.mrf.mxu1 }
 0x16c   : > { %v1236_v3 = vpop.f32.mrf.mxu0 }
 0x16d   : > { %v1242_v4 = vadd.f32 %v1236_v3, %v1134_v2  ;;  %v1354_v5 = vpop.f32.mrf.mxu1 }
 0x16e   : > { %v1360_v8 = vpack.c.bf16 %v1354_v5, %v1354_v5  ;;  %1365 = vst [vmem:[%s273_s25] sm:$0x1] %v1354_v5  ;;  %v1366_v9 = vmul.f32 %v1354_v5, %v1354_v5  ;;  %v1997_v10 = vpop.f32.mrf.mxu0 }
 0x16f   : > { %v1243_v11 = vpack.c.bf16 %v1242_v4, %v1242_v4  ;;  %1251 = vst [vmem:[%s266_s28] sm:$0x1] %v1242_v4  ;;  %v1252_v12 = vmul.f32 %v1242_v4, %v1242_v4  ;;  %v2017_v13 = vpop.f32.mrf.mxu1 }
 0x170   : > { %v1362_v14 = vsel %vm1246_vm3, %v1360_v8, %v1361_v6  ;;  %1368 = vst [vmem:[%s273_s25 + $0x1] sm:$0x1] %v1366_v9  ;;  %v1239_v15 = vpop.f32.mrf.mxu0 }
 0x171   : > { %v1248_v16 = vsel %vm1246_vm3, %v1243_v11, %v1247_v7  ;;  %1254 = vst [vmem:[%s266_s28 + $0x1] sm:$0x1] %v1252_v12  ;;  %1363 = vst [vmem:[%s269_s17] sm:$0x1] %v1362_v14  ;;  %v1357_v17 = vpop.f32.mrf.mxu1 }
 0x172   : > { %1249 = vst [vmem:[%s262_s20] sm:$0x1] %v1248_v16  ;;  %v1998_v18 = vpop.f32.mrf.mxu0 }
 0x173   : > { %v2018_v19 = vpop.f32.mrf.mxu1 }
 0x174 PF: > { %s17_s21 = sadd.s32 1, %s2116_s21  }
 0x175   : > { %p14_p4 = scmp.ge.s32.totalorder %s17_s21, 4  }
 0x177   :  { %16 = sbr.rel (!%p14_p4) target bundleno = 1 (0x1), region = 114 }

// kernel: _lambda_.37
= control target key start
LH: loop header
LB: loop body
LE: loop exit
PB: predicated region body
PF: predicated region fallthrough
CT: control target
= control target key end

     0   :  { %s813_s21 = smov 0   ;;  %s903_s0 = inlined_call_operand.vmem [shape: bf16[2,1,128], index: 0, kind: input, shape index: {}]   ;;  %s904_s1 = inlined_call_operand.vmem [shape: bf16[9,128,128], index: 1, kind: input, shape index: {}]   ;;  %s905_s2 = inlined_call_operand.vmem [shape: bf16[128,128], index: 2, kind: input, shape index: {}]   ;;  %s906_s3 = inlined_call_operand.vmem [shape: bf16[2,1,128], index: 3, kind: output, shape index: {0}]   ;;  %s907_s4 = inlined_call_operand.vmem [shape: f32[2,2,128], index: 4, kind: output, shape index: {1}]   ;;  %s908_s5 = inlined_call_operand.vmem [shape: bf16[2,1,128], index: 5, kind: output, shape index: {2}]   ;;  %s909_s6 = inlined_call_operand.vmem [shape: f32[2,2,128], index: 6, kind: output, shape index: {3}]  }
   0x1 LB: > { %s641_s22 = sadd.s32 4294967295, %s773_s21   ;;  %p645_p0 = scmp.ge.s32.totalorder %s773_s21, 1  ;;  %s773_s21 = sphi %s813_s21, %s17_s21  }
   0x2   : > { %p217_p1 = scmp.lt.s32.totalorder %s773_s21, 3 }
   0x4   : > { %p218_p2 = pnand %p645_p0, %p217_p1 }
   0x5   : > { %p254_p3 = scmp.lt.s32.totalorder (!%p218_p2), %s641_s22, 1 }
   0x6   : > { %221 = sbr.rel (%p218_p2) target bundleno = 244 (0xf4), region = 32 }
   0xb   : > { %v751_v0 = vld [vmem:[%s904_s1 + $0x138] sm:$0xff]   ;;  %v775_v1 = vmov 0.0   ;;  %v753_v3 = vld [vmem:[%s904_s1 + $0x130] sm:$0xff]   ;;  %vm776_vm0 = vmmov 0   ;;  %v777_v5 = vmov 0   ;;  %v755_v6 = vld [vmem:[%s904_s1 + $0x128] sm:$0xff]  }
   0xc   : > { %700 = vmatprep.subr.bf16.mxu0 %v775_v1  ;;  %720 = vmatprep.subr.bf16.mxu1 %v775_v1  ;;  %v752_v2 = vld [vmem:[%s905_s2 + $0x38] sm:$0xff]   ;;  %v754_v4 = vld [vmem:[%s905_s2 + $0x30] sm:$0xff]   ;;  %273 = vst [vmem:[#allocation2 + $0x4] sm:$0xf] %v777_v5  ;;  %v756_v7 = vld [vmem:[%s905_s2 + $0x28] sm:$0xff]   ;;  %s913_s22 = smov (!%p254_p3, %s641_s22), 1 }
   0xd   : > { %701 = vmatpush3.bf16.msra.mxu0 %v751_v0  ;;  %716 = vmatprep.mubr.msk.bf16.mxu0 %vm776_vm0, %v775_v1  ;;  %v757_v8 = vld [vmem:[%s904_s1 + $0x120] sm:$0xff]   ;;  %s256_s17 = scalar_lea.vmem %s903_s0, %s913_s22  ;;  %v759_v10 = vld [vmem:[%s904_s1 + $0x118] sm:$0xff]   ;;  %vm275_vm1 = vcmask 1040384   ;;  %vm276_vm2 = vsmask.f32 256  ;;  %v761_v15 = vld [vmem:[%s904_s1 + $0x110] sm:$0xff]   ;;  %s259_s15 = scalar_lea.vmem %s906_s3, %s913_s22 }
   0xe   : > { %721 = vmatpush3.bf16.msra.mxu1 %v752_v2  ;;  %702 = vmatprep.subr.bf16.mxu0 %v775_v1  ;;  %v758_v9 = vld [vmem:[%s905_s2 + $0x20] sm:$0xff]   ;;  %v760_v11 = vld [vmem:[%s905_s2 + $0x18] sm:$0xff]   ;;  %vm857_vm3 = vmand %vm275_vm1, %vm276_vm2  ;;  %s646_s12 = sshll.u32 %s913_s22, 1  ;;  %s266_s23 = scalar_lea.vmem %s908_s5, %s913_s22 }
   0xf   : > { %722 = vmatprep.subr.bf16.mxu1 %v775_v1  ;;  %736 = vmatprep.mubr.msk.bf16.mxu1 %vm776_vm0, %v775_v1  ;;  %v274_v12 = vld [vmem:[%s256_s17] sm:$0x1]  ;;  %v762_v17 = vld [vmem:[%s905_s2 + $0x10] sm:$0xff]   ;;  %v763_v18 = vld [vmem:[%s904_s1 + $0x108] sm:$0xff]   ;;  %s263_s18 = scalar_lea.vmem %s907_s4, %s646_s12  ;;  %s270_s26 = scalar_lea.vmem %s909_s6, %s646_s12 }
  0x10   : > { %v764_v19 = vld [vmem:[%s905_s2 + $0x8] sm:$0xff]   ;;  %v765_v20 = vld [vmem:[%s904_s1 + $0x100] sm:$0xff]  }
  0x11   : > { %703 = vmatpush3.bf16.msra.mxu0 %v753_v3  ;;  %v766_v21 = vld [vmem:[%s905_s2] sm:$0xff]  }
  0x12   : > { %723 = vmatpush3.bf16.msra.mxu1 %v754_v4  ;;  %704 = vmatprep.subr.bf16.mxu0 %v775_v1  ;;  %v388_v25 = vld [vmem:[%s259_s15] sm:$0x1] }
  0x13   : > { %724 = vmatprep.subr.bf16.mxu1 %v775_v1  ;;  %v278_v13 = vld [vmem:[#allocation2 + $0x4] sm:$0x1]  ;;  %v502_v29 = vld [vmem:[%s266_s23] sm:$0x1] }
  0x14   : > { %v279_v16 = vsel %vm857_vm3, %v274_v12, %v278_v13 }
  0x15   : > { %705 = vmatpush3.bf16.msra.mxu0 %v755_v6  ;;  %280 = vst [vmem:[#allocation2 + $0x4] sm:$0x1] %v279_v16 }
  0x16   : > { %725 = vmatpush3.bf16.msra.mxu1 %v756_v7  ;;  %706 = vmatprep.subr.bf16.mxu0 %v775_v1 }
  0x17   : > { %726 = vmatprep.subr.bf16.mxu1 %v775_v1 }
  0x19   : > { %707 = vmatpush3.bf16.msra.mxu0 %v757_v8 }
  0x1a   : > { %727 = vmatpush3.bf16.msra.mxu1 %v758_v9  ;;  %708 = vmatprep.subr.bf16.mxu0 %v775_v1 }
  0x1b   : > { %728 = vmatprep.subr.bf16.mxu1 %v775_v1 }
  0x1c   : > { %v281_v22 = vld [vmem:[#allocation2 + $0x4] sm:$0x1] }
  0x1d   : > { %709 = vmatpush3.bf16.msra.mxu0 %v759_v10  ;;  %v396_v23 = vld [vmem:[#allocation2 + $0x4] sm:$0x1] }
  0x1e   : > { %729 = vmatpush3.bf16.msra.mxu1 %v760_v11  ;;  %710 = vmatprep.subr.bf16.mxu0 %v775_v1 }
  0x1f   : > { %730 = vmatprep.subr.bf16.mxu1 %v775_v1 }
  0x21   : > { %711 = vmatpush3.bf16.msra.mxu0 %v761_v15 }
  0x22   : > { %731 = vmatpush3.bf16.msra.mxu1 %v762_v17  ;;  %712 = vmatprep.subr.bf16.mxu0 %v775_v1 }
  0x23   : > { %732 = vmatprep.subr.bf16.mxu1 %v775_v1 }
  0x25   : > { %713 = vmatpush3.bf16.msra.mxu0 %v763_v18 }
  0x26   : > { %733 = vmatpush3.bf16.msra.mxu1 %v764_v19  ;;  %714 = vmatprep.subr.bf16.mxu0 %v775_v1 }
  0x27   : > { %734 = vmatprep.subr.bf16.mxu1 %v775_v1 }
  0x29   : > { %715 = vmatpush3.bf16.msra.mxu0 %v765_v20 }
  0x2a   : > { %735 = vmatpush3.bf16.msra.mxu1 %v766_v21 }
  0x2c   : > { %717 = vmatmul.mubr.bf16.vlgmr.msra.gmra.mxu0 %v281_v22 }
  0x2d   : > { %737 = vmatmul.mubr.bf16.vlgmr.msra.gmra.mxu1 %v396_v23 }
  0xec   : > { %v381_v24 = vpop.f32.mrf.mxu0 }
  0xed   : > { %v387_v26 = vpack.c.bf16 %v381_v24, %v381_v24  ;;  %392 = vst [vmem:[%s263_s18] sm:$0x1] %v381_v24  ;;  %v393_v27 = vmul.f32 %v381_v24, %v381_v24  ;;  %v495_v28 = vpop.f32.mrf.mxu1 }
  0xee   : > { %v501_v30 = vpack.c.bf16 %v495_v28, %v495_v28  ;;  %506 = vst [vmem:[%s270_s26] sm:$0x1] %v495_v28  ;;  %v507_v31 = vmul.f32 %v495_v28, %v495_v28  ;;  %v718_v32 = vpop.f32.mrf.mxu0 }
  0xef   : > { %v389_v33 = vsel %vm857_vm3, %v387_v26, %v388_v25  ;;  %395 = vst [vmem:[%s263_s18 + $0x1] sm:$0x1] %v393_v27  ;;  %v738_v34 = vpop.f32.mrf.mxu1 }
  0xf0   : > { %390 = vst [vmem:[%s259_s15] sm:$0x1] %v389_v33  ;;  %v503_v35 = vsel %vm857_vm3, %v501_v30, %v502_v29  ;;  %509 = vst [vmem:[%s270_s26 + $0x1] sm:$0x1] %v507_v31  ;;  %v384_v36 = vpop.f32.mrf.mxu0 }
  0xf1   : > { %504 = vst [vmem:[%s266_s23] sm:$0x1] %v503_v35  ;;  %v498_v37 = vpop.f32.mrf.mxu1 }
  0xf2   : > { %v719_v38 = vpop.f32.mrf.mxu0 }
  0xf3   : > { %v739_v39 = vpop.f32.mrf.mxu1 }
  0xf4 PF: > { %s17_s21 = sadd.s32 1, %s773_s21  }
  0xf5   : > { %p14_p4 = scmp.ge.s32.totalorder %s17_s21, 4  }
  0xf7   :  { %16 = sbr.rel (!%p14_p4) target bundleno = 1 (0x1), region = 99 }

// kernel: _lambda_.43
= control target key start
LH: loop header
LB: loop body
LE: loop exit
PB: predicated region body
PF: predicated region fallthrough
CT: control target
= control target key end

     0   :  { %v234_v1 = vmov 0.0   ;;  %vm235_vm0 = vmmov 0   ;;  %s293_s0 = inlined_call_operand.vmem [shape: bf16[2,1,128], index: 0, kind: input, shape index: {}]   ;;  %s294_s1 = inlined_call_operand.vmem [shape: bf16[128,128], index: 1, kind: input, shape index: {}]   ;;  %s295_s2 = inlined_call_operand.vmem [shape: f32[1,128], index: 2, kind: input, shape index: {}]   ;;  %s296_s3 = inlined_call_operand.hbm [shape: f32[2,128], index: 3, kind: output, shape index: {}]  }
   0x1   :  { %v202_v0 = vld [vmem:[%s294_s1 + $0x38] sm:$0xff]   ;;  %179 = vmatprep.subr.bf16.mxu0 %v234_v1  ;;  %v203_v2 = vld [vmem:[%s294_s1 + $0x30] sm:$0xff]   ;;  %195 = vmatprep.mubr.msk.bf16.mxu0 %vm235_vm0, %v234_v1  ;;  %v204_v3 = vld [vmem:[%s294_s1 + $0x28] sm:$0xff]  }
   0x2   :  { %180 = vmatpush3.bf16.msra.mxu0 %v202_v0  ;;  %v205_v4 = vld [vmem:[%s294_s1 + $0x20] sm:$0xff]  }
   0x3   :  { %181 = vmatprep.subr.bf16.mxu0 %v234_v1 }
   0x6   :  { %182 = vmatpush3.bf16.msra.mxu0 %v203_v2 }
   0x7   :  { %183 = vmatprep.subr.bf16.mxu0 %v234_v1 }
   0xa   :  { %184 = vmatpush3.bf16.msra.mxu0 %v204_v3 }
   0xb   :  { %8 = vsyncpa [#allocation3], 0  ;;  %185 = vmatprep.subr.bf16.mxu0 %v234_v1  ;;  %v206_v5 = vld [vmem:[%s294_s1 + $0x18] sm:$0xff]   ;;  %v211_v6 = vld [vmem:[%s293_s0 + $0x1] ss:$0 sps:$4 sm:$0x11]  }
   0xc   :  { %v207_v7 = vld [vmem:[%s294_s1 + $0x10] sm:$0xff]   ;;  %v210_v8 = vld [vmem:[%s293_s0] ss:$0 sps:$4 sm:$0x11]   ;;  %v50_v9 = vunpack.c.l.b16 %v211_v6  ;;  %v208_v10 = vld [vmem:[%s294_s1 + $0x8] sm:$0xff]   ;;  %vm52_vm1 = vcmask 1041409  }
   0xd   :  { %v49_v11 = vunpack.c.l.b16 %v210_v8  ;;  %v209_v13 = vld [vmem:[%s294_s1] sm:$0xff]   ;;  %s236_s6 = smov [#allocation2]  }
   0xe   :  { %186 = vmatpush3.bf16.msra.mxu0 %v205_v4  ;;  %v51_v12 = vrot.slane %v50_v9, 7  ;;  %v161_v16 = vld [vmem:[%s295_s2] ss:$0 sm:$0xff]  ;;  %s151_s7 = sshll.u32 %s236_s6, 4  ;;  %s152_s7 = int_to_ptr.vmem [resolvable:$true] %s151_s7 }
   0xf   :  { %187 = vmatprep.subr.bf16.mxu0 %v234_v1  ;;  %s212_s8 = scalar_lea.vmem %s152_s7, 32  ;;  %p217_p1 = scmp.lt.s32.totalorder %s152_s7, %s152_s7 }
  0x10   :  { %v53_v14 = vsel %vm52_vm1, %v51_v12, %v49_v11  ;;  %p213_p0 = scmp.ne.s32.totalorder %s152_s7, %s212_s8  ;;  %p218_p2 = scmp.lt.s32.totalorder %s212_s8, %s212_s8 }
  0x11   :  { %v54_v15 = vpack.c.b16 %v53_v14, %v53_v14 }
  0x12   :  { %188 = vmatpush3.bf16.msra.mxu0 %v206_v5  ;;  %p219_p3 = por %p218_p2, %p217_p1 }
  0x13   :  { %189 = vmatprep.subr.bf16.mxu0 %v234_v1 }
  0x14   :  { %p220_p4 = pnand %p219_p3, %p213_p0 }
  0x16   :  { %190 = vmatpush3.bf16.msra.mxu0 %v207_v7 }
  0x17   :  { %191 = vmatprep.subr.bf16.mxu0 %v234_v1 }
  0x1a   :  { %192 = vmatpush3.bf16.msra.mxu0 %v208_v10 }
  0x1b   :  { %193 = vmatprep.subr.bf16.mxu0 %v234_v1 }
  0x1e   :  { %194 = vmatpush3.bf16.msra.mxu0 %v209_v13 }
  0x21   :  { %196 = vmatmul.mubr.bf16.vlgmr.msra.gmra.mxu0 %v54_v15 }
  0xe1   :  { %v138_v17 = vpop.f32.mrf.mxu0 }
  0xe2   :  { %v139_v18 = vadd.f32 %v161_v16, %v138_v17 }
  0xe3   :  { %v197_v19 = vpop.f32.mrf.mxu0 }
  0xe4   :  { %144 = vst [vmem:[#allocation2] sm:$0x3] %v139_v18 }
  0xe5   :  { %v141_v20 = vpop.f32.mrf.mxu0 }
  0xe6   :  { %223 = shalt.err (!%p220_p4)
}
  0xe7   :  { %154 = dma.vmem_to_hbm [thread:$0]  %s152_s7, 32, %s296_s3, [#allocation3]   ;;  %v198_v21 = vpop.f32.mrf.mxu0 }
  0xe8   :  { %232 = dma.done.wait [#allocation3], 32  }
  0xe9   :  { %233 = vsyncadd [#allocation3], 4294967264 }
  0xea   :  { %158 = vsyncpa [#allocation3], 1 }

</bundles_post_ra>
